<compile_context>
chip_gen: v6e
topology: v6e:2x2x1
jax: 0.10.0
libtpu: 0.0.40
codegen_flags: <defaults>
</compile_context>

<pallas_src>
import math
from functools import partial

import numpy as np
import jax
import jax.numpy as jnp
from jax.experimental import pallas as pl
from jax.experimental.pallas import tpu as pltpu

_EPS = 1e-5  # PyTorch BatchNorm2d default eps


# ------------------------------ kernel helpers -------------------------------
def _bn_cols(x):
    """Training-mode BatchNorm (gamma=1, beta=0): biased stats per column."""
    mean = jnp.mean(x, axis=0, keepdims=True)
    var = jnp.mean((x - mean) ** 2, axis=0, keepdims=True)
    return (x - mean) * jax.lax.rsqrt(var + _EPS)


def _conv3x3_bn_relu(x, w_ref, shifts, masks):
    """3x3 'same' conv on rows ordered (b, i, j), then train-mode BN + ReLU.

    im2col along lanes: each tap is a sublane roll (XLU) of the input, masked
    by its precomputed spatial-validity column; the 9 tap copies are
    concatenated on the lane axis and hit the MXU as ONE
    (R, 9*Cin) x (9*Cin, Cout) matmul.  No O(R^2) shift matrices, no per-tap
    skinny-K matmuls, no in-kernel iota/compare mask building.
    """
    R = x.shape[0]
    pieces = []
    for t, s in enumerate(shifts):
        if s == 0:                                   # centre tap: always valid
            pieces.append(x)
        else:
            # result[r] = x[(r + s) mod R]; out-of-image rows are masked to 0,
            # which also kills every cross-image / wrap-around contribution.
            pieces.append(pltpu.roll(x, (-s) % R, 0) * masks[:, t:t + 1])
    slab = jnp.concatenate(pieces, axis=-1)          # (R, 9*Cin)
    y = jnp.dot(slab, w_ref[...], preferred_element_type=jnp.float32)
    # Conv bias omitted: a per-column constant cancels exactly in train-mode BN.
    return jnp.maximum(_bn_cols(y), 0.0)


# ------------------------------ fused kernels --------------------------------
def features_kernel(x_ref, masks_ref, cw1_ref, cw2_ref, h2_ref, *, W):
    # TODO(synk): BatchNorm running-mean/var buffer updates (training-mode side
    # effect) are not modeled; forward uses batch statistics like torch at init.
    # TODO(synk): for very large B*H*W the row axis must be tiled (grid over
    # rows + two-pass BN, "parallel" dimension_semantics) to fit v7x's 64 MiB
    # VMEM and to use both of its TensorCores.
    x = _bn_cols(x_ref[...].astype(jnp.float32))            # states BN, (R, C)
    masks = masks_ref[...]                                   # (R, 9) 0/1 table
    shifts = [dy * W + dx for dy in (-1, 0, 1) for dx in (-1, 0, 1)]
    h1 = _conv3x3_bn_relu(x, cw1_ref, shifts, masks)         # (R, 128) 4x conv1
    h2 = _conv3x3_bn_relu(h1, cw2_ref, shifts, masks)        # (R, 64)  4x conv2
    h2_ref[...] = h2


def heads_mixing_kernel(flat_ref, qs_ref, fw1_ref, fb1_ref, fw2_ref, fb2_ref,
                        o_ref, *, num_agents, mixing_dim):
    f32 = jnp.float32
    # fc1 + ReLU of all four hypernets as one wide MXU pass.
    h = jnp.dot(flat_ref[...], fw1_ref[...], preferred_element_type=f32)
    h = jnp.maximum(h + fb1_ref[...], 0.0)                   # (B, 256)
    # fc2 heads of all four hypernets as one lane slab.
    heads = jnp.dot(h, fw2_ref[...], preferred_element_type=f32) + fb2_ref[...]

    M = mixing_dim
    NM = num_agents * M
    w1 = jnp.abs(heads[:, :NM])                              # (B, N*M)
    b1 = heads[:, NM:NM + M]                                 # (B, M)
    w2 = jnp.abs(heads[:, NM + M:NM + 2 * M])                # (B, M)
    b2 = heads[:, NM + 2 * M:NM + 2 * M + 1]                 # (B, 1)

    # Mixing: bmm(qs, |w1|) + b1 done purely on the VPU (static unroll over
    # agents, lane-broadcast multiply-adds) -- no MXU pipeline fill and no
    # per-call iota/select matrix construction.
    qs = qs_ref[...].astype(f32)                             # (B, N)
    hidden = b1
    for n in range(num_agents):
        hidden = hidden + qs[:, n:n + 1] * w1[:, n * M:(n + 1) * M]
    # ELU(alpha=1); exp argument clamped so the discarded branch cannot inf.
    hidden = jnp.where(hidden > 0.0, hidden,
                       jnp.exp(jnp.minimum(hidden, 0.0)) - 1.0)
    q_tot = jnp.sum(hidden * w2, axis=-1, keepdims=True) + b2
    # TODO(synk): a lane-dense (1, B) output layout would avoid the masked
    # narrow store; only relevant once B is large.
    o_ref[...] = q_tot


# -------------------------------- call helpers --------------------------------
def _vmem_limit_bytes(operands, out_shapes, internal_bytes):
    """Scoped-VMEM budget from actual operand/output/intermediate sizes."""
    total = int(internal_bytes)
    for a in (*operands, *out_shapes):
        total += math.prod(a.shape) * jnp.dtype(a.dtype).itemsize
    # 2x margin for compiler temporaries; clamp to a window that is safe on
    # v5e / v6e / v7x.
    return int(min(max(2 * total + (2 << 20), 4 << 20), 32 << 20))


def _tap_masks(B, H, W):
    """(R, 9) 0/1 spatial-validity table for the 9 conv taps (host constant)."""
    r = np.arange(B * H * W)
    ii = (r // W) % H
    jj = r % W
    cols = []
    for dy in (-1, 0, 1):
        for dx in (-1, 0, 1):
            cols.append((ii + dy >= 0) & (ii + dy < H) &
                        (jj + dx >= 0) & (jj + dx < W))
    return np.stack(cols, axis=1).astype(np.float32)


# ----------------------------------- forward ---------------------------------
@partial(jax.jit, static_argnames=("num_agents", "mixing_dim"))
def mixing_network_forward(params, agent_qs, states_nchw, *, num_agents,
                           mixing_dim):
    B, C, H, W = states_nchw.shape
    R = B * H * W
    C2 = params["cw2"].shape[-1]                    # stacked conv2 width (64)

    # TODO(synk): fold this NCHW->NHWC transpose into the kernel's input DMA
    # (compiler_params.allow_input_fusion) to avoid the extra HBM round trip.
    x = jnp.transpose(states_nchw.astype(jnp.float32), (0, 2, 3, 1)).reshape(R, C)
    masks = jnp.asarray(_tap_masks(B, H, W))        # constant-folded under jit

    feat_args = (x, masks, params["cw1"], params["cw2"])
    h2_shape = jax.ShapeDtypeStruct((R, C2), jnp.float32)
    h2 = pl.pallas_call(
        partial(features_kernel, W=W),
        out_shape=h2_shape,
        compiler_params=pltpu.CompilerParams(
            vmem_limit_bytes=_vmem_limit_bytes(
                feat_args, (h2_shape,), internal_bytes=R * 12 * 1024)),
    )(*feat_args)

    # Contiguous, metadata-only reshape: (B*H*W, 64) -> (B, H*W*64).  The
    # per-hypernet torch NCHW-flatten permutation is baked into fw1 at init.
    # TODO(synk): fusing this boundary into one kernel needs an in-kernel
    # lane-dim regroup with no guaranteed Mosaic lowering; kept as a free XLA
    # reshape (costs one extra launch + a small h2 HBM round trip).
    flat = h2.reshape(B, H * W * C2)

    head_args = (flat, agent_qs.astype(jnp.float32), params["fw1"],
                 params["fb1"], params["fw2"], params["fb2"])
    out_shape = jax.ShapeDtypeStruct((B, 1), jnp.float32)
    q_tot = pl.pallas_call(
        partial(heads_mixing_kernel, num_agents=num_agents,
                mixing_dim=mixing_dim),
        out_shape=out_shape,
        compiler_params=pltpu.CompilerParams(
            vmem_limit_bytes=_vmem_limit_bytes(
                head_args, (out_shape,), internal_bytes=B * 24 * 1024)),
    )(*head_args)
    return q_tot[:, 0]                               # (B,)


# ------------------------- deterministic param init --------------------------
def _xavier_normal(key, shape, fan_in, fan_out):
    std = math.sqrt(2.0 / (fan_in + fan_out))
    return std * jax.random.normal(key, shape, dtype=jnp.float32)


def init_mixing_params(key, C, H, W, num_agents, mixing_dim, hidden_dim=64):
    """Build the four HyperNetworks and pack them into stacked/fused weights."""
    HW = H * W
    NM = num_agents * mixing_dim
    out_dims = (NM, mixing_dim, mixing_dim, 1)       # hyper_w1, b1, w2, b2
    col_off = (0, NM, NM + mixing_dim, NM + 2 * mixing_dim)
    head_width = ((NM + 2 * mixing_dim + 1 + 63) // 64) * 64
    keys = jax.random.split(key, 16)

    cw1_blocks = []
    cw2s = jnp.zeros((9, 4, 32, 4, 16), jnp.float32)              # block-diag
    fw1s = jnp.zeros((HW, 4, 16, 4, hidden_dim), jnp.float32)     # block + perm
    fw2s = jnp.zeros((4 * hidden_dim, head_width), jnp.float32)   # head slab

    for hyp, d in enumerate(out_dims):
        k1, k2, k3, k4 = (keys[4 * hyp + i] for i in range(4))
        w_c1 = _xavier_normal(k1, (32, C, 3, 3), C * 9, 32 * 9)
        w_c2 = _xavier_normal(k2, (16, 32, 3, 3), 32 * 9, 16 * 9)
        w_f1 = _xavier_normal(k3, (hidden_dim, 16 * HW), 16 * HW, hidden_dim)
        w_f2 = _xavier_normal(k4, (d, hidden_dim), hidden_dim, d)

        # conv1: (32, C, 3, 3) -> rows (tap, cin), stacked along output lanes.
        cw1_blocks.append(jnp.transpose(w_c1, (2, 3, 1, 0)).reshape(9, C, 32))
        # conv2: (16, 32, 3, 3) -> (tap, 32, 16) placed block-diagonally.
        cw2s = cw2s.at[:, hyp, :, hyp, :].set(
            jnp.transpose(w_c2, (2, 3, 1, 0)).reshape(9, 32, 16))
        # fc1: absorb the torch (C,H,W)-flatten permutation into the rows so it
        # consumes the NHWC-stacked h2 slab with a plain contiguous reshape.
        f1_perm = jnp.transpose(w_f1.reshape(hidden_dim, 16, H, W),
                                (2, 3, 1, 0)).reshape(HW, 16, hidden_dim)
        fw1s = fw1s.at[:, hyp, :, hyp, :].set(f1_perm)
        # fc2: all four heads concatenated into one lane slab.
        fw2s = fw2s.at[hyp * hidden_dim:(hyp + 1) * hidden_dim,
                       col_off[hyp]:col_off[hyp] + d].set(w_f2.T)

    # Conv biases are intentionally absent: they cancel in train-mode BN.
    return {
        "cw1": jnp.concatenate(cw1_blocks, axis=-1).reshape(9 * C, 128),
        "cw2": cw2s.reshape(9 * 128, 64),
        "fw1": fw1s.reshape(HW * 64, 4 * hidden_dim),        # (HW*64, 256)
        "fb1": jnp.zeros((1, 4 * hidden_dim), jnp.float32),
        "fw2": fw2s,                                          # (256, head_width)
        "fb2": jnp.zeros((1, head_width), jnp.float32),
    }


if __name__ == "__main__":
    C, H, W = 4, 8, 8            # state_dim
    NUM_AGENTS, MIXING_DIM = 5, 8
    B = 2

    key = jax.random.PRNGKey(0)
    kq, ks, kp = jax.random.split(key, 3)
    agent_qs = jax.random.normal(kq, (B, NUM_AGENTS), dtype=jnp.float32)
    states = jax.random.normal(ks, (B, C, H, W), dtype=jnp.float32)   # NCHW

    params = init_mixing_params(kp, C, H, W, NUM_AGENTS, MIXING_DIM)

    q_tot = mixing_network_forward(params, agent_qs, states,
                                   num_agents=NUM_AGENTS, mixing_dim=MIXING_DIM)
    q_tot = jax.block_until_ready(q_tot)
    assert q_tot.shape == (B,) and q_tot.dtype == jnp.float32
    assert bool(jnp.all(jnp.isfinite(q_tot)))
    print("KERNEL_OK")
</pallas_src>

<mosaic_0001>
module attributes {stable_mosaic.version = 11 : i64} {
  func.func @features_kernel(%arg0: memref<128x4xf32, #tpu.memory_space<vmem>>, %arg1: memref<128x9xf32, #tpu.memory_space<vmem>>, %arg2: memref<36x128xf32, #tpu.memory_space<vmem>>, %arg3: memref<1152x64xf32, #tpu.memory_space<vmem>>, %arg4: memref<128x64xf32, #tpu.memory_space<vmem>>) attributes {dimension_semantics = [], scalar_prefetch = 0 : i64, scratch_operands = 0 : i64, tpu.core_type = #tpu.core_type<tc>} {
    %c0 = arith.constant 0 : index
    %c0_0 = arith.constant 0 : index
    %0 = vector.load %arg0[%c0, %c0_0] : memref<128x4xf32, #tpu.memory_space<vmem>>, vector<128x4xf32>
    %cst = arith.constant dense<0.000000e+00> : vector<4xf32>
    %1 = vector.multi_reduction <add>, %0, %cst [0] : vector<128x4xf32> to vector<4xf32>
    %2 = vector.shape_cast %1 : vector<4xf32> to vector<1x4xf32>
    %cst_1 = arith.constant 1.280000e+02 : f32
    %3 = vector.broadcast %cst_1 : f32 to vector<1x4xf32>
    %4 = arith.divf %2, %3 : vector<1x4xf32>
    %5 = vector.broadcast %4 : vector<1x4xf32> to vector<128x4xf32>
    %6 = arith.subf %0, %5 : vector<128x4xf32>
    %7 = arith.mulf %6, %6 : vector<128x4xf32>
    %cst_2 = arith.constant dense<0.000000e+00> : vector<4xf32>
    %8 = vector.multi_reduction <add>, %7, %cst_2 [0] : vector<128x4xf32> to vector<4xf32>
    %9 = vector.shape_cast %8 : vector<4xf32> to vector<1x4xf32>
    %cst_3 = arith.constant 1.280000e+02 : f32
    %10 = vector.broadcast %cst_3 : f32 to vector<1x4xf32>
    %11 = arith.divf %9, %10 : vector<1x4xf32>
    %12 = vector.broadcast %4 : vector<1x4xf32> to vector<128x4xf32>
    %13 = arith.subf %0, %12 : vector<128x4xf32>
    %cst_4 = arith.constant 9.99999974E-6 : f32
    %14 = vector.broadcast %cst_4 : f32 to vector<1x4xf32>
    %15 = arith.addf %11, %14 : vector<1x4xf32>
    %16 = math.rsqrt %15 : vector<1x4xf32>
    %17 = vector.broadcast %16 : vector<1x4xf32> to vector<128x4xf32>
    %18 = arith.mulf %13, %17 : vector<128x4xf32>
    %c0_5 = arith.constant 0 : index
    %c0_6 = arith.constant 0 : index
    %19 = vector.load %arg1[%c0_5, %c0_6] : memref<128x9xf32, #tpu.memory_space<vmem>>, vector<128x9xf32>
    %c9_i32 = arith.constant 9 : i32
    %20 = tpu.dynamic_rotate %18 by %c9_i32 dim 0 : vector<128x4xf32>, i32 -> vector<128x4xf32>
    %21 = vector.extract_strided_slice %19 {offsets = [0, 0], sizes = [128, 1], strides = [1, 1]} : vector<128x9xf32> to vector<128x1xf32>
    %22 = vector.broadcast %21 : vector<128x1xf32> to vector<128x4xf32>
    %23 = arith.mulf %20, %22 : vector<128x4xf32>
    %c8_i32 = arith.constant 8 : i32
    %24 = tpu.dynamic_rotate %18 by %c8_i32 dim 0 : vector<128x4xf32>, i32 -> vector<128x4xf32>
    %25 = vector.extract_strided_slice %19 {offsets = [0, 1], sizes = [128, 1], strides = [1, 1]} : vector<128x9xf32> to vector<128x1xf32>
    %26 = vector.broadcast %25 : vector<128x1xf32> to vector<128x4xf32>
    %27 = arith.mulf %24, %26 : vector<128x4xf32>
    %c7_i32 = arith.constant 7 : i32
    %28 = tpu.dynamic_rotate %18 by %c7_i32 dim 0 : vector<128x4xf32>, i32 -> vector<128x4xf32>
    %29 = vector.extract_strided_slice %19 {offsets = [0, 2], sizes = [128, 1], strides = [1, 1]} : vector<128x9xf32> to vector<128x1xf32>
    %30 = vector.broadcast %29 : vector<128x1xf32> to vector<128x4xf32>
    %31 = arith.mulf %28, %30 : vector<128x4xf32>
    %c1_i32 = arith.constant 1 : i32
    %32 = tpu.dynamic_rotate %18 by %c1_i32 dim 0 : vector<128x4xf32>, i32 -> vector<128x4xf32>
    %33 = vector.extract_strided_slice %19 {offsets = [0, 3], sizes = [128, 1], strides = [1, 1]} : vector<128x9xf32> to vector<128x1xf32>
    %34 = vector.broadcast %33 : vector<128x1xf32> to vector<128x4xf32>
    %35 = arith.mulf %32, %34 : vector<128x4xf32>
    %c127_i32 = arith.constant 127 : i32
    %36 = tpu.dynamic_rotate %18 by %c127_i32 dim 0 : vector<128x4xf32>, i32 -> vector<128x4xf32>
    %37 = vector.extract_strided_slice %19 {offsets = [0, 5], sizes = [128, 1], strides = [1, 1]} : vector<128x9xf32> to vector<128x1xf32>
    %38 = vector.broadcast %37 : vector<128x1xf32> to vector<128x4xf32>
    %39 = arith.mulf %36, %38 : vector<128x4xf32>
    %c121_i32 = arith.constant 121 : i32
    %40 = tpu.dynamic_rotate %18 by %c121_i32 dim 0 : vector<128x4xf32>, i32 -> vector<128x4xf32>
    %41 = vector.extract_strided_slice %19 {offsets = [0, 6], sizes = [128, 1], strides = [1, 1]} : vector<128x9xf32> to vector<128x1xf32>
    %42 = vector.broadcast %41 : vector<128x1xf32> to vector<128x4xf32>
    %43 = arith.mulf %40, %42 : vector<128x4xf32>
    %c120_i32 = arith.constant 120 : i32
    %44 = tpu.dynamic_rotate %18 by %c120_i32 dim 0 : vector<128x4xf32>, i32 -> vector<128x4xf32>
    %45 = vector.extract_strided_slice %19 {offsets = [0, 7], sizes = [128, 1], strides = [1, 1]} : vector<128x9xf32> to vector<128x1xf32>
    %46 = vector.broadcast %45 : vector<128x1xf32> to vector<128x4xf32>
    %47 = arith.mulf %44, %46 : vector<128x4xf32>
    %c119_i32 = arith.constant 119 : i32
    %48 = tpu.dynamic_rotate %18 by %c119_i32 dim 0 : vector<128x4xf32>, i32 -> vector<128x4xf32>
    %49 = vector.extract_strided_slice %19 {offsets = [0, 8], sizes = [128, 1], strides = [1, 1]} : vector<128x9xf32> to vector<128x1xf32>
    %50 = vector.broadcast %49 : vector<128x1xf32> to vector<128x4xf32>
    %51 = arith.mulf %48, %50 : vector<128x4xf32>
    %52 = tpu.concatenate %23, %27, %31, %35, %18, %39, %43, %47, %51 in 1 : vector<128x4xf32>, vector<128x4xf32>, vector<128x4xf32>, vector<128x4xf32>, vector<128x4xf32>, vector<128x4xf32>, vector<128x4xf32>, vector<128x4xf32>, vector<128x4xf32> -> vector<128x36xf32>
    %c0_7 = arith.constant 0 : index
    %c0_8 = arith.constant 0 : index
    %53 = vector.load %arg2[%c0_7, %c0_8] : memref<36x128xf32, #tpu.memory_space<vmem>>, vector<36x128xf32>
    %cst_9 = arith.constant dense<0.000000e+00> : vector<128x128xf32>
    %54 = tpu.matmul %52, %53, %cst_9 {dimension_numbers = #tpu.dot_dimension_numbers<[1], [0], [0], [1], [0, 0, 1, 1], [], []>} : vector<128x36xf32>, vector<36x128xf32>, vector<128x128xf32> -> vector<128x128xf32>
    %cst_10 = arith.constant dense<0.000000e+00> : vector<128xf32>
    %55 = vector.multi_reduction <add>, %54, %cst_10 [0] : vector<128x128xf32> to vector<128xf32>
    %56 = vector.shape_cast %55 : vector<128xf32> to vector<1x128xf32>
    %cst_11 = arith.constant 1.280000e+02 : f32
    %57 = vector.broadcast %cst_11 : f32 to vector<1x128xf32>
    %58 = arith.divf %56, %57 : vector<1x128xf32>
    %59 = vector.broadcast %58 : vector<1x128xf32> to vector<128x128xf32>
    %60 = arith.subf %54, %59 : vector<128x128xf32>
    %61 = arith.mulf %60, %60 : vector<128x128xf32>
    %cst_12 = arith.constant dense<0.000000e+00> : vector<128xf32>
    %62 = vector.multi_reduction <add>, %61, %cst_12 [0] : vector<128x128xf32> to vector<128xf32>
    %63 = vector.shape_cast %62 : vector<128xf32> to vector<1x128xf32>
    %cst_13 = arith.constant 1.280000e+02 : f32
    %64 = vector.broadcast %cst_13 : f32 to vector<1x128xf32>
    %65 = arith.divf %63, %64 : vector<1x128xf32>
    %66 = vector.broadcast %58 : vector<1x128xf32> to vector<128x128xf32>
    %67 = arith.subf %54, %66 : vector<128x128xf32>
    %cst_14 = arith.constant 9.99999974E-6 : f32
    %68 = vector.broadcast %cst_14 : f32 to vector<1x128xf32>
    %69 = arith.addf %65, %68 : vector<1x128xf32>
    %70 = math.rsqrt %69 : vector<1x128xf32>
    %71 = vector.broadcast %70 : vector<1x128xf32> to vector<128x128xf32>
    %72 = arith.mulf %67, %71 : vector<128x128xf32>
    %cst_15 = arith.constant 0.000000e+00 : f32
    %73 = vector.broadcast %cst_15 : f32 to vector<128x128xf32>
    %74 = arith.maximumf %72, %73 : vector<128x128xf32>
    %c9_i32_16 = arith.constant 9 : i32
    %75 = tpu.dynamic_rotate %74 by %c9_i32_16 dim 0 : vector<128x128xf32>, i32 -> vector<128x128xf32>
    %76 = vector.extract_strided_slice %19 {offsets = [0, 0], sizes = [128, 1], strides = [1, 1]} : vector<128x9xf32> to vector<128x1xf32>
    %77 = vector.broadcast %76 : vector<128x1xf32> to vector<128x128xf32>
    %78 = arith.mulf %75, %77 : vector<128x128xf32>
    %c8_i32_17 = arith.constant 8 : i32
    %79 = tpu.dynamic_rotate %74 by %c8_i32_17 dim 0 : vector<128x128xf32>, i32 -> vector<128x128xf32>
    %80 = vector.extract_strided_slice %19 {offsets = [0, 1], sizes = [128, 1], strides = [1, 1]} : vector<128x9xf32> to vector<128x1xf32>
    %81 = vector.broadcast %80 : vector<128x1xf32> to vector<128x128xf32>
    %82 = arith.mulf %79, %81 : vector<128x128xf32>
    %c7_i32_18 = arith.constant 7 : i32
    %83 = tpu.dynamic_rotate %74 by %c7_i32_18 dim 0 : vector<128x128xf32>, i32 -> vector<128x128xf32>
    %84 = vector.extract_strided_slice %19 {offsets = [0, 2], sizes = [128, 1], strides = [1, 1]} : vector<128x9xf32> to vector<128x1xf32>
    %85 = vector.broadcast %84 : vector<128x1xf32> to vector<128x128xf32>
    %86 = arith.mulf %83, %85 : vector<128x128xf32>
    %c1_i32_19 = arith.constant 1 : i32
    %87 = tpu.dynamic_rotate %74 by %c1_i32_19 dim 0 : vector<128x128xf32>, i32 -> vector<128x128xf32>
    %88 = vector.extract_strided_slice %19 {offsets = [0, 3], sizes = [128, 1], strides = [1, 1]} : vector<128x9xf32> to vector<128x1xf32>
    %89 = vector.broadcast %88 : vector<128x1xf32> to vector<128x128xf32>
    %90 = arith.mulf %87, %89 : vector<128x128xf32>
    %c127_i32_20 = arith.constant 127 : i32
    %91 = tpu.dynamic_rotate %74 by %c127_i32_20 dim 0 : vector<128x128xf32>, i32 -> vector<128x128xf32>
    %92 = vector.extract_strided_slice %19 {offsets = [0, 5], sizes = [128, 1], strides = [1, 1]} : vector<128x9xf32> to vector<128x1xf32>
    %93 = vector.broadcast %92 : vector<128x1xf32> to vector<128x128xf32>
    %94 = arith.mulf %91, %93 : vector<128x128xf32>
    %c121_i32_21 = arith.constant 121 : i32
    %95 = tpu.dynamic_rotate %74 by %c121_i32_21 dim 0 : vector<128x128xf32>, i32 -> vector<128x128xf32>
    %96 = vector.extract_strided_slice %19 {offsets = [0, 6], sizes = [128, 1], strides = [1, 1]} : vector<128x9xf32> to vector<128x1xf32>
    %97 = vector.broadcast %96 : vector<128x1xf32> to vector<128x128xf32>
    %98 = arith.mulf %95, %97 : vector<128x128xf32>
    %c120_i32_22 = arith.constant 120 : i32
    %99 = tpu.dynamic_rotate %74 by %c120_i32_22 dim 0 : vector<128x128xf32>, i32 -> vector<128x128xf32>
    %100 = vector.extract_strided_slice %19 {offsets = [0, 7], sizes = [128, 1], strides = [1, 1]} : vector<128x9xf32> to vector<128x1xf32>
    %101 = vector.broadcast %100 : vector<128x1xf32> to vector<128x128xf32>
    %102 = arith.mulf %99, %101 : vector<128x128xf32>
    %c119_i32_23 = arith.constant 119 : i32
    %103 = tpu.dynamic_rotate %74 by %c119_i32_23 dim 0 : vector<128x128xf32>, i32 -> vector<128x128xf32>
    %104 = vector.extract_strided_slice %19 {offsets = [0, 8], sizes = [128, 1], strides = [1, 1]} : vector<128x9xf32> to vector<128x1xf32>
    %105 = vector.broadcast %104 : vector<128x1xf32> to vector<128x128xf32>
    %106 = arith.mulf %103, %105 : vector<128x128xf32>
    %107 = tpu.concatenate %78, %82, %86, %90, %74, %94, %98, %102, %106 in 1 : vector<128x128xf32>, vector<128x128xf32>, vector<128x128xf32>, vector<128x128xf32>, vector<128x128xf32>, vector<128x128xf32>, vector<128x128xf32>, vector<128x128xf32>, vector<128x128xf32> -> vector<128x1152xf32>
    %c0_24 = arith.constant 0 : index
    %c0_25 = arith.constant 0 : index
    %108 = vector.load %arg3[%c0_24, %c0_25] : memref<1152x64xf32, #tpu.memory_space<vmem>>, vector<1152x64xf32>
    %cst_26 = arith.constant dense<0.000000e+00> : vector<128x64xf32>
    %109 = tpu.matmul %107, %108, %cst_26 {dimension_numbers = #tpu.dot_dimension_numbers<[1], [0], [0], [1], [0, 0, 1, 1], [], []>} : vector<128x1152xf32>, vector<1152x64xf32>, vector<128x64xf32> -> vector<128x64xf32>
    %cst_27 = arith.constant dense<0.000000e+00> : vector<64xf32>
    %110 = vector.multi_reduction <add>, %109, %cst_27 [0] : vector<128x64xf32> to vector<64xf32>
    %111 = vector.shape_cast %110 : vector<64xf32> to vector<1x64xf32>
    %cst_28 = arith.constant 1.280000e+02 : f32
    %112 = vector.broadcast %cst_28 : f32 to vector<1x64xf32>
    %113 = arith.divf %111, %112 : vector<1x64xf32>
    %114 = vector.broadcast %113 : vector<1x64xf32> to vector<128x64xf32>
    %115 = arith.subf %109, %114 : vector<128x64xf32>
    %116 = arith.mulf %115, %115 : vector<128x64xf32>
    %cst_29 = arith.constant dense<0.000000e+00> : vector<64xf32>
    %117 = vector.multi_reduction <add>, %116, %cst_29 [0] : vector<128x64xf32> to vector<64xf32>
    %118 = vector.shape_cast %117 : vector<64xf32> to vector<1x64xf32>
    %cst_30 = arith.constant 1.280000e+02 : f32
    %119 = vector.broadcast %cst_30 : f32 to vector<1x64xf32>
    %120 = arith.divf %118, %119 : vector<1x64xf32>
    %121 = vector.broadcast %113 : vector<1x64xf32> to vector<128x64xf32>
    %122 = arith.subf %109, %121 : vector<128x64xf32>
    %cst_31 = arith.constant 9.99999974E-6 : f32
    %123 = vector.broadcast %cst_31 : f32 to vector<1x64xf32>
    %124 = arith.addf %120, %123 : vector<1x64xf32>
    %125 = math.rsqrt %124 : vector<1x64xf32>
    %126 = vector.broadcast %125 : vector<1x64xf32> to vector<128x64xf32>
    %127 = arith.mulf %122, %126 : vector<128x64xf32>
    %cst_32 = arith.constant 0.000000e+00 : f32
    %128 = vector.broadcast %cst_32 : f32 to vector<128x64xf32>
    %129 = arith.maximumf %127, %128 : vector<128x64xf32>
    %c0_33 = arith.constant 0 : index
    %c0_34 = arith.constant 0 : index
    %130 = vector.load %arg4[%c0_33, %c0_34] : memref<128x64xf32, #tpu.memory_space<vmem>>, vector<128x64xf32>
    tpu.vector_store %arg4[%c0_33, %c0_34], %129 {strides = array<i32>} : memref<128x64xf32, #tpu.memory_space<vmem>>, vector<128x64xf32>,
    return
  }
}

module attributes {stable_mosaic.version = 11 : i64} {
  func.func @heads_mixing_kernel(%arg0: memref<2x4096xf32, #tpu.memory_space<vmem>>, %arg1: memref<2x5xf32, #tpu.memory_space<vmem>>, %arg2: memref<4096x256xf32, #tpu.memory_space<vmem>>, %arg3: memref<1x256xf32, #tpu.memory_space<vmem>>, %arg4: memref<256x64xf32, #tpu.memory_space<vmem>>, %arg5: memref<1x64xf32, #tpu.memory_space<vmem>>, %arg6: memref<2x1xf32, #tpu.memory_space<vmem>>) attributes {dimension_semantics = [], scalar_prefetch = 0 : i64, scratch_operands = 0 : i64, tpu.core_type = #tpu.core_type<tc>} {
    %c0 = arith.constant 0 : index
    %c0_0 = arith.constant 0 : index
    %0 = vector.load %arg0[%c0, %c0_0] : memref<2x4096xf32, #tpu.memory_space<vmem>>, vector<2x4096xf32>
    %c0_1 = arith.constant 0 : index
    %c0_2 = arith.constant 0 : index
    %1 = vector.load %arg2[%c0_1, %c0_2] : memref<4096x256xf32, #tpu.memory_space<vmem>>, vector<4096x256xf32>
    %cst = arith.constant dense<0.000000e+00> : vector<2x256xf32>
    %2 = tpu.matmul %0, %1, %cst {dimension_numbers = #tpu.dot_dimension_numbers<[1], [0], [0], [1], [0, 0, 1, 1], [], []>} : vector<2x4096xf32>, vector<4096x256xf32>, vector<2x256xf32> -> vector<2x256xf32>
    %c0_3 = arith.constant 0 : index
    %c0_4 = arith.constant 0 : index
    %3 = vector.load %arg3[%c0_3, %c0_4] : memref<1x256xf32, #tpu.memory_space<vmem>>, vector<1x256xf32>
    %4 = vector.broadcast %3 : vector<1x256xf32> to vector<2x256xf32>
    %5 = arith.addf %2, %4 : vector<2x256xf32>
    %cst_5 = arith.constant 0.000000e+00 : f32
    %6 = vector.broadcast %cst_5 : f32 to vector<2x256xf32>
    %7 = arith.maximumf %5, %6 : vector<2x256xf32>
    %c0_6 = arith.constant 0 : index
    %c0_7 = arith.constant 0 : index
    %8 = vector.load %arg4[%c0_6, %c0_7] : memref<256x64xf32, #tpu.memory_space<vmem>>, vector<256x64xf32>
    %cst_8 = arith.constant dense<0.000000e+00> : vector<2x64xf32>
    %9 = tpu.matmul %7, %8, %cst_8 {dimension_numbers = #tpu.dot_dimension_numbers<[1], [0], [0], [1], [0, 0, 1, 1], [], []>} : vector<2x256xf32>, vector<256x64xf32>, vector<2x64xf32> -> vector<2x64xf32>
    %c0_9 = arith.constant 0 : index
    %c0_10 = arith.constant 0 : index
    %10 = vector.load %arg5[%c0_9, %c0_10] : memref<1x64xf32, #tpu.memory_space<vmem>>, vector<1x64xf32>
    %11 = vector.broadcast %10 : vector<1x64xf32> to vector<2x64xf32>
    %12 = arith.addf %9, %11 : vector<2x64xf32>
    %13 = vector.extract_strided_slice %12 {offsets = [0, 0], sizes = [2, 40], strides = [1, 1]} : vector<2x64xf32> to vector<2x40xf32>
    %14 = math.absf %13 : vector<2x40xf32>
    %15 = vector.extract_strided_slice %12 {offsets = [0, 40], sizes = [2, 8], strides = [1, 1]} : vector<2x64xf32> to vector<2x8xf32>
    %16 = vector.extract_strided_slice %12 {offsets = [0, 48], sizes = [2, 8], strides = [1, 1]} : vector<2x64xf32> to vector<2x8xf32>
    %17 = math.absf %16 : vector<2x8xf32>
    %18 = vector.extract_strided_slice %12 {offsets = [0, 56], sizes = [2, 1], strides = [1, 1]} : vector<2x64xf32> to vector<2x1xf32>
    %c0_11 = arith.constant 0 : index
    %c0_12 = arith.constant 0 : index
    %19 = vector.load %arg1[%c0_11, %c0_12] : memref<2x5xf32, #tpu.memory_space<vmem>>, vector<2x5xf32>
    %20 = vector.extract_strided_slice %19 {offsets = [0, 0], sizes = [2, 1], strides = [1, 1]} : vector<2x5xf32> to vector<2x1xf32>
    %21 = vector.extract_strided_slice %14 {offsets = [0, 0], sizes = [2, 8], strides = [1, 1]} : vector<2x40xf32> to vector<2x8xf32>
    %22 = vector.broadcast %20 : vector<2x1xf32> to vector<2x8xf32>
    %23 = arith.mulf %22, %21 : vector<2x8xf32>
    %24 = arith.addf %15, %23 : vector<2x8xf32>
    %25 = vector.extract_strided_slice %19 {offsets = [0, 1], sizes = [2, 1], strides = [1, 1]} : vector<2x5xf32> to vector<2x1xf32>
    %26 = vector.extract_strided_slice %14 {offsets = [0, 8], sizes = [2, 8], strides = [1, 1]} : vector<2x40xf32> to vector<2x8xf32>
    %27 = vector.broadcast %25 : vector<2x1xf32> to vector<2x8xf32>
    %28 = arith.mulf %27, %26 : vector<2x8xf32>
    %29 = arith.addf %24, %28 : vector<2x8xf32>
    %30 = vector.extract_strided_slice %19 {offsets = [0, 2], sizes = [2, 1], strides = [1, 1]} : vector<2x5xf32> to vector<2x1xf32>
    %31 = vector.extract_strided_slice %14 {offsets = [0, 16], sizes = [2, 8], strides = [1, 1]} : vector<2x40xf32> to vector<2x8xf32>
    %32 = vector.broadcast %30 : vector<2x1xf32> to vector<2x8xf32>
    %33 = arith.mulf %32, %31 : vector<2x8xf32>
    %34 = arith.addf %29, %33 : vector<2x8xf32>
    %35 = vector.extract_strided_slice %19 {offsets = [0, 3], sizes = [2, 1], strides = [1, 1]} : vector<2x5xf32> to vector<2x1xf32>
    %36 = vector.extract_strided_slice %14 {offsets = [0, 24], sizes = [2, 8], strides = [1, 1]} : vector<2x40xf32> to vector<2x8xf32>
    %37 = vector.broadcast %35 : vector<2x1xf32> to vector<2x8xf32>
    %38 = arith.mulf %37, %36 : vector<2x8xf32>
    %39 = arith.addf %34, %38 : vector<2x8xf32>
    %40 = vector.extract_strided_slice %19 {offsets = [0, 4], sizes = [2, 1], strides = [1, 1]} : vector<2x5xf32> to vector<2x1xf32>
    %41 = vector.extract_strided_slice %14 {offsets = [0, 32], sizes = [2, 8], strides = [1, 1]} : vector<2x40xf32> to vector<2x8xf32>
    %42 = vector.broadcast %40 : vector<2x1xf32> to vector<2x8xf32>
    %43 = arith.mulf %42, %41 : vector<2x8xf32>
    %44 = arith.addf %39, %43 : vector<2x8xf32>
    %cst_13 = arith.constant 0.000000e+00 : f32
    %45 = vector.broadcast %cst_13 : f32 to vector<2x8xf32>
    %46 = arith.cmpf ogt, %44, %45 : vector<2x8xf32>
    %cst_14 = arith.constant 0.000000e+00 : f32
    %47 = vector.broadcast %cst_14 : f32 to vector<2x8xf32>
    %48 = arith.minimumf %44, %47 : vector<2x8xf32>
    %49 = math.exp %48 : vector<2x8xf32>
    %cst_15 = arith.constant 1.000000e+00 : f32
    %50 = vector.broadcast %cst_15 : f32 to vector<2x8xf32>
    %51 = arith.subf %49, %50 : vector<2x8xf32>
    %52 = arith.select %46, %44, %51 : vector<2x8xi1>, vector<2x8xf32>
    %53 = arith.mulf %52, %17 : vector<2x8xf32>
    %cst_16 = arith.constant dense<0.000000e+00> : vector<2xf32>
    %54 = vector.multi_reduction <add>, %53, %cst_16 [1] : vector<2x8xf32> to vector<2xf32>
    %55 = vector.shape_cast %54 : vector<2xf32> to vector<2x1xf32>
    %56 = arith.addf %55, %18 : vector<2x1xf32>
    %c0_17 = arith.constant 0 : index
    %c0_18 = arith.constant 0 : index
    %57 = vector.load %arg6[%c0_17, %c0_18] : memref<2x1xf32, #tpu.memory_space<vmem>>, vector<2x1xf32>
    tpu.vector_store %arg6[%c0_17, %c0_18], %56 {strides = array<i32>} : memref<2x1xf32, #tpu.memory_space<vmem>>, vector<2x1xf32>,
    return
  }
}

</mosaic_0001>

<bundles_post_ra>
// kernel: mixing_network_forward.2
= control target key start
LH: loop header
LB: loop body
LE: loop exit
PB: predicated region body
PF: predicated region fallthrough
CT: control target
= control target key end

     0   :  { %9 = vsyncpa [#allocation3], 0  ;;  %s6887_s0 = inlined_call_operand.vmem [shape: f32[128,4], index: 0, kind: input, shape index: {}]   ;;  %s6888_s1 = inlined_call_operand.hbm [shape: f32[128,9], index: 1, kind: input, shape index: {}]   ;;  %s6889_s2 = inlined_call_operand.hbm [shape: f32[36,128], index: 2, kind: input, shape index: {}]   ;;  %s6890_s3 = inlined_call_operand.vmem [shape: f32[1152,64], index: 3, kind: input, shape index: {}]   ;;  %s6891_s4 = inlined_call_operand.vmem [shape: f32[128,64], index: 4, kind: output, shape index: {}]  }
   0x1   :  { %10 = vsyncpa [#allocation5], 0  ;;  %s3782_s15 = smov [#allocation2]  }
   0x2   :  { %s18_s16 = sshll.u32 %s3782_s15, 4  ;;  %s19_s16 = int_to_ptr.vmem [resolvable:$true] %s18_s16 }
   0x3   :  { %s3746_s17 = scalar_lea.vmem %s19_s16, 2048  ;;  %p3751_p1 = scmp.lt.s32.totalorder %s19_s16, %s19_s16 }
   0x4   :  { %p3747_p0 = scmp.ne.s32.totalorder %s19_s16, %s3746_s17  ;;  %p3752_p2 = scmp.lt.s32.totalorder %s3746_s17, %s3746_s17 }
   0x6   :  { %p3753_p3 = por %p3752_p2, %p3751_p1 }
   0x8   :  { %p3754_p4 = pnand %p3753_p3, %p3747_p0 }
   0xa   :  { %3757 = shalt.err (!%p3754_p4)
}
   0xb   :  { %s3783_s18 = smov 128   ;;  %s3784_s19 = smov 8  }
   0xc   :  { %24 = dma.hbm_to_vmem [thread:$0]  %s6888_s1, 2048, %s19_s16, [#allocation3], %s3783_s18, %s3783_s18, %s3784_s19  }
   0xd   :  { %s3785_s22 = smov [#allocation4]  }
   0xe   :  { %s30_s23 = sshll.u32 %s3785_s22, 4  ;;  %s31_s23 = int_to_ptr.vmem [resolvable:$true] %s30_s23 }
   0xf   :  { %s3766_s24 = scalar_lea.vmem %s31_s23, 640  ;;  %p3771_p6 = scmp.lt.s32.totalorder %s31_s23, %s31_s23 }
  0x10   :  { %p3767_p5 = scmp.ne.s32.totalorder %s31_s23, %s3766_s24  ;;  %p3772_p7 = scmp.lt.s32.totalorder %s3766_s24, %s3766_s24 }
  0x12   :  { %p3773_p8 = por %p3772_p7, %p3771_p6 }
  0x14   :  { %p3774_p9 = pnand %p3773_p8, %p3767_p5 }
  0x16   :  { %3777 = shalt.err (!%p3774_p9)
}
  0x17   :  { %36 = dma.hbm_to_vmem [thread:$0]  %s6889_s2, 640, %s31_s23, [#allocation5], %s3783_s18, %s3783_s18, %s3784_s19  }
  0x18   :  { %3778 = dma.done.wait [#allocation3], 2048  }
  0x19   :  { %3779 = vsyncadd [#allocation3], 4294965248 }
  0x1a   :  { %3780 = dma.done.wait [#allocation5], 640  }
  0x1b   :  { %3781 = vsyncadd [#allocation5], 4294966656  ;;  %v3786_v0 = vmov 2   ;;  %v6901_v1 = vmov 1   ;;  %v3836_v2 = vld [vmem:[#allocation2] sm:$0xff]  ;;  %v3840_v3 = vld [vmem:[#allocation2 + $0x8] sm:$0xff] }
  0x1c   :  { %3647 = vset.pattern.permute.xlu1 %v3786_v0  ;;  %3646 = vset.pattern.permute.xlu0 %v6901_v1  ;;  %vm61_vm0 = vcmask 31744   ;;  %v3847_v4 = vld [vmem:[%s6887_s0] sm:$0xff]  ;;  %v3852_v5 = vld [vmem:[%s6887_s0 + $0x8] sm:$0xff]  ;;  %v3857_v6 = vld [vmem:[%s6887_s0 + $0x10] sm:$0xff]  ;;  %v6897_v14 = vmov 3   ;;  %v6899_v24 = vmov 5  }
  0x1d   :  { %450 = vperm.xlu1 %3647, %v3836_v2   ;;  %337 = vperm.xlu0 %3646, %v3836_v2   ;;  %v3862_v7 = vld [vmem:[%s6887_s0 + $0x18] sm:$0xff]  ;;  %v62_v8 = vsel %vm61_vm0, %v3847_v4, 0.0  ;;  %v63_v9 = vsel %vm61_vm0, %v3852_v5, 0.0  ;;  %v3871_v10 = vld [vmem:[%s6887_s0 + $0x20] sm:$0xff]  ;;  %v65_v12 = vsel %vm61_vm0, %v3857_v6, 0.0  ;;  %v3882_v15 = vld [vmem:[%s6887_s0 + $0x28] sm:$0xff] }
  0x1e   :  { %v64_v11 = vadd.f32 %v63_v9, %v62_v8  ;;  %v67_v13 = vsel %vm61_vm0, %v3862_v7, 0.0  ;;  %v69_v17 = vsel %vm61_vm0, %v3871_v10, 0.0  ;;  %v3891_v18 = vld [vmem:[%s6887_s0 + $0x30] sm:$0xff]  ;;  %v71_v21 = vsel %vm61_vm0, %v3882_v15, 0.0  ;;  %v3900_v22 = vld [vmem:[%s6887_s0 + $0x38] sm:$0xff]  ;;  %v3911_v26 = vld [vmem:[%s6887_s0 + $0x40] sm:$0xff] }
  0x1f   :  { %v3893_v20 = vld [vmem:[#allocation2 + $0x10] sm:$0xff]  ;;  %v73_v25 = vsel %vm61_vm0, %v3891_v18, 0.0  ;;  %v3913_v28 = vld [vmem:[#allocation2 + $0x18] sm:$0xff]  ;;  %v75_v29 = vsel %vm61_vm0, %v3900_v22, 0.0  ;;  %v3920_v30 = vld [vmem:[%s6887_s0 + $0x48] sm:$0xff]  ;;  %v77_v32 = vsel %vm61_vm0, %v3911_v26, 0.0 }
  0x20   :  { %v66_v16 = vadd.f32 %v65_v12, %v64_v11  ;;  %v3929_v33 = vld [vmem:[%s6887_s0 + $0x50] sm:$0xff]  ;;  %v3931_v35 = vld [vmem:[#allocation2 + $0x20] sm:$0xff]  ;;  %v79_v36 = vsel %vm61_vm0, %v3920_v30, 0.0  ;;  %v3938_v37 = vld [vmem:[%s6887_s0 + $0x58] sm:$0xff]  ;;  %v6895_v49 = vmov 6   ;;  %v6893_v12 = vmov 7  }
  0x21   :  { %454 = vperm.xlu1 %3647, %v3840_v3   ;;  %341 = vperm.xlu0 %3646, %v3840_v3   ;;  %v81_v39 = vsel %vm61_vm0, %v3929_v33, 0.0  ;;  %v3947_v40 = vld [vmem:[%s6887_s0 + $0x60] sm:$0xff]  ;;  %v3950_v42 = vld [vmem:[#allocation2 + $0x30] sm:$0xff]  ;;  %v83_v43 = vsel %vm61_vm0, %v3938_v37, 0.0  ;;  %v3957_v44 = vld [vmem:[%s6887_s0 + $0x68] sm:$0xff]  ;;  %s3795_s30 = smov 12  }
  0x22   :  { %v68_v19 = vadd.f32 %v67_v13, %v66_v16  ;;  %v85_v46 = vsel %vm61_vm0, %v3947_v40, 0.0  ;;  %v3965_v47 = vld [vmem:[%s6887_s0 + $0x70] sm:$0xff]  ;;  %v3968_v50 = vld [vmem:[#allocation2 + $0x40] sm:$0xff]  ;;  %v87_v51 = vsel %vm61_vm0, %v3957_v44, 0.0  ;;  %v3976_v52 = vld [vmem:[%s6887_s0 + $0x78] sm:$0xff]  ;;  %s3794_s0 = smov 4  }
  0x23   :  { %v89_v54 = vsel %vm61_vm0, %v3965_v47, 0.0  ;;  %v3981_v56 = vld [vmem:[#allocation2 + $0x50] sm:$0xff]  ;;  %v91_v57 = vsel %vm61_vm0, %v3976_v52, 0.0  ;;  %v3988_v60 = vld [vmem:[#allocation2 + $0x60] sm:$0xff]  ;;  %v4000_v13 = vld [vmem:[#allocation2 + $0x28] sm:$0xff]  ;;  %s3796_s5 = smov 16  }
  0x24   :  { %v70_v23 = vadd.f32 %v69_v17, %v68_v19  ;;  %s3797_s6 = smov 24   ;;  %s3798_s7 = smov 28   ;;  %vm1630_vm3 = vcmask 1043456   ;;  %vm1457_vm4 = vcmask 64512   ;;  %vm1474_vm5 = vcmask 97280  }
  0x25   :  { %3649 = vset.pattern.permute.xlu1 %v6897_v14  ;;  %3648 = vset.pattern.permute.xlu0 %v6897_v14  ;;  %s3799_s8 = smov 20   ;;  %s3800_s9 = smov 32   ;;  %vm1491_vm6 = vcmask 130048   ;;  %vm1508_vm7 = vcmask 162816   ;;  %vm1525_vm8 = vcmask 195584   ;;  %vm1559_vm9 = vcmask 261120  }
  0x26   :  { %534 = vperm.xlu1 %3649, %v3840_v3   ;;  %530 = vperm.xlu0 %3648, %v3836_v2   ;;  %v72_v27 = vadd.f32 %v71_v21, %v70_v23  ;;  %vm1542_vm10 = vcmask 228352   ;;  %vm1581_vm11 = vcmask 293888   ;;  %vm2950_vm12 = vcmask 523264  }
  0x28   :  { %v74_v31 = vadd.f32 %v73_v25, %v72_v27 }
  0x2a   :  { %3650 = vset.pattern.permute.xlu1 %v6901_v1  ;;  %3651 = vset.pattern.permute.xlu0 %v6899_v24  ;;  %v76_v34 = vadd.f32 %v75_v29, %v74_v31 }
  0x2b   :  { %345 = vperm.xlu1 %3650, %v3893_v20   ;;  %610 = vperm.xlu0 %3651, %v3836_v2  }
  0x2c   :  { %v78_v38 = vadd.f32 %v77_v32, %v76_v34  ;;  %v4047_v34 = vld [vmem:[#allocation2 + $0x48] sm:$0xff] }
  0x2e   :  { %v80_v41 = vadd.f32 %v79_v36, %v78_v38 }
  0x2f   :  { %349 = vperm.xlu1 %3650, %v3913_v28   ;;  %614 = vperm.xlu0 %3651, %v3840_v3  }
  0x30   :  { %v82_v45 = vadd.f32 %v81_v39, %v80_v41 }
  0x32   :  { %v84_v48 = vadd.f32 %v83_v43, %v82_v45 }
  0x33   :  { %3652 = vset.pattern.permute.xlu1 %v3786_v0  ;;  %626 = vperm.xlu0 %3651, %v3931_v35  }
  0x34   :  { %458 = vperm.xlu1 %3652, %v3893_v20   ;;  %v86_v53 = vadd.f32 %v85_v46, %v84_v48  ;;  %v4068_v46 = vld [vmem:[#allocation2 + $0x58] sm:$0xff] }
  0x36   :  { %v88_v55 = vadd.f32 %v87_v51, %v86_v53 }
  0x37   :  { %634 = vperm.xlu0 %3651, %v3950_v42  }
  0x38   :  { %3653 = vset.pattern.permute.xlu1 %v6895_v49  ;;  %v90_v58 = vadd.f32 %v89_v54, %v88_v55 }
  0x39   :  { %690 = vperm.xlu1 %3653, %v3836_v2  }
  0x3a   :  { %v92_v59 = vadd.f32 %v91_v57, %v90_v58  ;;  %v4089_v58 = vld [vmem:[#allocation2 + $0x68] sm:$0xff] }
  0x3b   :  { %642 = vperm.xlu0 %3651, %v3968_v50  }
  0x3c   :  { %v93_v61 = vrot.slane %v92_v59, 4 }
  0x3d   :  { %3654 = vset.pattern.permute.xlu1 %v6897_v14 }
  0x3e   :  { %538 = vperm.xlu1 %3654, %v3893_v20   ;;  %v94_v62 = vadd.f32 %v93_v61, %v92_v59 }
  0x3f   :  { %650 = vperm.xlu0 %3651, %v3981_v56  }
  0x40   :  { %v95_v63 = vrot.slane %v94_v62, 2 }
  0x42   :  { %3655 = vset.pattern.permute.xlu1 %v6895_v49  ;;  %v96_v8 = vadd.f32 %v95_v63, %v94_v62  ;;  %v4101_v63 = vld [vmem:[#allocation2 + $0x70] sm:$0xff] }
  0x43   :  { %694 = vperm.xlu1 %3655, %v3840_v3   ;;  %658 = vperm.xlu0 %3651, %v3988_v60  }
  0x44   :  { %v97_v9 = vrot.slane %v96_v8, 1 }
  0x46   :  { %v98_v11 = vadd.f32 %v97_v9, %v96_v8 }
  0x47   :  { %3656 = vset.pattern.permute.xlu1 %v6897_v14  ;;  %3704 = vset.pattern.permute.xlu0 %v3786_v0 }
  0x48   :  { %542 = vperm.xlu1 %3656, %v3913_v28   ;;  %462 = vperm.xlu0 %3704, %v3913_v28   ;;  %v4002_v16 = vmul.f32 0.0078125, %v98_v11 }
  0x4a   :  { %v4006_v0 = vsub.f32 %v3847_v4, %v4002_v16  ;;  %v4010_v17 = vsub.f32 %v3852_v5, %v4002_v16  ;;  %v4017_v19 = vsub.f32 %v3857_v6, %v4002_v16  ;;  %v4024_v5 = vld [vmem:[#allocation2 + $0x38] sm:$0xff]  ;;  %v4030_v23 = vsub.f32 %v3862_v7, %v4002_v16 }
  0x4b   :  { %v4040_v31 = vsub.f32 %v3871_v10, %v4002_v16  ;;  %v4051_v38 = vsub.f32 %v3882_v15, %v4002_v16  ;;  %v4061_v43 = vsub.f32 %v3891_v18, %v4002_v16  ;;  %v4073_v51 = vsub.f32 %v3900_v22, %v4002_v16 }
  0x4c   :  { %3657 = vset.pattern.permute.xlu1 %v6893_v12  ;;  %466 = vperm.xlu0 %3704, %v3931_v35   ;;  %v117_v21 = vmul.f32 %v4006_v0, %v4006_v0  ;;  %v118_v4 = vmul.f32 %v4010_v17, %v4010_v17  ;;  %v119_v6 = vmul.f32 %v4017_v19, %v4017_v19 }
  0x4d   :  { %774 = vperm.xlu1 %3657, %v3840_v3   ;;  %v120_v7 = vmul.f32 %v4030_v23, %v4030_v23  ;;  %v121_v10 = vmul.f32 %v4040_v31, %v4040_v31  ;;  %v122_v15 = vmul.f32 %v4051_v38, %v4051_v38  ;;  %v123_v18 = vmul.f32 %v4061_v43, %v4061_v43 }
  0x4e   :  { %v133_v25 = vsel %vm61_vm0, %v117_v21, 0.0  ;;  %v134_v27 = vsel %vm61_vm0, %v118_v4, 0.0  ;;  %v136_v32 = vsel %vm61_vm0, %v119_v6, 0.0  ;;  %v4083_v55 = vsub.f32 %v3911_v26, %v4002_v16  ;;  %v4113_v21 = vld [vmem:[#allocation2 + $0x78] sm:$0xff] }
  0x4f   :  { %v135_v29 = vadd.f32 %v134_v27, %v133_v25  ;;  %v138_v39 = vsel %vm61_vm0, %v120_v7, 0.0  ;;  %v140_v45 = vsel %vm61_vm0, %v121_v10, 0.0  ;;  %v142_v53 = vsel %vm61_vm0, %v122_v15, 0.0 }
  0x50   :  { %470 = vperm.xlu0 %3704, %v4000_v13   ;;  %v124_v22 = vmul.f32 %v4073_v51, %v4073_v51  ;;  %v144_v57 = vsel %vm61_vm0, %v123_v18, 0.0  ;;  %v4094_v61 = vsub.f32 %v3920_v30, %v4002_v16  ;;  %v125_v26 = vmul.f32 %v4083_v55, %v4083_v55 }
  0x51   :  { %3658 = vset.pattern.permute.xlu1 %v6901_v1  ;;  %v137_v36 = vadd.f32 %v136_v32, %v135_v29  ;;  %v4105_v9 = vsub.f32 %v3929_v33, %v4002_v16  ;;  %v4117_v6 = vsub.f32 %v3938_v37, %v4002_v16  ;;  %v6905_v27 = vmov 8  }
  0x52   :  { %353 = vperm.xlu1 %3658, %v3931_v35   ;;  %v146_v62 = vsel %vm61_vm0, %v124_v22, 0.0  ;;  %v126_v30 = vmul.f32 %v4094_v61, %v4094_v61  ;;  %v148_v11 = vsel %vm61_vm0, %v125_v26, 0.0  ;;  %v4127_v7 = vsub.f32 %v3947_v40, %v4002_v16 }
  0x53   :  { %v139_v41 = vadd.f32 %v138_v39, %v137_v36  ;;  %v127_v33 = vmul.f32 %v4105_v9, %v4105_v9  ;;  %v128_v37 = vmul.f32 %v4117_v6, %v4117_v6 }
  0x54   :  { %474 = vperm.xlu0 %3704, %v3950_v42   ;;  %v150_v25 = vsel %vm61_vm0, %v126_v30, 0.0  ;;  %v129_v40 = vmul.f32 %v4127_v7, %v4127_v7 }
  0x55   :  { %v141_v48 = vadd.f32 %v140_v45, %v139_v41  ;;  %v152_v32 = vsel %vm61_vm0, %v127_v33, 0.0  ;;  %v154_v10 = vsel %vm61_vm0, %v128_v37, 0.0  ;;  %v4147_v41 = vsub.f32 %v3965_v47, %v4002_v16 }
  0x56   :  { %3659 = vset.pattern.permute.xlu1 %v6899_v24 }
  0x57   :  { %618 = vperm.xlu1 %3659, %v3893_v20   ;;  %v143_v54 = vadd.f32 %v142_v53, %v141_v48  ;;  %7067 = vst [vmem:[#allocation8_spill] sm:$0xff] %v4147_v41  ;;  %v4156_v48 = vsub.f32 %v3976_v52, %v4002_v16  ;;  %v131_v18 = vmul.f32 %v4147_v41, %v4147_v41 }
  0x58   :  { %478 = vperm.xlu0 %3704, %v4024_v5  }
  0x59   :  { %v145_v59 = vadd.f32 %v144_v57, %v143_v54  ;;  %v132_v54 = vmul.f32 %v4156_v48, %v4156_v48  ;;  %v160_v22 = vsel %vm61_vm0, %v131_v18, 0.0 }
  0x5b   :  { %3660 = vset.pattern.permute.xlu1 %v6901_v1  ;;  %v147_v8 = vadd.f32 %v146_v62, %v145_v59 }
  0x5c   :  { %357 = vperm.xlu1 %3660, %v4000_v13   ;;  %482 = vperm.xlu0 %3704, %v3968_v50  }
  0x5d   :  { %v149_v4 = vadd.f32 %v148_v11, %v147_v8 }
  0x5f   :  { %v151_v29 = vadd.f32 %v150_v25, %v149_v4 }
  0x60   :  { %3661 = vset.pattern.permute.xlu1 %v6899_v24  ;;  %486 = vperm.xlu0 %3704, %v4047_v34  }
  0x61   :  { %622 = vperm.xlu1 %3661, %v3913_v28   ;;  %v153_v36 = vadd.f32 %v152_v32, %v151_v29 }
  0x63   :  { %v155_v39 = vadd.f32 %v154_v10, %v153_v36 }
  0x64   :  { %490 = vperm.xlu0 %3704, %v3981_v56  }
  0x65   :  { %3662 = vset.pattern.permute.xlu1 %v6895_v49 }
  0x66   :  { %698 = vperm.xlu1 %3662, %v3893_v20  }
  0x68   :  { %494 = vperm.xlu0 %3704, %v4068_v46  }
  0x6a   :  { %3663 = vset.pattern.permute.xlu1 %v6897_v14 }
  0x6b   :  { %546 = vperm.xlu1 %3663, %v3931_v35  }
  0x6c   :  { %498 = vperm.xlu0 %3704, %v3988_v60  }
  0x6f   :  { %3664 = vset.pattern.permute.xlu1 %v6893_v12 }
  0x70   :  { %778 = vperm.xlu1 %3664, %v3893_v20   ;;  %502 = vperm.xlu0 %3704, %v4089_v58  }
  0x74   :  { %3665 = vset.pattern.permute.xlu1 %v6897_v14  ;;  %506 = vperm.xlu0 %3704, %v4101_v63  }
  0x75   :  { %550 = vperm.xlu1 %3665, %v4000_v13  }
  0x78   :  { %510 = vperm.xlu0 %3704, %v4113_v21  }
  0x79   :  { %3666 = vset.pattern.permute.xlu1 %v6905_v27 }
  0x7a   :  { %858 = vperm.xlu1 %3666, %v3893_v20   ;;  %v4138_v20 = vsub.f32 %v3957_v44, %v4002_v16  ;;  %v156_v44 = vsel %vm61_vm0, %v129_v40, 0.0  ;;  %v162_v16 = vsel %vm61_vm0, %v132_v54, 0.0 }
  0x7b   :  { %v157_v45 = vadd.f32 %v156_v44, %v155_v39 }
  0x7c   :  { %3709 = vset.pattern.permute.xlu0 %v6893_v12  ;;  %v130_v15 = vmul.f32 %v4138_v20, %v4138_v20 }
  0x7d   :  { %770 = vperm.xlu0 %3709, %v3836_v2  }
  0x7e   :  { %3667 = vset.pattern.permute.xlu1 %v6901_v1  ;;  %v158_v47 = vsel %vm61_vm0, %v130_v15, 0.0 }
  0x7f   :  { %361 = vperm.xlu1 %3667, %v3950_v42   ;;  %v159_v53 = vadd.f32 %v158_v47, %v157_v45 }
  0x81   :  { %782 = vperm.xlu0 %3709, %v3913_v28   ;;  %v161_v52 = vadd.f32 %v160_v22, %v159_v53 }
  0x83   :  { %3668 = vset.pattern.permute.xlu1 %v6905_v27  ;;  %v163_v57 = vadd.f32 %v162_v16, %v161_v52 }
  0x84   :  { %862 = vperm.xlu1 %3668, %v3913_v28  }
  0x85   :  { %790 = vperm.xlu0 %3709, %v4000_v13   ;;  %v164_v59 = vrot.slane %v163_v57, 4 }
  0x87   :  { %v165_v8 = vadd.f32 %v164_v59, %v163_v57 }
  0x88   :  { %3669 = vset.pattern.permute.xlu1 %v6901_v1 }
  0x89   :  { %365 = vperm.xlu1 %3669, %v4024_v5   ;;  %798 = vperm.xlu0 %3709, %v4024_v5   ;;  %v166_v4 = vrot.slane %v165_v8, 2 }
  0x8b   :  { %v167_v29 = vadd.f32 %v166_v4, %v165_v8  ;;  %v6892_v8 = vmov 0  }
  0x8d   :  { %3670 = vset.pattern.permute.xlu1 %v6899_v24  ;;  %806 = vperm.xlu0 %3709, %v4047_v34  }
  0x8e   :  { %630 = vperm.xlu1 %3670, %v4000_v13  }
  0x91   :  { %814 = vperm.xlu0 %3709, %v4068_v46  }
  0x92   :  { %3671 = vset.pattern.permute.xlu1 %v6895_v49 }
  0x93   :  { %706 = vperm.xlu1 %3671, %v3931_v35  }
  0x95   :  { %822 = vperm.xlu0 %3709, %v4089_v58  }
  0x97   :  { %3672 = vset.pattern.permute.xlu1 %v6897_v14 }
  0x98   :  { %554 = vperm.xlu1 %3672, %v3950_v42   ;;  %v4177_v26 = vpop.permute.xlu1 %450  ;;  %v4179_v62 = vpop.permute.xlu0 %337 }
  0x99   :  { %7068 = vst [vmem:[#allocation9_spill] sm:$0xff] %v4177_v26  ;;  %7069 = vst [vmem:[#allocation10_spill] sm:$0xff] %v4179_v62  ;;  %3713 = vset.pattern.permute.xlu0 %v6895_v49 }
  0x9a   :  { %702 = vperm.xlu0 %3713, %v3913_v28   ;;  %v168_v28 = vrot.slane %v167_v29, 1 }
  0x9c   :  { %3673 = vset.pattern.permute.xlu1 %v6893_v12  ;;  %v4184_v30 = vpop.permute.xlu1 %454  ;;  %v4186_v11 = vpop.permute.xlu0 %341  ;;  %v169_v36 = vadd.f32 %v168_v28, %v167_v29 }
  0x9d   :  { %7070 = vst [vmem:[#allocation11_spill] sm:$0xff] %v4184_v30  ;;  %7071 = vst [vmem:[#allocation12_spill] sm:$0xff] %v4186_v11  ;;  %786 = vperm.xlu1 %3673, %v3931_v35  }
  0x9e   :  { %710 = vperm.xlu0 %3713, %v4000_v13   ;;  %v170_v39 = vmul.f32 0.0078125, %v169_v36  ;;  %v221_v36 = vlaneseq }
  0xa1   :  { %3674 = vset.pattern.permute.xlu1 %v6897_v14  ;;  %v4191_v33 = vpop.permute.xlu1 %534  ;;  %v4193_v25 = vpop.permute.xlu0 %530 }
  0xa2   :  { %7072 = vst [vmem:[#allocation13_spill] sm:$0xff] %v4191_v33  ;;  %7073 = vst [vmem:[#allocation14_spill] sm:$0xff] %v4193_v25  ;;  %558 = vperm.xlu1 %3674, %v4024_v5   ;;  %718 = vperm.xlu0 %3713, %v4024_v5  }
  0xa6   :  { %3675 = vset.pattern.permute.xlu1 %v6905_v27  ;;  %v4198_v37 = vpop.permute.xlu1 %345  ;;  %726 = vperm.xlu0 %3713, %v4047_v34   ;;  %v4201_v32 = vpop.permute.xlu0 %610 }
  0xa7   :  { %7074 = vst [vmem:[#allocation15_spill] sm:$0xff] %v4198_v37  ;;  %7075 = vst [vmem:[#allocation16_spill] sm:$0xff] %v4201_v32  ;;  %866 = vperm.xlu1 %3675, %v3931_v35   ;;  %v171_v35 = vadd.f32 1e-05, %v170_v39  ;;  %v7115_v32 = vmov 6   ;;  %v7122_v37 = vmov 7  }
  0xa9   :  { %3723 = vrsqrt.f32 %v171_v35 }
  0xaa   :  { %v4204_v40 = vpop.permute.xlu1 %349  ;;  %734 = vperm.xlu0 %3713, %v4068_v46   ;;  %v4207_v10 = vpop.permute.xlu0 %614 }
  0xab   :  { %7076 = vst [vmem:[#allocation17_spill] sm:$0xff] %v4204_v40  ;;  %7077 = vst [vmem:[#allocation18_spill] sm:$0xff] %v4207_v10  ;;  %3676 = vset.pattern.permute.xlu1 %v6901_v1  ;;  %v7110_v10 = vmov 5  }
  0xac   :  { %369 = vperm.xlu1 %3676, %v3968_v50  }
  0xae   :  { %742 = vperm.xlu0 %3713, %v4089_v58   ;;  %v4212_v15 = vpop.permute.xlu0 %626 }
  0xaf   :  { %7078 = vst [vmem:[#allocation19_spill] sm:$0xff] %v4212_v15  ;;  %v4214_v44 = vpop.permute.xlu1 %458 }
  0xb0   :  { %7079 = vst [vmem:[#allocation20_spill] sm:$0xff] %v4214_v44  ;;  %3677 = vset.pattern.permute.xlu1 %v6905_v27 }
  0xb1   :  { %870 = vperm.xlu1 %3677, %v4000_v13  }
  0xb2   :  { %750 = vperm.xlu0 %3713, %v4113_v21   ;;  %v4219_v45 = vpop.permute.xlu0 %634 }
  0xb3   :  { %7080 = vst [vmem:[#allocation21_spill] sm:$0xff] %v4219_v45 }
  0xb4   :  { %v4221_v18 = vpop.permute.xlu1 %690 }
  0xb5   :  { %7081 = vst [vmem:[#allocation22_spill] sm:$0xff] %v4221_v18  ;;  %3678 = vset.pattern.permute.xlu1 %v6901_v1 }
  0xb6   :  { %373 = vperm.xlu1 %3678, %v4047_v34   ;;  %3717 = vset.pattern.permute.xlu0 %v6905_v27  ;;  %v4226_v47 = vpop.permute.xlu0 %642 }
  0xb7   :  { %7082 = vst [vmem:[#allocation23_spill] sm:$0xff] %v4226_v47  ;;  %850 = vperm.xlu0 %3717, %v3836_v2   ;;  %v4243_v2 = vpop.eup %3723 }
  0xb8   :  { %v4254_v59 = vmul.f32 %v4243_v2, %v4156_v48  ;;  %v4267_v39 = vmul.f32 %v4243_v2, %v4006_v0  ;;  %v4348_v41 = vmul.f32 %v4243_v2, %v4030_v23 }
  0xb9   :  { %v4229_v53 = vpop.permute.xlu1 %538 }
  0xba   :  { %7083 = vst [vmem:[#allocation24_spill] sm:$0xff] %v4229_v53  ;;  %3679 = vset.pattern.permute.xlu1 %v6899_v24  ;;  %v4232_v54 = vpop.permute.xlu0 %650  ;;  %v400_v29 = vmul.f32 %v4179_v62, %v4254_v59  ;;  %7091 = vst [vmem:[#allocation32_spill] sm:$0xff] %v4267_v39  ;;  %v401_v35 = vmul.f32 %v4186_v11, %v4267_v39  ;;  %v205_v0 = vrot.slane %v4267_v39, 7  ;;  %v7101_v11 = vmov 1  }
  0xbb   :  { %7084 = vst [vmem:[#allocation25_spill] sm:$0xff] %v4232_v54  ;;  %638 = vperm.xlu1 %3679, %v4024_v5   ;;  %854 = vperm.xlu0 %3717, %v3840_v3   ;;  %v7104_v62 = vmov 8  }
  0xbe   :  { %v4236_v22 = vpop.permute.xlu1 %694  ;;  %v4238_v52 = vpop.permute.xlu0 %658 }
  0xbf   :  { %7085 = vst [vmem:[#allocation26_spill] sm:$0xff] %v4236_v22  ;;  %7086 = vst [vmem:[#allocation27_spill] sm:$0xff] %v4238_v52  ;;  %3680 = vset.pattern.permute.xlu1 %v6895_v49  ;;  %902 = vperm.xlu0 %3717, %v4089_v58  }
  0xc0   :  { %714 = vperm.xlu1 %3680, %v3950_v42  }
  0xc3   :  { %v4245_v16 = vpop.permute.xlu1 %542  ;;  %906 = vperm.xlu0 %3717, %v4101_v63   ;;  %v4248_v57 = vpop.permute.xlu0 %462 }
  0xc4   :  { %7087 = vst [vmem:[#allocation28_spill] sm:$0xff] %v4245_v16  ;;  %7088 = vst [vmem:[#allocation29_spill] sm:$0xff] %v4248_v57  ;;  %3681 = vset.pattern.permute.xlu1 %v6897_v14 }
  0xc5   :  { %562 = vperm.xlu1 %3681, %v3968_v50  }
  0xc7   :  { %3721 = vset.pattern.permute.xlu0 %v6892_v8  ;;  %v4257_v4 = vpop.permute.xlu0 %466  ;;  %v6904_v8 = vrot.slane %v4254_v59, 7 }
  0xc8   :  { %7089 = vst [vmem:[#allocation30_spill] sm:$0xff] %v4257_v4  ;;  %v4261_v28 = vpop.permute.xlu1 %774  ;;  %247 = vperm.xlu0 %3721, %v3840_v3  }
  0xc9   :  { %7090 = vst [vmem:[#allocation31_spill] sm:$0xff] %v4261_v28  ;;  %3682 = vset.pattern.permute.xlu1 %v6893_v12  ;;  %v4278_v12 = vshrl.u32 %v221_v36, 7 }
  0xca   :  { %794 = vperm.xlu1 %3682, %v3950_v42  }
  0xcb   :  { %v4270_v48 = vpop.permute.xlu0 %470  ;;  %7094 = vst [vmem:[#allocation35_spill] sm:$0xff] %v4278_v12  ;;  %vm223_vm1 = vcmp.lt.s32.totalorder %v4278_v12, 1  ;;  %vm432_vm2 = vcmp.lt.s32.totalorder %v4278_v12, 7 }
  0xcc   :  { %7092 = vst [vmem:[#allocation33_spill] sm:$0xff] %v4270_v48  ;;  %945 = vrot.lane.b32.xlu0 %v400_v29, %s3794_s0  ;;  %v4291_v29 = vsel %vm223_vm1, %v6904_v8, %v205_v0 }
  0xcd   :  { %v4276_v3 = vpop.permute.xlu1 %353  ;;  %7096 = vst [vmem:[#allocation37_spill] sm:$0xff] %v4291_v29  ;;  %v593_v24 = vmul.f32 %v4193_v25, %v4291_v29  ;;  %v4321_v25 = vmul.f32 %v4243_v2, %v4017_v19 }
  0xce   :  { %7093 = vst [vmem:[#allocation34_spill] sm:$0xff] %v4276_v3  ;;  %3683 = vset.pattern.permute.xlu1 %v6897_v14 }
  0xcf   :  { %566 = vperm.xlu1 %3683, %v4047_v34   ;;  %v4283_v49 = vpop.permute.xlu0 %474 }
  0xd0   :  { %7095 = vst [vmem:[#allocation36_spill] sm:$0xff] %v4283_v49  ;;  %947 = vrot.lane.b32.xlu0 %v401_v35, %s3794_s0 }
  0xd2   :  { %v4293_v36 = vpop.permute.xlu1 %618 }
  0xd3   :  { %7097 = vst [vmem:[#allocation38_spill] sm:$0xff] %v4293_v36  ;;  %3684 = vset.pattern.permute.xlu1 %v6905_v27  ;;  %v4296_v14 = vpop.permute.xlu0 %478 }
  0xd4   :  { %7098 = vst [vmem:[#allocation39_spill] sm:$0xff] %v4296_v14  ;;  %874 = vperm.xlu1 %3684, %v3950_v42   ;;  %267 = vperm.xlu0 %3721, %v4000_v13   ;;  %v4317_v13 = vmul.f32 %v4243_v2, %v4010_v17 }
  0xd7   :  { %v4302_v35 = vpop.permute.xlu1 %357  ;;  %v4304_v1 = vpop.permute.xlu0 %482 }
  0xd8   :  { %7099 = vst [vmem:[#allocation40_spill] sm:$0xff] %v4302_v35  ;;  %7100 = vst [vmem:[#allocation41_spill] sm:$0xff] %v4304_v1  ;;  %3685 = vset.pattern.permute.xlu1 %v7101_v11  ;;  %1073 = vrot.lane.b32.xlu0 %v593_v24, %s3795_s30  ;;  %v418_v24 = vrot.slane %v4321_v25, 1 }
  0xd9   :  { %377 = vperm.xlu1 %3685, %v3981_v56  }
  0xdb   :  { %v4309_v8 = vpop.permute.xlu0 %486 }
  0xdc   :  { %7102 = vst [vmem:[#allocation42_spill] sm:$0xff] %v4309_v8  ;;  %v4311_v27 = vpop.permute.xlu1 %622  ;;  %1137 = vrot.lane.b32.xlu0 %v4267_v39, %s3796_s5 }
  0xdd   :  { %7103 = vst [vmem:[#allocation43_spill] sm:$0xff] %v4311_v27  ;;  %3686 = vset.pattern.permute.xlu1 %v7104_v62  ;;  %v6916_v27 = vrot.slane %v4317_v13, 1 }
  0xde   :  { %878 = vperm.xlu1 %3686, %v4024_v5   ;;  %v206_v5 = vrot.slane %v4317_v13, 7 }
  0xdf   :  { %v4326_v29 = vpop.permute.xlu0 %490  ;;  %v4339_v17 = vsel %vm432_vm2, %v6916_v27, %v418_v24  ;;  %v419_v27 = vrot.slane %v4348_v41, 1 }
  0xe0   :  { %7105 = vst [vmem:[#allocation44_spill] sm:$0xff] %v4326_v29  ;;  %1139 = vrot.lane.b32.xlu0 %v4317_v13, %s3796_s5  ;;  %7107 = vst [vmem:[#allocation46_spill] sm:$0xff] %v4339_v17  ;;  %v515_v52 = vmul.f32 %v4214_v44, %v4339_v17 }
  0xe1   :  { %v4331_v35 = vpop.permute.xlu1 %698  ;;  %v4368_v44 = vsel %vm432_vm2, %v418_v24, %v419_v27 }
  0xe2   :  { %7106 = vst [vmem:[#allocation45_spill] sm:$0xff] %v4331_v35  ;;  %3687 = vset.pattern.permute.xlu1 %v7101_v11  ;;  %7112 = vst [vmem:[#allocation50_spill] sm:$0xff] %v4368_v44 }
  0xe3   :  { %381 = vperm.xlu1 %3687, %v4068_v46   ;;  %v4342_v19 = vpop.permute.xlu0 %494 }
  0xe4   :  { %7108 = vst [vmem:[#allocation47_spill] sm:$0xff] %v4342_v19  ;;  %272 = vperm.xlu0 %3721, %v3950_v42   ;;  %v4362_v42 = vsel %vm223_vm1, %v205_v0, %v206_v5  ;;  %v6932_v0 = vrot.slane %v4348_v41, 7 }
  0xe5   :  { %v753_v23 = vmul.f32 %v4221_v18, %v4362_v42 }
  0xe6   :  { %v4352_v53 = vpop.permute.xlu1 %546 }
  0xe7   :  { %7109 = vst [vmem:[#allocation48_spill] sm:$0xff] %v4352_v53  ;;  %3688 = vset.pattern.permute.xlu1 %v7110_v10  ;;  %v4356_v40 = vpop.permute.xlu0 %498 }
  0xe8   :  { %7111 = vst [vmem:[#allocation49_spill] sm:$0xff] %v4356_v40  ;;  %646 = vperm.xlu1 %3688, %v4047_v34   ;;  %1013 = vrot.lane.b32.xlu0 %v515_v52, %s3784_s19  ;;  %v516_v40 = vmul.f32 %v4248_v57, %v4368_v44  ;;  %v207_v52 = vrot.slane %v4321_v25, 7 }
  0xea   :  { %v4388_v57 = vsel %vm223_vm1, %v206_v5, %v207_v52 }
  0xeb   :  { %v4370_v53 = vpop.permute.xlu1 %778  ;;  %v4372_v17 = vpop.permute.xlu0 %502 }
  0xec   :  { %7113 = vst [vmem:[#allocation51_spill] sm:$0xff] %v4370_v53  ;;  %7114 = vst [vmem:[#allocation52_spill] sm:$0xff] %v4372_v17  ;;  %3689 = vset.pattern.permute.xlu1 %v7115_v32  ;;  %1265 = vrot.lane.b32.xlu0 %v753_v23, %s3797_s6  ;;  %v7118_v53 = vmov 3   ;;  %v754_v23 = vmul.f32 %v4236_v22, %v4388_v57 }
  0xed   :  { %722 = vperm.xlu1 %3689, %v3968_v50  }
  0xef   :  { %v4381_v24 = vpop.permute.xlu0 %506 }
  0xf0   :  { %7116 = vst [vmem:[#allocation53_spill] sm:$0xff] %v4381_v24  ;;  %v4383_v18 = vpop.permute.xlu1 %550  ;;  %1015 = vrot.lane.b32.xlu0 %v516_v40, %s3784_s19  ;;  %v4398_v24 = vsel %vm223_vm1, %v207_v52, %v6932_v0  ;;  %v834_v52 = vmul.f32 %v4261_v28, %v4321_v25 }
  0xf1   :  { %7117 = vst [vmem:[#allocation54_spill] sm:$0xff] %v4383_v18  ;;  %3690 = vset.pattern.permute.xlu1 %v7118_v53  ;;  %7119 = vst [vmem:[#allocation55_spill] sm:$0xff] %v4398_v24  ;;  %v596_v5 = vmul.f32 %v4245_v16, %v4398_v24  ;;  %v404_v16 = vmul.f32 %v4276_v3, %v4348_v41 }
  0xf2   :  { %570 = vperm.xlu1 %3690, %v3981_v56  }
  0xf3   :  { %v4400_v17 = vpop.permute.xlu0 %510 }
  0xf4   :  { %7120 = vst [vmem:[#allocation56_spill] sm:$0xff] %v4400_v17  ;;  %1267 = vrot.lane.b32.xlu0 %v754_v23, %s3797_s6 }
  0xf5   :  { %v4403_v40 = vpop.permute.xlu1 %858 }
  0xf6   :  { %7121 = vst [vmem:[#allocation57_spill] sm:$0xff] %v4403_v40  ;;  %3691 = vset.pattern.permute.xlu1 %v7122_v37  ;;  %v4431_v40 = vmul.f32 %v4243_v2, %v4040_v31 }
  0xf7   :  { %802 = vperm.xlu1 %3691, %v3968_v50  }
  0xf8   :  { %1079 = vrot.lane.b32.xlu0 %v596_v5, %s3795_s30  ;;  %v4410_v22 = vpop.permute.xlu0 %770  ;;  %v420_v17 = vrot.slane %v4431_v40, 1 }
  0xf9   :  { %7123 = vst [vmem:[#allocation58_spill] sm:$0xff] %v4410_v22 }
  0xfa   :  { %v4414_v0 = vpop.permute.xlu1 %361  ;;  %v4446_v31 = vsel %vm432_vm2, %v419_v27, %v420_v17 }
  0xfb   :  { %7124 = vst [vmem:[#allocation59_spill] sm:$0xff] %v4414_v0  ;;  %3692 = vset.pattern.permute.xlu1 %v7118_v53  ;;  %7130 = vst [vmem:[#allocation65_spill] sm:$0xff] %v4446_v31 }
  0xfc   :  { %574 = vperm.xlu1 %3692, %v4068_v46   ;;  %1331 = vrot.lane.b32.xlu0 %v834_v52, %s3798_s7  ;;  %v4419_v23 = vpop.permute.xlu0 %782  ;;  %v675_v52 = vmul.f32 %v4293_v36, %v4368_v44 }
  0xfd   :  { %7125 = vst [vmem:[#allocation60_spill] sm:$0xff] %v4419_v23 }
  0xff   :  { %v4423_v5 = vpop.permute.xlu1 %862 }
 0x100   :  { %7126 = vst [vmem:[#allocation61_spill] sm:$0xff] %v4423_v5  ;;  %3693 = vset.pattern.permute.xlu1 %v7104_v62  ;;  %953 = vrot.lane.b32.xlu0 %v404_v16, %s3794_s0  ;;  %v4427_v28 = vpop.permute.xlu0 %790  ;;  %v517_v16 = vmul.f32 %v4257_v4, %v4446_v31 }
 0x101   :  { %7127 = vst [vmem:[#allocation62_spill] sm:$0xff] %v4427_v28  ;;  %882 = vperm.xlu1 %3693, %v3968_v50  }
 0x104   :  { %v4437_v3 = vpop.permute.xlu1 %365  ;;  %1205 = vrot.lane.b32.xlu0 %v675_v52, %s3799_s8  ;;  %v4440_v5 = vpop.permute.xlu0 %798  ;;  %v4455_v52 = vmul.f32 %v4243_v2, %v4051_v38 }
 0x105   :  { %7128 = vst [vmem:[#allocation63_spill] sm:$0xff] %v4437_v3  ;;  %7129 = vst [vmem:[#allocation64_spill] sm:$0xff] %v4440_v5  ;;  %3694 = vset.pattern.permute.xlu1 %v7101_v11 }
 0x106   :  { %385 = vperm.xlu1 %3694, %v3988_v60   ;;  %v421_v44 = vrot.slane %v4455_v52, 1 }
 0x108   :  { %282 = vperm.xlu0 %3721, %v3968_v50   ;;  %v4451_v36 = vpop.permute.xlu0 %806  ;;  %v755_v50 = vmul.f32 %v4331_v35, %v4398_v24  ;;  %v4471_v38 = vsel %vm432_vm2, %v420_v17, %v421_v44  ;;  %v210_v35 = vrot.slane %v4455_v52, 7  ;;  %v7137_v17 = vrot.slane %v4348_v41, 7 }
 0x109   :  { %7131 = vst [vmem:[#allocation66_spill] sm:$0xff] %v4451_v36  ;;  %v4457_v3 = vpop.permute.xlu1 %630 }
 0x10a   :  { %7132 = vst [vmem:[#allocation67_spill] sm:$0xff] %v4457_v3  ;;  %3695 = vset.pattern.permute.xlu1 %v7104_v62  ;;  %v518_v3 = vmul.f32 %v4270_v48, %v4471_v38 }
 0x10b   :  { %886 = vperm.xlu1 %3695, %v4047_v34  }
 0x10c   :  { %1017 = vrot.lane.b32.xlu0 %v517_v16, %s3784_s19  ;;  %v4463_v27 = vpop.permute.xlu0 %814  ;;  %v209_v16 = vrot.slane %v4431_v40, 7 }
 0x10d   :  { %7133 = vst [vmem:[#allocation68_spill] sm:$0xff] %v4463_v27 }
 0x10e   :  { %v4467_v4 = vpop.permute.xlu1 %706  ;;  %v4490_v48 = vsel %vm223_vm1, %v7137_v17, %v209_v16  ;;  %v836_v17 = vmul.f32 %v4419_v23, %v4431_v40  ;;  %v677_v23 = vmul.f32 %v4212_v15, %v4471_v38 }
 0x10f   :  { %7134 = vst [vmem:[#allocation69_spill] sm:$0xff] %v4467_v4  ;;  %3696 = vset.pattern.permute.xlu1 %v7101_v11 }
 0x110   :  { %389 = vperm.xlu1 %3696, %v4089_v58   ;;  %1269 = vrot.lane.b32.xlu0 %v755_v50, %s3797_s6  ;;  %v4478_v34 = vpop.permute.xlu0 %822 }
 0x111   :  { %7135 = vst [vmem:[#allocation70_spill] sm:$0xff] %v4478_v34 }
 0x113   :  { %v4482_v24 = vpop.permute.xlu1 %554 }
 0x114   :  { %7136 = vst [vmem:[#allocation71_spill] sm:$0xff] %v4482_v24  ;;  %3697 = vset.pattern.permute.xlu1 %v7110_v10  ;;  %1019 = vrot.lane.b32.xlu0 %v518_v3, %s3784_s19  ;;  %v4499_v24 = vsel %vm223_vm1, %v209_v16, %v210_v35 }
 0x115   :  { %654 = vperm.xlu1 %3697, %v4068_v46   ;;  %v4493_v50 = vpop.permute.xlu0 %702  ;;  %7139 = vst [vmem:[#allocation73_spill] sm:$0xff] %v4499_v24  ;;  %v598_v3 = vmul.f32 %v4383_v18, %v4499_v24 }
 0x116   :  { %7138 = vst [vmem:[#allocation72_spill] sm:$0xff] %v4493_v50  ;;  %v756_v34 = vmul.f32 %v4493_v50, %v4490_v48 }
 0x118   :  { %v4501_v31 = vpop.permute.xlu1 %786  ;;  %1271 = vrot.lane.b32.xlu0 %v756_v34, %s3797_s6  ;;  %v406_v34 = vmul.f32 %v4414_v0, %v4455_v52 }
 0x119   :  { %7140 = vst [vmem:[#allocation74_spill] sm:$0xff] %v4501_v31  ;;  %3698 = vset.pattern.permute.xlu1 %v7115_v32 }
 0x11a   :  { %730 = vperm.xlu1 %3698, %v3981_v56  }
 0x11c   :  { %1083 = vrot.lane.b32.xlu0 %v598_v3, %s3795_s30  ;;  %v4527_v3 = vmul.f32 %v4243_v2, %v4061_v43  ;;  %v4546_v43 = vmul.f32 %v4243_v2, %v4073_v51 }
 0x11d   :  { %v4511_v50 = vpop.permute.xlu1 %558 }
 0x11e   :  { %7141 = vst [vmem:[#allocation75_spill] sm:$0xff] %v4511_v50  ;;  %3699 = vset.pattern.permute.xlu1 %v7118_v53 }
 0x11f   :  { %578 = vperm.xlu1 %3699, %v3988_v60  }
 0x120   :  { %1335 = vrot.lane.b32.xlu0 %v836_v17, %s3798_s7  ;;  %v422_v17 = vrot.slane %v4527_v3, 1 }
 0x122   :  { %v4518_v16 = vpop.permute.xlu1 %866  ;;  %v4537_v15 = vsel %vm432_vm2, %v421_v44, %v422_v17  ;;  %v423_v44 = vrot.slane %v4546_v43, 1 }
 0x123   :  { %7142 = vst [vmem:[#allocation76_spill] sm:$0xff] %v4518_v16  ;;  %3700 = vset.pattern.permute.xlu1 %v7122_v37 }
 0x124   :  { %810 = vperm.xlu1 %3700, %v3981_v56   ;;  %957 = vrot.lane.b32.xlu0 %v406_v34, %s3794_s0  ;;  %v519_v34 = vmul.f32 %v4283_v49, %v4537_v15  ;;  %v757_v49 = vmul.f32 %v4467_v4, %v4499_v24  ;;  %v4561_v51 = vsel %vm432_vm2, %v422_v17, %v423_v44  ;;  %v212_v17 = vrot.slane %v4546_v43, 7 }
 0x127   :  { %v4530_v18 = vpop.permute.xlu1 %369 }
 0x128   :  { %7143 = vst [vmem:[#allocation77_spill] sm:$0xff] %v4530_v18  ;;  %3701 = vset.pattern.permute.xlu1 %v7118_v53  ;;  %1209 = vrot.lane.b32.xlu0 %v677_v23, %s3799_s8  ;;  %v4549_v23 = vpop.permute.xlu0 %710 }
 0x129   :  { %582 = vperm.xlu1 %3701, %v4089_v58   ;;  %7145 = vst [vmem:[#allocation79_spill] sm:$0xff] %v4549_v23 }
 0x12c   :  { %v4541_v0 = vpop.permute.xlu1 %870  ;;  %292 = vperm.xlu0 %3721, %v3981_v56   ;;  %v4567_v31 = vpop.permute.xlu0 %718 }
 0x12d   :  { %7144 = vst [vmem:[#allocation78_spill] sm:$0xff] %v4541_v0  ;;  %3702 = vset.pattern.permute.xlu1 %v7104_v62  ;;  %v211_v0 = vrot.slane %v4527_v3, 7  ;;  %7147 = vst [vmem:[#allocation81_spill] sm:$0xff] %v4567_v31 }
 0x12e   :  { %890 = vperm.xlu1 %3702, %v3981_v56   ;;  %v520_v56 = vmul.f32 %v4296_v14, %v4561_v51 }
 0x12f   :  { %v4574_v4 = vsel %vm223_vm1, %v210_v35, %v211_v0 }
 0x130   :  { %1021 = vrot.lane.b32.xlu0 %v519_v34, %s3784_s19  ;;  %7149 = vst [vmem:[#allocation83_spill] sm:$0xff] %v4574_v4  ;;  %v758_v24 = vmul.f32 %v4549_v23, %v4574_v4  ;;  %v4582_v14 = vpop.permute.xlu0 %726 }
 0x131   :  { %v4554_v16 = vpop.permute.xlu1 %373  ;;  %7150 = vst [vmem:[#allocation84_spill] sm:$0xff] %v4582_v14 }
 0x132   :  { %7146 = vst [vmem:[#allocation80_spill] sm:$0xff] %v4554_v16  ;;  %3703 = vset.pattern.permute.xlu1 %v7101_v11 }
 0x133   :  { %393 = vperm.xlu1 %3703, %v4101_v63  }
 0x134   :  { %1273 = vrot.lane.b32.xlu0 %v757_v49, %s3797_s6  ;;  %v4586_v49 = vsel %vm223_vm1, %v211_v0, %v212_v17  ;;  %v408_v0 = vmul.f32 %v4530_v18, %v4546_v43 }
 0x135   :  { %7151 = vst [vmem:[#allocation85_spill] sm:$0xff] %v4586_v49  ;;  %v600_v35 = vmul.f32 %v4511_v50, %v4586_v49 }
 0x136   :  { %v4570_v34 = vpop.permute.xlu1 %638 }
 0x137   :  { %7148 = vst [vmem:[#allocation82_spill] sm:$0xff] %v4570_v34  ;;  %3705 = vset.pattern.permute.xlu1 %v7104_v62 }
 0x138   :  { %894 = vperm.xlu1 %3705, %v4068_v46   ;;  %1023 = vrot.lane.b32.xlu0 %v520_v56, %s3784_s19  ;;  %v838_v46 = vmul.f32 %v4427_v28, %v4527_v3  ;;  %v4597_v56 = vpop.permute.xlu0 %734 }
 0x139   :  { %7153 = vst [vmem:[#allocation87_spill] sm:$0xff] %v4597_v56 }
 0x13b   :  { %v4588_v34 = vpop.permute.xlu1 %714 }
 0x13c   :  { %7152 = vst [vmem:[#allocation86_spill] sm:$0xff] %v4588_v34  ;;  %3706 = vset.pattern.permute.xlu1 %v7101_v11  ;;  %1275 = vrot.lane.b32.xlu0 %v758_v24, %s3797_s6  ;;  %v4609_v24 = vpop.permute.xlu0 %742 }
 0x13d   :  { %397 = vperm.xlu1 %3706, %v4113_v21   ;;  %7156 = vst [vmem:[#allocation90_spill] sm:$0xff] %v4609_v24 }
 0x140   :  { %v4599_v23 = vpop.permute.xlu1 %562  ;;  %1087 = vrot.lane.b32.xlu0 %v600_v35, %s3795_s30  ;;  %v679_v35 = vmul.f32 %v4219_v45, %v4561_v51 }
 0x141   :  { %7154 = vst [vmem:[#allocation88_spill] sm:$0xff] %v4599_v23  ;;  %3707 = vset.pattern.permute.xlu1 %v7110_v10 }
 0x142   :  { %662 = vperm.xlu1 %3707, %v4089_v58   ;;  %v4620_v58 = vmul.f32 %v4243_v2, %v4083_v55  ;;  %v4634_v55 = vmul.f32 %v4243_v2, %v4094_v61  ;;  %v759_v61 = vmul.f32 %v4588_v34, %v4586_v49 }
 0x144   :  { %1339 = vrot.lane.b32.xlu0 %v838_v46, %s3798_s7  ;;  %v4623_v46 = vpop.permute.xlu0 %750  ;;  %v424_v18 = vrot.slane %v4620_v58, 1  ;;  %v214_v49 = vrot.slane %v4634_v55, 7 }
 0x145   :  { %v4605_v11 = vpop.permute.xlu1 %794  ;;  %7158 = vst [vmem:[#allocation92_spill] sm:$0xff] %v4623_v46 }
 0x146   :  { %7155 = vst [vmem:[#allocation89_spill] sm:$0xff] %v4605_v11  ;;  %3708 = vset.pattern.permute.xlu1 %v7115_v32  ;;  %v4638_v45 = vsel %vm432_vm2, %v423_v44, %v424_v18  ;;  %v213_v44 = vrot.slane %v4620_v58, 7 }
 0x147   :  { %738 = vperm.xlu1 %3708, %v3988_v60  }
 0x148   :  { %961 = vrot.lane.b32.xlu0 %v408_v0, %s3794_s0  ;;  %v4643_v50 = vpop.permute.xlu0 %850  ;;  %v4668_v34 = vsel %vm223_vm1, %v212_v17, %v213_v44 }
 0x149   :  { %7160 = vst [vmem:[#allocation94_spill] sm:$0xff] %v4643_v50  ;;  %7164 = vst [vmem:[#allocation98_spill] sm:$0xff] %v4668_v34 }
 0x14a   :  { %v4616_v28 = vpop.permute.xlu1 %566 }
 0x14b   :  { %7157 = vst [vmem:[#allocation91_spill] sm:$0xff] %v4616_v28  ;;  %3710 = vset.pattern.permute.xlu1 %v7118_v53 }
 0x14c   :  { %586 = vperm.xlu1 %3710, %v4101_v63   ;;  %1213 = vrot.lane.b32.xlu0 %v679_v35, %s3799_s8  ;;  %v521_v35 = vmul.f32 %v4304_v1, %v4638_v45  ;;  %v4654_v11 = vpop.permute.xlu0 %854 }
 0x14d   :  { %7162 = vst [vmem:[#allocation96_spill] sm:$0xff] %v4654_v11 }
 0x14f   :  { %v4628_v0 = vpop.permute.xlu1 %874 }
 0x150   :  { %7159 = vst [vmem:[#allocation93_spill] sm:$0xff] %v4628_v0  ;;  %3711 = vset.pattern.permute.xlu1 %v7122_v37  ;;  %302 = vperm.xlu0 %3721, %v3988_v60   ;;  %v425_v0 = vrot.slane %v4634_v55, 1 }
 0x151   :  { %818 = vperm.xlu1 %3711, %v3988_v60  }
 0x152   :  { %v4659_v1 = vsel %vm432_vm2, %v424_v18, %v425_v0  ;;  %v4675_v18 = vpop.permute.xlu0 %902 }
 0x153   :  { %7165 = vst [vmem:[#allocation99_spill] sm:$0xff] %v4675_v18 }
 0x154   :  { %v4645_v46 = vpop.permute.xlu1 %377  ;;  %1025 = vrot.lane.b32.xlu0 %v521_v35, %s3784_s19 }
 0x155   :  { %7161 = vst [vmem:[#allocation95_spill] sm:$0xff] %v4645_v46  ;;  %3712 = vset.pattern.permute.xlu1 %v7118_v53  ;;  %v522_v53 = vmul.f32 %v4309_v8, %v4659_v1  ;;  %v4681_v8 = vsel %vm223_vm1, %v213_v44, %v214_v49 }
 0x156   :  { %590 = vperm.xlu1 %3712, %v4113_v21   ;;  %7166 = vst [vmem:[#allocation100_spill] sm:$0xff] %v4681_v8 }
 0x158   :  { %1277 = vrot.lane.b32.xlu0 %v759_v61, %s3797_s6  ;;  %v760_v61 = vmul.f32 %v4567_v31, %v4668_v34  ;;  %v4692_v31 = vpop.permute.xlu0 %906 }
 0x159   :  { %v4661_v35 = vpop.permute.xlu1 %878  ;;  %7168 = vst [vmem:[#allocation102_spill] sm:$0xff] %v4692_v31 }
 0x15a   :  { %7163 = vst [vmem:[#allocation97_spill] sm:$0xff] %v4661_v35  ;;  %3714 = vset.pattern.permute.xlu1 %v7104_v62 }
 0x15b   :  { %898 = vperm.xlu1 %3714, %v3988_v60   ;;  %v602_v60 = vmul.f32 %v4616_v28, %v4681_v8 }
 0x15c   :  { %1027 = vrot.lane.b32.xlu0 %v522_v53, %s3784_s19  ;;  %v840_v53 = vmul.f32 %v4440_v5, %v4620_v58  ;;  %v4701_v44 = vpop.permute.xlu0 %247  ;;  %v4708_v5 = vmul.f32 %v4243_v2, %v4105_v9 }
 0x15d   :  { %7170 = vst [vmem:[#allocation104_spill] sm:$0xff] %v4701_v44 }
 0x15e   :  { %v4677_v35 = vpop.permute.xlu1 %381 }
 0x15f   :  { %3715 = vset.pattern.permute.xlu1 %v7110_v10 }
 0x160   :  { %666 = vperm.xlu1 %3715, %v4101_v63   ;;  %1279 = vrot.lane.b32.xlu0 %v760_v61, %s3797_s6  ;;  %v410_v61 = vmul.f32 %v4645_v46, %v4634_v55  ;;  %v426_v46 = vrot.slane %v4708_v5, 1 }
 0x162   :  { %v4725_v9 = vsel %vm432_vm2, %v425_v0, %v426_v46 }
 0x163   :  { %v4688_v17 = vpop.permute.xlu1 %646 }
 0x164   :  { %7167 = vst [vmem:[#allocation101_spill] sm:$0xff] %v4688_v17  ;;  %670 = vperm.xlu1 %3715, %v4113_v21   ;;  %1091 = vrot.lane.b32.xlu0 %v602_v60, %s3795_s30  ;;  %v681_v60 = vmul.f32 %v4226_v47, %v4659_v1  ;;  %v523_v47 = vmul.f32 %v4326_v29, %v4725_v9  ;;  %v7174_v29 = vmov 0  }
 0x168   :  { %3716 = vset.pattern.permute.xlu1 %v7115_v32  ;;  %v4697_v10 = vpop.permute.xlu1 %722  ;;  %1343 = vrot.lane.b32.xlu0 %v840_v53, %s3798_s7  ;;  %v4716_v53 = vpop.permute.xlu0 %945 }
 0x169   :  { %7169 = vst [vmem:[#allocation103_spill] sm:$0xff] %v4697_v10  ;;  %746 = vperm.xlu1 %3716, %v4101_v63  }
 0x16c   :  { %965 = vrot.lane.b32.xlu0 %v410_v61, %s3794_s0 }
 0x16d   :  { %3718 = vset.pattern.permute.xlu1 %v7122_v37  ;;  %v4711_v32 = vpop.permute.xlu1 %570  ;;  %v4730_v37 = vmul.f32 %v4243_v2, %v4117_v6  ;;  %v215_v6 = vrot.slane %v4708_v5, 7 }
 0x16e   :  { %7171 = vst [vmem:[#allocation105_spill] sm:$0xff] %v4711_v32  ;;  %826 = vperm.xlu1 %3718, %v4101_v63   ;;  %v3729_v32 = vld [vmem:[#allocation2] sm:$0xff] }
 0x16f   :  { %v427_v0 = vrot.slane %v4730_v37, 1 }
 0x170   :  { %1217 = vrot.lane.b32.xlu0 %v681_v60, %s3799_s8  ;;  %v4734_v60 = vpop.permute.xlu0 %947 }
 0x172   :  { %830 = vperm.xlu1 %3718, %v4113_v21   ;;  %v4721_v61 = vpop.permute.xlu1 %802 }
 0x173   :  { %7172 = vst [vmem:[#allocation106_spill] sm:$0xff] %v4721_v61 }
 0x174   :  { %312 = vperm.xlu0 %3721, %v4101_v63   ;;  %v761_v63 = vmul.f32 %v4697_v10, %v4681_v8  ;;  %v4747_v61 = vpop.permute.xlu0 %267  ;;  %v4760_v10 = vsel %vm223_vm1, %v214_v49, %v215_v6  ;;  %v3730_v8 = vld [vmem:[#allocation2 + $0x10] sm:$0xff] }
 0x175   :  { %7175 = vst [vmem:[#allocation108_spill] sm:$0xff] %v4747_v61  ;;  %7177 = vst [vmem:[#allocation110_spill] sm:$0xff] %v4760_v10  ;;  %v416_v61 = vrot.slane %v4267_v39, 1 }
 0x176   :  { %3719 = vset.pattern.permute.xlu1 %v7104_v62 }
 0x177   :  { %910 = vperm.xlu1 %3719, %v4113_v21   ;;  %v4738_v28 = vpop.permute.xlu1 %574 }
 0x178   :  { %7173 = vst [vmem:[#allocation107_spill] sm:$0xff] %v4738_v28  ;;  %1029 = vrot.lane.b32.xlu0 %v523_v47, %s3784_s19  ;;  %v4754_v47 = vsel %vm432_vm2, %v426_v46, %v427_v0  ;;  %v4768_v46 = vpop.permute.xlu0 %1073 }
 0x179   :  { %3722 = vset.pattern.permute.xlu0 %v7104_v62  ;;  %v524_v62 = vmul.f32 %v4342_v19, %v4754_v47  ;;  %v6995_v19 = vrot.slane %v4254_v59, 1 }
 0x17b   :  { %3720 = vset.pattern.permute.xlu1 %v7174_v29  ;;  %v216_v29 = vrot.slane %v4730_v37, 7 }
 0x17c   :  { %242 = vperm.xlu1 %3720, %v3729_v32   ;;  %v4749_v21 = vpop.permute.xlu1 %882  ;;  %1281 = vrot.lane.b32.xlu0 %v761_v63, %s3797_s6  ;;  %v762_v32 = vmul.f32 %v4582_v14, %v4760_v10  ;;  %v4785_v14 = vsel %vm432_vm2, %v6995_v19, %v416_v61  ;;  %v4787_v39 = vpop.permute.xlu0 %1137  ;;  %v3732_v10 = vld [vmem:[#allocation2 + $0x20] sm:$0xff] }
 0x17d   :  { %7176 = vst [vmem:[#allocation109_spill] sm:$0xff] %v4749_v21  ;;  %v4774_v49 = vsel %vm223_vm1, %v215_v6, %v216_v29  ;;  %v3731_v21 = vld [vmem:[#allocation2 + $0x18] sm:$0xff]  ;;  %7180 = vst [vmem:[#allocation113_spill] sm:$0xff] %v4785_v14  ;;  %v513_v6 = vmul.f32 %v4177_v26, %v4785_v14 }
 0x180   :  { %252 = vperm.xlu1 %3720, %v3730_v8   ;;  %1031 = vrot.lane.b32.xlu0 %v524_v62, %s3784_s19  ;;  %v604_v8 = vmul.f32 %v4738_v28, %v4774_v49 }
 0x181   :  { %v4766_v63 = vpop.permute.xlu1 %385 }
 0x182   :  { %7178 = vst [vmem:[#allocation111_spill] sm:$0xff] %v4766_v63 }
 0x184   :  { %257 = vperm.xlu1 %3720, %v3731_v21   ;;  %1283 = vrot.lane.b32.xlu0 %v762_v32, %s3797_s6  ;;  %v842_v21 = vmul.f32 %v4451_v36, %v4708_v5  ;;  %v7181_v32 = vrot.slane %v4317_v13, 1  ;;  %v412_v36 = vmul.f32 %v4766_v63, %v4730_v37  ;;  %v7187_v63 = vld [vmem:[#allocation15_spill] sm:$0xff] }
 0x186   :  { %v4779_v62 = vpop.permute.xlu1 %886  ;;  %v4798_v28 = vsel %vm432_vm2, %v416_v61, %v7181_v32  ;;  %v594_v61 = vmul.f32 %v4191_v33, %v4362_v42 }
 0x187   :  { %7179 = vst [vmem:[#allocation112_spill] sm:$0xff] %v4779_v62  ;;  %7182 = vst [vmem:[#allocation114_spill] sm:$0xff] %v4798_v28 }
 0x188   :  { %262 = vperm.xlu1 %3720, %v3732_v10   ;;  %1095 = vrot.lane.b32.xlu0 %v604_v8, %s3795_s30  ;;  %v514_v10 = vmul.f32 %v4184_v30, %v4798_v28  ;;  %v4806_v8 = vpop.permute.xlu0 %1139  ;;  %v402_v30 = vmul.f32 %v7187_v63, %v4317_v13 }
 0x18b   :  { %v4800_v19 = vpop.permute.xlu1 %389 }
 0x18c   :  { %7183 = vst [vmem:[#allocation115_spill] sm:$0xff] %v4800_v19  ;;  %1009 = vrot.lane.b32.xlu1 %v513_v6, %s3784_s19  ;;  %1347 = vrot.lane.b32.xlu0 %v842_v21, %s3798_s7  ;;  %v683_v6 = vmul.f32 %v4232_v54, %v4754_v47  ;;  %v4820_v21 = vmul.f32 %v4243_v2, %v4127_v7  ;;  %v4822_v32 = vpop.permute.xlu0 %272 }
 0x18d   :  { %7185 = vst [vmem:[#allocation117_spill] sm:$0xff] %v4822_v32 }
 0x18e   :  { %v413_v54 = vmul.f32 %v4800_v19, %v4820_v21  ;;  %v428_v7 = vrot.slane %v4820_v21, 1 }
 0x190   :  { %v4810_v26 = vpop.permute.xlu1 %654  ;;  %1011 = vrot.lane.b32.xlu1 %v514_v10, %s3784_s19  ;;  %969 = vrot.lane.b32.xlu0 %v412_v36, %s3794_s0  ;;  %v4828_v10 = vmul.f32 %v4243_v2, %v4138_v20  ;;  %v4842_v20 = vsel %vm432_vm2, %v427_v0, %v428_v7  ;;  %v4846_v32 = vpop.permute.xlu0 %1013  ;;  %v7191_v0 = vld [vmem:[#allocation17_spill] sm:$0xff] }
 0x191   :  { %7184 = vst [vmem:[#allocation116_spill] sm:$0xff] %v4810_v26  ;;  %v684_v19 = vmul.f32 %v4810_v26, %v4842_v20 }
 0x194   :  { %1221 = vrot.lane.b32.xlu0 %v683_v6, %s3799_s8  ;;  %1075 = vrot.lane.b32.xlu1 %v594_v61, %s3795_s30  ;;  %v7008_v61 = vrot.slane %v4828_v10, 1  ;;  %v7188_v6 = vld [vmem:[#allocation16_spill] sm:$0xff] }
 0x195   :  { %v4830_v36 = vpop.permute.xlu1 %730  ;;  %v673_v33 = vmul.f32 %v7188_v6, %v4798_v28  ;;  %v403_v6 = vmul.f32 %v7191_v0, %v4321_v25  ;;  %v7192_v28 = vld [vmem:[#allocation52_spill] sm:$0xff] }
 0x196   :  { %7186 = vst [vmem:[#allocation118_spill] sm:$0xff] %v4830_v36 }
 0x198   :  { %971 = vrot.lane.b32.xlu0 %v413_v54, %s3794_s0  ;;  %949 = vrot.lane.b32.xlu1 %v402_v30, %s3794_s0  ;;  %v217_v54 = vrot.slane %v4820_v21, 7  ;;  %v4859_v30 = vsel %vm432_vm2, %v428_v7, %v7008_v61  ;;  %v7195_v7 = vld [vmem:[#allocation46_spill] sm:$0xff] }
 0x199   :  { %7190 = vst [vmem:[#allocation120_spill] sm:$0xff] %v4859_v30  ;;  %v526_v26 = vmul.f32 %v7192_v28, %v4859_v30  ;;  %v7196_v61 = vld [vmem:[#allocation18_spill] sm:$0xff] }
 0x19a   :  { %v4850_v63 = vpop.permute.xlu1 %578  ;;  %v674_v0 = vmul.f32 %v7196_v61, %v7195_v7 }
 0x19b   :  { %7189 = vst [vmem:[#allocation119_spill] sm:$0xff] %v4850_v63  ;;  %v4867_v63 = vsel %vm223_vm1, %v216_v29, %v217_v54 }
 0x19c   :  { %1223 = vrot.lane.b32.xlu0 %v684_v19, %s3799_s8  ;;  %1201 = vrot.lane.b32.xlu1 %v673_v33, %s3799_s8  ;;  %7193 = vst [vmem:[#allocation121_spill] sm:$0xff] %v4867_v63  ;;  %v7011_v33 = vrot.slane %v4828_v10, 7  ;;  %v4872_v19 = vpop.permute.xlu0 %1265  ;;  %v764_v28 = vmul.f32 %v4597_v56, %v4867_v63  ;;  %v3733_v56 = vld [vmem:[#allocation2 + $0x38] sm:$0xff]  ;;  %v844_v63 = vmul.f32 %v4463_v27, %v4820_v21 }
 0x19e   :  { %v4884_v29 = vsel %vm223_vm1, %v217_v54, %v7011_v33  ;;  %v7200_v54 = vld [vmem:[#allocation24_spill] sm:$0xff] }
 0x19f   :  { %v4869_v36 = vpop.permute.xlu1 %810  ;;  %7197 = vst [vmem:[#allocation46_spill] sm:$0xff] %v4884_v29  ;;  %v595_v33 = vmul.f32 %v7200_v54, %v4388_v57 }
 0x1a0   :  { %7194 = vst [vmem:[#allocation122_spill] sm:$0xff] %v4869_v36  ;;  %1035 = vrot.lane.b32.xlu0 %v526_v26, %s3784_s19  ;;  %951 = vrot.lane.b32.xlu1 %v403_v6, %s3794_s0  ;;  %v4892_v6 = vpop.permute.xlu0 %1015 }
 0x1a4   :  { %v4886_v36 = vpop.permute.xlu1 %582  ;;  %1287 = vrot.lane.b32.xlu0 %v764_v28, %s3797_s6  ;;  %1203 = vrot.lane.b32.xlu1 %v674_v0, %s3799_s8  ;;  %v4901_v28 = vpop.permute.xlu0 %1267  ;;  %v833_v0 = vmul.f32 %v4410_v22, %v4317_v13  ;;  %v913_v13 = vmul.f32 %v4643_v50, %v7195_v7  ;;  %v7204_v22 = vld [vmem:[#allocation8_spill] sm:$0xff]  ;;  %v1576_v7 = vld [vmem:[#allocation4] sm:$0xff] }
 0x1a5   :  { %7198 = vst [vmem:[#allocation123_spill] sm:$0xff] %v4886_v36  ;;  %v606_v26 = vmul.f32 %v4886_v36, %v4884_v29  ;;  %v1580_v36 = vld [vmem:[#allocation4 + $0x20] sm:$0xf] }
 0x1a6   :  { %3505 = vmatprep.subr.msk.mxu0 %vm1630_vm3, %v1580_v36 }
 0x1a7   :  { %3506 = vmatpush3.msk.msra.mxu0 %vm1630_vm3, %v1580_v36 }
 0x1a8   :  { %1099 = vrot.lane.b32.xlu0 %v606_v26, %s3795_s30  ;;  %277 = vperm.xlu1 %3720, %v3733_v56   ;;  %v4913_v27 = vpop.permute.xlu0 %1079 }
 0x1a9   :  { %v4895_v61 = vpop.permute.xlu1 %890 }
 0x1aa   :  { %7199 = vst [vmem:[#allocation124_spill] sm:$0xff] %v4895_v61 }
 0x1ac   :  { %1351 = vrot.lane.b32.xlu0 %v844_v63, %s3798_s7  ;;  %1077 = vrot.lane.b32.xlu1 %v595_v33, %s3795_s30  ;;  %v7202_v63 = vld [vmem:[#allocation27_spill] sm:$0xff] }
 0x1ad   :  { %v685_v33 = vmul.f32 %v7202_v63, %v4859_v30  ;;  %v4928_v63 = vpop.permute.xlu0 %1331  ;;  %v3734_v30 = vld [vmem:[#allocation2 + $0x48] sm:$0xff] }
 0x1ae   :  { %v4907_v26 = vpop.permute.xlu1 %393 }
 0x1af   :  { %7201 = vst [vmem:[#allocation125_spill] sm:$0xff] %v4907_v26  ;;  %v414_v56 = vmul.f32 %v4907_v26, %v4828_v10  ;;  %v1578_v26 = vld [vmem:[#allocation4 + $0x10] sm:$0xff] }
 0x1b0   :  { %1329 = vrot.lane.b32.xlu1 %v833_v0, %s3798_s7  ;;  %v1579_v0 = vld [vmem:[#allocation4 + $0x18] sm:$0xff] }
 0x1b1   :  { %973 = vrot.lane.b32.xlu0 %v414_v56, %s3794_s0  ;;  %v4925_v56 = vmul.f32 %v4243_v2, %v7204_v22  ;;  %3507 = vmatprep.subr.mxu0 %v1579_v0  ;;  %v7207_v2 = vrot.slane %v4828_v10, 1 }
 0x1b2   :  { %3508 = vmatpush3.msra.mxu0 %v1579_v0 }
 0x1b3   :  { %v4917_v54 = vpop.permute.xlu1 %894  ;;  %7205 = vst [vmem:[#allocation8_spill] sm:$0xff] %v4925_v56  ;;  %3509 = vmatprep.subr.mxu0 %v1578_v26  ;;  %v430_v50 = vrot.slane %v4925_v56, 1  ;;  %v219_v29 = vrot.slane %v4925_v56, 7 }
 0x1b4   :  { %7203 = vst [vmem:[#allocation126_spill] sm:$0xff] %v4917_v54  ;;  %1141 = vrot.lane.b32.xlu1 %v4321_v25, %s3796_s5  ;;  %3510 = vmatpush3.msra.mxu0 %v1578_v26  ;;  %v1577_v25 = vld [vmem:[#allocation4 + $0x8] sm:$0xff] }
 0x1b5   :  { %1225 = vrot.lane.b32.xlu0 %v685_v33, %s3799_s8  ;;  %3511 = vmatprep.subr.mxu0 %v1577_v25  ;;  %v4943_v26 = vsel %vm432_vm2, %v7207_v2, %v430_v50  ;;  %v7214_v2 = vld [vmem:[#allocation40_spill] sm:$0xff] }
 0x1b6   :  { %3512 = vmatpush3.msra.mxu0 %v1577_v25  ;;  %7208 = vst [vmem:[#allocation128_spill] sm:$0xff] %v4943_v26 }
 0x1b7   :  { %3513 = vmatprep.subr.mxu0 %v1576_v7 }
 0x1b8   :  { %v4930_v36 = vpop.permute.xlu1 %397  ;;  %1393 = vrot.lane.b32.xlu1 %v913_v13, %s3800_s9  ;;  %3514 = vmatpush3.msra.mxu0 %v1576_v7  ;;  %v7210_v13 = vld [vmem:[#allocation50_spill] sm:$0xff] }
 0x1b9   :  { %7206 = vst [vmem:[#allocation127_spill] sm:$0xff] %v4930_v36  ;;  %v415_v22 = vmul.f32 %v4930_v36, %v4925_v56  ;;  %v914_v0 = vmul.f32 %v4654_v11, %v7210_v13  ;;  %v4949_v36 = vpop.permute.xlu0 %953  ;;  %v405_v13 = vmul.f32 %v7214_v2, %v4431_v40  ;;  %v7215_v11 = vld [vmem:[#allocation56_spill] sm:$0xff] }
 0x1ba   :  { %7211 = vst [vmem:[#allocation50_spill] sm:$0xff] %v4949_v36 }
 0x1bb   :  { %975 = vrot.lane.b32.xlu0 %v415_v22, %s3794_s0  ;;  %v7212_v22 = vrot.slane %v4254_v59, 1 }
 0x1bc   :  { %1143 = vrot.lane.b32.xlu1 %v4348_v41, %s3796_s5 }
 0x1bd   :  { %v4945_v33 = vpop.permute.xlu1 %662  ;;  %v4957_v7 = vsel %vm432_vm2, %v430_v50, %v7212_v22  ;;  %v4974_v22 = vpop.permute.xlu0 %1205 }
 0x1be   :  { %7209 = vst [vmem:[#allocation129_spill] sm:$0xff] %v4945_v33  ;;  %v686_v25 = vmul.f32 %v4945_v33, %v4943_v26  ;;  %7213 = vst [vmem:[#allocation130_spill] sm:$0xff] %v4957_v7  ;;  %v528_v36 = vmul.f32 %v7215_v11, %v4957_v7  ;;  %v7217_v33 = vrot.slane %v4828_v10, 7 }
 0x1c0   :  { %1227 = vrot.lane.b32.xlu0 %v686_v25, %s3799_s8  ;;  %1395 = vrot.lane.b32.xlu1 %v914_v0, %s3800_s9  ;;  %v4972_v50 = vsel %vm223_vm1, %v7217_v33, %v219_v29  ;;  %v7218_v0 = vld [vmem:[#allocation65_spill] sm:$0xff]  ;;  %v7219_v25 = vld [vmem:[#allocation43_spill] sm:$0xff] }
 0x1c1   :  { %v676_v2 = vmul.f32 %v7219_v25, %v7218_v0  ;;  %v766_v11 = vmul.f32 %v4609_v24, %v4972_v50  ;;  %v4986_v33 = vpop.permute.xlu0 %282  ;;  %v7224_v25 = vrot.slane %v4254_v59, 7 }
 0x1c2   :  { %v4966_v54 = vpop.permute.xlu1 %738  ;;  %7221 = vst [vmem:[#allocation132_spill] sm:$0xff] %v4986_v33 }
 0x1c3   :  { %7216 = vst [vmem:[#allocation131_spill] sm:$0xff] %v4966_v54  ;;  %v4996_v24 = vsel %vm223_vm1, %v219_v29, %v7224_v25 }
 0x1c4   :  { %1039 = vrot.lane.b32.xlu0 %v528_v36, %s3784_s19  ;;  %955 = vrot.lane.b32.xlu1 %v405_v13, %s3794_s0  ;;  %v7223_v36 = vld [vmem:[#allocation48_spill] sm:$0xff] }
 0x1c5   :  { %v597_v13 = vmul.f32 %v7223_v36, %v4490_v48  ;;  %v7227_v36 = vld [vmem:[#allocation70_spill] sm:$0xff] }
 0x1c6   :  { %v846_v29 = vmul.f32 %v7227_v36, %v4925_v56 }
 0x1c7   :  { %v4982_v26 = vpop.permute.xlu1 %586 }
 0x1c8   :  { %7220 = vst [vmem:[#allocation65_spill] sm:$0xff] %v4982_v26  ;;  %1291 = vrot.lane.b32.xlu0 %v766_v11, %s3797_s6  ;;  %1207 = vrot.lane.b32.xlu1 %v676_v2, %s3799_s8  ;;  %v4998_v26 = vpop.permute.xlu0 %1017  ;;  %v7226_v2 = vld [vmem:[#allocation51_spill] sm:$0xff] }
 0x1c9   :  { %v835_v33 = vmul.f32 %v7226_v2, %v4348_v41  ;;  %v7229_v41 = vld [vmem:[#allocation57_spill] sm:$0xff] }
 0x1cc   :  { %v4988_v54 = vpop.permute.xlu1 %818  ;;  %287 = vperm.xlu1 %3720, %v3734_v30   ;;  %v5011_v25 = vpop.permute.xlu0 %1269 }
 0x1cd   :  { %7222 = vst [vmem:[#allocation133_spill] sm:$0xff] %v4988_v54 }
 0x1d0   :  { %1081 = vrot.lane.b32.xlu1 %v597_v13, %s3795_s30  ;;  %v915_v13 = vmul.f32 %v7229_v41, %v7218_v0 }
 0x1d1   :  { %v5001_v11 = vpop.permute.xlu1 %590 }
 0x1d2   :  { %7225 = vst [vmem:[#allocation134_spill] sm:$0xff] %v5001_v11  ;;  %v608_v30 = vmul.f32 %v5001_v11, %v4996_v24 }
 0x1d4   :  { %1103 = vrot.lane.b32.xlu0 %v608_v30, %s3795_s30  ;;  %1333 = vrot.lane.b32.xlu1 %v835_v33, %s3798_s7  ;;  %v5022_v30 = vpop.permute.xlu0 %1019  ;;  %v926_v33 = vmul.f32 %v4675_v18, %v4957_v7  ;;  %v7234_v18 = vld [vmem:[#allocation63_spill] sm:$0xff] }
 0x1d5   :  { %v407_v11 = vmul.f32 %v7234_v18, %v4527_v3 }
 0x1d6   :  { %v5013_v12 = vpop.permute.xlu1 %898 }
 0x1d7   :  { %7228 = vst [vmem:[#allocation135_spill] sm:$0xff] %v5013_v12 }
 0x1d8   :  { %1355 = vrot.lane.b32.xlu0 %v846_v29, %s3798_s7  ;;  %1145 = vrot.lane.b32.xlu1 %v4431_v40, %s3796_s5  ;;  %v7232_v40 = vld [vmem:[#allocation61_spill] sm:$0xff]  ;;  %v5036_v29 = vpop.permute.xlu0 %1271 }
 0x1d9   :  { %v916_v0 = vmul.f32 %v7232_v40, %v4471_v38  ;;  %v7236_v38 = vld [vmem:[#allocation67_spill] sm:$0xff] }
 0x1da   :  { %v678_v40 = vmul.f32 %v7236_v38, %v4537_v15  ;;  %v7238_v38 = vld [vmem:[#allocation71_spill] sm:$0xff] }
 0x1db   :  { %v5020_v2 = vpop.permute.xlu1 %666 }
 0x1dc   :  { %7230 = vst [vmem:[#allocation136_spill] sm:$0xff] %v5020_v2  ;;  %1167 = vrot.lane.b32.xlu0 %v4254_v59, %s3796_s5  ;;  %1397 = vrot.lane.b32.xlu1 %v915_v13, %s3800_s9  ;;  %v599_v2 = vmul.f32 %v7238_v38, %v4574_v4 }
 0x1df   :  { %v5029_v36 = vpop.permute.xlu1 %670 }
 0x1e0   :  { %7231 = vst [vmem:[#allocation137_spill] sm:$0xff] %v5029_v36  ;;  %1419 = vrot.lane.b32.xlu0 %v926_v33, %s3800_s9  ;;  %1147 = vrot.lane.b32.xlu1 %v4455_v52, %s3796_s5  ;;  %v5046_v33 = vpop.permute.xlu0 %1083 }
 0x1e4   :  { %v5038_v41 = vpop.permute.xlu1 %746  ;;  %1399 = vrot.lane.b32.xlu1 %v916_v0, %s3800_s9  ;;  %v5061_v18 = vpop.permute.xlu0 %1335 }
 0x1e5   :  { %7233 = vst [vmem:[#allocation138_spill] sm:$0xff] %v5038_v41  ;;  %v767_v13 = vmul.f32 %v5038_v41, %v4996_v24 }
 0x1e7   :  { %1293 = vrot.lane.b32.xlu0 %v767_v13, %s3797_s6  ;;  %v927_v13 = vmul.f32 %v4692_v31, %v4785_v14 }
 0x1e8   :  { %959 = vrot.lane.b32.xlu1 %v407_v11, %s3794_s0  ;;  %v3735_v11 = vld [vmem:[#allocation2 + $0x58] sm:$0xff] }
 0x1e9   :  { %v5049_v36 = vpop.permute.xlu1 %826 }
 0x1ea   :  { %7235 = vst [vmem:[#allocation139_spill] sm:$0xff] %v5049_v36  ;;  %v847_v0 = vmul.f32 %v5049_v36, %v4254_v59  ;;  %v5068_v59 = vpop.permute.xlu0 %957 }
 0x1eb   :  { %7240 = vst [vmem:[#allocation142_spill] sm:$0xff] %v5068_v59 }
 0x1ec   :  { %1357 = vrot.lane.b32.xlu0 %v847_v0, %s3798_s7  ;;  %1211 = vrot.lane.b32.xlu1 %v678_v40, %s3799_s8  ;;  %v7241_v40 = vld [vmem:[#allocation74_spill] sm:$0xff] }
 0x1ed   :  { %v5057_v41 = vpop.permute.xlu1 %830  ;;  %v837_v0 = vmul.f32 %v7241_v40, %v4455_v52 }
 0x1ee   :  { %7237 = vst [vmem:[#allocation140_spill] sm:$0xff] %v5057_v41  ;;  %v5076_v31 = vpop.permute.xlu0 %1209 }
 0x1f0   :  { %1421 = vrot.lane.b32.xlu0 %v927_v13, %s3800_s9  ;;  %297 = vperm.xlu1 %3720, %v3735_v11   ;;  %v7243_v11 = vld [vmem:[#allocation76_spill] sm:$0xff] }
 0x1f1   :  { %v917_v38 = vmul.f32 %v7243_v11, %v4537_v15  ;;  %v409_v15 = vmul.f32 %v4554_v16, %v4620_v58 }
 0x1f2   :  { %v5066_v7 = vpop.permute.xlu1 %910 }
 0x1f3   :  { %7239 = vst [vmem:[#allocation141_spill] sm:$0xff] %v5066_v7 }
 0x1f4   :  { %1085 = vrot.lane.b32.xlu1 %v599_v2, %s3795_s30  ;;  %v5086_v2 = vpop.permute.xlu0 %292 }
 0x1f5   :  { %7244 = vst [vmem:[#allocation144_spill] sm:$0xff] %v5086_v2 }
 0x1f7   :  { %v5073_v36 = vpop.permute.xlu1 %242 }
 0x1f8   :  { %7242 = vst [vmem:[#allocation143_spill] sm:$0xff] %v5073_v36  ;;  %1337 = vrot.lane.b32.xlu1 %v837_v0, %s3798_s7  ;;  %v7245_v0 = vld [vmem:[#allocation78_spill] sm:$0xff]  ;;  %v5095_v4 = vpop.permute.xlu0 %1021 }
 0x1f9   :  { %v918_v40 = vmul.f32 %v7245_v0, %v4561_v51  ;;  %7246 = vst [vmem:[#allocation145_spill] sm:$0xff] %v5095_v4  ;;  %v3736_v4 = vld [vmem:[#allocation2 + $0x68] sm:$0xff] }
 0x1fb   :  { %v5078_v13 = vpop.permute.xlu1 %252 }
 0x1fc   :  { %1149 = vrot.lane.b32.xlu1 %v4527_v3, %s3796_s5  ;;  %v5100_v2 = vpop.permute.xlu0 %1273 }
 0x1ff   :  { %v5084_v7 = vpop.permute.xlu1 %257 }
 0x200   :  { %1401 = vrot.lane.b32.xlu1 %v917_v38, %s3800_s9  ;;  %v7247_v38 = vld [vmem:[#allocation82_spill] sm:$0xff]  ;;  %v5106_v51 = vpop.permute.xlu0 %1023 }
 0x201   :  { %v680_v41 = vmul.f32 %v7247_v38, %v4638_v45  ;;  %7248 = vst [vmem:[#allocation146_spill] sm:$0xff] %v5106_v51 }
 0x203   :  { %v5089_v52 = vpop.permute.xlu1 %262 }
 0x204   :  { %1151 = vrot.lane.b32.xlu1 %v4546_v43, %s3796_s5  ;;  %v5112_v14 = vpop.permute.xlu0 %1275 }
 0x207   :  { %v1010_v3 = vpop.permute.xlu1 %1009 }
 0x208   :  { %1403 = vrot.lane.b32.xlu1 %v918_v40, %s3800_s9  ;;  %v601_v40 = vmul.f32 %v4599_v23, %v4668_v34  ;;  %v320_v34 = vmul.f32 %v5073_v36, %v4996_v24 }
 0x20b   :  { %v1012_v11 = vpop.permute.xlu1 %1011 }
 0x20c   :  { %963 = vrot.lane.b32.xlu1 %v409_v15, %s3794_s0  ;;  %v7249_v15 = vld [vmem:[#allocation89_spill] sm:$0xff] }
 0x20d   :  { %v839_v38 = vmul.f32 %v7249_v15, %v4546_v43  ;;  %v1441_v43 = vsel %vm61_vm0, %v320_v34, %v4716_v53  ;;  %v7252_v15 = vld [vmem:[#allocation37_spill] sm:$0xff]  ;;  %v411_v53 = vmul.f32 %v4677_v35, %v4708_v5 }
 0x20f   :  { %v1076_v59 = vpop.permute.xlu1 %1075 }
 0x210   :  { %1215 = vrot.lane.b32.xlu1 %v680_v41, %s3799_s8  ;;  %v5120_v41 = vpop.permute.xlu0 %1087 }
 0x213   :  { %v5108_v0 = vpop.permute.xlu1 %949 }
 0x214   :  { %307 = vperm.xlu1 %3720, %v3736_v4   ;;  %v7250_v4 = vld [vmem:[#allocation93_spill] sm:$0xff]  ;;  %v5130_v56 = vpop.permute.xlu0 %1339 }
 0x215   :  { %v919_v23 = vmul.f32 %v7250_v4, %v4638_v45  ;;  %v7251_v45 = vld [vmem:[#allocation97_spill] sm:$0xff] }
 0x216   :  { %v920_v24 = vmul.f32 %v7251_v45, %v4659_v1 }
 0x217   :  { %v1202_v16 = vpop.permute.xlu1 %1201 }
 0x218   :  { %1089 = vrot.lane.b32.xlu1 %v601_v40, %s3795_s30  ;;  %v5142_v4 = vpop.permute.xlu0 %961 }
 0x21b   :  { %v5117_v12 = vpop.permute.xlu1 %951 }
 0x21c   :  { %1341 = vrot.lane.b32.xlu1 %v839_v38, %s3798_s7 }
 0x21f   :  { %v1204_v51 = vpop.permute.xlu1 %1203 }
 0x220   :  { %1153 = vrot.lane.b32.xlu1 %v4620_v58, %s3796_s5  ;;  %v1458_v58 = vsel %vm1457_vm4, %v1441_v43, %v1010_v3 }
 0x221   :  { %v1475_v36 = vsel %vm1474_vm5, %v1458_v58, %v4768_v46 }
 0x222   :  { %v1492_v3 = vsel %vm1491_vm6, %v1475_v36, %v4787_v39 }
 0x223   :  { %v5128_v40 = vpop.permute.xlu1 %277  ;;  %v1509_v43 = vsel %vm1508_vm7, %v1492_v3, %v1202_v16  ;;  %v3737_v3 = vld [vmem:[#allocation2 + $0x78] sm:$0xff] }
 0x224   :  { %1405 = vrot.lane.b32.xlu1 %v919_v23, %s3800_s9  ;;  %v321_v23 = vmul.f32 %v4701_v44, %v7252_v15  ;;  %v5156_v44 = vpop.permute.xlu0 %1213  ;;  %v1526_v39 = vsel %vm1525_vm8, %v1509_v43, %v4872_v19 }
 0x226   :  { %v1442_v1 = vsel %vm61_vm0, %v321_v23, %v4734_v60 }
 0x227   :  { %v5135_v38 = vpop.permute.xlu1 %1077  ;;  %v1459_v46 = vsel %vm1457_vm4, %v1442_v1, %v1012_v11  ;;  %v7254_v1 = vld [vmem:[#allocation105_spill] sm:$0xff] }
 0x228   :  { %1155 = vrot.lane.b32.xlu1 %v4634_v55, %s3796_s5  ;;  %v1476_v58 = vsel %vm1474_vm5, %v1459_v46, %v1076_v59  ;;  %v5172_v23 = vpop.permute.xlu0 %302 }
 0x229   :  { %v1493_v36 = vsel %vm1491_vm6, %v1476_v58, %v4806_v8 }
 0x22a   :  { %v1510_v59 = vsel %vm1508_vm7, %v1493_v36, %v1204_v51 }
 0x22b   :  { %v1330_v34 = vpop.permute.xlu1 %1329  ;;  %v1527_v19 = vsel %vm1525_vm8, %v1510_v59, %v4901_v28 }
 0x22c   :  { %1407 = vrot.lane.b32.xlu1 %v920_v24, %s3800_s9  ;;  %v682_v24 = vmul.f32 %v4688_v17, %v4725_v9  ;;  %v1543_v16 = vsel %vm1542_vm10, %v1526_v39, %v1330_v34  ;;  %v7253_v34 = vld [vmem:[#allocation110_spill] sm:$0xff]  ;;  %v1544_v8 = vsel %vm1542_vm10, %v1527_v19, %v4928_v63  ;;  %v5180_v58 = vpop.permute.xlu0 %1025  ;;  %v7256_v63 = vld [vmem:[#allocation109_spill] sm:$0xff] }
 0x22d   :  { %v603_v43 = vmul.f32 %v7254_v1, %v7253_v34  ;;  %v921_v36 = vmul.f32 %v7256_v63, %v4725_v9  ;;  %v7317_v17 = vld [vmem:[#allocation54_spill] sm:$0xff] }
 0x22f   :  { %v1142_v45 = vpop.permute.xlu1 %1141 }
 0x230   :  { %967 = vrot.lane.b32.xlu1 %v411_v53, %s3794_s0 }
 0x233   :  { %v1394_v60 = vpop.permute.xlu1 %1393 }
 0x234   :  { %1219 = vrot.lane.b32.xlu1 %v682_v24, %s3799_s8  ;;  %v1560_v11 = vsel %vm1559_vm9, %v1543_v16, %v1394_v60  ;;  %v7255_v24 = vld [vmem:[#allocation106_spill] sm:$0xff]  ;;  %v5190_v16 = vpop.permute.xlu0 %1277 }
 0x235   :  { %3515 = vmatprep.mubr.msk.f32.mxu0 %vm1581_vm11, %v1560_v11  ;;  %v841_v28 = vmul.f32 %v7255_v24, %v4634_v55  ;;  %v322_v55 = vmul.f32 %v5078_v13, %v4362_v42  ;;  %v7323_v24 = vld [vmem:[#allocation75_spill] sm:$0xff] }
 0x237   :  { %v1144_v53 = vpop.permute.xlu1 %1143  ;;  %v1443_v19 = vsel %vm61_vm0, %v322_v55, %v5108_v0 }
 0x238   :  { %317 = vperm.xlu1 %3720, %v3737_v3   ;;  %v5198_v59 = vpop.permute.xlu0 %1027 }
 0x23b   :  { %v1396_v46 = vpop.permute.xlu1 %1395 }
 0x23c   :  { %v1561_v51 = vsel %vm1559_vm9, %v1544_v8, %v1396_v46  ;;  %1093 = vrot.lane.b32.xlu1 %v603_v43, %s3795_s30  ;;  %v5209_v9 = vpop.permute.xlu0 %1279  ;;  %v1460_v43 = vsel %vm1457_vm4, %v1443_v19, %v4846_v32  ;;  %v323_v8 = vmul.f32 %v5084_v7, %v4388_v57 }
 0x23d   :  { %3516 = vmatmul.mubr.msk.f32.vlgmr.msra.gmra.mxu0 %vm1581_vm11, %v1561_v51  ;;  %v1477_v42 = vsel %vm1474_vm5, %v1460_v43, %v5135_v38  ;;  %v7258_v38 = vld [vmem:[#allocation118_spill] sm:$0xff] }
 0x23e   :  { %v1494_v0 = vsel %vm1491_vm6, %v1477_v42, %v1142_v45  ;;  %v1444_v51 = vsel %vm61_vm0, %v323_v8, %v5117_v12  ;;  %v763_v45 = vmul.f32 %v7258_v38, %v4774_v49  ;;  %v7259_v42 = vld [vmem:[#allocation121_spill] sm:$0xff] }
 0x23f   :  { %v5187_v39 = vpop.permute.xlu1 %955  ;;  %v1511_v32 = vsel %vm1508_vm7, %v1494_v0, %v4974_v22  ;;  %v1461_v57 = vsel %vm1457_vm4, %v1444_v51, %v4892_v6  ;;  %v7260_v0 = vld [vmem:[#allocation119_spill] sm:$0xff] }
 0x240   :  { %1345 = vrot.lane.b32.xlu1 %v841_v28, %s3798_s7  ;;  %v5225_v55 = vpop.permute.xlu0 %1091  ;;  %v1528_v12 = vsel %vm1525_vm8, %v1511_v32, %v5011_v25  ;;  %v1478_v19 = vsel %vm1474_vm5, %v1461_v57, %v4913_v27  ;;  %v605_v51 = vmul.f32 %v7260_v0, %v7259_v42 }
 0x241   :  { %v1495_v43 = vsel %vm1491_vm6, %v1478_v19, %v1144_v53  ;;  %v7261_v53 = vld [vmem:[#allocation122_spill] sm:$0xff]  ;;  %v7262_v19 = vld [vmem:[#allocation55_spill] sm:$0xff] }
 0x243   :  { %v1208_v60 = vpop.permute.xlu1 %1207 }
 0x244   :  { %1157 = vrot.lane.b32.xlu1 %v4708_v5, %s3796_s5  ;;  %v922_v5 = vmul.f32 %v4779_v62, %v4754_v47  ;;  %v7257_v47 = vld [vmem:[#allocation49_spill] sm:$0xff]  ;;  %v1512_v6 = vsel %vm1508_vm7, %v1495_v43, %v1208_v60  ;;  %v5244_v25 = vpop.permute.xlu0 %1343 }
 0x245   :  { %v525_v28 = vmul.f32 %v7257_v47, %v4842_v20  ;;  %v1529_v27 = vsel %vm1525_vm8, %v1512_v6, %v5036_v29 }
 0x246   :  { %v1546_v32 = vsel %vm1542_vm10, %v1529_v27, %v5061_v18 }
 0x247   :  { %v5196_v11 = vpop.permute.xlu1 %287 }
 0x248   :  { %1409 = vrot.lane.b32.xlu1 %v921_v36, %s3800_s9  ;;  %v5253_v57 = vpop.permute.xlu0 %965 }
 0x24b   :  { %v1082_v3 = vpop.permute.xlu1 %1081 }
 0x24c   :  { %1159 = vrot.lane.b32.xlu1 %v4730_v37, %s3796_s5  ;;  %v5264_v29 = vpop.permute.xlu0 %1217 }
 0x24f   :  { %v1334_v46 = vpop.permute.xlu1 %1333 }
 0x250   :  { %1411 = vrot.lane.b32.xlu1 %v922_v5, %s3800_s9  ;;  %v1545_v5 = vsel %vm1542_vm10, %v1528_v12, %v1334_v46  ;;  %v843_v46 = vmul.f32 %v7261_v53, %v4730_v37  ;;  %v923_v37 = vmul.f32 %v4895_v61, %v4842_v20  ;;  %v5271_v43 = vpop.permute.xlu0 %312  ;;  %v2204_v53 = vld [vmem:[%s6890_s3 + $0x3d8] sm:$0xff] }
 0x253   :  { %v1146_v36 = vpop.permute.xlu1 %1145 }
 0x254   :  { %1033 = vrot.lane.b32.xlu1 %v525_v28, %s3784_s19 }
 0x257   :  { %v1398_v22 = vpop.permute.xlu1 %1397 }
 0x258   :  { %v1562_v8 = vsel %vm1559_vm9, %v1545_v5, %v1398_v22  ;;  %1285 = vrot.lane.b32.xlu1 %v763_v45, %s3797_s6  ;;  %v324_v5 = vmul.f32 %v5089_v52, %v7262_v19  ;;  %v7268_v19 = vld [vmem:[#allocation108_spill] sm:$0xff] }
 0x259   :  { %3518 = vmatprep.mubr.msk.f32.mxu0 %vm1581_vm11, %v1562_v8  ;;  %v7263_v8 = vld [vmem:[#allocation120_spill] sm:$0xff]  ;;  %v325_v61 = vmul.f32 %v7268_v19, %v4490_v48 }
 0x25b   :  { %v1148_v28 = vpop.permute.xlu1 %1147 }
 0x25c   :  { %1097 = vrot.lane.b32.xlu1 %v605_v51, %s3795_s30  ;;  %v7265_v51 = vld [vmem:[#allocation50_spill] sm:$0xff] }
 0x25d   :  { %v1445_v20 = vsel %vm61_vm0, %v324_v5, %v7265_v51  ;;  %v1446_v5 = vsel %vm61_vm0, %v325_v61, %v5187_v39  ;;  %v7270_v51 = vld [vmem:[#allocation131_spill] sm:$0xff] }
 0x25e   :  { %v1463_v48 = vsel %vm1457_vm4, %v1446_v5, %v5022_v30  ;;  %v7272_v5 = vld [vmem:[#allocation8_spill] sm:$0xff] }
 0x25f   :  { %v1400_v60 = vpop.permute.xlu1 %1399  ;;  %v1480_v39 = vsel %vm1474_vm5, %v1463_v48, %v5046_v33 }
 0x260   :  { %v1563_v45 = vsel %vm1559_vm9, %v1546_v32, %v1400_v60  ;;  %1349 = vrot.lane.b32.xlu1 %v843_v46, %s3798_s7  ;;  %v7266_v46 = vld [vmem:[#allocation128_spill] sm:$0xff]  ;;  %v7267_v32 = vld [vmem:[#allocation53_spill] sm:$0xff] }
 0x261   :  { %3519 = vmatmul.mubr.msk.f32.gmra.mxu0 %vm1581_vm11, %v1563_v45  ;;  %v527_v60 = vmul.f32 %v7267_v32, %v7266_v46  ;;  %v5282_v45 = vpop.permute.xlu0 %1029 }
 0x263   :  { %v5258_v12 = vpop.permute.xlu1 %959 }
 0x264   :  { %1161 = vrot.lane.b32.xlu1 %v4820_v21, %s3796_s5  ;;  %v7264_v21 = vld [vmem:[#allocation126_spill] sm:$0xff] }
 0x265   :  { %v924_v6 = vmul.f32 %v7264_v21, %v7263_v8 }
 0x267   :  { %v1212_v18 = vpop.permute.xlu1 %1211 }
 0x268   :  { %1413 = vrot.lane.b32.xlu1 %v923_v37, %s3800_s9  ;;  %v1462_v37 = vsel %vm1457_vm4, %v1445_v20, %v4998_v26  ;;  %v5297_v20 = vpop.permute.xlu0 %1281 }
 0x269   :  { %v1479_v62 = vsel %vm1474_vm5, %v1462_v37, %v1082_v3 }
 0x26a   :  { %v1496_v21 = vsel %vm1491_vm6, %v1479_v62, %v1146_v36  ;;  %v7271_v62 = vld [vmem:[#allocation65_spill] sm:$0xff] }
 0x26b   :  { %v5269_v22 = vpop.permute.xlu1 %297  ;;  %v1513_v38 = vsel %vm1508_vm7, %v1496_v21, %v5076_v31  ;;  %v607_v3 = vmul.f32 %v7271_v62, %v4972_v50  ;;  %v1497_v21 = vsel %vm1491_vm6, %v1480_v39, %v1148_v28 }
 0x26c   :  { %1163 = vrot.lane.b32.xlu1 %v4828_v10, %s3796_s5  ;;  %v1530_v61 = vsel %vm1525_vm8, %v1513_v38, %v5100_v2  ;;  %v1514_v30 = vsel %vm1508_vm7, %v1497_v21, %v1212_v18  ;;  %v5316_v2 = vpop.permute.xlu0 %1031  ;;  %v7277_v21 = vld [vmem:[#allocation137_spill] sm:$0xff] }
 0x26d   :  { %v1531_v33 = vsel %vm1525_vm8, %v1514_v30, %v5112_v14  ;;  %v7274_v14 = vld [vmem:[#allocation130_spill] sm:$0xff] }
 0x26e   :  { %v1548_v28 = vsel %vm1542_vm10, %v1531_v33, %v5130_v56  ;;  %v7279_v33 = vld [vmem:[#allocation117_spill] sm:$0xff] }
 0x26f   :  { %v1086_v27 = vpop.permute.xlu1 %1085 }
 0x270   :  { %1415 = vrot.lane.b32.xlu1 %v924_v6, %s3800_s9  ;;  %v7269_v6 = vld [vmem:[#allocation46_spill] sm:$0xff] }
 0x271   :  { %v765_v63 = vmul.f32 %v7270_v51, %v7269_v6 }
 0x273   :  { %v1338_v8 = vpop.permute.xlu1 %1337 }
 0x274   :  { %1037 = vrot.lane.b32.xlu1 %v527_v60, %s3784_s19  ;;  %v1547_v36 = vsel %vm1542_vm10, %v1530_v61, %v1338_v8  ;;  %v5323_v8 = vpop.permute.xlu0 %1283  ;;  %v7275_v61 = vld [vmem:[#allocation136_spill] sm:$0xff] }
 0x275   :  { %v687_v39 = vmul.f32 %v7275_v61, %v7274_v14 }
 0x277   :  { %v1150_v26 = vpop.permute.xlu1 %1149 }
 0x278   :  { %1289 = vrot.lane.b32.xlu1 %v765_v63, %s3797_s6  ;;  %v845_v63 = vmul.f32 %v4988_v54, %v4828_v10  ;;  %v7273_v10 = vld [vmem:[#allocation135_spill] sm:$0xff]  ;;  %v5334_v56 = vpop.permute.xlu0 %1095 }
 0x279   :  { %v925_v48 = vmul.f32 %v7273_v10, %v7266_v46  ;;  %v7278_v46 = vld [vmem:[#allocation73_spill] sm:$0xff]  ;;  %v7283_v10 = vld [vmem:[#allocation32_spill] sm:$0xff] }
 0x27b   :  { %v1402_v31 = vpop.permute.xlu1 %1401 }
 0x27c   :  { %v1564_v60 = vsel %vm1559_vm9, %v1547_v36, %v1402_v31  ;;  %1101 = vrot.lane.b32.xlu1 %v607_v3, %s3795_s30  ;;  %v7276_v31 = vld [vmem:[#allocation113_spill] sm:$0xff] }
 0x27d   :  { %3521 = vmatprep.mubr.msk.f32.mxu0 %vm1581_vm11, %v1564_v60  ;;  %v688_v60 = vmul.f32 %v7277_v21, %v7276_v31  ;;  %v7284_v21 = vld [vmem:[#allocation140_spill] sm:$0xff] }
 0x27e   :  { %v848_v61 = vmul.f32 %v7284_v21, %v7283_v10 }
 0x27f   :  { %v1152_v38 = vpop.permute.xlu1 %1151 }
 0x280   :  { %1353 = vrot.lane.b32.xlu1 %v845_v63, %s3798_s7  ;;  %v5341_v63 = vpop.permute.xlu0 %1347 }
 0x283   :  { %v1404_v37 = vpop.permute.xlu1 %1403 }
 0x284   :  { %v1565_v18 = vsel %vm1559_vm9, %v1548_v28, %v1404_v37  ;;  %1165 = vrot.lane.b32.xlu1 %v7272_v5, %s3796_s5  ;;  %v326_v28 = vmul.f32 %v7279_v33, %v7278_v46  ;;  %v7280_v37 = vld [vmem:[#allocation92_spill] sm:$0xff]  ;;  %v5355_v51 = vpop.permute.xlu0 %969 }
 0x285   :  { %3522 = vmatmul.mubr.msk.f32.gmra.mxu0 %vm1581_vm11, %v1565_v18  ;;  %v768_v18 = vmul.f32 %v7280_v37, %v7252_v15 }
 0x287   :  { %v964_v3 = vpop.permute.xlu1 %963 }
 0x288   :  { %1417 = vrot.lane.b32.xlu1 %v925_v48, %s3800_s9  ;;  %v7281_v48 = vld [vmem:[#allocation142_spill] sm:$0xff]  ;;  %v5368_v21 = vpop.permute.xlu0 %1221 }
 0x289   :  { %v1447_v14 = vsel %vm61_vm0, %v326_v28, %v7281_v48  ;;  %v7287_v48 = vld [vmem:[#allocation141_spill] sm:$0xff] }
 0x28b   :  { %v1216_v36 = vpop.permute.xlu1 %1215 }
 0x28c   :  { %1229 = vrot.lane.b32.xlu1 %v687_v39, %s3799_s8  ;;  %v7282_v39 = vld [vmem:[#allocation145_spill] sm:$0xff] }
 0x28d   :  { %v1464_v31 = vsel %vm1457_vm4, %v1447_v14, %v7282_v39 }
 0x28e   :  { %v1481_v54 = vsel %vm1474_vm5, %v1464_v31, %v1086_v27 }
 0x28f   :  { %v5339_v30 = vpop.permute.xlu1 %307  ;;  %v1498_v37 = vsel %vm1491_vm6, %v1481_v54, %v1150_v26 }
 0x290   :  { %1231 = vrot.lane.b32.xlu1 %v688_v60, %s3799_s8  ;;  %v7285_v60 = vld [vmem:[#allocation83_spill] sm:$0xff]  ;;  %v1515_v10 = vsel %vm1508_vm7, %v1498_v37, %v5156_v44 }
 0x291   :  { %v327_v46 = vmul.f32 %v5128_v40, %v7285_v60  ;;  %v7288_v60 = vld [vmem:[#allocation146_spill] sm:$0xff]  ;;  %v1532_v54 = vsel %vm1525_vm8, %v1515_v10, %v5190_v16 }
 0x293   :  { %v1090_v5 = vpop.permute.xlu1 %1089  ;;  %v1448_v28 = vsel %vm61_vm0, %v327_v46, %v5258_v12  ;;  %v5382_v46 = vpop.permute.xlu0 %971 }
 0x294   :  { %1295 = vrot.lane.b32.xlu1 %v768_v18, %s3797_s6  ;;  %v7286_v18 = vld [vmem:[#allocation114_spill] sm:$0xff]  ;;  %v1465_v27 = vsel %vm1457_vm4, %v1448_v28, %v7288_v60 }
 0x295   :  { %v928_v14 = vmul.f32 %v7287_v48, %v7286_v18  ;;  %v1482_v12 = vsel %vm1474_vm5, %v1465_v27, %v5120_v41 }
 0x296   :  { %v1499_v31 = vsel %vm1491_vm6, %v1482_v12, %v1152_v38  ;;  %v7290_v12 = vld [vmem:[#allocation132_spill] sm:$0xff] }
 0x297   :  { %v1342_v15 = vpop.permute.xlu1 %1341  ;;  %v1516_v37 = vsel %vm1508_vm7, %v1499_v31, %v1216_v36 }
 0x298   :  { %1359 = vrot.lane.b32.xlu1 %v848_v61, %s3798_s7  ;;  %v1549_v26 = vsel %vm1542_vm10, %v1532_v54, %v1342_v15  ;;  %v1533_v16 = vsel %vm1525_vm8, %v1516_v37, %v5209_v9  ;;  %v5388_v15 = vpop.permute.xlu0 %1223  ;;  %v7289_v54 = vld [vmem:[#allocation85_spill] sm:$0xff] }
 0x299   :  { %v1550_v41 = vsel %vm1542_vm10, %v1533_v16, %v5244_v25  ;;  %v328_v9 = vmul.f32 %v7290_v12, %v7289_v54 }
 0x29b   :  { %v1154_v39 = vpop.permute.xlu1 %1153  ;;  %v1449_v25 = vsel %vm61_vm0, %v328_v9, %v5142_v4 }
 0x29c   :  { %1423 = vrot.lane.b32.xlu1 %v928_v14, %s3800_s9  ;;  %v5392_v36 = vpop.permute.xlu0 %1035 }
 0x29f   :  { %v1406_v61 = vpop.permute.xlu1 %1405 }
 0x2a0   :  { %v1566_v44 = vsel %vm1559_vm9, %v1549_v26, %v1406_v61  ;;  %v1288_v27 = vpop.permute.xlu0 %1287  ;;  %v1466_v61 = vsel %vm1457_vm4, %v1449_v25, %v5180_v58 }
 0x2a1   :  { %3524 = vmatprep.mubr.msk.f32.mxu0 %vm1581_vm11, %v1566_v44  ;;  %v7291_v44 = vld [vmem:[#allocation98_spill] sm:$0xff]  ;;  %v1483_v16 = vsel %vm1474_vm5, %v1466_v61, %v1090_v5 }
 0x2a2   :  { %v329_v37 = vmul.f32 %v5196_v11, %v7291_v44 }
 0x2a3   :  { %v1156_v28 = vpop.permute.xlu1 %1155 }
 0x2a4   :  { %v5402_v31 = vpop.permute.xlu0 %1099 }
 0x2a7   :  { %v1408_v18 = vpop.permute.xlu1 %1407 }
 0x2a8   :  { %v1567_v38 = vsel %vm1559_vm9, %v1550_v41, %v1408_v18  ;;  %v1500_v18 = vsel %vm1491_vm6, %v1483_v16, %v1154_v39  ;;  %v1352_v4 = vpop.permute.xlu0 %1351 }
 0x2a9   :  { %3525 = vmatmul.mubr.msk.f32.gmra.mxu0 %vm1581_vm11, %v1567_v38  ;;  %v1450_v38 = vsel %vm61_vm0, %v329_v37, %v964_v3  ;;  %v1517_v54 = vsel %vm1508_vm7, %v1500_v18, %v5264_v29 }
 0x2aa   :  { %v1467_v58 = vsel %vm1457_vm4, %v1450_v38, %v5198_v59  ;;  %v1534_v9 = vsel %vm1525_vm8, %v1517_v54, %v5297_v20  ;;  %v7292_v38 = vld [vmem:[#allocation100_spill] sm:$0xff] }
 0x2ab   :  { %v968_v14 = vpop.permute.xlu1 %967  ;;  %v1484_v25 = vsel %vm1474_vm5, %v1467_v58, %v5225_v55  ;;  %v7293_v54 = vld [vmem:[#allocation144_spill] sm:$0xff] }
 0x2ac   :  { %v1501_v39 = vsel %vm1491_vm6, %v1484_v25, %v1156_v28  ;;  %v5422_v44 = vpop.permute.xlu0 %973  ;;  %v330_v58 = vmul.f32 %v7293_v54, %v7292_v38 }
 0x2af   :  { %v1220_v10 = vpop.permute.xlu1 %1219 }
 0x2b0   :  { %v1518_v29 = vsel %vm1508_vm7, %v1501_v39, %v1220_v10  ;;  %v1226_v16 = vpop.permute.xlu0 %1225 }
 0x2b1   :  { %v1535_v20 = vsel %vm1525_vm8, %v1518_v29, %v5323_v8  ;;  %v331_v8 = vmul.f32 %v5269_v22, %v7253_v34 }
 0x2b2   :  { %v1552_v55 = vsel %vm1542_vm10, %v1535_v20, %v5341_v63  ;;  %v1451_v63 = vsel %vm61_vm0, %v330_v58, %v5253_v57 }
 0x2b3   :  { %v5394_v60 = vpop.permute.xlu1 %317  ;;  %v1468_v39 = vsel %vm1457_vm4, %v1451_v63, %v5282_v45 }
 0x2b4   :  { %v5430_v18 = vpop.permute.xlu0 %975 }
 0x2b7   :  { %v1094_v26 = vpop.permute.xlu1 %1093 }
 0x2b8   :  { %v1228_v25 = vpop.permute.xlu0 %1227 }
 0x2bb   :  { %v1346_v41 = vpop.permute.xlu1 %1345 }
 0x2bc   :  { %v1551_v5 = vsel %vm1542_vm10, %v1534_v9, %v1346_v41  ;;  %v5442_v29 = vpop.permute.xlu0 %1039 }
 0x2bf   :  { %v1158_v48 = vpop.permute.xlu1 %1157 }
 0x2c0   :  { %v1292_v38 = vpop.permute.xlu0 %1291 }
 0x2c3   :  { %v1410_v61 = vpop.permute.xlu1 %1409 }
 0x2c4   :  { %v1568_v3 = vsel %vm1559_vm9, %v1551_v5, %v1410_v61  ;;  %v1452_v5 = vsel %vm61_vm0, %v331_v8, %v968_v14 }
 0x2c5   :  { %3527 = vmatprep.mubr.msk.f32.mxu0 %vm1581_vm11, %v1568_v3  ;;  %v1485_v3 = vsel %vm1474_vm5, %v1468_v39, %v1094_v26  ;;  %v1469_v20 = vsel %vm1457_vm4, %v1452_v5, %v5316_v2  ;;  %v333_v5 = vmul.f32 %v5339_v30, %v7259_v42 }
 0x2c6   :  { %v1486_v34 = vsel %vm1474_vm5, %v1469_v20, %v5334_v56  ;;  %v1104_v56 = vpop.permute.xlu0 %1103 }
 0x2c7   :  { %v1160_v59 = vpop.permute.xlu1 %1159 }
 0x2c8   :  { %v1503_v14 = vsel %vm1491_vm6, %v1486_v34, %v1160_v59 }
 0x2c9   :  { %v1520_v2 = vsel %vm1508_vm7, %v1503_v14, %v5388_v15  ;;  %v1454_v15 = vsel %vm61_vm0, %v333_v5, %v5382_v46 }
 0x2ca   :  { %v1537_v8 = vsel %vm1525_vm8, %v1520_v2, %v1288_v27  ;;  %v1356_v63 = vpop.permute.xlu0 %1355  ;;  %v1471_v27 = vsel %vm1457_vm4, %v1454_v15, %v5392_v36  ;;  %v334_v2 = vmul.f32 %v5271_v43, %v7269_v6 }
 0x2cb   :  { %v1412_v37 = vpop.permute.xlu1 %1411 }
 0x2cc   :  { %v1569_v41 = vsel %vm1559_vm9, %v1552_v55, %v1412_v37  ;;  %v1502_v55 = vsel %vm1491_vm6, %v1485_v3, %v1158_v48 }
 0x2cd   :  { %3528 = vmatmul.mubr.msk.f32.gmra.mxu0 %vm1581_vm11, %v1569_v41  ;;  %v1519_v57 = vsel %vm1508_vm7, %v1502_v55, %v5368_v21  ;;  %v1554_v21 = vsel %vm1542_vm10, %v1537_v8, %v1352_v4  ;;  %v1488_v4 = vsel %vm1474_vm5, %v1471_v27, %v5402_v31  ;;  %v332_v55 = vmul.f32 %v5172_v23, %v4774_v49 }
 0x2ce   :  { %v1168_v3 = vpop.permute.xlu0 %1167 }
 0x2cf   :  { %v1034_v28 = vpop.permute.xlu1 %1033  ;;  %v1453_v42 = vsel %vm61_vm0, %v332_v55, %v5355_v51 }
 0x2d0   :  { %v1470_v46 = vsel %vm1457_vm4, %v1453_v42, %v1034_v28 }
 0x2d3   :  { %v1286_v10 = vpop.permute.xlu1 %1285 }
 0x2d4   :  { %v1536_v45 = vsel %vm1525_vm8, %v1519_v57, %v1286_v10  ;;  %v1420_v57 = vpop.permute.xlu0 %1419 }
 0x2d7   :  { %v1098_v9 = vpop.permute.xlu1 %1097 }
 0x2d8   :  { %v1487_v36 = vsel %vm1474_vm5, %v1470_v46, %v1098_v9  ;;  %v1455_v9 = vsel %vm61_vm0, %v334_v2, %v5422_v44  ;;  %v2094_v2 = vld [vmem:[%s6890_s3 + $0x68] sm:$0xff] }
 0x2db   :  { %v1350_v61 = vpop.permute.xlu1 %1349 }
 0x2dc   :  { %v1553_v26 = vsel %vm1542_vm10, %v1536_v45, %v1350_v61 }
 0x2df   :  { %v1162_v37 = vpop.permute.xlu1 %1161 }
 0x2e3   :  { %v1414_v41 = vpop.permute.xlu1 %1413 }
 0x2e4   :  { %v1570_v58 = vsel %vm1559_vm9, %v1553_v26, %v1414_v41  ;;  %v1294_v26 = vpop.permute.xlu0 %1293  ;;  %v1504_v41 = vsel %vm1491_vm6, %v1487_v36, %v1162_v37  ;;  %v2111_v36 = vld [vmem:[%s6890_s3 + $0xf0] sm:$0xff] }
 0x2e5   :  { %3530 = vmatprep.mubr.msk.f32.mxu0 %vm1581_vm11, %v1570_v58  ;;  %v1521_v49 = vsel %vm1508_vm7, %v1504_v41, %v1226_v16  ;;  %v2095_v41 = vld [vmem:[%s6890_s3 + $0x70] sm:$0xff] }
 0x2e7   :  { %v1164_v48 = vpop.permute.xlu1 %1163 }
 0x2e8   :  { %v1505_v34 = vsel %vm1491_vm6, %v1488_v4, %v1164_v48  ;;  %v1358_v8 = vpop.permute.xlu0 %1357 }
 0x2e9   :  { %v1522_v45 = vsel %vm1508_vm7, %v1505_v34, %v1228_v25 }
 0x2ea   :  { %v1539_v31 = vsel %vm1525_vm8, %v1522_v45, %v1292_v38  ;;  %v2128_v45 = vld [vmem:[%s6890_s3 + $0x178] sm:$0xff] }
 0x2eb   :  { %v1416_v59 = vpop.permute.xlu1 %1415  ;;  %v1556_v48 = vsel %vm1542_vm10, %v1539_v31, %v1356_v63  ;;  %v2127_v31 = vld [vmem:[%s6890_s3 + $0x170] sm:$0xff] }
 0x2ec   :  { %v1571_v10 = vsel %vm1559_vm9, %v1554_v21, %v1416_v59  ;;  %v1573_v16 = vsel %vm1559_vm9, %v1556_v48, %v1420_v57  ;;  %v335_v21 = vmul.f32 %v5394_v60, %v4972_v50  ;;  %v1422_v5 = vpop.permute.xlu0 %1421  ;;  %v2109_v48 = vld [vmem:[%s6890_s3 + $0xe0] sm:$0xff] }
 0x2ed   :  { %3531 = vmatmul.mubr.msk.f32.gmra.mxu0 %vm1581_vm11, %v1571_v10 }
 0x2ee   :  { %v1456_v15 = vsel %vm61_vm0, %v335_v21, %v5430_v18  ;;  %v2139_v21 = vld [vmem:[%s6890_s3 + $0x1d0] sm:$0xff] }
 0x2ef   :  { %v1038_v61 = vpop.permute.xlu1 %1037  ;;  %v1473_v50 = vsel %vm1457_vm4, %v1456_v15, %v5442_v29  ;;  %v2112_v29 = vld [vmem:[%s6890_s3 + $0xf8] sm:$0xff]  ;;  %v2105_v15 = vld [vmem:[%s6890_s3 + $0xc0] sm:$0xff] }
 0x2f0   :  { %v1472_v38 = vsel %vm1457_vm4, %v1455_v9, %v1038_v61  ;;  %v1490_v4 = vsel %vm1474_vm5, %v1473_v50, %v1104_v56  ;;  %3153 = vmatprep.subr.mxu1 %v2112_v29  ;;  %v2144_v56 = vld [vmem:[%s6890_s3 + $0x1f8] sm:$0xff]  ;;  %v2125_v9 = vld [vmem:[%s6890_s3 + $0x160] sm:$0xff]  ;;  %v2119_v29 = vld [vmem:[%s6890_s3 + $0x130] sm:$0xff] }
 0x2f1   :  { %v1507_v34 = vsel %vm1491_vm6, %v1490_v4, %v1168_v3  ;;  %v2096_v3 = vld [vmem:[%s6890_s3 + $0x78] sm:$0xff]  ;;  %3233 = vmatprep.subr.mxu0 %v2144_v56  ;;  %v2102_v56 = vld [vmem:[%s6890_s3 + $0xa8] sm:$0xff] }
 0x2f2   :  { %3154 = vmatpush3.msra.mxu1 %v2096_v3  ;;  %3234 = vmatpush3.msra.mxu0 %v2128_v45  ;;  %v2104_v4 = vld [vmem:[%s6890_s3 + $0xb8] sm:$0xff]  ;;  %v2134_v3 = vld [vmem:[%s6890_s3 + $0x1a8] sm:$0xff] }
 0x2f3   :  { %v1290_v39 = vpop.permute.xlu1 %1289  ;;  %3155 = vmatprep.subr.mxu1 %v2111_v36  ;;  %v2086_v45 = vld [vmem:[%s6890_s3 + $0x28] sm:$0xff] }
 0x2f4   :  { %v1538_v51 = vsel %vm1525_vm8, %v1521_v49, %v1290_v39  ;;  %3156 = vmatpush3.msra.mxu1 %v2095_v41  ;;  %v2142_v49 = vld [vmem:[%s6890_s3 + $0x1e8] sm:$0xff]  ;;  %v2101_v41 = vld [vmem:[%s6890_s3 + $0xa0] sm:$0xff] }
 0x2f7   :  { %v1102_v20 = vpop.permute.xlu1 %1101 }
 0x2f8   :  { %v1489_v6 = vsel %vm1474_vm5, %v1472_v38, %v1102_v20  ;;  %v2092_v38 = vld [vmem:[%s6890_s3 + $0x58] sm:$0xff] }
 0x2fb   :  { %v1354_v14 = vpop.permute.xlu1 %1353 }
 0x2fc   :  { %v1555_v28 = vsel %vm1542_vm10, %v1538_v51, %v1354_v14  ;;  %v2126_v51 = vld [vmem:[%s6890_s3 + $0x168] sm:$0xff] }
 0x2fd   :  { %v5606_v50 = vpop.f32.mrf.mxu0 }
 0x2ff   :  { %v1166_v58 = vpop.permute.xlu1 %1165 }
 0x300   :  { %v1506_v59 = vsel %vm1491_vm6, %v1489_v6, %v1166_v58  ;;  %v2110_v58 = vld [vmem:[%s6890_s3 + $0xe8] sm:$0xff]  ;;  %v2107_v6 = vld [vmem:[%s6890_s3 + $0xd0] sm:$0xff] }
 0x301   :  { %3157 = vmatprep.subr.mxu1 %v2110_v58  ;;  %v2085_v58 = vld [vmem:[%s6890_s3 + $0x20] sm:$0xff] }
 0x302   :  { %3158 = vmatpush3.msra.mxu1 %v2094_v2  ;;  %v2100_v2 = vld [vmem:[%s6890_s3 + $0x98] sm:$0xff] }
 0x303   :  { %v1418_v25 = vpop.permute.xlu1 %1417  ;;  %3159 = vmatprep.subr.mxu1 %v2109_v48  ;;  %v2084_v48 = vld [vmem:[%s6890_s3 + $0x18] sm:$0xff] }
 0x304   :  { %v1572_v37 = vsel %vm1559_vm9, %v1555_v28, %v1418_v25  ;;  %v2141_v28 = vld [vmem:[%s6890_s3 + $0x1e0] sm:$0xff] }
 0x305   :  { %3533 = vmatprep.mubr.msk.f32.mxu0 %vm1581_vm11, %v1572_v37  ;;  %v2093_v25 = vld [vmem:[%s6890_s3 + $0x60] sm:$0xff]  ;;  %v2140_v37 = vld [vmem:[%s6890_s3 + $0x1d8] sm:$0xff] }
 0x306   :  { %3534 = vmatmul.mubr.msk.f32.gmra.mxu0 %vm1581_vm11, %v1573_v16  ;;  %3160 = vmatpush3.msra.mxu1 %v2093_v25  ;;  %v2124_v16 = vld [vmem:[%s6890_s3 + $0x158] sm:$0xff] }
 0x307   :  { %v1230_v10 = vpop.permute.xlu1 %1229  ;;  %v2116_v25 = vld [vmem:[%s6890_s3 + $0x118] sm:$0xff] }
 0x308   :  { %v1523_v44 = vsel %vm1508_vm7, %v1506_v59, %v1230_v10  ;;  %v2091_v59 = vld [vmem:[%s6890_s3 + $0x50] sm:$0xff] }
 0x309   :  { %v1540_v63 = vsel %vm1525_vm8, %v1523_v44, %v1294_v26  ;;  %v2143_v26 = vld [vmem:[%s6890_s3 + $0x1f0] sm:$0xff]  ;;  %v2106_v44 = vld [vmem:[%s6890_s3 + $0xc8] sm:$0xff] }
 0x30a   :  { %v1557_v61 = vsel %vm1542_vm10, %v1540_v63, %v1358_v8  ;;  %3235 = vmatprep.subr.mxu0 %v2143_v26  ;;  %v2108_v8 = vld [vmem:[%s6890_s3 + $0xd8] sm:$0xff]  ;;  %v2123_v10 = vld [vmem:[%s6890_s3 + $0x150] sm:$0xff]  ;;  %v2138_v63 = vld [vmem:[%s6890_s3 + $0x1c8] sm:$0xff] }
 0x30b   :  { %v1232_v39 = vpop.permute.xlu1 %1231  ;;  %v1574_v27 = vsel %vm1559_vm9, %v1557_v61, %v1422_v5  ;;  %3236 = vmatpush3.msra.mxu0 %v2127_v31  ;;  %3161 = vmatprep.subr.mxu1 %v2108_v8  ;;  %v2090_v5 = vld [vmem:[%s6890_s3 + $0x48] sm:$0xff]  ;;  %v2133_v31 = vld [vmem:[%s6890_s3 + $0x1a0] sm:$0xff]  ;;  %v2131_v8 = vld [vmem:[%s6890_s3 + $0x190] sm:$0xff] }
 0x30c   :  { %3536 = vmatprep.mubr.msk.f32.mxu0 %vm1581_vm11, %v1574_v27  ;;  %v1524_v57 = vsel %vm1508_vm7, %v1507_v34, %v1232_v39  ;;  %3237 = vmatprep.subr.mxu0 %v2142_v49  ;;  %v2122_v61 = vld [vmem:[%s6890_s3 + $0x148] sm:$0xff]  ;;  %v2137_v39 = vld [vmem:[%s6890_s3 + $0x1c0] sm:$0xff]  ;;  %v2088_v34 = vld [vmem:[%s6890_s3 + $0x38] sm:$0xff] }
 0x30d   :  { %3238 = vmatpush3.msra.mxu0 %v2126_v51  ;;  %3162 = vmatpush3.msra.mxu1 %v2092_v38  ;;  %v2089_v27 = vld [vmem:[%s6890_s3 + $0x40] sm:$0xff]  ;;  %v2118_v26 = vld [vmem:[%s6890_s3 + $0x128] sm:$0xff]  ;;  %v2132_v51 = vld [vmem:[%s6890_s3 + $0x198] sm:$0xff] }
 0x30e   :  { %3239 = vmatprep.subr.mxu0 %v2141_v28  ;;  %3163 = vmatprep.subr.mxu1 %v2107_v6  ;;  %v2117_v49 = vld [vmem:[%s6890_s3 + $0x120] sm:$0xff]  ;;  %v2083_v38 = vld [vmem:[%s6890_s3 + $0x10] sm:$0xff]  ;;  %v2098_v6 = vld [vmem:[%s6890_s3 + $0x88] sm:$0xff] }
 0x30f   :  { %v1296_v20 = vpop.permute.xlu1 %1295  ;;  %3240 = vmatpush3.msra.mxu0 %v2125_v9  ;;  %3164 = vmatpush3.msra.mxu1 %v2091_v59  ;;  %v2099_v9 = vld [vmem:[%s6890_s3 + $0x90] sm:$0xff]  ;;  %v2130_v59 = vld [vmem:[%s6890_s3 + $0x188] sm:$0xff] }
 0x310   :  { %v1541_v42 = vsel %vm1525_vm8, %v1524_v57, %v1296_v20  ;;  %3241 = vmatprep.subr.mxu0 %v2140_v37  ;;  %3165 = vmatprep.subr.mxu1 %v2106_v44  ;;  %v2121_v20 = vld [vmem:[%s6890_s3 + $0x140] sm:$0xff]  ;;  %v2120_v57 = vld [vmem:[%s6890_s3 + $0x138] sm:$0xff] }
 0x311   :  { %3242 = vmatpush3.msra.mxu0 %v2124_v16  ;;  %3166 = vmatpush3.msra.mxu1 %v2090_v5  ;;  %v2115_v16 = vld [vmem:[%s6890_s3 + $0x110] sm:$0xff]  ;;  %v2097_v5 = vld [vmem:[%s6890_s3 + $0x80] sm:$0xff] }
 0x312   :  { %3243 = vmatprep.subr.mxu0 %v2139_v21  ;;  %3167 = vmatprep.subr.mxu1 %v2105_v15  ;;  %v2081_v15 = vld [vmem:[%s6890_s3] sm:$0xff] }
 0x313   :  { %v1360_v55 = vpop.permute.xlu1 %1359  ;;  %3244 = vmatpush3.msra.mxu0 %v2123_v10  ;;  %3168 = vmatpush3.msra.mxu1 %v2089_v27  ;;  %v2082_v10 = vld [vmem:[%s6890_s3 + $0x8] sm:$0xff] }
 0x314   :  { %v1558_v18 = vsel %vm1542_vm10, %v1541_v42, %v1360_v55  ;;  %3245 = vmatprep.subr.mxu0 %v2138_v63  ;;  %3169 = vmatprep.subr.mxu1 %v2104_v4  ;;  %v2136_v55 = vld [vmem:[%s6890_s3 + $0x1b8] sm:$0xff]  ;;  %v2103_v42 = vld [vmem:[%s6890_s3 + $0xb0] sm:$0xff]  ;;  %v2114_v63 = vld [vmem:[%s6890_s3 + $0x108] sm:$0xff] }
 0x315   :  { %3246 = vmatpush3.msra.mxu0 %v2122_v61  ;;  %3170 = vmatpush3.msra.mxu1 %v2088_v34  ;;  %v2129_v61 = vld [vmem:[%s6890_s3 + $0x180] sm:$0xff]  ;;  %v2208_v4 = vld [vmem:[%s6890_s3 + $0x3f8] sm:$0xff] }
 0x316   :  { %3247 = vmatprep.subr.mxu0 %v2137_v39  ;;  %3171 = vmatprep.subr.mxu1 %v2103_v42  ;;  %v2113_v39 = vld [vmem:[%s6890_s3 + $0x100] sm:$0xff] }
 0x317   :  { %v1424_v14 = vpop.permute.xlu1 %1423  ;;  %3248 = vmatpush3.msra.mxu0 %v2121_v20 }
 0x318   :  { %v1575_v46 = vsel %vm1559_vm9, %v1558_v18, %v1424_v14  ;;  %3249 = vmatprep.subr.mxu0 %v2136_v55  ;;  %v2135_v18 = vld [vmem:[%s6890_s3 + $0x1b0] sm:$0xff] }
 0x319   :  { %3537 = vmatmul.mubr.msk.f32.gmra.mxu0 %vm1581_vm11, %v1575_v46  ;;  %v2087_v14 = vld [vmem:[%s6890_s3 + $0x30] sm:$0xff]  ;;  %v5632_v46 = vpop.f32.mrf.mxu0 }
 0x31a   :  { %3250 = vmatpush3.msra.mxu0 %v2120_v57  ;;  %3172 = vmatpush3.msra.mxu1 %v2087_v14  ;;  %v1779_v37 = vadd.f32 %v5606_v50, %v5632_v46 }
 0x31b   :  { %3251 = vmatprep.subr.mxu0 %v2135_v18  ;;  %3173 = vmatprep.subr.mxu1 %v2102_v56 }
 0x31c   :  { %3252 = vmatpush3.msra.mxu0 %v2119_v29  ;;  %3174 = vmatpush3.msra.mxu1 %v2086_v45  ;;  %v2176_v29 = vld [vmem:[%s6890_s3 + $0x2f8] sm:$0xff] }
 0x31d   :  { %3253 = vmatprep.subr.mxu0 %v2134_v3  ;;  %3175 = vmatprep.subr.mxu1 %v2101_v41 }
 0x31e   :  { %3254 = vmatpush3.msra.mxu0 %v2118_v26  ;;  %3176 = vmatpush3.msra.mxu1 %v2085_v58 }
 0x31f   :  { %3255 = vmatprep.subr.mxu0 %v2133_v31  ;;  %3177 = vmatprep.subr.mxu1 %v2100_v2 }
 0x320   :  { %3256 = vmatpush3.msra.mxu0 %v2117_v49  ;;  %3178 = vmatpush3.msra.mxu1 %v2084_v48 }
 0x321   :  { %v5646_v36 = vpop.f32.mrf.mxu0  ;;  %3257 = vmatprep.subr.mxu0 %v2132_v51  ;;  %3179 = vmatprep.subr.mxu1 %v2099_v9 }
 0x322   :  { %3258 = vmatpush3.msra.mxu0 %v2116_v25  ;;  %3180 = vmatpush3.msra.mxu1 %v2083_v38 }
 0x323   :  { %v5672_v28 = vpop.f32.mrf.mxu0  ;;  %3259 = vmatprep.subr.mxu0 %v2131_v8  ;;  %3181 = vmatprep.subr.mxu1 %v2098_v6 }
 0x324   :  { %v1780_v44 = vadd.f32 %v1779_v37, %v5672_v28  ;;  %3260 = vmatpush3.msra.mxu0 %v2115_v16  ;;  %3182 = vmatpush3.msra.mxu1 %v2082_v10 }
 0x325   :  { %3261 = vmatprep.subr.mxu0 %v2130_v59  ;;  %3183 = vmatprep.subr.mxu1 %v2097_v5 }
 0x326   :  { %3262 = vmatpush3.msra.mxu0 %v2114_v63  ;;  %3184 = vmatpush3.msra.mxu1 %v2081_v15  ;;  %v1781_v20 = vadd.f32 %v5646_v36, %v1780_v44 }
 0x327   :  { %3263 = vmatprep.subr.mxu0 %v2129_v61  ;;  %3313 = vmatprep.subr.mxu1 %v2176_v29 }
 0x328   :  { %3264 = vmatpush3.msra.mxu0 %v2113_v39 }
 0x329   :  { %3393 = vmatprep.subr.mxu0 %v2208_v4 }
 0x345   :  { %v5694_v21 = vpop.f32.mrf.mxu0 }
 0x347   :  { %v1720_v27 = vpop.f32.mrf.mxu0 }
 0x348   :  { %v1782_v34 = vadd.f32 %v1781_v20, %v1720_v27 }
 0x34a   :  { %v1783_v42 = vadd.f32 %v5694_v21, %v1782_v34 }
 0x369   :  { %v3526_v55 = vpop.f32.mrf.mxu0 }
 0x36b   :  { %v1730_v57 = vpop.f32.mrf.mxu0 }
 0x36c   :  { %v1784_v14 = vadd.f32 %v1783_v42, %v1730_v57 }
 0x36e   :  { %v1785_v3 = vadd.f32 %v3526_v55, %v1784_v14 }
 0x38d   :  { %v3529_v18 = vpop.f32.mrf.mxu0 }
 0x38f   :  { %v1740_v56 = vpop.f32.mrf.mxu0 }
 0x390   :  { %v1786_v26 = vadd.f32 %v1785_v3, %v1740_v56 }
 0x392   :  { %v1787_v31 = vadd.f32 %v3529_v18, %v1786_v26 }
 0x3ad   :  { %v3532_v45 = vpop.f32.mrf.mxu0 }
 0x3af   :  { %v1750_v41 = vpop.f32.mrf.mxu0 }
 0x3b0   :  { %v1788_v49 = vadd.f32 %v1787_v31, %v1750_v41 }
 0x3b2   :  { %v1789_v51 = vadd.f32 %v3532_v45, %v1788_v49 }
 0x3c6   :  { %v3535_v58 = vpop.f32.mrf.mxu0 }
 0x3c8   :  { %v1760_v2 = vpop.f32.mrf.mxu0 }
 0x3c9   :  { %v1790_v48 = vadd.f32 %v1789_v51, %v1760_v2 }
 0x3cb   :  { %v1791_v9 = vadd.f32 %v3535_v58, %v1790_v48 }
 0x3d9   :  { %v3538_v25 = vpop.f32.mrf.mxu0 }
 0x3db   :  { %v1770_v8 = vpop.f32.mrf.mxu0 }
 0x3dc   :  { %v1792_v37 = vadd.f32 %v1791_v9, %v1770_v8 }
 0x3de   :  { %v1793_v38 = vadd.f32 %v3538_v25, %v1792_v37 }
 0x3e0   :  { %v1794_v16 = vrot.slane %v1793_v38, 4 }
 0x3e2   :  { %v1795_v6 = vadd.f32 %v1794_v16, %v1793_v38 }
 0x3e4   :  { %v1796_v59 = vrot.slane %v1795_v6, 2 }
 0x3e6   :  { %v1797_v10 = vadd.f32 %v1796_v59, %v1795_v6 }
 0x3e8   :  { %v1798_v44 = vrot.slane %v1797_v10, 1 }
 0x3ea   :  { %v1799_v63 = vadd.f32 %v1798_v44, %v1797_v10 }
 0x3ec   :  { %v1800_v5 = vmul.f32 0.0078125, %v1799_v63 }
 0x3ee   :  { %v1801_v61 = vsub.f32 %v5632_v46, %v1800_v5  ;;  %v1802_v15 = vsub.f32 %v5606_v50, %v1800_v5  ;;  %v1803_v39 = vsub.f32 %v5672_v28, %v1800_v5  ;;  %v1804_v34 = vsub.f32 %v5646_v36, %v1800_v5 }
 0x3ef   :  { %v5730_v42 = vsub.f32 %v1720_v27, %v1800_v5  ;;  %v5733_v3 = vsub.f32 %v5694_v21, %v1800_v5  ;;  %v5735_v49 = vsub.f32 %v1730_v57, %v1800_v5  ;;  %v5739_v28 = vsub.f32 %v3526_v55, %v1800_v5 }
 0x3f0   :  { %v1817_v20 = vmul.f32 %v1801_v61, %v1801_v61  ;;  %v1818_v4 = vmul.f32 %v1802_v15, %v1802_v15  ;;  %v1819_v14 = vmul.f32 %v1803_v39, %v1803_v39  ;;  %v1820_v26 = vmul.f32 %v1804_v34, %v1804_v34 }
 0x3f1   :  { %v1821_v50 = vmul.f32 %v5730_v42, %v5730_v42  ;;  %v1822_v36 = vmul.f32 %v5733_v3, %v5733_v3  ;;  %v5743_v51 = vsub.f32 %v1740_v56, %v1800_v5  ;;  %v1823_v21 = vmul.f32 %v5735_v49, %v5735_v49 }
 0x3f2   :  { %v1833_v29 = vadd.f32 %v1818_v4, %v1817_v20  ;;  %v5747_v9 = vsub.f32 %v3529_v18, %v1800_v5  ;;  %v1824_v57 = vmul.f32 %v5739_v28, %v5739_v28  ;;  %v5751_v38 = vsub.f32 %v1750_v41, %v1800_v5 }
 0x3f3   :  { %v1825_v55 = vmul.f32 %v5743_v51, %v5743_v51  ;;  %v5755_v6 = vsub.f32 %v3532_v45, %v1800_v5  ;;  %v5759_v10 = vsub.f32 %v1760_v2, %v1800_v5  ;;  %v5763_v63 = vsub.f32 %v3535_v58, %v1800_v5 }
 0x3f4   :  { %v1834_v31 = vadd.f32 %v1833_v29, %v1819_v14  ;;  %v1826_v56 = vmul.f32 %v5747_v9, %v5747_v9  ;;  %v1827_v18 = vmul.f32 %v5751_v38, %v5751_v38  ;;  %v1815_v4 = vsub.f32 %v1770_v8, %v1800_v5 }
 0x3f5   :  { %v1828_v41 = vmul.f32 %v5755_v6, %v5755_v6  ;;  %v1829_v45 = vmul.f32 %v5759_v10, %v5759_v10  ;;  %v1816_v29 = vsub.f32 %v3538_v25, %v1800_v5  ;;  %v1830_v2 = vmul.f32 %v5763_v63, %v5763_v63 }
 0x3f6   :  { %v1835_v46 = vadd.f32 %v1834_v31, %v1820_v26  ;;  %v1831_v31 = vmul.f32 %v1815_v4, %v1815_v4 }
 0x3f8   :  { %v1836_v27 = vadd.f32 %v1835_v46, %v1821_v50  ;;  %v1832_v46 = vmul.f32 %v1816_v29, %v1816_v29 }
 0x3fa   :  { %v1837_v48 = vadd.f32 %v1836_v27, %v1822_v36 }
 0x3fc   :  { %v1838_v37 = vadd.f32 %v1837_v48, %v1823_v21 }
 0x3fe   :  { %v1839_v16 = vadd.f32 %v1838_v37, %v1824_v57 }
 0x400   :  { %v1840_v59 = vadd.f32 %v1839_v16, %v1825_v55 }
 0x402   :  { %v1841_v44 = vadd.f32 %v1840_v59, %v1826_v56 }
 0x404   :  { %v1842_v20 = vadd.f32 %v1841_v44, %v1827_v18 }
 0x406   :  { %v1843_v14 = vadd.f32 %v1842_v20, %v1828_v41 }
 0x408   :  { %v1844_v26 = vadd.f32 %v1843_v14, %v1829_v45 }
 0x40a   :  { %v1845_v50 = vadd.f32 %v1844_v26, %v1830_v2  ;;  %v7294_v2 = vld [vmem:[#allocation10_spill] sm:$0xff] }
 0x40c   :  { %v1846_v36 = vadd.f32 %v1845_v50, %v1831_v31 }
 0x40e   :  { %v1847_v58 = vadd.f32 %v1846_v36, %v1832_v46 }
 0x410   :  { %v1848_v27 = vrot.slane %v1847_v58, 4 }
 0x412   :  { %v1849_v21 = vadd.f32 %v1848_v27, %v1847_v58  ;;  %v7297_v27 = vld [vmem:[#allocation143_spill] sm:$0xff] }
 0x414   :  { %v1850_v48 = vrot.slane %v1849_v21, 2 }
 0x416   :  { %v1851_v57 = vadd.f32 %v1850_v48, %v1849_v21  ;;  %v7298_v48 = vld [vmem:[#allocation14_spill] sm:$0xff] }
 0x418   :  { %v1852_v37 = vrot.slane %v1851_v57, 1 }
 0x41a   :  { %v1853_v8 = vadd.f32 %v1852_v37, %v1851_v57 }
 0x41c   :  { %v1854_v55 = vmul.f32 0.0078125, %v1853_v8 }
 0x41e   :  { %v1855_v16 = vadd.f32 1e-05, %v1854_v55  ;;  %v7300_v55 = vld [vmem:[#allocation12_spill] sm:$0xff] }
 0x420   :  { %3725 = vrsqrt.f32 %v1855_v16 }
 0x42d   :  { %v5771_v56 = vpop.eup %3725 }
 0x42e   :  { %v1871_v25 = vmul.f32 %v5771_v56, %v1815_v4  ;;  %v1872_v5 = vmul.f32 %v5771_v56, %v1816_v29  ;;  %v1857_v59 = vmul.f32 %v5771_v56, %v1801_v61  ;;  %v1858_v20 = vmul.f32 %v5771_v56, %v1802_v15  ;;  %v7344_v15 = vld [vmem:[#allocation56_spill] sm:$0xff] }
 0x42f   :  { %v1859_v45 = vmul.f32 %v5771_v56, %v1803_v39  ;;  %v1860_v14 = vmul.f32 %v5771_v56, %v1804_v34 }
 0x430   :  { %v5776_v18 = vmax.f32 %v1871_v25, 0.0  ;;  %v5778_v44 = vmax.f32 %v1872_v5, 0.0  ;;  %v5780_v41 = vmax.f32 %v1857_v59, 0.0  ;;  %v5792_v46 = vmax.f32 %v1858_v20, 0.0  ;;  %v7301_v25 = vld [vmem:[#allocation9_spill] sm:$0xff]  ;;  %v2192_v59 = vld [vmem:[%s6890_s3 + $0x378] sm:$0xff] }
 0x431   :  { %v5804_v36 = vmax.f32 %v1859_v45, 0.0  ;;  %v5806_v58 = vmax.f32 %v1860_v14, 0.0  ;;  %v2207_v14 = vld [vmem:[%s6890_s3 + $0x3f0] sm:$0xff] }
 0x432   :  { %v1937_v26 = vmul.f32 %v5778_v44, %v7294_v2  ;;  %v7058_v4 = vrot.slane %v5776_v18, 7  ;;  %v1904_v29 = vrot.slane %v5778_v44, 7  ;;  %v1889_v61 = vrot.slane %v5780_v41, 7 }
 0x433   :  { %v1953_v31 = vrot.slane %v5780_v41, 1  ;;  %v7057_v50 = vrot.slane %v5778_v44, 1  ;;  %v1890_v8 = vrot.slane %v5792_v46, 7  ;;  %v1938_v16 = vmul.f32 %v5780_v41, %v7300_v55  ;;  %v7303_v55 = vld [vmem:[#allocation104_spill] sm:$0xff] }
 0x434   :  { %2289 = vmatprep.mubr.f32.mxu1 %v1937_v26  ;;  %v5798_v39 = vsel %vm223_vm1, %v7058_v4, %v1904_v29  ;;  %v5802_v34 = vsel %vm223_vm1, %v1904_v29, %v1889_v61  ;;  %v1954_v20 = vrot.slane %v5792_v46, 1  ;;  %v1891_v2 = vrot.slane %v5804_v36, 7  ;;  %v7308_v4 = vld [vmem:[#allocation20_spill] sm:$0xff] }
 0x435   :  { %7296 = vst [vmem:[#allocation37_spill] sm:$0xff] %v5802_v34  ;;  %v1921_v21 = vmul.f32 %v5798_v39, %v7297_v27  ;;  %v2001_v57 = vmul.f32 %v5802_v34, %v7298_v48  ;;  %v5816_v37 = vsel %vm432_vm2, %v7057_v50, %v1953_v31  ;;  %v5829_v45 = vsel %vm223_vm1, %v1889_v61, %v1890_v8  ;;  %v7302_v27 = vld [vmem:[#allocation13_spill] sm:$0xff]  ;;  %v2206_v50 = vld [vmem:[%s6890_s3 + $0x3e8] sm:$0xff] }
 0x436   :  { %7299 = vst [vmem:[#allocation110_spill] sm:$0xff] %v5816_v37  ;;  %v1985_v5 = vmul.f32 %v5816_v37, %v7301_v25  ;;  %v1955_v26 = vrot.slane %v5804_v36, 1  ;;  %v1861_v29 = vmul.f32 %v5771_v56, %v5730_v42  ;;  %v5842_v61 = vsel %vm432_vm2, %v1953_v31, %v1954_v20  ;;  %v2191_v48 = vld [vmem:[%s6890_s3 + $0x370] sm:$0xff] }
 0x437   :  { %2290 = vmatmul.mubr.f32.vlgmr.msra.gmra.mxu1 %v1921_v21  ;;  %2434 = vmatprep.mubr.f32.mxu0 %v2001_v57  ;;  %v2002_v21 = vmul.f32 %v5829_v45, %v7302_v27  ;;  %v1892_v57 = vrot.slane %v5806_v58, 7  ;;  %v1922_v25 = vmul.f32 %v5802_v34, %v7303_v55  ;;  %v5852_v42 = vsel %vm223_vm1, %v1890_v8, %v1891_v2  ;;  %v2205_v34 = vld [vmem:[%s6890_s3 + $0x3e0] sm:$0xff] }
 0x438   :  { %2294 = vmatprep.mubr.f32.mxu1 %v1938_v16  ;;  %2435 = vmatmul.mubr.f32.vlgmr.msra.gmra.mxu0 %v1985_v5  ;;  %v7304_v16 = vld [vmem:[#allocation15_spill] sm:$0xff]  ;;  %v5865_v8 = vsel %vm432_vm2, %v1954_v20, %v1955_v26  ;;  %v2175_v20 = vld [vmem:[%s6890_s3 + $0x2f0] sm:$0xff] }
 0x439   :  { %3394 = vmatpush3.msra.mxu0 %v2192_v59  ;;  %2439 = vmatprep.mubr.f32.mxu0 %v2002_v21  ;;  %v1939_v31 = vmul.f32 %v5792_v46, %v7304_v16  ;;  %v7305_v5 = vld [vmem:[#allocation11_spill] sm:$0xff]  ;;  %v7306_v59 = vld [vmem:[#allocation24_spill] sm:$0xff]  ;;  %v1956_v16 = vrot.slane %v5806_v58, 1 }
 0x43a   :  { %3395 = vmatprep.subr.mxu0 %v2207_v14  ;;  %v1986_v27 = vmul.f32 %v5842_v61, %v7305_v5  ;;  %v2003_v55 = vmul.f32 %v5852_v42, %v7306_v59  ;;  %v2160_v14 = vld [vmem:[%s6890_s3 + $0x278] sm:$0xff]  ;;  %v2190_v21 = vld [vmem:[%s6890_s3 + $0x368] sm:$0xff]  ;;  %v5874_v5 = vmax.f32 %v1861_v29, 0.0  ;;  %v1923_v59 = vmul.f32 %v5829_v45, %v5078_v13 }
 0x43b   :  { %2295 = vmatmul.mubr.f32.gmra.mxu1 %v1922_v25  ;;  %3396 = vmatpush3.msra.mxu0 %v2191_v48  ;;  %v5878_v48 = vsel %vm223_vm1, %v1891_v2, %v1892_v57  ;;  %v1862_v25 = vmul.f32 %v5771_v56, %v5733_v3  ;;  %v1987_v2 = vmul.f32 %v5865_v8, %v7308_v4  ;;  %v2159_v4 = vld [vmem:[%s6890_s3 + $0x270] sm:$0xff] }
 0x43c   :  { %2299 = vmatprep.mubr.f32.mxu1 %v1939_v31  ;;  %2440 = vmatmul.mubr.f32.gmra.mxu0 %v1986_v27  ;;  %v1893_v29 = vrot.slane %v5874_v5, 7  ;;  %v7307_v31 = vld [vmem:[#allocation17_spill] sm:$0xff]  ;;  %v1863_v13 = vmul.f32 %v5771_v56, %v5735_v49 }
 0x43d   :  { %2444 = vmatprep.mubr.f32.mxu0 %v2003_v55  ;;  %3397 = vmatprep.subr.mxu0 %v2206_v50  ;;  %v1940_v27 = vmul.f32 %v5804_v36, %v7307_v31  ;;  %v5895_v3 = vmax.f32 %v1862_v25, 0.0  ;;  %v7309_v50 = vld [vmem:[#allocation28_spill] sm:$0xff]  ;;  %v5903_v31 = vsel %vm432_vm2, %v1955_v26, %v1956_v16  ;;  %v1864_v25 = vmul.f32 %v5771_v56, %v5739_v28 }
 0x43e   :  { %3314 = vmatpush3.msra.mxu1 %v2160_v14  ;;  %3398 = vmatpush3.msra.mxu0 %v2190_v21  ;;  %v2004_v55 = vmul.f32 %v5878_v48, %v7309_v50  ;;  %v2189_v14 = vld [vmem:[%s6890_s3 + $0x360] sm:$0xff]  ;;  %v1957_v21 = vrot.slane %v5874_v5, 1  ;;  %v5914_v49 = vsel %vm223_vm1, %v1892_v57, %v1893_v29  ;;  %v2174_v26 = vld [vmem:[%s6890_s3 + $0x2e8] sm:$0xff]  ;;  %v7312_v50 = vld [vmem:[#allocation29_spill] sm:$0xff] }
 0x43f   :  { %2300 = vmatmul.mubr.f32.gmra.mxu1 %v1923_v59  ;;  %3315 = vmatprep.subr.mxu1 %v2175_v20  ;;  %v1894_v20 = vrot.slane %v5895_v3, 7  ;;  %v1924_v59 = vmul.f32 %v5852_v42, %v5084_v7  ;;  %v1988_v37 = vmul.f32 %v5903_v31, %v7312_v50  ;;  %v7313_v28 = vld [vmem:[#allocation48_spill] sm:$0xff]  ;;  %v7316_v50 = vld [vmem:[#allocation30_spill] sm:$0xff] }
 0x440   :  { %2304 = vmatprep.mubr.f32.mxu1 %v1940_v27  ;;  %2445 = vmatmul.mubr.f32.gmra.mxu0 %v1987_v2  ;;  %v5924_v27 = vmax.f32 %v1863_v13, 0.0  ;;  %v7311_v2 = vld [vmem:[#allocation34_spill] sm:$0xff]  ;;  %v5937_v7 = vsel %vm432_vm2, %v1956_v16, %v1957_v21  ;;  %v2173_v16 = vld [vmem:[%s6890_s3 + $0x2e0] sm:$0xff] }
 0x441   :  { %2449 = vmatprep.mubr.f32.mxu0 %v2004_v55  ;;  %3399 = vmatprep.subr.mxu0 %v2205_v34  ;;  %v1941_v57 = vmul.f32 %v5806_v58, %v7311_v2  ;;  %v2005_v55 = vmul.f32 %v5914_v49, %v7313_v28  ;;  %v2158_v34 = vld [vmem:[%s6890_s3 + $0x268] sm:$0xff]  ;;  %v2188_v13 = vld [vmem:[%s6890_s3 + $0x358] sm:$0xff]  ;;  %v1865_v2 = vmul.f32 %v5771_v56, %v5743_v51 }
 0x442   :  { %7310 = vst [vmem:[#allocation105_spill] sm:$0xff] %v5924_v27  ;;  %3316 = vmatpush3.msra.mxu1 %v2159_v4  ;;  %3400 = vmatpush3.msra.mxu0 %v2189_v14  ;;  %v1958_v4 = vrot.slane %v5895_v3, 1  ;;  %v5948_v14 = vsel %vm223_vm1, %v1893_v29, %v1894_v20  ;;  %v1989_v28 = vmul.f32 %v5937_v7, %v7316_v50  ;;  %v7319_v50 = vld [vmem:[#allocation33_spill] sm:$0xff] }
 0x443   :  { %2305 = vmatmul.mubr.f32.gmra.mxu1 %v1924_v59  ;;  %3317 = vmatprep.subr.mxu1 %v2174_v26  ;;  %v1895_v26 = vrot.slane %v5924_v27, 7  ;;  %v5954_v59 = vmax.f32 %v1864_v25, 0.0  ;;  %v2203_v25 = vld [vmem:[%s6890_s3 + $0x3d0] sm:$0xff]  ;;  %v2006_v51 = vmul.f32 %v5948_v14, %v7317_v17 }
 0x444   :  { %2309 = vmatprep.mubr.f32.mxu1 %v1941_v57  ;;  %2450 = vmatmul.mubr.f32.gmra.mxu0 %v1988_v37  ;;  %v1925_v57 = vmul.f32 %v5878_v48, %v5089_v52  ;;  %v7315_v37 = vld [vmem:[#allocation40_spill] sm:$0xff]  ;;  %v5971_v52 = vsel %vm432_vm2, %v1957_v21, %v1958_v4  ;;  %v2172_v21 = vld [vmem:[%s6890_s3 + $0x2d8] sm:$0xff] }
 0x445   :  { %7314 = vst [vmem:[#allocation49_spill] sm:$0xff] %v5954_v59  ;;  %2454 = vmatprep.mubr.f32.mxu0 %v2005_v55  ;;  %3401 = vmatprep.subr.mxu0 %v2204_v53  ;;  %v1942_v29 = vmul.f32 %v5874_v5, %v7315_v37  ;;  %v2157_v53 = vld [vmem:[%s6890_s3 + $0x260] sm:$0xff]  ;;  %v2187_v55 = vld [vmem:[%s6890_s3 + $0x350] sm:$0xff]  ;;  %v5984_v17 = vsel %vm223_vm1, %v1894_v20, %v1895_v26 }
 0x446   :  { %3318 = vmatpush3.msra.mxu1 %v2158_v34  ;;  %3402 = vmatpush3.msra.mxu0 %v2188_v13  ;;  %v1959_v34 = vrot.slane %v5924_v27, 1  ;;  %v1866_v13 = vmul.f32 %v5771_v56, %v5747_v9  ;;  %v1926_v37 = vmul.f32 %v5914_v49, %v7268_v19  ;;  %v7318_v9 = vld [vmem:[#allocation59_spill] sm:$0xff]  ;;  %v1990_v20 = vmul.f32 %v5971_v52, %v7319_v50 }
 0x447   :  { %2310 = vmatmul.mubr.f32.gmra.mxu1 %v1925_v57  ;;  %3319 = vmatprep.subr.mxu1 %v2173_v16  ;;  %v1896_v16 = vrot.slane %v5954_v59, 7  ;;  %v5990_v57 = vmax.f32 %v1865_v2, 0.0  ;;  %v7320_v2 = vld [vmem:[#allocation71_spill] sm:$0xff] }
 0x448   :  { %2314 = vmatprep.mubr.f32.mxu1 %v1942_v29  ;;  %2455 = vmatmul.mubr.f32.gmra.mxu0 %v1989_v28  ;;  %v1943_v29 = vmul.f32 %v5895_v3, %v7318_v9  ;;  %v2202_v28 = vld [vmem:[%s6890_s3 + $0x3c8] sm:$0xff]  ;;  %v6005_v19 = vsel %vm432_vm2, %v1958_v4, %v1959_v34  ;;  %v6016_v9 = vmax.f32 %v1866_v13, 0.0 }
 0x449   :  { %2459 = vmatprep.mubr.f32.mxu0 %v2006_v51  ;;  %3403 = vmatprep.subr.mxu0 %v2203_v25  ;;  %v2007_v51 = vmul.f32 %v5984_v17, %v7320_v2  ;;  %v2156_v25 = vld [vmem:[%s6890_s3 + $0x258] sm:$0xff]  ;;  %v6020_v4 = vsel %vm223_vm1, %v1895_v26, %v1896_v16  ;;  %v1897_v50 = vrot.slane %v5990_v57, 7  ;;  %v1927_v2 = vmul.f32 %v5948_v14, %v7279_v33  ;;  %v2201_v26 = vld [vmem:[%s6890_s3 + $0x3c0] sm:$0xff] }
 0x44a   :  { %3320 = vmatpush3.msra.mxu1 %v2157_v53  ;;  %3404 = vmatpush3.msra.mxu0 %v2187_v55  ;;  %v2186_v53 = vld [vmem:[%s6890_s3 + $0x348] sm:$0xff]  ;;  %v1960_v55 = vrot.slane %v5954_v59, 1 }
 0x44b   :  { %2315 = vmatmul.mubr.f32.gmra.mxu1 %v1926_v37  ;;  %3321 = vmatprep.subr.mxu1 %v2172_v21  ;;  %v1867_v37 = vmul.f32 %v5771_v56, %v5751_v38  ;;  %v2171_v21 = vld [vmem:[%s6890_s3 + $0x2d0] sm:$0xff]  ;;  %v7321_v38 = vld [vmem:[#allocation63_spill] sm:$0xff] }
 0x44c   :  { %2319 = vmatprep.mubr.f32.mxu1 %v1943_v29  ;;  %2460 = vmatmul.mubr.f32.gmra.mxu0 %v1990_v20  ;;  %v1944_v13 = vmul.f32 %v5924_v27, %v7321_v38  ;;  %v7322_v29 = vld [vmem:[#allocation36_spill] sm:$0xff]  ;;  %v6039_v33 = vsel %vm432_vm2, %v1959_v34, %v1960_v55 }
 0x44d   :  { %2464 = vmatprep.mubr.f32.mxu0 %v2007_v51  ;;  %3405 = vmatprep.subr.mxu0 %v2202_v28  ;;  %v1991_v20 = vmul.f32 %v6005_v19, %v7322_v29  ;;  %v2008_v51 = vmul.f32 %v6020_v4, %v7323_v24  ;;  %v2155_v28 = vld [vmem:[%s6890_s3 + $0x250] sm:$0xff]  ;;  %v6050_v38 = vmax.f32 %v1867_v37, 0.0  ;;  %v6054_v24 = vsel %vm223_vm1, %v1896_v16, %v1897_v50  ;;  %v2170_v34 = vld [vmem:[%s6890_s3 + $0x2c8] sm:$0xff]  ;;  %v2200_v16 = vld [vmem:[%s6890_s3 + $0x3b8] sm:$0xff] }
 0x44e   :  { %3322 = vmatpush3.msra.mxu1 %v2156_v25  ;;  %3406 = vmatpush3.msra.mxu0 %v2186_v53  ;;  %v2185_v25 = vld [vmem:[%s6890_s3 + $0x340] sm:$0xff]  ;;  %v1961_v53 = vrot.slane %v5990_v57, 1  ;;  %v1928_v29 = vmul.f32 %v5984_v17, %v5128_v40  ;;  %v7326_v27 = vld [vmem:[#allocation88_spill] sm:$0xff] }
 0x44f   :  { %2320 = vmatmul.mubr.f32.gmra.mxu1 %v1927_v2  ;;  %3323 = vmatprep.subr.mxu1 %v2171_v21  ;;  %v1868_v2 = vmul.f32 %v5771_v56, %v5755_v6  ;;  %v1898_v21 = vrot.slane %v6016_v9, 7  ;;  %v7324_v6 = vld [vmem:[#allocation77_spill] sm:$0xff] }
 0x450   :  { %2324 = vmatprep.mubr.f32.mxu1 %v1944_v13  ;;  %2465 = vmatmul.mubr.f32.gmra.mxu0 %v1991_v20  ;;  %v1945_v37 = vmul.f32 %v5954_v59, %v7324_v6  ;;  %v7325_v13 = vld [vmem:[#allocation39_spill] sm:$0xff]  ;;  %v6073_v40 = vsel %vm432_vm2, %v1960_v55, %v1961_v53 }
 0x451   :  { %2469 = vmatprep.mubr.f32.mxu0 %v2008_v51  ;;  %3407 = vmatprep.subr.mxu0 %v2201_v26  ;;  %v1992_v20 = vmul.f32 %v6039_v33, %v7325_v13  ;;  %v2009_v51 = vmul.f32 %v6054_v24, %v7326_v27  ;;  %v2154_v26 = vld [vmem:[%s6890_s3 + $0x248] sm:$0xff]  ;;  %v6084_v6 = vmax.f32 %v1868_v2, 0.0  ;;  %v6088_v27 = vsel %vm223_vm1, %v1897_v50, %v1898_v21  ;;  %v2169_v55 = vld [vmem:[%s6890_s3 + $0x2c0] sm:$0xff]  ;;  %v2199_v50 = vld [vmem:[%s6890_s3 + $0x3b0] sm:$0xff] }
 0x452   :  { %3324 = vmatpush3.msra.mxu1 %v2155_v28  ;;  %3408 = vmatpush3.msra.mxu0 %v2185_v25  ;;  %v2184_v28 = vld [vmem:[%s6890_s3 + $0x338] sm:$0xff]  ;;  %v1962_v25 = vrot.slane %v6016_v9, 1  ;;  %v1929_v13 = vmul.f32 %v6020_v4, %v7290_v12  ;;  %v7329_v59 = vld [vmem:[#allocation91_spill] sm:$0xff] }
 0x453   :  { %2325 = vmatmul.mubr.f32.gmra.mxu1 %v1928_v29  ;;  %3325 = vmatprep.subr.mxu1 %v2170_v34  ;;  %v1869_v29 = vmul.f32 %v5771_v56, %v5759_v10  ;;  %v1899_v34 = vrot.slane %v6050_v38, 7  ;;  %v7327_v10 = vld [vmem:[#allocation80_spill] sm:$0xff] }
 0x454   :  { %2329 = vmatprep.mubr.f32.mxu1 %v1945_v37  ;;  %2470 = vmatmul.mubr.f32.gmra.mxu0 %v1992_v20  ;;  %v1946_v2 = vmul.f32 %v5990_v57, %v7327_v10  ;;  %v7328_v37 = vld [vmem:[#allocation41_spill] sm:$0xff]  ;;  %v6107_v12 = vsel %vm432_vm2, %v1961_v53, %v1962_v25  ;;  %v2168_v53 = vld [vmem:[%s6890_s3 + $0x2b8] sm:$0xff] }
 0x455   :  { %2474 = vmatprep.mubr.f32.mxu0 %v2009_v51  ;;  %3409 = vmatprep.subr.mxu0 %v2200_v16  ;;  %v1993_v20 = vmul.f32 %v6073_v40, %v7328_v37  ;;  %v2010_v51 = vmul.f32 %v6088_v27, %v7329_v59  ;;  %v2153_v16 = vld [vmem:[%s6890_s3 + $0x240] sm:$0xff]  ;;  %v6118_v10 = vmax.f32 %v1869_v29, 0.0  ;;  %v6122_v59 = vsel %vm223_vm1, %v1898_v21, %v1899_v34  ;;  %v7331_v29 = vld [vmem:[#allocation42_spill] sm:$0xff]  ;;  %v2198_v21 = vld [vmem:[%s6890_s3 + $0x3a8] sm:$0xff] }
 0x456   :  { %3326 = vmatpush3.msra.mxu1 %v2154_v26  ;;  %3410 = vmatpush3.msra.mxu0 %v2184_v28  ;;  %v2183_v26 = vld [vmem:[%s6890_s3 + $0x330] sm:$0xff]  ;;  %v1963_v28 = vrot.slane %v6050_v38, 1  ;;  %v1930_v37 = vmul.f32 %v6054_v24, %v5196_v11 }
 0x457   :  { %2330 = vmatmul.mubr.f32.gmra.mxu1 %v1929_v13  ;;  %3327 = vmatprep.subr.mxu1 %v2169_v55  ;;  %v1870_v13 = vmul.f32 %v5771_v56, %v5763_v63  ;;  %v1900_v55 = vrot.slane %v6084_v6, 7  ;;  %v7330_v63 = vld [vmem:[#allocation95_spill] sm:$0xff] }
 0x458   :  { %2334 = vmatprep.mubr.f32.mxu1 %v1946_v2  ;;  %2475 = vmatmul.mubr.f32.gmra.mxu0 %v1993_v20  ;;  %v1947_v56 = vmul.f32 %v6016_v9, %v7330_v63  ;;  %v1994_v2 = vmul.f32 %v6107_v12, %v7331_v29  ;;  %v2011_v20 = vmul.f32 %v6122_v59, %v7254_v1  ;;  %v7332_v63 = vld [vmem:[#allocation44_spill] sm:$0xff]  ;;  %v7333_v29 = vld [vmem:[#allocation107_spill] sm:$0xff] }
 0x459   :  { %2479 = vmatprep.mubr.f32.mxu0 %v2010_v51  ;;  %3411 = vmatprep.subr.mxu0 %v2199_v50  ;;  %v6141_v11 = vsel %vm432_vm2, %v1962_v25, %v1963_v28  ;;  %v2152_v50 = vld [vmem:[%s6890_s3 + $0x238] sm:$0xff]  ;;  %v2182_v51 = vld [vmem:[%s6890_s3 + $0x328] sm:$0xff]  ;;  %v6154_v1 = vsel %vm223_vm1, %v1899_v34, %v1900_v55  ;;  %v2167_v25 = vld [vmem:[%s6890_s3 + $0x2b0] sm:$0xff] }
 0x45a   :  { %3328 = vmatpush3.msra.mxu1 %v2153_v16  ;;  %3412 = vmatpush3.msra.mxu0 %v2183_v26  ;;  %v1964_v16 = vrot.slane %v6084_v6, 1  ;;  %v6150_v26 = vmax.f32 %v1870_v13, 0.0  ;;  %v1948_v13 = vmul.f32 %v6050_v38, %v4677_v35  ;;  %v2197_v34 = vld [vmem:[%s6890_s3 + $0x3a0] sm:$0xff]  ;;  %v2151_v35 = vld [vmem:[%s6890_s3 + $0x230] sm:$0xff] }
 0x45b   :  { %2335 = vmatmul.mubr.f32.gmra.mxu1 %v1930_v37  ;;  %3329 = vmatprep.subr.mxu1 %v2168_v53  ;;  %v1901_v53 = vrot.slane %v6118_v10, 7  ;;  %v1931_v37 = vmul.f32 %v6088_v27, %v7293_v54 }
 0x45c   :  { %2339 = vmatprep.mubr.f32.mxu1 %v1947_v56  ;;  %2480 = vmatmul.mubr.f32.gmra.mxu0 %v1994_v2  ;;  %v1995_v56 = vmul.f32 %v6141_v11, %v7332_v63  ;;  %v2012_v2 = vmul.f32 %v6154_v1, %v7333_v29  ;;  %v6173_v54 = vsel %vm432_vm2, %v1963_v28, %v1964_v16  ;;  %v2166_v28 = vld [vmem:[%s6890_s3 + $0x2a8] sm:$0xff] }
 0x45d   :  { %2484 = vmatprep.mubr.f32.mxu0 %v2011_v20  ;;  %3413 = vmatprep.subr.mxu0 %v2198_v21  ;;  %v2181_v21 = vld [vmem:[%s6890_s3 + $0x320] sm:$0xff]  ;;  %v1965_v20 = vrot.slane %v6118_v10, 1 }
 0x45e   :  { %3330 = vmatpush3.msra.mxu1 %v2152_v50  ;;  %3414 = vmatpush3.msra.mxu0 %v2182_v51  ;;  %v6184_v50 = vsel %vm223_vm1, %v1900_v55, %v1901_v53  ;;  %v1902_v51 = vrot.slane %v6150_v26, 7  ;;  %v2196_v55 = vld [vmem:[%s6890_s3 + $0x398] sm:$0xff] }
 0x45f   :  { %2340 = vmatmul.mubr.f32.gmra.mxu1 %v1931_v37  ;;  %3331 = vmatprep.subr.mxu1 %v2167_v25  ;;  %v1932_v25 = vmul.f32 %v6122_v59, %v5269_v22  ;;  %v7334_v37 = vld [vmem:[#allocation111_spill] sm:$0xff]  ;;  %v2013_v29 = vmul.f32 %v6184_v50, %v7260_v0  ;;  %v6203_v22 = vsel %vm432_vm2, %v1964_v16, %v1965_v20 }
 0x460   :  { %2344 = vmatprep.mubr.f32.mxu1 %v1948_v13  ;;  %2485 = vmatmul.mubr.f32.gmra.mxu0 %v1995_v56  ;;  %v1949_v63 = vmul.f32 %v6084_v6, %v7334_v37  ;;  %v7335_v13 = vld [vmem:[#allocation47_spill] sm:$0xff]  ;;  %v6214_v0 = vsel %vm223_vm1, %v1901_v53, %v1902_v51  ;;  %v1997_v37 = vmul.f32 %v6203_v22, %v7257_v47  ;;  %v2195_v53 = vld [vmem:[%s6890_s3 + $0x390] sm:$0xff] }
 0x461   :  { %2489 = vmatprep.mubr.f32.mxu0 %v2012_v2  ;;  %3415 = vmatprep.subr.mxu0 %v2197_v34  ;;  %v1996_v56 = vmul.f32 %v6173_v54, %v7335_v13  ;;  %v2150_v34 = vld [vmem:[%s6890_s3 + $0x228] sm:$0xff]  ;;  %v2180_v2 = vld [vmem:[%s6890_s3 + $0x318] sm:$0xff]  ;;  %v2165_v16 = vld [vmem:[%s6890_s3 + $0x2a0] sm:$0xff] }
 0x462   :  { %3332 = vmatpush3.msra.mxu1 %v2151_v35  ;;  %3416 = vmatpush3.msra.mxu0 %v2181_v21  ;;  %v1966_v35 = vrot.slane %v6150_v26, 1  ;;  %v1933_v21 = vmul.f32 %v6154_v1, %v5172_v23  ;;  %v2179_v47 = vld [vmem:[%s6890_s3 + $0x310] sm:$0xff] }
 0x463   :  { %2345 = vmatmul.mubr.f32.gmra.mxu1 %v1932_v25  ;;  %3333 = vmatprep.subr.mxu1 %v2166_v28  ;;  %v7336_v28 = vld [vmem:[#allocation115_spill] sm:$0xff] }
 0x464   :  { %2349 = vmatprep.mubr.f32.mxu1 %v1949_v63  ;;  %2490 = vmatmul.mubr.f32.gmra.mxu0 %v1996_v56  ;;  %v1950_v25 = vmul.f32 %v6118_v10, %v7336_v28  ;;  %v7337_v63 = vld [vmem:[#allocation123_spill] sm:$0xff]  ;;  %v6232_v23 = vsel %vm432_vm2, %v1965_v20, %v1966_v35  ;;  %v2164_v20 = vld [vmem:[%s6890_s3 + $0x298] sm:$0xff]  ;;  %v7340_v28 = vld [vmem:[#allocation52_spill] sm:$0xff] }
 0x465   :  { %2494 = vmatprep.mubr.f32.mxu0 %v2013_v29  ;;  %3417 = vmatprep.subr.mxu0 %v2196_v55  ;;  %v2014_v13 = vmul.f32 %v6214_v0, %v7337_v63  ;;  %v2149_v56 = vld [vmem:[%s6890_s3 + $0x220] sm:$0xff]  ;;  %v1967_v55 = vrot.slane %v5776_v18, 1  ;;  %v7338_v29 = vrot.slane %v5776_v18, 7  ;;  %v2178_v63 = vld [vmem:[%s6890_s3 + $0x308] sm:$0xff] }
 0x466   :  { %3334 = vmatpush3.msra.mxu1 %v2150_v34  ;;  %3418 = vmatpush3.msra.mxu0 %v2180_v2  ;;  %v1934_v2 = vmul.f32 %v6184_v50, %v5339_v30 }
 0x467   :  { %2350 = vmatmul.mubr.f32.gmra.mxu1 %v1933_v21  ;;  %3335 = vmatprep.subr.mxu1 %v2165_v16  ;;  %v6245_v34 = vsel %vm223_vm1, %v1902_v51, %v7338_v29  ;;  %v7339_v16 = vld [vmem:[#allocation125_spill] sm:$0xff]  ;;  %v2194_v51 = vld [vmem:[%s6890_s3 + $0x388] sm:$0xff]  ;;  %v6263_v30 = vsel %vm432_vm2, %v1966_v35, %v1967_v55  ;;  %v7341_v35 = vld [vmem:[#allocation127_spill] sm:$0xff] }
 0x468   :  { %2354 = vmatprep.mubr.f32.mxu1 %v1950_v25  ;;  %2495 = vmatmul.mubr.f32.gmra.mxu0 %v1997_v37  ;;  %v1951_v21 = vmul.f32 %v6150_v26, %v7339_v16  ;;  %v1998_v25 = vmul.f32 %v6232_v23, %v7340_v28  ;;  %v2015_v37 = vmul.f32 %v6245_v34, %v7271_v62  ;;  %v2147_v29 = vld [vmem:[%s6890_s3 + $0x210] sm:$0xff]  ;;  %v2193_v16 = vld [vmem:[%s6890_s3 + $0x380] sm:$0xff] }
 0x469   :  { %2499 = vmatprep.mubr.f32.mxu0 %v2014_v13  ;;  %3419 = vmatprep.subr.mxu0 %v2195_v53  ;;  %v2148_v53 = vld [vmem:[%s6890_s3 + $0x218] sm:$0xff]  ;;  %v2163_v13 = vld [vmem:[%s6890_s3 + $0x290] sm:$0xff]  ;;  %v1935_v62 = vmul.f32 %v6214_v0, %v5271_v43  ;;  %v2162_v43 = vld [vmem:[%s6890_s3 + $0x288] sm:$0xff] }
 0x46a   :  { %3336 = vmatpush3.msra.mxu1 %v2149_v56  ;;  %3420 = vmatpush3.msra.mxu0 %v2179_v47  ;;  %v1952_v56 = vmul.f32 %v5776_v18, %v7341_v35  ;;  %v1999_v47 = vmul.f32 %v6263_v30, %v7267_v32  ;;  %v7343_v32 = vrot.slane %v5778_v44, 1  ;;  %v2177_v28 = vld [vmem:[%s6890_s3 + $0x300] sm:$0xff]  ;;  %v2224_v35 = vld [vmem:[%s6890_s3 + $0x478] sm:$0xff] }
 0x46b   :  { %2355 = vmatmul.mubr.f32.gmra.mxu1 %v1934_v2  ;;  %3337 = vmatprep.subr.mxu1 %v2164_v20  ;;  %v7342_v20 = vld [vmem:[#allocation134_spill] sm:$0xff] }
 0x46c   :  { %2359 = vmatprep.mubr.f32.mxu1 %v1951_v21  ;;  %2500 = vmatmul.mubr.f32.gmra.mxu0 %v1998_v25  ;;  %v2016_v2 = vmul.f32 %v5798_v39, %v7342_v20  ;;  %v6295_v21 = vsel %vm432_vm2, %v1967_v55, %v7343_v32  ;;  %v1936_v25 = vmul.f32 %v6245_v34, %v5394_v60  ;;  %v2145_v60 = vld [vmem:[%s6890_s3 + $0x200] sm:$0xff] }
 0x46d   :  { %2504 = vmatprep.mubr.f32.mxu0 %v2015_v37  ;;  %3421 = vmatprep.subr.mxu0 %v2194_v51  ;;  %v2146_v51 = vld [vmem:[%s6890_s3 + $0x208] sm:$0xff]  ;;  %v2000_v55 = vmul.f32 %v6295_v21, %v7344_v15  ;;  %v2161_v37 = vld [vmem:[%s6890_s3 + $0x280] sm:$0xff] }
 0x46e   :  { %3338 = vmatpush3.msra.mxu1 %v2148_v53  ;;  %3422 = vmatpush3.msra.mxu0 %v2178_v63  ;;  %v7345_v53 = vld [vmem:[#allocation16_spill] sm:$0xff]  ;;  %v7352_v15 = vld [vmem:[#allocation51_spill] sm:$0xff] }
 0x46f   :  { %2360 = vmatmul.mubr.f32.gmra.mxu1 %v1935_v62  ;;  %3339 = vmatprep.subr.mxu1 %v2163_v13  ;;  %v2017_v63 = vmul.f32 %v5842_v61, %v7345_v53  ;;  %v7346_v13 = vld [vmem:[#allocation58_spill] sm:$0xff] }
 0x470   :  { %2364 = vmatprep.mubr.f32.mxu1 %v1952_v56  ;;  %2505 = vmatmul.mubr.f32.gmra.mxu0 %v1999_v47  ;;  %v2049_v62 = vmul.f32 %v5792_v46, %v7346_v13  ;;  %v7347_v56 = vld [vmem:[#allocation22_spill] sm:$0xff] }
 0x471   :  { %2509 = vmatprep.mubr.f32.mxu0 %v2016_v2  ;;  %3340 = vmatpush3.msra.mxu1 %v2147_v29  ;;  %v2033_v47 = vmul.f32 %v5829_v45, %v7347_v56  ;;  %v7348_v29 = vld [vmem:[#allocation18_spill] sm:$0xff]  ;;  %v7349_v2 = vld [vmem:[#allocation31_spill] sm:$0xff] }
 0x472   :  { %3341 = vmatprep.subr.mxu1 %v2162_v43  ;;  %3423 = vmatprep.subr.mxu0 %v2193_v16  ;;  %v2018_v20 = vmul.f32 %v5865_v8, %v7348_v29  ;;  %v2050_v43 = vmul.f32 %v5804_v36, %v7349_v2  ;;  %v2223_v16 = vld [vmem:[%s6890_s3 + $0x470] sm:$0xff]  ;;  %v7350_v45 = vld [vmem:[#allocation38_spill] sm:$0xff] }
 0x473   :  { %2365 = vmatmul.mubr.f32.gmra.mxu1 %v1936_v25  ;;  %3424 = vmatpush3.msra.mxu0 %v2177_v28  ;;  %v2019_v32 = vmul.f32 %v5903_v31, %v7350_v45  ;;  %v7351_v28 = vld [vmem:[#allocation26_spill] sm:$0xff]  ;;  %v7362_v45 = vld [vmem:[#allocation105_spill] sm:$0xff] }
 0x474   :  { %2510 = vmatmul.mubr.f32.gmra.mxu0 %v2000_v55  ;;  %3342 = vmatpush3.msra.mxu1 %v2146_v51  ;;  %v2034_v25 = vmul.f32 %v5852_v42, %v7351_v28  ;;  %v2222_v51 = vld [vmem:[%s6890_s3 + $0x468] sm:$0xff]  ;;  %v2051_v55 = vmul.f32 %v5806_v58, %v7352_v15  ;;  %v7363_v28 = vld [vmem:[#allocation21_spill] sm:$0xff] }
 0x475   :  { %2579 = vmatprep.mubr.f32.mxu1 %v2017_v63  ;;  %3343 = vmatprep.subr.mxu1 %v2161_v37  ;;  %v7353_v37 = vld [vmem:[#allocation43_spill] sm:$0xff]  ;;  %v7354_v63 = vld [vmem:[#allocation45_spill] sm:$0xff] }
 0x476   :  { %2724 = vmatprep.mubr.f32.mxu0 %v2049_v62  ;;  %3344 = vmatpush3.msra.mxu1 %v2145_v60  ;;  %v2020_v53 = vmul.f32 %v5937_v7, %v7353_v37  ;;  %v2035_v42 = vmul.f32 %v5878_v48, %v7354_v63  ;;  %v7355_v60 = vld [vmem:[#allocation60_spill] sm:$0xff]  ;;  %v7356_v62 = vld [vmem:[#allocation19_spill] sm:$0xff]  ;;  %v7365_v15 = vld [vmem:[#allocation89_spill] sm:$0xff] }
 0x477   :  { %2580 = vmatmul.mubr.f32.vlgmr.msra.gmra.mxu1 %v5780_v41  ;;  %3539 = vmatprep.subr.mxu0 %v2224_v35  ;;  %v2052_v13 = vmul.f32 %v5874_v5, %v7355_v60  ;;  %v2021_v56 = vmul.f32 %v5971_v52, %v7356_v62  ;;  %v7357_v48 = vld [vmem:[#allocation72_spill] sm:$0xff] }
 0x478   :  { %2584 = vmatprep.mubr.f32.mxu1 %v2018_v20  ;;  %2725 = vmatmul.mubr.f32.vlgmr.msra.gmra.mxu0 %v2033_v47  ;;  %v7358_v47 = vld [vmem:[#allocation74_spill] sm:$0xff]  ;;  %v7359_v20 = vld [vmem:[#allocation67_spill] sm:$0xff] }
 0x479   :  { %3540 = vmatpush3.msra.mxu0 %v2224_v35  ;;  %2729 = vmatprep.mubr.f32.mxu0 %v2050_v43  ;;  %v2053_v29 = vmul.f32 %v5895_v3, %v7358_v47  ;;  %v2022_v2 = vmul.f32 %v6005_v19, %v7359_v20  ;;  %v7373_v47 = vld [vmem:[#allocation101_spill] sm:$0xff] }
 0x47a   :  { %3541 = vmatprep.subr.mxu0 %v2223_v16  ;;  %3595 = vmatprep.subr.mxu1 %v2224_v35 }
 0x47b   :  { %2585 = vmatmul.mubr.f32.gmra.mxu1 %v5792_v46  ;;  %3542 = vmatpush3.msra.mxu0 %v2223_v16  ;;  %v2221_v46 = vld [vmem:[%s6890_s3 + $0x460] sm:$0xff] }
 0x47c   :  { %2589 = vmatprep.mubr.f32.mxu1 %v2019_v32  ;;  %2730 = vmatmul.mubr.f32.gmra.mxu0 %v2034_v25  ;;  %v2023_v25 = vmul.f32 %v6039_v33, %v7363_v28 }
 0x47d   :  { %2734 = vmatprep.mubr.f32.mxu0 %v2051_v55  ;;  %3543 = vmatprep.subr.mxu0 %v2222_v51  ;;  %v7366_v55 = vld [vmem:[#allocation49_spill] sm:$0xff] }
 0x47e   :  { %3611 = vmatpush3.msra.mxu1 %v2224_v35  ;;  %3544 = vmatpush3.msra.mxu0 %v2222_v51  ;;  %v2036_v35 = vmul.f32 %v5914_v49, %v7357_v48  ;;  %v7360_v49 = vld [vmem:[#allocation69_spill] sm:$0xff]  ;;  %v2055_v37 = vmul.f32 %v7366_v55, %v7365_v15  ;;  %v2216_v48 = vld [vmem:[%s6890_s3 + $0x438] sm:$0xff] }
 0x47f   :  { %2590 = vmatmul.mubr.f32.gmra.mxu1 %v5804_v36  ;;  %3596 = vmatprep.subr.mxu1 %v2223_v16  ;;  %v2220_v36 = vld [vmem:[%s6890_s3 + $0x458] sm:$0xff]  ;;  %v2037_v43 = vmul.f32 %v5948_v14, %v7360_v49  ;;  %v7364_v14 = vld [vmem:[#allocation79_spill] sm:$0xff] }
 0x480   :  { %2594 = vmatprep.mubr.f32.mxu1 %v2020_v53  ;;  %2735 = vmatmul.mubr.f32.gmra.mxu0 %v2035_v42  ;;  %v7367_v53 = vld [vmem:[#allocation82_spill] sm:$0xff] }
 0x481   :  { %2739 = vmatprep.mubr.f32.mxu0 %v2052_v13  ;;  %3545 = vmatprep.subr.mxu0 %v2221_v46  ;;  %v2024_v63 = vmul.f32 %v6073_v40, %v7367_v53  ;;  %v7370_v13 = vld [vmem:[#allocation23_spill] sm:$0xff]  ;;  %v7375_v49 = vld [vmem:[#allocation66_spill] sm:$0xff] }
 0x482   :  { %3612 = vmatpush3.msra.mxu1 %v2223_v16  ;;  %3546 = vmatpush3.msra.mxu0 %v2221_v46  ;;  %v7361_v16 = vld [vmem:[#allocation62_spill] sm:$0xff]  ;;  %v2025_v62 = vmul.f32 %v6107_v12, %v7370_v13 }
 0x483   :  { %2595 = vmatmul.mubr.f32.gmra.mxu1 %v5806_v58  ;;  %3597 = vmatprep.subr.mxu1 %v2222_v51  ;;  %v2219_v58 = vld [vmem:[%s6890_s3 + $0x450] sm:$0xff]  ;;  %v2054_v32 = vmul.f32 %v7362_v45, %v7361_v16 }
 0x484   :  { %2599 = vmatprep.mubr.f32.mxu1 %v2021_v56  ;;  %2740 = vmatmul.mubr.f32.gmra.mxu0 %v2036_v35  ;;  %v7372_v35 = vld [vmem:[#allocation106_spill] sm:$0xff] }
 0x485   :  { %2744 = vmatprep.mubr.f32.mxu0 %v2053_v29  ;;  %3547 = vmatprep.subr.mxu0 %v2220_v36  ;;  %v2026_v29 = vmul.f32 %v6141_v11, %v7373_v47  ;;  %v7392_v47 = vld [vmem:[#allocation110_spill] sm:$0xff] }
 0x486   :  { %3613 = vmatpush3.msra.mxu1 %v2222_v51  ;;  %3548 = vmatpush3.msra.mxu0 %v2220_v36  ;;  %v2038_v51 = vmul.f32 %v5984_v17, %v7364_v14  ;;  %v7368_v17 = vld [vmem:[#allocation86_spill] sm:$0xff] }
 0x487   :  { %2600 = vmatmul.mubr.f32.gmra.mxu1 %v5874_v5  ;;  %3598 = vmatprep.subr.mxu1 %v2221_v46  ;;  %v2218_v5 = vld [vmem:[%s6890_s3 + $0x448] sm:$0xff]  ;;  %v2039_v42 = vmul.f32 %v6020_v4, %v7368_v17  ;;  %v7371_v4 = vld [vmem:[#allocation81_spill] sm:$0xff] }
 0x488   :  { %2604 = vmatprep.mubr.f32.mxu1 %v2022_v2  ;;  %2745 = vmatmul.mubr.f32.gmra.mxu0 %v2037_v43  ;;  %v2040_v56 = vmul.f32 %v6054_v24, %v7371_v4  ;;  %v7374_v24 = vld [vmem:[#allocation103_spill] sm:$0xff]  ;;  %v2215_v2 = vld [vmem:[%s6890_s3 + $0x430] sm:$0xff]  ;;  %v2058_v43 = vmul.f32 %v6050_v38, %v7375_v49  ;;  %v7395_v49 = vld [vmem:[#allocation92_spill] sm:$0xff] }
 0x489   :  { %2749 = vmatprep.mubr.f32.mxu0 %v2054_v32  ;;  %3549 = vmatprep.subr.mxu0 %v2219_v58  ;;  %v2041_v20 = vmul.f32 %v6088_v27, %v7374_v24  ;;  %v7377_v27 = vld [vmem:[#allocation84_spill] sm:$0xff]  ;;  %v7378_v32 = vld [vmem:[#allocation122_spill] sm:$0xff] }
 0x48a   :  { %3614 = vmatpush3.msra.mxu1 %v2221_v46  ;;  %3550 = vmatpush3.msra.mxu0 %v2219_v58  ;;  %v7369_v46 = vld [vmem:[#allocation64_spill] sm:$0xff]  ;;  %v2059_v28 = vmul.f32 %v6084_v6, %v7378_v32 }
 0x48b   :  { %2605 = vmatmul.mubr.f32.gmra.mxu1 %v5895_v3  ;;  %3599 = vmatprep.subr.mxu1 %v2220_v36  ;;  %v2217_v3 = vld [vmem:[%s6890_s3 + $0x440] sm:$0xff]  ;;  %v2056_v60 = vmul.f32 %v5990_v57, %v7369_v46 }
 0x48c   :  { %2609 = vmatprep.mubr.f32.mxu1 %v2023_v25  ;;  %2750 = vmatmul.mubr.f32.gmra.mxu0 %v2038_v51  ;;  %v7379_v25 = vld [vmem:[#allocation116_spill] sm:$0xff] }
 0x48d   :  { %2754 = vmatprep.mubr.f32.mxu0 %v2055_v37  ;;  %3551 = vmatprep.subr.mxu0 %v2218_v5  ;;  %v2028_v14 = vmul.f32 %v6203_v22, %v7379_v25 }
 0x48e   :  { %3615 = vmatpush3.msra.mxu1 %v2220_v36  ;;  %3552 = vmatpush3.msra.mxu0 %v2218_v5  ;;  %v2057_v36 = vmul.f32 %v6016_v9, %v7372_v35 }
 0x48f   :  { %2610 = vmatmul.mubr.f32.gmra.mxu1 %v7362_v45  ;;  %3600 = vmatprep.subr.mxu1 %v2219_v58  ;;  %v2042_v45 = vmul.f32 %v6122_v59, %v7377_v27  ;;  %v7380_v59 = vld [vmem:[#allocation118_spill] sm:$0xff] }
 0x490   :  { %2614 = vmatprep.mubr.f32.mxu1 %v2024_v63  ;;  %2755 = vmatmul.mubr.f32.gmra.mxu0 %v2039_v42  ;;  %v2043_v51 = vmul.f32 %v6154_v1, %v7380_v59  ;;  %v7383_v1 = vld [vmem:[#allocation87_spill] sm:$0xff]  ;;  %v7384_v63 = vld [vmem:[#allocation133_spill] sm:$0xff]  ;;  %v7399_v27 = vld [vmem:[#allocation78_spill] sm:$0xff] }
 0x491   :  { %2759 = vmatprep.mubr.f32.mxu0 %v2056_v60  ;;  %3553 = vmatprep.subr.mxu0 %v2217_v3  ;;  %v2044_v53 = vmul.f32 %v6184_v50, %v7383_v1  ;;  %v2061_v17 = vmul.f32 %v6150_v26, %v7384_v63  ;;  %v7385_v42 = vld [vmem:[#allocation129_spill] sm:$0xff]  ;;  %v7386_v50 = vld [vmem:[#allocation131_spill] sm:$0xff]  ;;  %v7387_v60 = vld [vmem:[#allocation70_spill] sm:$0xff] }
 0x492   :  { %3616 = vmatpush3.msra.mxu1 %v2219_v58  ;;  %3554 = vmatpush3.msra.mxu0 %v2217_v3  ;;  %v7376_v58 = vld [vmem:[#allocation25_spill] sm:$0xff]  ;;  %v2045_v46 = vmul.f32 %v6214_v0, %v7386_v50  ;;  %v2062_v13 = vmul.f32 %v5776_v18, %v7387_v60  ;;  %v7389_v0 = vld [vmem:[#allocation90_spill] sm:$0xff] }
 0x493   :  { %2615 = vmatmul.mubr.f32.gmra.mxu1 %v7366_v55  ;;  %3601 = vmatprep.subr.mxu1 %v2218_v5  ;;  %v2027_v16 = vmul.f32 %v6173_v54, %v7376_v58  ;;  %v7382_v55 = vld [vmem:[#allocation27_spill] sm:$0xff]  ;;  %v7398_v58 = vld [vmem:[#allocation94_spill] sm:$0xff] }
 0x494   :  { %2619 = vmatprep.mubr.f32.mxu1 %v2025_v62  ;;  %2760 = vmatmul.mubr.f32.gmra.mxu0 %v2040_v56  ;;  %v2029_v37 = vmul.f32 %v6232_v23, %v7382_v55  ;;  %v7388_v62 = vld [vmem:[#allocation136_spill] sm:$0xff]  ;;  %v2046_v56 = vmul.f32 %v6245_v34, %v7389_v0  ;;  %v7393_v34 = vld [vmem:[#allocation138_spill] sm:$0xff]  ;;  %v7409_v55 = vld [vmem:[#allocation135_spill] sm:$0xff] }
 0x495   :  { %2764 = vmatprep.mubr.f32.mxu0 %v2057_v36  ;;  %3555 = vmatprep.subr.mxu0 %v2216_v48  ;;  %v2031_v4 = vmul.f32 %v6295_v21, %v7388_v62  ;;  %v7391_v36 = vld [vmem:[#allocation137_spill] sm:$0xff]  ;;  %v2047_v24 = vmul.f32 %v5798_v39, %v7393_v34  ;;  %v7411_v1 = vld [vmem:[#allocation102_spill] sm:$0xff] }
 0x496   :  { %3617 = vmatpush3.msra.mxu1 %v2218_v5  ;;  %3556 = vmatpush3.msra.mxu0 %v2216_v48  ;;  %v7381_v5 = vld [vmem:[#allocation68_spill] sm:$0xff]  ;;  %v7396_v39 = vld [vmem:[#allocation37_spill] sm:$0xff] }
 0x497   :  { %2620 = vmatmul.mubr.f32.gmra.mxu1 %v5990_v57  ;;  %3602 = vmatprep.subr.mxu1 %v2217_v3  ;;  %v2214_v57 = vld [vmem:[%s6890_s3 + $0x428] sm:$0xff]  ;;  %v2060_v15 = vmul.f32 %v6118_v10, %v7381_v5 }
 0x498   :  { %2624 = vmatprep.mubr.f32.mxu1 %v2026_v29  ;;  %2765 = vmatmul.mubr.f32.gmra.mxu0 %v2041_v20  ;;  %v2032_v29 = vmul.f32 %v7392_v47, %v7391_v36  ;;  %v7394_v20 = vld [vmem:[#allocation140_spill] sm:$0xff] }
 0x499   :  { %2769 = vmatprep.mubr.f32.mxu0 %v2058_v43  ;;  %3557 = vmatprep.subr.mxu0 %v2215_v2  ;;  %v2048_v43 = vmul.f32 %v7396_v39, %v7395_v49  ;;  %v7407_v5 = vld [vmem:[#allocation124_spill] sm:$0xff] }
 0x49a   :  { %3618 = vmatpush3.msra.mxu1 %v2217_v3  ;;  %3558 = vmatpush3.msra.mxu0 %v2215_v2  ;;  %v2030_v3 = vmul.f32 %v6263_v30, %v7385_v42 }
 0x49b   :  { %2625 = vmatmul.mubr.f32.gmra.mxu1 %v6016_v9  ;;  %3603 = vmatprep.subr.mxu1 %v2216_v48  ;;  %v2213_v9 = vld [vmem:[%s6890_s3 + $0x420] sm:$0xff] }
 0x49c   :  { %2629 = vmatprep.mubr.f32.mxu1 %v2027_v16  ;;  %2770 = vmatmul.mubr.f32.gmra.mxu0 %v2042_v45  ;;  %v2065_v16 = vmul.f32 %v5865_v8, %v7398_v58  ;;  %v2070_v45 = vmul.f32 %v6039_v33, %v7399_v27  ;;  %v7403_v8 = vld [vmem:[#allocation97_spill] sm:$0xff] }
 0x49d   :  { %2774 = vmatprep.mubr.f32.mxu0 %v2059_v28  ;;  %3559 = vmatprep.subr.mxu0 %v2214_v57  ;;  %v2072_v33 = vmul.f32 %v6107_v12, %v7403_v8 }
 0x49e   :  { %3619 = vmatpush3.msra.mxu1 %v2216_v48  ;;  %3560 = vmatpush3.msra.mxu0 %v2214_v57  ;;  %v7390_v48 = vld [vmem:[#allocation139_spill] sm:$0xff] }
 0x49f   :  { %2630 = vmatmul.mubr.f32.gmra.mxu1 %v6050_v38  ;;  %3604 = vmatprep.subr.mxu1 %v2215_v2  ;;  %v2212_v38 = vld [vmem:[%s6890_s3 + $0x418] sm:$0xff]  ;;  %v2063_v35 = vmul.f32 %v5778_v44, %v7390_v48 }
 0x4a0   :  { %2634 = vmatprep.mubr.f32.mxu1 %v2028_v14  ;;  %2775 = vmatmul.mubr.f32.gmra.mxu0 %v2043_v51  ;;  %v7404_v14 = vld [vmem:[#allocation61_spill] sm:$0xff] }
 0x4a1   :  { %2779 = vmatprep.mubr.f32.mxu0 %v2060_v15  ;;  %3561 = vmatprep.subr.mxu0 %v2213_v9  ;;  %v2068_v59 = vmul.f32 %v5971_v52, %v7404_v14  ;;  %v7405_v51 = vld [vmem:[#allocation109_spill] sm:$0xff]  ;;  %v7408_v15 = vld [vmem:[#allocation126_spill] sm:$0xff]  ;;  %v2077_v52 = vmul.f32 %v6263_v30, %v7409_v55 }
 0x4a2   :  { %3620 = vmatpush3.msra.mxu1 %v2215_v2  ;;  %3562 = vmatpush3.msra.mxu0 %v2213_v9  ;;  %v2209_v2 = vld [vmem:[%s6890_s3 + $0x400] sm:$0xff]  ;;  %v2076_v12 = vmul.f32 %v6232_v23, %v7408_v15 }
 0x4a3   :  { %2635 = vmatmul.mubr.f32.gmra.mxu1 %v6084_v6  ;;  %3605 = vmatprep.subr.mxu1 %v2214_v57  ;;  %v2211_v6 = vld [vmem:[%s6890_s3 + $0x410] sm:$0xff] }
 0x4a4   :  { %2639 = vmatprep.mubr.f32.mxu1 %v2029_v37  ;;  %2780 = vmatmul.mubr.f32.gmra.mxu0 %v2044_v53  ;;  %v2079_v53 = vmul.f32 %v7392_v47, %v7411_v1 }
 0x4a5   :  { %2784 = vmatprep.mubr.f32.mxu0 %v2061_v17  ;;  %3563 = vmatprep.subr.mxu0 %v2212_v38 }
 0x4a6   :  { %3621 = vmatpush3.msra.mxu1 %v2214_v57  ;;  %3564 = vmatpush3.msra.mxu0 %v2212_v38  ;;  %v7400_v57 = vld [vmem:[#allocation96_spill] sm:$0xff] }
 0x4a7   :  { %2640 = vmatmul.mubr.f32.gmra.mxu1 %v6118_v10  ;;  %3606 = vmatprep.subr.mxu1 %v2213_v9  ;;  %v2210_v10 = vld [vmem:[%s6890_s3 + $0x408] sm:$0xff]  ;;  %v2066_v32 = vmul.f32 %v5903_v31, %v7400_v57  ;;  %v2073_v31 = vmul.f32 %v6141_v11, %v7405_v51  ;;  %v7410_v11 = vld [vmem:[#allocation99_spill] sm:$0xff] }
 0x4a8   :  { %2644 = vmatprep.mubr.f32.mxu1 %v2030_v3  ;;  %2785 = vmatmul.mubr.f32.gmra.mxu0 %v2045_v46  ;;  %v2078_v37 = vmul.f32 %v6295_v21, %v7410_v11 }
 0x4a9   :  { %2789 = vmatprep.mubr.f32.mxu0 %v2062_v13  ;;  %3565 = vmatprep.subr.mxu0 %v2211_v6 }
 0x4aa   :  { %3622 = vmatpush3.msra.mxu1 %v2213_v9  ;;  %3566 = vmatpush3.msra.mxu0 %v2211_v6 }
 0x4ab   :  { %2645 = vmatmul.mubr.f32.gmra.mxu1 %v6150_v26  ;;  %3607 = vmatprep.subr.mxu1 %v2212_v38  ;;  %v2064_v26 = vmul.f32 %v5780_v41, %v7394_v20 }
 0x4ac   :  { %2649 = vmatprep.mubr.f32.mxu1 %v2031_v4  ;;  %2790 = vmatmul.mubr.f32.gmra.mxu0 %v2046_v56 }
 0x4ad   :  { %2794 = vmatprep.mubr.f32.mxu0 %v2063_v35  ;;  %3567 = vmatprep.subr.mxu0 %v2210_v10 }
 0x4ae   :  { %3623 = vmatpush3.msra.mxu1 %v2212_v38  ;;  %3568 = vmatpush3.msra.mxu0 %v2210_v10 }
 0x4af   :  { %2650 = vmatmul.mubr.f32.gmra.mxu1 %v5776_v18  ;;  %3608 = vmatprep.subr.mxu1 %v2211_v6  ;;  %v7397_v18 = vld [vmem:[#allocation76_spill] sm:$0xff] }
 0x4b0   :  { %2654 = vmatprep.mubr.f32.mxu1 %v2032_v29  ;;  %2795 = vmatmul.mubr.f32.gmra.mxu0 %v2047_v24  ;;  %v2069_v41 = vmul.f32 %v6005_v19, %v7397_v18  ;;  %v7402_v19 = vld [vmem:[#allocation57_spill] sm:$0xff] }
 0x4b1   :  { %2799 = vmatprep.mubr.f32.mxu0 %v2064_v26  ;;  %3624 = vmatpush3.msra.mxu1 %v2211_v6  ;;  %v2067_v25 = vmul.f32 %v5937_v7, %v7402_v19  ;;  %v2075_v7 = vmul.f32 %v6203_v22, %v7407_v5 }
 0x4b2   :  { %3609 = vmatprep.subr.mxu1 %v2210_v10  ;;  %3569 = vmatprep.subr.mxu0 %v2209_v2 }
 0x4b3   :  { %2655 = vmatmul.mubr.f32.gmra.mxu1 %v5778_v44  ;;  %3570 = vmatpush3.msra.mxu0 %v2209_v2  ;;  %v7401_v44 = vld [vmem:[#allocation93_spill] sm:$0xff] }
 0x4b4   :  { %2800 = vmatmul.mubr.f32.gmra.mxu0 %v2048_v43  ;;  %3625 = vmatpush3.msra.mxu1 %v2210_v10  ;;  %v2071_v28 = vmul.f32 %v6073_v40, %v7401_v44  ;;  %v7406_v40 = vld [vmem:[#allocation112_spill] sm:$0xff] }
 0x4b5   :  { %3577 = vmatprep.mubr.f32.mxu1 %v2069_v41  ;;  %3610 = vmatprep.subr.mxu1 %v2209_v2  ;;  %v2074_v9 = vmul.f32 %v6173_v54, %v7406_v40  ;;  %v7412_v54 = vld [vmem:[#allocation141_spill] sm:$0xff] }
 0x4b6   :  { %3571 = vmatprep.mubr.f32.mxu0 %v2065_v16  ;;  %3626 = vmatpush3.msra.mxu1 %v2209_v2  ;;  %v2080_v22 = vmul.f32 %v5842_v61, %v7412_v54 }
 0x4b7   :  { %3578 = vmatmul.mubr.f32.vlgmr.msra.gmra.mxu1 %v2070_v45 }
 0x4b8   :  { %3572 = vmatmul.mubr.f32.vlgmr.msra.gmra.mxu0 %v2066_v32  ;;  %3580 = vmatprep.mubr.f32.mxu1 %v2071_v28 }
 0x4b9   :  { %3574 = vmatprep.mubr.f32.mxu0 %v2067_v25 }
 0x4bb   :  { %3581 = vmatmul.mubr.f32.gmra.mxu1 %v2072_v33 }
 0x4bc   :  { %3575 = vmatmul.mubr.f32.gmra.mxu0 %v2068_v59  ;;  %3583 = vmatprep.mubr.f32.mxu1 %v2073_v31 }
 0x4bf   :  { %3584 = vmatmul.mubr.f32.gmra.mxu1 %v2074_v9 }
 0x4c0   :  { %3586 = vmatprep.mubr.f32.mxu1 %v2075_v7 }
 0x4c3   :  { %3587 = vmatmul.mubr.f32.gmra.mxu1 %v2076_v12 }
 0x4c4   :  { %3589 = vmatprep.mubr.f32.mxu1 %v2077_v52 }
 0x4c7   :  { %3590 = vmatmul.mubr.f32.gmra.mxu1 %v2078_v37 }
 0x4c8   :  { %3592 = vmatprep.mubr.f32.mxu1 %v2079_v53 }
 0x4cb   :  { %3593 = vmatmul.mubr.f32.gmra.mxu1 %v2080_v22 }
 0x4f7   :  { %v3185_v38 = vpop.f32.mrf.mxu1 }
 0x4f8   :  { %v3265_v63 = vpop.f32.mrf.mxu0 }
 0x4f9   :  { %v3186_v23 = vpop.f32.mrf.mxu1 }
 0x4fa   :  { %v3187_v17 = vadd.f32 %v3186_v23, %v3185_v38  ;;  %v3266_v42 = vpop.f32.mrf.mxu0 }
 0x4fb   :  { %v3267_v30 = vadd.f32 %v3266_v42, %v3265_v63  ;;  %v3188_v3 = vpop.f32.mrf.mxu1 }
 0x4fc   :  { %v3268_v50 = vpop.f32.mrf.mxu0 }
 0x4fd   :  { %v6505_v46 = vadd.f32 %v3267_v30, %v3187_v17  ;;  %v3189_v21 = vpop.f32.mrf.mxu1 }
 0x4fe   :  { %v3190_v6 = vadd.f32 %v3189_v21, %v3188_v3  ;;  %v3269_v60 = vpop.f32.mrf.mxu0 }
 0x4ff   :  { %v3270_v13 = vadd.f32 %v3269_v60, %v3268_v50  ;;  %v3191_v62 = vpop.f32.mrf.mxu1 }
 0x500   :  { %v3271_v4 = vpop.f32.mrf.mxu0 }
 0x501   :  { %v6507_v0 = vadd.f32 %v3270_v13, %v3190_v6  ;;  %v3192_v61 = vpop.f32.mrf.mxu1 }
 0x502   :  { %v3193_v56 = vadd.f32 %v3192_v61, %v3191_v62  ;;  %v3272_v10 = vpop.f32.mrf.mxu0 }
 0x503   :  { %v3273_v48 = vadd.f32 %v3272_v10, %v3271_v4  ;;  %v3194_v35 = vpop.f32.mrf.mxu1 }
 0x504   :  { %v3274_v36 = vpop.f32.mrf.mxu0 }
 0x505   :  { %v6509_v47 = vadd.f32 %v3273_v48, %v3193_v56  ;;  %v3195_v29 = vpop.f32.mrf.mxu1 }
 0x506   :  { %v3196_v34 = vadd.f32 %v3195_v29, %v3194_v35  ;;  %v3275_v24 = vpop.f32.mrf.mxu0 }
 0x507   :  { %v3276_v20 = vadd.f32 %v3275_v24, %v3274_v36  ;;  %v3197_v26 = vpop.f32.mrf.mxu1 }
 0x508   :  { %v3277_v2 = vpop.f32.mrf.mxu0 }
 0x509   :  { %v6511_v49 = vadd.f32 %v3276_v20, %v3196_v34  ;;  %v3198_v39 = vpop.f32.mrf.mxu1 }
 0x50a   :  { %v3199_v43 = vadd.f32 %v3198_v39, %v3197_v26  ;;  %v3278_v18 = vpop.f32.mrf.mxu0 }
 0x50b   :  { %v3279_v41 = vadd.f32 %v3278_v18, %v3277_v2  ;;  %v3200_v58 = vpop.f32.mrf.mxu1 }
 0x50c   :  { %v3280_v16 = vpop.f32.mrf.mxu0 }
 0x50d   :  { %v6513_v27 = vadd.f32 %v3279_v41, %v3199_v43  ;;  %v3201_v45 = vpop.f32.mrf.mxu1 }
 0x50e   :  { %v3202_v57 = vadd.f32 %v3201_v45, %v3200_v58  ;;  %v3281_v32 = vpop.f32.mrf.mxu0 }
 0x50f   :  { %v3282_v44 = vadd.f32 %v3281_v32, %v3280_v16  ;;  %v3203_v28 = vpop.f32.mrf.mxu1 }
 0x510   :  { %v3283_v19 = vpop.f32.mrf.mxu0 }
 0x511   :  { %v6515_v25 = vadd.f32 %v3282_v44, %v3202_v57  ;;  %v3204_v8 = vpop.f32.mrf.mxu1 }
 0x512   :  { %v3205_v33 = vadd.f32 %v3204_v8, %v3203_v28  ;;  %v3284_v14 = vpop.f32.mrf.mxu0 }
 0x513   :  { %v3285_v59 = vadd.f32 %v3284_v14, %v3283_v19  ;;  %v3206_v51 = vpop.f32.mrf.mxu1 }
 0x514   :  { %v3286_v31 = vpop.f32.mrf.mxu0 }
 0x515   :  { %v6517_v40 = vadd.f32 %v3285_v59, %v3205_v33  ;;  %v3207_v9 = vpop.f32.mrf.mxu1 }
 0x516   :  { %v3208_v5 = vadd.f32 %v3207_v9, %v3206_v51  ;;  %v3287_v7 = vpop.f32.mrf.mxu0 }
 0x517   :  { %v3288_v15 = vadd.f32 %v3287_v7, %v3286_v31  ;;  %v3209_v12 = vpop.f32.mrf.mxu1 }
 0x518   :  { %v3289_v55 = vpop.f32.mrf.mxu0 }
 0x519   :  { %v6519_v52 = vadd.f32 %v3288_v15, %v3208_v5  ;;  %v3210_v11 = vpop.f32.mrf.mxu1 }
 0x51a   :  { %v3211_v37 = vadd.f32 %v3210_v11, %v3209_v12  ;;  %v3290_v1 = vpop.f32.mrf.mxu0 }
 0x51b   :  { %v3291_v53 = vadd.f32 %v3290_v1, %v3289_v55  ;;  %v3212_v54 = vpop.f32.mrf.mxu1 }
 0x51c   :  { %v3292_v22 = vpop.f32.mrf.mxu0 }
 0x51d   :  { %v6521_v38 = vadd.f32 %v3291_v53, %v3211_v37  ;;  %v3213_v63 = vpop.f32.mrf.mxu1 }
 0x51e   :  { %v3214_v23 = vadd.f32 %v3213_v63, %v3212_v54  ;;  %v3293_v17 = vpop.f32.mrf.mxu0 }
 0x51f   :  { %v3294_v42 = vadd.f32 %v3293_v17, %v3292_v22  ;;  %v3215_v30 = vpop.f32.mrf.mxu1 }
 0x520   :  { %v3295_v3 = vpop.f32.mrf.mxu0 }
 0x521   :  { %v6523_v50 = vadd.f32 %v3294_v42, %v3214_v23  ;;  %v3216_v21 = vpop.f32.mrf.mxu1 }
 0x522   :  { %v3217_v6 = vadd.f32 %v3216_v21, %v3215_v30  ;;  %v3296_v60 = vpop.f32.mrf.mxu0 }
 0x523   :  { %v3297_v13 = vadd.f32 %v3296_v60, %v3295_v3  ;;  %v3218_v62 = vpop.f32.mrf.mxu1 }
 0x524   :  { %v3298_v4 = vpop.f32.mrf.mxu0 }
 0x525   :  { %v6525_v61 = vadd.f32 %v3297_v13, %v3217_v6  ;;  %v3219_v56 = vpop.f32.mrf.mxu1 }
 0x526   :  { %v3220_v10 = vadd.f32 %v3219_v56, %v3218_v62  ;;  %v3299_v48 = vpop.f32.mrf.mxu0 }
 0x527   :  { %7413 = vst [vmem:[#allocation121_spill] sm:$0xff] %v6525_v61  ;;  %v3300_v35 = vadd.f32 %v3299_v48, %v3298_v4  ;;  %v3221_v36 = vpop.f32.mrf.mxu1 }
 0x528   :  { %v3301_v29 = vpop.f32.mrf.mxu0 }
 0x529   :  { %v6527_v34 = vadd.f32 %v3300_v35, %v3220_v10  ;;  %v3222_v24 = vpop.f32.mrf.mxu1 }
 0x52a   :  { %v3223_v20 = vadd.f32 %v3222_v24, %v3221_v36  ;;  %v3302_v26 = vpop.f32.mrf.mxu0 }
 0x52b   :  { %7414 = vst [vmem:[#allocation119_spill] sm:$0xff] %v6527_v34  ;;  %v3303_v2 = vadd.f32 %v3302_v26, %v3301_v29  ;;  %v3224_v39 = vpop.f32.mrf.mxu1 }
 0x52c   :  { %v3304_v43 = vpop.f32.mrf.mxu0 }
 0x52d   :  { %v6529_v18 = vadd.f32 %v3303_v2, %v3223_v20  ;;  %v3225_v41 = vpop.f32.mrf.mxu1 }
 0x52e   :  { %v3226_v58 = vadd.f32 %v3225_v41, %v3224_v39  ;;  %v3305_v16 = vpop.f32.mrf.mxu0 }
 0x52f   :  { %7415 = vst [vmem:[#allocation55_spill] sm:$0xff] %v6529_v18  ;;  %v3306_v45 = vadd.f32 %v3305_v16, %v3304_v43  ;;  %v3227_v57 = vpop.f32.mrf.mxu1 }
 0x530   :  { %v3307_v32 = vpop.f32.mrf.mxu0 }
 0x531   :  { %v6531_v44 = vadd.f32 %v3306_v45, %v3226_v58  ;;  %v3228_v28 = vpop.f32.mrf.mxu1 }
 0x532   :  { %v3229_v19 = vadd.f32 %v3228_v28, %v3227_v57  ;;  %v3308_v8 = vpop.f32.mrf.mxu0 }
 0x533   :  { %7416 = vst [vmem:[#allocation120_spill] sm:$0xff] %v6531_v44  ;;  %v3309_v33 = vadd.f32 %v3308_v8, %v3307_v32  ;;  %v3230_v14 = vpop.f32.mrf.mxu1 }
 0x534   :  { %v3310_v59 = vpop.f32.mrf.mxu0 }
 0x535   :  { %v6533_v51 = vadd.f32 %v3309_v33, %v3229_v19  ;;  %v3231_v31 = vpop.f32.mrf.mxu1 }
 0x536   :  { %v3232_v9 = vadd.f32 %v3231_v31, %v3230_v14  ;;  %v3311_v5 = vpop.f32.mrf.mxu0 }
 0x537   :  { %7417 = vst [vmem:[#allocation50_spill] sm:$0xff] %v6533_v51  ;;  %v3312_v7 = vadd.f32 %v3311_v5, %v3310_v59  ;;  %v3345_v15 = vpop.f32.mrf.mxu1 }
 0x538   :  { %v3425_v12 = vpop.f32.mrf.mxu0 }
 0x539   :  { %v6535_v55 = vadd.f32 %v3312_v7, %v3232_v9  ;;  %v3346_v11 = vpop.f32.mrf.mxu1 }
 0x53a   :  { %v3347_v37 = vadd.f32 %v3346_v11, %v3345_v15  ;;  %v3426_v1 = vpop.f32.mrf.mxu0 }
 0x53b   :  { %7418 = vst [vmem:[#allocation128_spill] sm:$0xff] %v6535_v55  ;;  %v3427_v53 = vadd.f32 %v3426_v1, %v3425_v12  ;;  %v3348_v54 = vpop.f32.mrf.mxu1 }
 0x53c   :  { %v2582_v22 = vadd.f32 %v3347_v37, %v6505_v46  ;;  %v3428_v63 = vpop.f32.mrf.mxu0 }
 0x53d   :  { %v3349_v23 = vpop.f32.mrf.mxu1 }
 0x53e   :  { %v3429_v17 = vpop.f32.mrf.mxu0  ;;  %v6538_v42 = vadd.f32 %v3427_v53, %v2582_v22 }
 0x53f   :  { %v3351_v30 = vpop.f32.mrf.mxu1 }
 0x540   :  { %v6540_v3 = vpop.f32.mrf.mxu0 }
 0x541   :  { %v3352_v21 = vpop.f32.mrf.mxu1 }
 0x542   :  { %v3432_v6 = vpop.f32.mrf.mxu0 }
 0x543   :  { %v3354_v60 = vpop.f32.mrf.mxu1 }
 0x544   :  { %v6542_v13 = vpop.f32.mrf.mxu0 }
 0x545   :  { %v3355_v62 = vpop.f32.mrf.mxu1 }
 0x546   :  { %v3435_v4 = vpop.f32.mrf.mxu0 }
 0x547   :  { %v3357_v56 = vpop.f32.mrf.mxu1 }
 0x548   :  { %v6544_v10 = vpop.f32.mrf.mxu0 }
 0x549   :  { %v3358_v48 = vpop.f32.mrf.mxu1 }
 0x54a   :  { %v3438_v46 = vpop.f32.mrf.mxu0 }
 0x54b   :  { %v3360_v35 = vpop.f32.mrf.mxu1 }
 0x54c   :  { %v6546_v36 = vpop.f32.mrf.mxu0 }
 0x54d   :  { %v3361_v29 = vpop.f32.mrf.mxu1 }
 0x54e   :  { %v6548_v24 = vpop.f32.mrf.mxu0 }
 0x54f   :  { %v3363_v20 = vpop.f32.mrf.mxu1 }
 0x550   :  { %v6550_v26 = vpop.f32.mrf.mxu0 }
 0x551   :  { %v3364_v2 = vpop.f32.mrf.mxu1 }
 0x552   :  { %v6552_v39 = vpop.f32.mrf.mxu0 }
 0x553   :  { %v6554_v43 = vpop.f32.mrf.mxu1 }
 0x554   :  { %v6556_v41 = vpop.f32.mrf.mxu0 }
 0x555   :  { %v3367_v58 = vpop.f32.mrf.mxu1 }
 0x556   :  { %v6558_v16 = vpop.f32.mrf.mxu0 }
 0x557   :  { %v6560_v45 = vpop.f32.mrf.mxu1 }
 0x558   :  { %v6562_v57 = vpop.f32.mrf.mxu0 }
 0x559   :  { %v3370_v32 = vpop.f32.mrf.mxu1 }
 0x55a   :  { %v6564_v28 = vpop.f32.mrf.mxu0 }
 0x55b   :  { %v6566_v19 = vpop.f32.mrf.mxu1 }
 0x55c   :  { %v6568_v8 = vpop.f32.mrf.mxu0 }
 0x55d   :  { %v6570_v33 = vpop.f32.mrf.mxu1 }
 0x55e   :  { %v6572_v14 = vpop.f32.mrf.mxu0 }
 0x55f   :  { %v6574_v59 = vpop.f32.mrf.mxu1 }
 0x560   :  { %v6576_v31 = vpop.f32.mrf.mxu0 }
 0x561   :  { %7419 = vst [vmem:[#allocation53_spill] sm:$0xff] %v6576_v31  ;;  %v6578_v9 = vpop.f32.mrf.mxu1 }
 0x562   :  { %v6580_v5 = vpop.f32.mrf.mxu0 }
 0x563   :  { %7420 = vst [vmem:[#allocation108_spill] sm:$0xff] %v6580_v5  ;;  %v6582_v7 = vpop.f32.mrf.mxu1 }
 0x564   :  { %v6584_v15 = vpop.f32.mrf.mxu0 }
 0x565   :  { %7421 = vst [vmem:[#allocation46_spill] sm:$0xff] %v6584_v15  ;;  %v6586_v12 = vpop.f32.mrf.mxu1  ;;  %v3350_v15 = vadd.f32 %v3349_v23, %v3348_v54  ;;  %v3359_v54 = vadd.f32 %v3358_v48, %v3357_v56  ;;  %v3365_v48 = vadd.f32 %v3364_v2, %v3363_v20 }
 0x566   :  { %v6588_v11 = vpop.f32.mrf.mxu0 }
 0x567   :  { %7422 = vst [vmem:[#allocation65_spill] sm:$0xff] %v6588_v11  ;;  %v6590_v37 = vpop.f32.mrf.mxu1  ;;  %v2587_v31 = vadd.f32 %v3350_v15, %v6507_v0 }
 0x568   :  { %v6592_v1 = vpop.f32.mrf.mxu0 }
 0x569   :  { %7423 = vst [vmem:[#allocation8_spill] sm:$0xff] %v6592_v1  ;;  %v6594_v53 = vpop.f32.mrf.mxu1 }
 0x56a   :  { %7424 = vst [vmem:[#allocation130_spill] sm:$0xff] %v6594_v53  ;;  %v6596_v22 = vpop.f32.mrf.mxu0 }
 0x56b   :  { %7425 = vst [vmem:[#allocation113_spill] sm:$0xff] %v6596_v22  ;;  %v6598_v55 = vpop.f32.mrf.mxu1  ;;  %v3430_v22 = vadd.f32 %v3429_v17, %v3428_v63  ;;  %v3436_v17 = vadd.f32 %v3435_v4, %v6542_v13  ;;  %v3368_v13 = vadd.f32 %v3367_v58, %v6554_v43  ;;  %v3374_v43 = vadd.f32 %v6570_v33, %v6566_v19 }
 0x56c   :  { %7426 = vst [vmem:[#allocation73_spill] sm:$0xff] %v6598_v55  ;;  %v6600_v51 = vpop.f32.mrf.mxu0  ;;  %v3353_v55 = vadd.f32 %v3352_v21, %v3351_v30  ;;  %v3377_v19 = vadd.f32 %v6578_v9, %v6574_v59 }
 0x56d   :  { %7427 = vst [vmem:[#allocation117_spill] sm:$0xff] %v6600_v51  ;;  %v6602_v44 = vpop.f32.mrf.mxu1 }
 0x56e   :  { %7428 = vst [vmem:[#allocation142_spill] sm:$0xff] %v6602_v44  ;;  %v6604_v18 = vpop.f32.mrf.mxu0  ;;  %v3356_v44 = vadd.f32 %v3355_v62, %v3354_v60  ;;  %v2602_v60 = vadd.f32 %v3359_v54, %v6513_v27  ;;  %v3439_v62 = vadd.f32 %v3438_v46, %v6544_v10 }
 0x56f   :  { %7429 = vst [vmem:[#allocation145_spill] sm:$0xff] %v6604_v18  ;;  %v6606_v34 = vpop.f32.mrf.mxu1 }
 0x570   :  { %7430 = vst [vmem:[#allocation32_spill] sm:$0xff] %v6606_v34  ;;  %v6608_v11 = vpop.f32.mrf.mxu0  ;;  %v3362_v34 = vadd.f32 %v3361_v29, %v3360_v35  ;;  %v2597_v63 = vadd.f32 %v3356_v44, %v6511_v49  ;;  %v3442_v49 = vadd.f32 %v6548_v24, %v6546_v36  ;;  %v2747_v35 = vadd.f32 %v3439_v62, %v2602_v60 }
 0x571   :  { %7431 = vst [vmem:[#allocation83_spill] sm:$0xff] %v6608_v11  ;;  %v6610_v5 = vpop.f32.mrf.mxu1  ;;  %v2732_v11 = vadd.f32 %v3430_v22, %v2587_v31  ;;  %v3445_v36 = vadd.f32 %v6552_v39, %v6550_v26  ;;  %v2617_v31 = vadd.f32 %v3368_v13, %v6519_v52  ;;  %v7434_v22 = vld [vmem:[#allocation130_spill] sm:$0xff]  ;;  %v7442_v13 = vld [vmem:[#allocation65_spill] sm:$0xff] }
 0x572   :  { %7432 = vst [vmem:[#allocation114_spill] sm:$0xff] %v6610_v5  ;;  %v6612_v1 = vpop.f32.mrf.mxu0  ;;  %v2592_v5 = vadd.f32 %v3353_v55, %v6509_v47  ;;  %v2742_v10 = vadd.f32 %v3436_v17, %v2597_v63  ;;  %v3383_v54 = vadd.f32 %v7434_v22, %v6590_v37  ;;  %v7451_v22 = vld [vmem:[#allocation50_spill] sm:$0xff] }
 0x573   :  { %7433 = vst [vmem:[#allocation146_spill] sm:$0xff] %v6612_v1  ;;  %v6615_v61 = vpop.f32.mrf.mxu1  ;;  %v3433_v1 = vadd.f32 %v3432_v6, %v6540_v3  ;;  %v2607_v3 = vadd.f32 %v3362_v34, %v6515_v25  ;;  %v2612_v34 = vadd.f32 %v3365_v48, %v6517_v40  ;;  %v7438_v62 = vld [vmem:[#allocation73_spill] sm:$0xff] }
 0x574   :  { %v6617_v51 = vpop.f32.mrf.mxu0 }
 0x575   :  { %v6619_v53 = vpop.f32.mrf.mxu1  ;;  %v2737_v6 = vadd.f32 %v3433_v1, %v2592_v5  ;;  %v2752_v58 = vadd.f32 %v3442_v49, %v2607_v3  ;;  %v3451_v5 = vadd.f32 %v6564_v28, %v6562_v57  ;;  %v3454_v1 = vadd.f32 %v6572_v14, %v6568_v8  ;;  %v7437_v8 = vld [vmem:[#allocation108_spill] sm:$0xff] }
 0x576   :  { %v6621_v23 = vpop.f32.mrf.mxu0  ;;  %v3380_v57 = vadd.f32 %v6586_v12, %v6582_v7 }
 0x577   :  { %v3579_v18 = vpop.f32.mrf.mxu1 }
 0x578   :  { %v3573_v0 = vpop.f32.mrf.mxu0  ;;  %v6664_v33 = vadd.f32 %v3579_v18, %v2752_v58 }
 0x579   :  { %v6627_v30 = vadd.f32 %v3573_v0, %v2732_v11  ;;  %v2891_v21 = vpop.f32.mrf.mxu1  ;;  %v2627_v11 = vadd.f32 %v3374_v43, %v6523_v50  ;;  %v7435_v50 = vld [vmem:[#allocation121_spill] sm:$0xff]  ;;  %v7447_v43 = vld [vmem:[#allocation114_spill] sm:$0xff] }
 0x57a   :  { %v2871_v56 = vpop.f32.mrf.mxu0  ;;  %v2632_v17 = vadd.f32 %v3377_v19, %v7435_v50  ;;  %v2960_v7 = vsel %vm2950_vm12, %v6664_v33, 0.0  ;;  %v7450_v19 = vld [vmem:[#allocation145_spill] sm:$0xff] }
 0x57b   :  { %v6632_v47 = vadd.f32 %v2871_v56, %v6538_v42  ;;  %v3582_v55 = vpop.f32.mrf.mxu1  ;;  %v2952_v27 = vsel %vm2950_vm12, %v6627_v30, 0.0  ;;  %v3371_v42 = vadd.f32 %v3370_v32, %v6560_v45  ;;  %v3448_v45 = vadd.f32 %v6558_v16, %v6556_v41  ;;  %v7439_v56 = vld [vmem:[#allocation142_spill] sm:$0xff] }
 0x57c   :  { %v3576_v44 = vpop.f32.mrf.mxu0  ;;  %v6655_v32 = vadd.f32 %v2891_v21, %v2747_v35  ;;  %v2757_v41 = vadd.f32 %v3445_v36, %v2612_v34  ;;  %v7436_v21 = vld [vmem:[#allocation53_spill] sm:$0xff]  ;;  %v3386_v48 = vadd.f32 %v7439_v56, %v7438_v62  ;;  %v2772_v3 = vadd.f32 %v3454_v1, %v2627_v11  ;;  %v7444_v35 = vld [vmem:[#allocation8_spill] sm:$0xff] }
 0x57d   :  { %v2951_v4 = vsel %vm2950_vm12, %v6632_v47, 0.0  ;;  %v2901_v46 = vpop.f32.mrf.mxu1  ;;  %v6646_v24 = vadd.f32 %v3576_v44, %v2742_v10  ;;  %v2622_v39 = vadd.f32 %v3371_v42, %v6521_v38  ;;  %v2762_v59 = vadd.f32 %v3448_v45, %v2617_v31  ;;  %v7440_v44 = vld [vmem:[#allocation119_spill] sm:$0xff]  ;;  %v7446_v36 = vld [vmem:[#allocation32_spill] sm:$0xff] }
 0x57e   :  { %v2953_v29 = vadd.f32 %v2952_v27, %v2951_v4  ;;  %v2881_v25 = vpop.f32.mrf.mxu0  ;;  %v2958_v28 = vsel %vm2950_vm12, %v6655_v32, 0.0  ;;  %v6675_v18 = vadd.f32 %v2901_v46, %v2757_v41  ;;  %v3457_v14 = vadd.f32 %v7437_v8, %v7436_v21  ;;  %v7443_v46 = vld [vmem:[#allocation55_spill] sm:$0xff] }
 0x57f   :  { %v6648_v20 = vadd.f32 %v2881_v25, %v2737_v6  ;;  %v3585_v2 = vpop.f32.mrf.mxu1  ;;  %v2956_v52 = vsel %vm2950_vm12, %v6646_v24, 0.0  ;;  %v2767_v63 = vadd.f32 %v3451_v5, %v2622_v39  ;;  %v6684_v12 = vadd.f32 %v3582_v55, %v2762_v59  ;;  %v7441_v6 = vld [vmem:[#allocation46_spill] sm:$0xff]  ;;  %v7445_v55 = vld [vmem:[#allocation113_spill] sm:$0xff]  ;;  %v7448_v39 = vld [vmem:[#allocation120_spill] sm:$0xff] }
 0x580   :  { %v2637_v37 = vadd.f32 %v3380_v57, %v7440_v44  ;;  %v3460_v27 = vadd.f32 %v7442_v13, %v7441_v6  ;;  %v2962_v4 = vsel %vm2950_vm12, %v6675_v18, 0.0  ;;  %v2642_v42 = vadd.f32 %v3383_v54, %v7443_v46 }
 0x581   :  { %v2954_v40 = vsel %vm2950_vm12, %v6648_v20, 0.0  ;;  %v2911_v26 = vpop.f32.mrf.mxu1  ;;  %v3389_v58 = vadd.f32 %v7447_v43, %v7446_v36  ;;  %v2964_v31 = vsel %vm2950_vm12, %v6684_v12, 0.0  ;;  %v2917_v45 = vadd.f32 %v3585_v2, %v2772_v3  ;;  %v7452_v2 = vld [vmem:[#allocation83_spill] sm:$0xff] }
 0x582   :  { %v2955_v15 = vadd.f32 %v2954_v40, %v2953_v29  ;;  %v2912_v10 = vadd.f32 %v2911_v26, %v2767_v63  ;;  %v3463_v29 = vadd.f32 %v7445_v55, %v7444_v35  ;;  %v2777_v40 = vadd.f32 %v3457_v14, %v2632_v17  ;;  %v7454_v14 = vld [vmem:[#allocation128_spill] sm:$0xff] }
 0x583   :  { %v3588_v16 = vpop.f32.mrf.mxu1  ;;  %v2647_v5 = vadd.f32 %v3386_v48, %v7448_v39  ;;  %v3392_v41 = vadd.f32 %v6619_v53, %v6615_v61  ;;  %v2782_v1 = vadd.f32 %v3460_v27, %v2637_v37  ;;  %v2652_v54 = vadd.f32 %v3389_v58, %v7451_v22 }
 0x584   :  { %v2957_v38 = vadd.f32 %v2956_v52, %v2955_v15  ;;  %v7449_v15 = vld [vmem:[#allocation117_spill] sm:$0xff]  ;;  %v2966_v11 = vsel %vm2950_vm12, %v2912_v10, 0.0  ;;  %v2968_v50 = vsel %vm2950_vm12, %v2917_v45, 0.0  ;;  %v3472_v61 = vadd.f32 %v6621_v23, %v6617_v51 }
 0x585   :  { %v2921_v9 = vpop.f32.mrf.mxu1  ;;  %v3466_v26 = vadd.f32 %v7450_v19, %v7449_v15  ;;  %v2927_v17 = vadd.f32 %v3588_v16, %v2782_v1 }
 0x586   :  { %v2959_v0 = vadd.f32 %v2958_v28, %v2957_v38  ;;  %v2922_v38 = vadd.f32 %v2921_v9, %v2777_v40  ;;  %v2787_v28 = vadd.f32 %v3463_v29, %v2642_v42 }
 0x587   :  { %v3591_v60 = vpop.f32.mrf.mxu1  ;;  %v2792_v8 = vadd.f32 %v3466_v26, %v2647_v5  ;;  %v2972_v48 = vsel %vm2950_vm12, %v2927_v17, 0.0 }
 0x588   :  { %v2961_v49 = vadd.f32 %v2960_v7, %v2959_v0  ;;  %v7453_v0 = vld [vmem:[#allocation146_spill] sm:$0xff]  ;;  %v2657_v7 = vadd.f32 %v3392_v41, %v7454_v14  ;;  %v2970_v53 = vsel %vm2950_vm12, %v2922_v38, 0.0 }
 0x589   :  { %v2931_v34 = vpop.f32.mrf.mxu1  ;;  %v3469_v63 = vadd.f32 %v7453_v0, %v7452_v2  ;;  %v2937_v3 = vadd.f32 %v3591_v60, %v2792_v8 }
 0x58a   :  { %v2963_v25 = vadd.f32 %v2962_v4, %v2961_v49  ;;  %v2932_v9 = vadd.f32 %v2931_v34, %v2787_v28  ;;  %v2802_v16 = vadd.f32 %v3472_v61, %v2657_v7 }
 0x58b   :  { %v3594_v59 = vpop.f32.mrf.mxu1  ;;  %v2797_v49 = vadd.f32 %v3469_v63, %v2652_v54  ;;  %v2976_v27 = vsel %vm2950_vm12, %v2937_v3, 0.0 }
 0x58c   :  { %v2965_v52 = vadd.f32 %v2964_v31, %v2963_v25  ;;  %v2974_v37 = vsel %vm2950_vm12, %v2932_v9, 0.0  ;;  %v2947_v4 = vadd.f32 %v3594_v59, %v2802_v16 }
 0x58d   :  { %v2941_v56 = vpop.f32.mrf.mxu1 }
 0x58e   :  { %v2967_v57 = vadd.f32 %v2966_v11, %v2965_v52  ;;  %v2942_v6 = vadd.f32 %v2941_v56, %v2797_v49  ;;  %v2980_v42 = vsel %vm2950_vm12, %v2947_v4, 0.0 }
 0x590   :  { %v2969_v21 = vadd.f32 %v2968_v50, %v2967_v57  ;;  %v2978_v51 = vsel %vm2950_vm12, %v2942_v6, 0.0 }
 0x592   :  { %v2971_v62 = vadd.f32 %v2970_v53, %v2969_v21 }
 0x594   :  { %v2973_v44 = vadd.f32 %v2972_v48, %v2971_v62 }
 0x596   :  { %v2975_v13 = vadd.f32 %v2974_v37, %v2973_v44 }
 0x598   :  { %v2977_v46 = vadd.f32 %v2976_v27, %v2975_v13 }
 0x59a   :  { %v2979_v23 = vadd.f32 %v2978_v51, %v2977_v46 }
 0x59c   :  { %v2981_v35 = vadd.f32 %v2980_v42, %v2979_v23 }
 0x59e   :  { %v2982_v55 = vrot.slane %v2981_v35, 4 }
 0x5a0   :  { %v2983_v29 = vadd.f32 %v2982_v55, %v2981_v35 }
 0x5a2   :  { %v2984_v60 = vrot.slane %v2983_v29, 2 }
 0x5a4   :  { %v2985_v25 = vadd.f32 %v2984_v60, %v2983_v29 }
 0x5a6   :  { %v2986_v34 = vrot.slane %v2985_v25, 1 }
 0x5a8   :  { %v2987_v36 = vadd.f32 %v2986_v34, %v2985_v25 }
 0x5aa   :  { %v2988_v43 = vmul.f32 0.0078125, %v2987_v36 }
 0x5ac   :  { %v6720_v58 = vsub.f32 %v6632_v47, %v2988_v43  ;;  %v6723_v31 = vsub.f32 %v6627_v30, %v2988_v43  ;;  %v6726_v40 = vsub.f32 %v6648_v20, %v2988_v43  ;;  %v6729_v39 = vsub.f32 %v6646_v24, %v2988_v43 }
 0x5ad   :  { %v6732_v5 = vsub.f32 %v6655_v32, %v2988_v43  ;;  %v6735_v15 = vsub.f32 %v6664_v33, %v2988_v43  ;;  %v6738_v19 = vsub.f32 %v6675_v18, %v2988_v43  ;;  %v6741_v47 = vsub.f32 %v6684_v12, %v2988_v43 }
 0x5ae   :  { %v6743_v30 = vsub.f32 %v2912_v10, %v2988_v43  ;;  %v6745_v26 = vsub.f32 %v2917_v45, %v2988_v43  ;;  %v6747_v20 = vsub.f32 %v2922_v38, %v2988_v43  ;;  %v6749_v24 = vsub.f32 %v2927_v17, %v2988_v43 }
 0x5af   :  { %v6751_v52 = vsub.f32 %v2932_v9, %v2988_v43  ;;  %v6753_v32 = vsub.f32 %v2937_v3, %v2988_v43  ;;  %v6755_v33 = vsub.f32 %v2942_v6, %v2988_v43  ;;  %v6757_v41 = vsub.f32 %v2947_v4, %v2988_v43 }
 0x5b0   :  { %v3005_v18 = vmul.f32 %v6720_v58, %v6720_v58  ;;  %v3006_v12 = vmul.f32 %v6723_v31, %v6723_v31  ;;  %v3007_v10 = vmul.f32 %v6726_v40, %v6726_v40  ;;  %v3008_v45 = vmul.f32 %v6729_v39, %v6729_v39 }
 0x5b1   :  { %v3009_v57 = vmul.f32 %v6732_v5, %v6732_v5  ;;  %v3010_v22 = vmul.f32 %v6735_v15, %v6735_v15  ;;  %v3011_v0 = vmul.f32 %v6738_v19, %v6738_v19  ;;  %v3012_v17 = vmul.f32 %v6741_v47, %v6741_v47 }
 0x5b2   :  { %v3021_v11 = vsel %vm2950_vm12, %v3005_v18, 0.0  ;;  %v3022_v1 = vsel %vm2950_vm12, %v3006_v12, 0.0  ;;  %v3024_v28 = vsel %vm2950_vm12, %v3007_v10, 0.0  ;;  %v3026_v54 = vsel %vm2950_vm12, %v3008_v45, 0.0 }
 0x5b3   :  { %v3023_v38 = vadd.f32 %v3022_v1, %v3021_v11  ;;  %v3028_v63 = vsel %vm2950_vm12, %v3009_v57, 0.0  ;;  %v3030_v21 = vsel %vm2950_vm12, %v3010_v22, 0.0  ;;  %v3013_v14 = vmul.f32 %v6743_v30, %v6743_v30 }
 0x5b4   :  { %v3032_v7 = vsel %vm2950_vm12, %v3011_v0, 0.0  ;;  %v3014_v53 = vmul.f32 %v6745_v26, %v6745_v26  ;;  %v3034_v9 = vsel %vm2950_vm12, %v3012_v17, 0.0  ;;  %v3015_v56 = vmul.f32 %v6747_v20, %v6747_v20 }
 0x5b5   :  { %v3025_v59 = vadd.f32 %v3024_v28, %v3023_v38  ;;  %v3036_v48 = vsel %vm2950_vm12, %v3013_v14, 0.0  ;;  %v3016_v49 = vmul.f32 %v6749_v24, %v6749_v24  ;;  %v3017_v16 = vmul.f32 %v6751_v52, %v6751_v52 }
 0x5b6   :  { %v3038_v44 = vsel %vm2950_vm12, %v3014_v53, 0.0  ;;  %v3040_v6 = vsel %vm2950_vm12, %v3015_v56, 0.0  ;;  %v3018_v27 = vmul.f32 %v6753_v32, %v6753_v32  ;;  %v3019_v51 = vmul.f32 %v6755_v33, %v6755_v33 }
 0x5b7   :  { %v3027_v2 = vadd.f32 %v3026_v54, %v3025_v59  ;;  %v3042_v4 = vsel %vm2950_vm12, %v3016_v49, 0.0  ;;  %v3044_v23 = vsel %vm2950_vm12, %v3017_v16, 0.0  ;;  %v3020_v35 = vmul.f32 %v6757_v41, %v6757_v41 }
 0x5b8   :  { %v3046_v55 = vsel %vm2950_vm12, %v3018_v27, 0.0  ;;  %v3048_v60 = vsel %vm2950_vm12, %v3019_v51, 0.0 }
 0x5b9   :  { %v3029_v50 = vadd.f32 %v3028_v63, %v3027_v2  ;;  %v3050_v34 = vsel %vm2950_vm12, %v3020_v35, 0.0 }
 0x5bb   :  { %v3031_v8 = vadd.f32 %v3030_v21, %v3029_v50 }
 0x5bd   :  { %v3033_v61 = vadd.f32 %v3032_v7, %v3031_v8 }
 0x5bf   :  { %v3035_v62 = vadd.f32 %v3034_v9, %v3033_v61 }
 0x5c1   :  { %v3037_v3 = vadd.f32 %v3036_v48, %v3035_v62 }
 0x5c3   :  { %v3039_v37 = vadd.f32 %v3038_v44, %v3037_v3 }
 0x5c5   :  { %v3041_v13 = vadd.f32 %v3040_v6, %v3039_v37 }
 0x5c7   :  { %v3043_v46 = vadd.f32 %v3042_v4, %v3041_v13 }
 0x5c9   :  { %v3045_v42 = vadd.f32 %v3044_v23, %v3043_v46 }
 0x5cb   :  { %v3047_v29 = vadd.f32 %v3046_v55, %v3045_v42 }
 0x5cd   :  { %v3049_v25 = vadd.f32 %v3048_v60, %v3047_v29 }
 0x5cf   :  { %v3051_v36 = vadd.f32 %v3050_v34, %v3049_v25 }
 0x5d1   :  { %v3052_v43 = vrot.slane %v3051_v36, 4 }
 0x5d3   :  { %v3053_v18 = vadd.f32 %v3052_v43, %v3051_v36 }
 0x5d5   :  { %v3054_v12 = vrot.slane %v3053_v18, 2 }
 0x5d7   :  { %v3055_v10 = vadd.f32 %v3054_v12, %v3053_v18 }
 0x5d9   :  { %v3056_v45 = vrot.slane %v3055_v10, 1 }
 0x5db   :  { %v3057_v11 = vadd.f32 %v3056_v45, %v3055_v10 }
 0x5dd   :  { %v3058_v1 = vmul.f32 0.0078125, %v3057_v11 }
 0x5df   :  { %v3059_v38 = vadd.f32 1e-05, %v3058_v1 }
 0x5e1   :  { %3727 = vrsqrt.f32 %v3059_v38 }
 0x5ee   :  { %v3728_v57 = vpop.eup %3727 }
 0x5ef   :  { %v3061_v28 = vmul.f32 %v3728_v57, %v6720_v58  ;;  %v3062_v59 = vmul.f32 %v3728_v57, %v6723_v31  ;;  %v3063_v22 = vmul.f32 %v3728_v57, %v6726_v40  ;;  %v3064_v54 = vmul.f32 %v3728_v57, %v6729_v39 }
 0x5f0   :  { %v3065_v2 = vmul.f32 %v3728_v57, %v6732_v5  ;;  %v3066_v0 = vmul.f32 %v3728_v57, %v6735_v15  ;;  %v3067_v63 = vmul.f32 %v3728_v57, %v6738_v19  ;;  %v3068_v50 = vmul.f32 %v3728_v57, %v6741_v47 }
 0x5f1   :  { %v3069_v17 = vmul.f32 %v3728_v57, %v6743_v30  ;;  %v3070_v21 = vmul.f32 %v3728_v57, %v6745_v26  ;;  %v3071_v58 = vmul.f32 %v3728_v57, %v6747_v20  ;;  %v3072_v31 = vmul.f32 %v3728_v57, %v6749_v24 }
 0x5f2   :  { %v3073_v40 = vmul.f32 %v3728_v57, %v6751_v52  ;;  %v3074_v39 = vmul.f32 %v3728_v57, %v6753_v32  ;;  %v3075_v5 = vmul.f32 %v3728_v57, %v6755_v33  ;;  %v3076_v15 = vmul.f32 %v3728_v57, %v6757_v41 }
 0x5f3   :  { %v3077_v8 = vmax.f32 %v3061_v28, 0.0  ;;  %v3078_v19 = vmax.f32 %v3062_v59, 0.0  ;;  %v3079_v14 = vmax.f32 %v3063_v22, 0.0  ;;  %v3080_v47 = vmax.f32 %v3064_v54, 0.0 }
 0x5f4   :  { %v3081_v7 = vmax.f32 %v3065_v2, 0.0  ;;  %v3082_v30 = vmax.f32 %v3066_v0, 0.0  ;;  %v3083_v61 = vmax.f32 %v3067_v63, 0.0  ;;  %v3084_v26 = vmax.f32 %v3068_v50, 0.0 }
 0x5f5   :  { %v3085_v53 = vmax.f32 %v3069_v17, 0.0  ;;  %v3086_v20 = vmax.f32 %v3070_v21, 0.0  ;;  %v3087_v9 = vmax.f32 %v3071_v58, 0.0  ;;  %v3088_v24 = vmax.f32 %v3072_v31, 0.0  ;;  %3093 = vst.msk [vmem:[%s6891_s4] sm:$0xff] %vm2950_vm12, %v3077_v8  ;;  %3094 = vst.msk [vmem:[%s6891_s4 + $0x8] sm:$0xff] %vm2950_vm12, %v3078_v19 }
 0x5f6   :  { %3095 = vst.msk [vmem:[%s6891_s4 + $0x10] sm:$0xff] %vm2950_vm12, %v3079_v14  ;;  %3096 = vst.msk [vmem:[%s6891_s4 + $0x18] sm:$0xff] %vm2950_vm12, %v3080_v47  ;;  %v3089_v52 = vmax.f32 %v3073_v40, 0.0  ;;  %v3090_v32 = vmax.f32 %v3074_v39, 0.0  ;;  %v3091_v33 = vmax.f32 %v3075_v5, 0.0  ;;  %v3092_v41 = vmax.f32 %v3076_v15, 0.0 }
 0x5f7   :  { %3097 = vst.msk [vmem:[%s6891_s4 + $0x20] sm:$0xff] %vm2950_vm12, %v3081_v7  ;;  %3098 = vst.msk [vmem:[%s6891_s4 + $0x28] sm:$0xff] %vm2950_vm12, %v3082_v30 }
 0x5f8   :  { %3099 = vst.msk [vmem:[%s6891_s4 + $0x30] sm:$0xff] %vm2950_vm12, %v3083_v61  ;;  %3100 = vst.msk [vmem:[%s6891_s4 + $0x38] sm:$0xff] %vm2950_vm12, %v3084_v26 }
 0x5f9   :  { %3101 = vst.msk [vmem:[%s6891_s4 + $0x40] sm:$0xff] %vm2950_vm12, %v3085_v53  ;;  %3102 = vst.msk [vmem:[%s6891_s4 + $0x48] sm:$0xff] %vm2950_vm12, %v3086_v20 }
 0x5fa   :  { %3103 = vst.msk [vmem:[%s6891_s4 + $0x50] sm:$0xff] %vm2950_vm12, %v3087_v9  ;;  %3104 = vst.msk [vmem:[%s6891_s4 + $0x58] sm:$0xff] %vm2950_vm12, %v3088_v24 }
 0x5fb   :  { %3105 = vst.msk [vmem:[%s6891_s4 + $0x60] sm:$0xff] %vm2950_vm12, %v3089_v52  ;;  %3106 = vst.msk [vmem:[%s6891_s4 + $0x68] sm:$0xff] %vm2950_vm12, %v3090_v32 }
 0x5fc   :  { %3107 = vst.msk [vmem:[%s6891_s4 + $0x70] sm:$0xff] %vm2950_vm12, %v3091_v33  ;;  %3108 = vst.msk [vmem:[%s6891_s4 + $0x78] sm:$0xff] %vm2950_vm12, %v3092_v41 }
 0x5fd   :  { %3113 = vsyncpa [#allocation3], 1 }
 0x5fe   :  { %3114 = vsyncpa [#allocation5], 1 }

// kernel: mixing_network_forward.3
= control target key start
LH: loop header
LB: loop body
LE: loop exit
PB: predicated region body
PF: predicated region fallthrough
CT: control target
= control target key end

     0   :  { %11 = vsyncpa [#allocation3], 0  ;;  %s2997_s0 = inlined_call_operand.vmem [shape: f32[2,4096], index: 0, kind: input, shape index: {}]   ;;  %s2998_s1 = inlined_call_operand.hbm [shape: f32[2,5], index: 1, kind: input, shape index: {}]   ;;  %s2999_s2 = inlined_call_operand.hbm [shape: f32[4096,256], index: 2, kind: input, shape index: {}]   ;;  %s3000_s3 = inlined_call_operand.hbm [shape: f32[1,256], index: 3, kind: input, shape index: {}]   ;;  %s3001_s4 = inlined_call_operand.vmem [shape: f32[256,64], index: 4, kind: input, shape index: {}]   ;;  %s3002_s5 = inlined_call_operand.hbm [shape: f32[1,64], index: 5, kind: input, shape index: {}]   ;;  %s3003_s6 = inlined_call_operand.vmem [shape: f32[2,1], index: 6, kind: output, shape index: {}]  }
   0x1   :  { %12 = vsyncpa [#allocation5], 0 }
   0x2   :  { %13 = vsyncpa [#allocation8], 0  ;;  %s2783_s21 = smov [#allocation4]  }
   0x3   :  { %s31_s22 = sshll.u32 %s2783_s21, 4  ;;  %s32_s22 = int_to_ptr.vmem [resolvable:$true] %s31_s22 }
   0x4   :  { %s2705_s23 = scalar_lea.vmem %s32_s22, 131072  ;;  %p2710_p1 = scmp.lt.s32.totalorder %s32_s22, %s32_s22 }
   0x5   :  { %p2706_p0 = scmp.ne.s32.totalorder %s32_s22, %s2705_s23  ;;  %p2711_p2 = scmp.lt.s32.totalorder %s2705_s23, %s2705_s23 }
   0x7   :  { %p2712_p3 = por %p2711_p2, %p2710_p1 }
   0x9   :  { %p2713_p4 = pnand %p2712_p3, %p2706_p0 }
   0xb   :  { %2716 = shalt.err (!%p2713_p4)
}
   0xc   :  { %s2784_s24 = smov 256   ;;  %s2785_s25 = smov 16  }
   0xd   :  { %37 = dma.hbm_to_vmem [thread:$0]  %s2999_s2, 131072, %s32_s22, [#allocation5], %s2784_s24, %s2784_s24, %s2785_s25  }
   0xe   :  { %s2786_s28 = smov [#allocation2]   ;;  %s2787_s30 = smov [#allocation6]  }
   0xf   :  { %s22_s29 = sshll.u32 %s2786_s28, 4  ;;  %s44_s7 = sshll.u32 %s2787_s30, 4  ;;  %s23_s29 = int_to_ptr.vmem [resolvable:$true] %s22_s29  ;;  %s45_s7 = int_to_ptr.vmem [resolvable:$true] %s44_s7 }
  0x10   :  { %s2725_s8 = scalar_lea.vmem %s23_s29, 32  ;;  %p2730_p6 = scmp.lt.s32.totalorder %s23_s29, %s23_s29 }
  0x11   :  { %p2726_p5 = scmp.ne.s32.totalorder %s23_s29, %s2725_s8  ;;  %p2731_p7 = scmp.lt.s32.totalorder %s2725_s8, %s2725_s8 }
  0x13   :  { %p2732_p8 = por %p2731_p7, %p2730_p6 }
  0x15   :  { %p2733_p9 = pnand %p2732_p8, %p2726_p5 }
  0x17   :  { %2736 = shalt.err (!%p2733_p9)
}
  0x18   :  { %25 = dma.hbm_to_vmem [thread:$0]  %s2998_s1, 32, %s23_s29, [#allocation3]  }
  0x19   :  { %s2745_s11 = scalar_lea.vmem %s45_s7, 32  ;;  %p2750_p11 = scmp.lt.s32.totalorder %s45_s7, %s45_s7 }
  0x1a   :  { %p2746_p10 = scmp.ne.s32.totalorder %s45_s7, %s2745_s11  ;;  %p2751_p12 = scmp.lt.s32.totalorder %s2745_s11, %s2745_s11 }
  0x1c   :  { %p2752_p13 = por %p2751_p12, %p2750_p11 }
  0x1e   :  { %p2753_p0 = pnand %p2752_p13, %p2746_p10 }
  0x20   :  { %2756 = shalt.err (!%p2753_p0)
}
  0x21   :  { %47 = dma.hbm_to_vmem [thread:$0]  %s3000_s3, 32, %s45_s7, [#allocation5]  }
  0x22   :  { %s2788_s13 = smov [#allocation7]  }
  0x23   :  { %s56_s14 = sshll.u32 %s2788_s13, 4  ;;  %s57_s14 = int_to_ptr.vmem [resolvable:$true] %s56_s14 }
  0x24   :  { %s2765_s15 = scalar_lea.vmem %s57_s14, 16  ;;  %s2769_s16 = scalar_lea.vmem %s57_s14, 32 }
  0x25   :  { %p2766_p1 = scmp.ne.s32.totalorder %s57_s14, %s2765_s15  ;;  %p2770_p2 = scmp.lt.s32.totalorder %s57_s14, %s57_s14 }
  0x26   :  { %p2771_p3 = scmp.lt.s32.totalorder %s2769_s16, %s2765_s15 }
  0x28   :  { %p2772_p4 = por %p2771_p3, %p2770_p2 }
  0x2a   :  { %p2773_p5 = pnand %p2772_p4, %p2766_p1 }
  0x2c   :  { %2776 = shalt.err (!%p2773_p5)
}
  0x2d   :  { %59 = dma.hbm_to_vmem [thread:$0]  %s3002_s5, 16, %s57_s14, [#allocation8]  }
  0x2e   :  { %2777 = dma.done.wait [#allocation3], 32  }
  0x2f   :  { %2778 = vsyncadd [#allocation3], 4294967264 }
  0x30   :  { %2779 = dma.done.wait [#allocation5], 131104  }
  0x31   :  { %2780 = vsyncadd [#allocation5], 4294836192 }
  0x32   :  { %2781 = dma.done.wait [#allocation8], 16  }
  0x33   :  { %2782 = vsyncadd [#allocation8], 4294967280  ;;  %v111_v0 = vld [vmem:[#allocation4 + $0xf8] sm:$0xff]  ;;  %v110_v2 = vld [vmem:[#allocation4 + $0xf0] sm:$0xff]  ;;  %s2796_s15 = smov 40   ;;  %s2797_s16 = smov 24  }
  0x34   :  { %v175_v1 = vld [vmem:[#allocation4 + $0x2f8] sm:$0xff]  ;;  %1292 = vmatprep.subr.mxu0 %v111_v0  ;;  %v174_v3 = vld [vmem:[#allocation4 + $0x2f0] sm:$0xff]  ;;  %v109_v4 = vld [vmem:[#allocation4 + $0xe8] sm:$0xff]  ;;  %s2798_s1 = smov 120   ;;  %s2799_s17 = smov 8   ;;  %vm2607_vm1 = vcmask 58368  }
  0x35   :  { %1363 = vmatprep.subr.mxu1 %v175_v1  ;;  %v173_v5 = vld [vmem:[#allocation4 + $0x2e8] sm:$0xff]  ;;  %1293 = vmatpush1.msra.mxu0 %v110_v2  ;;  %v108_v6 = vld [vmem:[#allocation4 + $0xe0] sm:$0xff]  ;;  %v107_v8 = vld [vmem:[#allocation4 + $0xd8] sm:$0xff]  ;;  %s2801_s3 = smov 72   ;;  %vm2616_vm2 = vcmask 1024  }
  0x36   :  { %1364 = vmatpush1.msra.mxu1 %v174_v3  ;;  %v172_v7 = vld [vmem:[#allocation4 + $0x2e0] sm:$0xff]  ;;  %1294 = vmatprep.subr.mxu0 %v109_v4  ;;  %v171_v9 = vld [vmem:[#allocation4 + $0x2d8] sm:$0xff]  ;;  %v106_v10 = vld [vmem:[#allocation4 + $0xd0] sm:$0xff] }
  0x37   :  { %1365 = vmatprep.subr.mxu1 %v173_v5  ;;  %v170_v11 = vld [vmem:[#allocation4 + $0x2d0] sm:$0xff]  ;;  %1295 = vmatpush1.msra.mxu0 %v108_v6  ;;  %v105_v12 = vld [vmem:[#allocation4 + $0xc8] sm:$0xff]  ;;  %v104_v14 = vld [vmem:[#allocation4 + $0xc0] sm:$0xff] }
  0x38   :  { %1366 = vmatpush1.msra.mxu1 %v172_v7  ;;  %v169_v13 = vld [vmem:[#allocation4 + $0x2c8] sm:$0xff]  ;;  %1296 = vmatprep.subr.mxu0 %v107_v8  ;;  %v168_v15 = vld [vmem:[#allocation4 + $0x2c0] sm:$0xff]  ;;  %v103_v16 = vld [vmem:[#allocation4 + $0xb8] sm:$0xff] }
  0x39   :  { %1367 = vmatprep.subr.mxu1 %v171_v9  ;;  %1297 = vmatpush1.msra.mxu0 %v106_v10  ;;  %v167_v17 = vld [vmem:[#allocation4 + $0x2b8] sm:$0xff]  ;;  %v102_v18 = vld [vmem:[#allocation4 + $0xb0] sm:$0xff]  ;;  %v101_v20 = vld [vmem:[#allocation4 + $0xa8] sm:$0xff] }
  0x3a   :  { %1368 = vmatpush1.msra.mxu1 %v170_v11  ;;  %1298 = vmatprep.subr.mxu0 %v105_v12  ;;  %v166_v19 = vld [vmem:[#allocation4 + $0x2b0] sm:$0xff]  ;;  %v165_v21 = vld [vmem:[#allocation4 + $0x2a8] sm:$0xff]  ;;  %v100_v22 = vld [vmem:[#allocation4 + $0xa0] sm:$0xff] }
  0x3b   :  { %1369 = vmatprep.subr.mxu1 %v169_v13  ;;  %1299 = vmatpush1.msra.mxu0 %v104_v14  ;;  %v164_v23 = vld [vmem:[#allocation4 + $0x2a0] sm:$0xff]  ;;  %v99_v24 = vld [vmem:[#allocation4 + $0x98] sm:$0xff]  ;;  %v98_v26 = vld [vmem:[#allocation4 + $0x90] sm:$0xff] }
  0x3c   :  { %1370 = vmatpush1.msra.mxu1 %v168_v15  ;;  %1300 = vmatprep.subr.mxu0 %v103_v16  ;;  %v163_v25 = vld [vmem:[#allocation4 + $0x298] sm:$0xff]  ;;  %v162_v27 = vld [vmem:[#allocation4 + $0x290] sm:$0xff]  ;;  %v97_v28 = vld [vmem:[#allocation4 + $0x88] sm:$0xff] }
  0x3d   :  { %1371 = vmatprep.subr.mxu1 %v167_v17  ;;  %1301 = vmatpush1.msra.mxu0 %v102_v18  ;;  %v161_v29 = vld [vmem:[#allocation4 + $0x288] sm:$0xff]  ;;  %v96_v30 = vld [vmem:[#allocation4 + $0x80] sm:$0xff]  ;;  %v95_v32 = vld [vmem:[#allocation4 + $0x78] sm:$0xff] }
  0x3e   :  { %1372 = vmatpush1.msra.mxu1 %v166_v19  ;;  %1302 = vmatprep.subr.mxu0 %v101_v20  ;;  %v160_v31 = vld [vmem:[#allocation4 + $0x280] sm:$0xff]  ;;  %v159_v33 = vld [vmem:[#allocation4 + $0x278] sm:$0xff]  ;;  %v94_v34 = vld [vmem:[#allocation4 + $0x70] sm:$0xff] }
  0x3f   :  { %1373 = vmatprep.subr.mxu1 %v165_v21  ;;  %1303 = vmatpush1.msra.mxu0 %v100_v22  ;;  %v158_v35 = vld [vmem:[#allocation4 + $0x270] sm:$0xff]  ;;  %v93_v36 = vld [vmem:[#allocation4 + $0x68] sm:$0xff]  ;;  %v92_v38 = vld [vmem:[#allocation4 + $0x60] sm:$0xff] }
  0x40   :  { %1374 = vmatpush1.msra.mxu1 %v164_v23  ;;  %1304 = vmatprep.subr.mxu0 %v99_v24  ;;  %v157_v37 = vld [vmem:[#allocation4 + $0x268] sm:$0xff]  ;;  %v156_v39 = vld [vmem:[#allocation4 + $0x260] sm:$0xff]  ;;  %v91_v40 = vld [vmem:[#allocation4 + $0x58] sm:$0xff] }
  0x41   :  { %1375 = vmatprep.subr.mxu1 %v163_v25  ;;  %1305 = vmatpush1.msra.mxu0 %v98_v26  ;;  %v155_v41 = vld [vmem:[#allocation4 + $0x258] sm:$0xff]  ;;  %v90_v42 = vld [vmem:[#allocation4 + $0x50] sm:$0xff]  ;;  %v89_v44 = vld [vmem:[#allocation4 + $0x48] sm:$0xff] }
  0x42   :  { %1376 = vmatpush1.msra.mxu1 %v162_v27  ;;  %1306 = vmatprep.subr.mxu0 %v97_v28  ;;  %v154_v43 = vld [vmem:[#allocation4 + $0x250] sm:$0xff]  ;;  %v153_v45 = vld [vmem:[#allocation4 + $0x248] sm:$0xff]  ;;  %v88_v46 = vld [vmem:[#allocation4 + $0x40] sm:$0xff] }
  0x43   :  { %1377 = vmatprep.subr.mxu1 %v161_v29  ;;  %1307 = vmatpush1.msra.mxu0 %v96_v30  ;;  %v152_v47 = vld [vmem:[#allocation4 + $0x240] sm:$0xff]  ;;  %v87_v48 = vld [vmem:[#allocation4 + $0x38] sm:$0xff]  ;;  %v86_v50 = vld [vmem:[#allocation4 + $0x30] sm:$0xff]  ;;  %v1106_v30 = vlaneseq }
  0x44   :  { %1378 = vmatpush1.msra.mxu1 %v160_v31  ;;  %1308 = vmatprep.subr.mxu0 %v95_v32  ;;  %v151_v49 = vld [vmem:[#allocation4 + $0x238] sm:$0xff]  ;;  %v150_v51 = vld [vmem:[#allocation4 + $0x230] sm:$0xff]  ;;  %v85_v52 = vld [vmem:[#allocation4 + $0x28] sm:$0xff]  ;;  %v2789_v31 = vmov 1983009808  }
  0x45   :  { %1379 = vmatprep.subr.mxu1 %v159_v33  ;;  %1309 = vmatpush1.msra.mxu0 %v94_v34  ;;  %v149_v53 = vld [vmem:[#allocation4 + $0x228] sm:$0xff]  ;;  %v84_v54 = vld [vmem:[#allocation4 + $0x20] sm:$0xff]  ;;  %v83_v56 = vld [vmem:[#allocation4 + $0x18] sm:$0xff]  ;;  %v1126_v32 = vunpack.c.l.s4 %v2789_v31 }
  0x46   :  { %1380 = vmatpush1.msra.mxu1 %v158_v35  ;;  %1310 = vmatprep.subr.mxu0 %v93_v36  ;;  %v148_v55 = vld [vmem:[#allocation4 + $0x220] sm:$0xff]  ;;  %v147_v57 = vld [vmem:[#allocation4 + $0x218] sm:$0xff]  ;;  %v82_v58 = vld [vmem:[#allocation4 + $0x10] sm:$0xff] }
  0x47   :  { %1381 = vmatprep.subr.mxu1 %v157_v37  ;;  %1311 = vmatpush1.msra.mxu0 %v92_v38  ;;  %v146_v59 = vld [vmem:[#allocation4 + $0x210] sm:$0xff]  ;;  %v81_v60 = vld [vmem:[#allocation4 + $0x8] sm:$0xff]  ;;  %v80_v62 = vld [vmem:[#allocation4] sm:$0xff] }
  0x48   :  { %1382 = vmatpush1.msra.mxu1 %v156_v39  ;;  %1312 = vmatprep.subr.mxu0 %v91_v40  ;;  %v145_v61 = vld [vmem:[#allocation4 + $0x208] sm:$0xff]  ;;  %v144_v63 = vld [vmem:[#allocation4 + $0x200] sm:$0xff]  ;;  %v143_v0 = vld [vmem:[#allocation4 + $0x1f8] sm:$0xff] }
  0x49   :  { %1383 = vmatprep.subr.mxu1 %v155_v41  ;;  %1313 = vmatpush1.msra.mxu0 %v90_v42  ;;  %v207_v1 = vld [vmem:[#allocation4 + $0x3f8] sm:$0xff]  ;;  %v142_v2 = vld [vmem:[#allocation4 + $0x1f0] sm:$0xff]  ;;  %v141_v4 = vld [vmem:[#allocation4 + $0x1e8] sm:$0xff]  ;;  %v2850_v41 = vshrl.u32 %v1106_v30, 7  ;;  %v1127_v42 = vunpack.c.0.s8 %v1126_v32 }
  0x4a   :  { %1384 = vmatpush1.msra.mxu1 %v154_v43  ;;  %1314 = vmatprep.subr.mxu0 %v89_v44  ;;  %v206_v3 = vld [vmem:[#allocation4 + $0x3f0] sm:$0xff]  ;;  %v205_v5 = vld [vmem:[#allocation4 + $0x3e8] sm:$0xff]  ;;  %v140_v6 = vld [vmem:[#allocation4 + $0x1e0] sm:$0xff] }
  0x4b   :  { %1385 = vmatprep.subr.mxu1 %v153_v45  ;;  %1315 = vmatpush1.msra.mxu0 %v88_v46  ;;  %v204_v7 = vld [vmem:[#allocation4 + $0x3e0] sm:$0xff]  ;;  %v139_v8 = vld [vmem:[#allocation4 + $0x1d8] sm:$0xff]  ;;  %v138_v10 = vld [vmem:[#allocation4 + $0x1d0] sm:$0xff] }
  0x4c   :  { %1386 = vmatpush1.msra.mxu1 %v152_v47  ;;  %1316 = vmatprep.subr.mxu0 %v87_v48  ;;  %v203_v9 = vld [vmem:[#allocation4 + $0x3d8] sm:$0xff]  ;;  %v202_v11 = vld [vmem:[#allocation4 + $0x3d0] sm:$0xff]  ;;  %v137_v12 = vld [vmem:[#allocation4 + $0x1c8] sm:$0xff] }
  0x4d   :  { %1387 = vmatprep.subr.mxu1 %v151_v49  ;;  %1317 = vmatpush1.msra.mxu0 %v86_v50  ;;  %v201_v13 = vld [vmem:[#allocation4 + $0x3c8] sm:$0xff]  ;;  %v136_v14 = vld [vmem:[#allocation4 + $0x1c0] sm:$0xff]  ;;  %v135_v16 = vld [vmem:[#allocation4 + $0x1b8] sm:$0xff] }
  0x4e   :  { %1388 = vmatpush1.msra.mxu1 %v150_v51  ;;  %1318 = vmatprep.subr.mxu0 %v85_v52  ;;  %v200_v15 = vld [vmem:[#allocation4 + $0x3c0] sm:$0xff]  ;;  %v199_v17 = vld [vmem:[#allocation4 + $0x3b8] sm:$0xff]  ;;  %v134_v18 = vld [vmem:[#allocation4 + $0x1b0] sm:$0xff]  ;;  %v2856_v52 = vsub.s32 %v1127_v42, %v2850_v41 }
  0x4f   :  { %1389 = vmatprep.subr.mxu1 %v149_v53  ;;  %1319 = vmatpush1.msra.mxu0 %v84_v54  ;;  %v198_v19 = vld [vmem:[#allocation4 + $0x3b0] sm:$0xff]  ;;  %v133_v20 = vld [vmem:[#allocation4 + $0x1a8] sm:$0xff]  ;;  %v132_v22 = vld [vmem:[#allocation4 + $0x1a0] sm:$0xff] }
  0x50   :  { %1390 = vmatpush1.msra.mxu1 %v148_v55  ;;  %1320 = vmatprep.subr.mxu0 %v83_v56  ;;  %v197_v21 = vld [vmem:[#allocation4 + $0x3a8] sm:$0xff]  ;;  %v196_v23 = vld [vmem:[#allocation4 + $0x3a0] sm:$0xff]  ;;  %v131_v24 = vld [vmem:[#allocation4 + $0x198] sm:$0xff] }
  0x51   :  { %1391 = vmatprep.subr.mxu1 %v147_v57  ;;  %1321 = vmatpush1.msra.mxu0 %v82_v58  ;;  %v195_v25 = vld [vmem:[#allocation4 + $0x398] sm:$0xff]  ;;  %v130_v26 = vld [vmem:[#allocation4 + $0x190] sm:$0xff]  ;;  %v129_v28 = vld [vmem:[#allocation4 + $0x188] sm:$0xff] }
  0x52   :  { %1392 = vmatpush1.msra.mxu1 %v146_v59  ;;  %1322 = vmatprep.subr.mxu0 %v81_v60  ;;  %v194_v27 = vld [vmem:[#allocation4 + $0x390] sm:$0xff]  ;;  %v193_v29 = vld [vmem:[#allocation4 + $0x388] sm:$0xff]  ;;  %v128_v33 = vld [vmem:[#allocation4 + $0x180] sm:$0xff] }
  0x53   :  { %1393 = vmatprep.subr.mxu1 %v145_v61  ;;  %1323 = vmatpush1.msra.mxu0 %v80_v62  ;;  %v192_v34 = vld [vmem:[#allocation4 + $0x380] sm:$0xff]  ;;  %v127_v35 = vld [vmem:[#allocation4 + $0x178] sm:$0xff]  ;;  %v126_v37 = vld [vmem:[#allocation4 + $0x170] sm:$0xff] }
  0x54   :  { %1394 = vmatpush1.msra.mxu1 %v144_v63  ;;  %1324 = vmatprep.subr.mxu0 %v143_v0  ;;  %v191_v36 = vld [vmem:[#allocation4 + $0x378] sm:$0xff]  ;;  %v190_v38 = vld [vmem:[#allocation4 + $0x370] sm:$0xff]  ;;  %v125_v39 = vld [vmem:[#allocation4 + $0x168] sm:$0xff] }
  0x55   :  { %1395 = vmatprep.subr.mxu1 %v207_v1  ;;  %1325 = vmatpush2.msra.mxu0 %v142_v2  ;;  %v189_v40 = vld [vmem:[#allocation4 + $0x368] sm:$0xff]  ;;  %v124_v43 = vld [vmem:[#allocation4 + $0x160] sm:$0xff]  ;;  %v123_v45 = vld [vmem:[#allocation4 + $0x158] sm:$0xff] }
  0x56   :  { %1396 = vmatpush2.msra.mxu1 %v206_v3  ;;  %1326 = vmatprep.subr.mxu0 %v141_v4  ;;  %v188_v44 = vld [vmem:[#allocation4 + $0x360] sm:$0xff]  ;;  %v187_v46 = vld [vmem:[#allocation4 + $0x358] sm:$0xff]  ;;  %v122_v47 = vld [vmem:[#allocation4 + $0x150] sm:$0xff] }
  0x57   :  { %1397 = vmatprep.subr.mxu1 %v205_v5  ;;  %1327 = vmatpush2.msra.mxu0 %v140_v6  ;;  %v186_v48 = vld [vmem:[#allocation4 + $0x350] sm:$0xff]  ;;  %v72_v49 = vld [vmem:[%s2997_s0] sm:$0xff]  ;;  %v121_v50 = vld [vmem:[#allocation4 + $0x148] sm:$0xff] }
  0x58   :  { %1398 = vmatpush2.msra.mxu1 %v204_v7  ;;  %1328 = vmatprep.subr.mxu0 %v139_v8  ;;  %v185_v51 = vld [vmem:[#allocation4 + $0x348] sm:$0xff]  ;;  %v120_v53 = vld [vmem:[#allocation4 + $0x140] sm:$0xff]  ;;  %v119_v55 = vld [vmem:[#allocation4 + $0x138] sm:$0xff]  ;;  %v1124_v57 = vcombine.high %v72_v49, %v72_v49  ;;  %v1131_v62 = vrot.slane %v72_v49, %v2856_v52 }
  0x59   :  { %1399 = vmatprep.subr.mxu1 %v203_v9  ;;  %1329 = vmatpush2.msra.mxu0 %v138_v10  ;;  %v184_v54 = vld [vmem:[#allocation4 + $0x340] sm:$0xff]  ;;  %v183_v56 = vld [vmem:[#allocation4 + $0x338] sm:$0xff]  ;;  %v118_v58 = vld [vmem:[#allocation4 + $0x130] sm:$0xff] }
  0x5a   :  { %1400 = vmatpush2.msra.mxu1 %v202_v11  ;;  %1330 = vmatprep.subr.mxu0 %v137_v12  ;;  %v182_v59 = vld [vmem:[#allocation4 + $0x330] sm:$0xff]  ;;  %v117_v60 = vld [vmem:[#allocation4 + $0x128] sm:$0xff]  ;;  %v116_v63 = vld [vmem:[#allocation4 + $0x120] sm:$0xff]  ;;  %v1138_v3 = vrot.slane %v1124_v57, %v2856_v52  ;;  %v1139_v8 = vcombine.high %v1131_v62, %v1131_v62 }
  0x5b   :  { %1401 = vmatprep.subr.mxu1 %v201_v13  ;;  %1331 = vmatpush2.msra.mxu0 %v136_v14  ;;  %v181_v61 = vld [vmem:[#allocation4 + $0x328] sm:$0xff]  ;;  %v180_v0 = vld [vmem:[#allocation4 + $0x320] sm:$0xff]  ;;  %v115_v1 = vld [vmem:[#allocation4 + $0x118] sm:$0xff] }
  0x5c   :  { %1402 = vmatpush2.msra.mxu1 %v200_v15  ;;  %1332 = vmatprep.subr.mxu0 %v135_v16  ;;  %v179_v2 = vld [vmem:[#allocation4 + $0x318] sm:$0xff]  ;;  %v114_v4 = vld [vmem:[#allocation4 + $0x110] sm:$0xff]  ;;  %v113_v6 = vld [vmem:[#allocation4 + $0x108] sm:$0xff]  ;;  %v1140_v11 = vcombine.high %v1138_v3, %v1138_v3 }
  0x5d   :  { %1403 = vmatprep.subr.mxu1 %v199_v17  ;;  %1333 = vmatpush2.msra.mxu0 %v134_v18  ;;  %v178_v5 = vld [vmem:[#allocation4 + $0x310] sm:$0xff]  ;;  %v177_v7 = vld [vmem:[#allocation4 + $0x308] sm:$0xff]  ;;  %v112_v9 = vld [vmem:[#allocation4 + $0x100] sm:$0xff] }
  0x5e   :  { %1404 = vmatpush2.msra.mxu1 %v198_v19  ;;  %1334 = vmatprep.subr.mxu0 %v133_v20  ;;  %v176_v10 = vld [vmem:[#allocation4 + $0x300] sm:$0xff]  ;;  %v239_v12 = vld [vmem:[#allocation4 + $0x4f8] sm:$0xff]  ;;  %v238_v14 = vld [vmem:[#allocation4 + $0x4f0] sm:$0xff] }
  0x5f   :  { %1405 = vmatprep.subr.mxu1 %v197_v21  ;;  %1335 = vmatpush2.msra.mxu0 %v132_v22  ;;  %v303_v13 = vld [vmem:[#allocation4 + $0x6f8] sm:$0xff]  ;;  %v302_v15 = vld [vmem:[#allocation4 + $0x6f0] sm:$0xff]  ;;  %v237_v16 = vld [vmem:[#allocation4 + $0x4e8] sm:$0xff] }
  0x60   :  { %1406 = vmatpush2.msra.mxu1 %v196_v23  ;;  %1336 = vmatprep.subr.mxu0 %v131_v24  ;;  %v301_v17 = vld [vmem:[#allocation4 + $0x6e8] sm:$0xff]  ;;  %v236_v18 = vld [vmem:[#allocation4 + $0x4e0] sm:$0xff]  ;;  %v235_v20 = vld [vmem:[#allocation4 + $0x4d8] sm:$0xff] }
  0x61   :  { %1407 = vmatprep.subr.mxu1 %v195_v25  ;;  %1337 = vmatpush2.msra.mxu0 %v130_v26  ;;  %v300_v19 = vld [vmem:[#allocation4 + $0x6e0] sm:$0xff]  ;;  %v299_v21 = vld [vmem:[#allocation4 + $0x6d8] sm:$0xff]  ;;  %v234_v22 = vld [vmem:[#allocation4 + $0x4d0] sm:$0xff] }
  0x62   :  { %1408 = vmatpush2.msra.mxu1 %v194_v27  ;;  %1338 = vmatprep.subr.mxu0 %v129_v28  ;;  %v298_v23 = vld [vmem:[#allocation4 + $0x6d0] sm:$0xff]  ;;  %v233_v24 = vld [vmem:[#allocation4 + $0x4c8] sm:$0xff]  ;;  %v232_v26 = vld [vmem:[#allocation4 + $0x4c0] sm:$0xff] }
  0x63   :  { %1409 = vmatprep.subr.mxu1 %v193_v29  ;;  %1339 = vmatpush2.msra.mxu0 %v128_v33  ;;  %v297_v25 = vld [vmem:[#allocation4 + $0x6c8] sm:$0xff]  ;;  %v296_v27 = vld [vmem:[#allocation4 + $0x6c0] sm:$0xff]  ;;  %v231_v28 = vld [vmem:[#allocation4 + $0x4b8] sm:$0xff] }
  0x64   :  { %1410 = vmatpush2.msra.mxu1 %v192_v34  ;;  %1340 = vmatprep.subr.mxu0 %v127_v35  ;;  %v295_v29 = vld [vmem:[#allocation4 + $0x6b8] sm:$0xff]  ;;  %v230_v30 = vld [vmem:[#allocation4 + $0x4b0] sm:$0xff]  ;;  %v229_v32 = vld [vmem:[#allocation4 + $0x4a8] sm:$0xff] }
  0x65   :  { %1411 = vmatprep.subr.mxu1 %v191_v36  ;;  %1341 = vmatpush2.msra.mxu0 %v126_v37  ;;  %v294_v31 = vld [vmem:[#allocation4 + $0x6b0] sm:$0xff]  ;;  %v293_v33 = vld [vmem:[#allocation4 + $0x6a8] sm:$0xff]  ;;  %v228_v34 = vld [vmem:[#allocation4 + $0x4a0] sm:$0xff] }
  0x66   :  { %1412 = vmatpush2.msra.mxu1 %v190_v38  ;;  %1342 = vmatprep.subr.mxu0 %v125_v39  ;;  %v292_v35 = vld [vmem:[#allocation4 + $0x6a0] sm:$0xff]  ;;  %v227_v36 = vld [vmem:[#allocation4 + $0x498] sm:$0xff]  ;;  %v226_v38 = vld [vmem:[#allocation4 + $0x490] sm:$0xff] }
  0x67   :  { %1413 = vmatprep.subr.mxu1 %v189_v40  ;;  %1343 = vmatpush2.msra.mxu0 %v124_v43  ;;  %v291_v37 = vld [vmem:[#allocation4 + $0x698] sm:$0xff]  ;;  %v290_v39 = vld [vmem:[#allocation4 + $0x690] sm:$0xff]  ;;  %v225_v40 = vld [vmem:[#allocation4 + $0x488] sm:$0xff] }
  0x68   :  { %1414 = vmatpush2.msra.mxu1 %v188_v44  ;;  %1344 = vmatprep.subr.mxu0 %v123_v45  ;;  %v289_v42 = vld [vmem:[#allocation4 + $0x688] sm:$0xff]  ;;  %v224_v43 = vld [vmem:[#allocation4 + $0x480] sm:$0xff]  ;;  %v223_v45 = vld [vmem:[#allocation4 + $0x478] sm:$0xff] }
  0x69   :  { %1415 = vmatprep.subr.mxu1 %v187_v46  ;;  %1345 = vmatpush2.msra.mxu0 %v122_v47  ;;  %v288_v44 = vld [vmem:[#allocation4 + $0x680] sm:$0xff]  ;;  %v287_v46 = vld [vmem:[#allocation4 + $0x678] sm:$0xff]  ;;  %v222_v47 = vld [vmem:[#allocation4 + $0x470] sm:$0xff] }
  0x6a   :  { %1416 = vmatpush2.msra.mxu1 %v186_v48  ;;  %1346 = vmatprep.subr.mxu0 %v121_v50  ;;  %v286_v48 = vld [vmem:[#allocation4 + $0x670] sm:$0xff]  ;;  %v221_v49 = vld [vmem:[#allocation4 + $0x468] sm:$0xff] }
  0x6b   :  { %1417 = vmatprep.subr.mxu1 %v185_v51  ;;  %1347 = vmatpush2.msra.mxu0 %v120_v53  ;;  %v285_v50 = vld [vmem:[#allocation4 + $0x668] sm:$0xff]  ;;  %v220_v51 = vld [vmem:[#allocation4 + $0x460] sm:$0xff]  ;;  %v282_v57 = vld [vmem:[#allocation4 + $0x650] sm:$0xff] }
  0x6c   :  { %1418 = vmatpush2.msra.mxu1 %v184_v54  ;;  %1348 = vmatprep.subr.mxu0 %v119_v55  ;;  %v284_v53 = vld [vmem:[#allocation4 + $0x660] sm:$0xff]  ;;  %v219_v54 = vld [vmem:[#allocation4 + $0x458] sm:$0xff] }
  0x6d   :  { %1419 = vmatprep.subr.mxu1 %v183_v56  ;;  %1349 = vmatpush2.msra.mxu0 %v118_v58  ;;  %v283_v55 = vld [vmem:[#allocation4 + $0x658] sm:$0xff]  ;;  %v218_v56 = vld [vmem:[#allocation4 + $0x450] sm:$0xff]  ;;  %v217_v58 = vld [vmem:[#allocation4 + $0x448] sm:$0xff] }
  0x6e   :  { %1420 = vmatpush2.msra.mxu1 %v182_v59  ;;  %1350 = vmatprep.subr.mxu0 %v117_v60  ;;  %v281_v59 = vld [vmem:[#allocation4 + $0x648] sm:$0xff]  ;;  %v216_v60 = vld [vmem:[#allocation4 + $0x440] sm:$0xff] }
  0x6f   :  { %1421 = vmatprep.subr.mxu1 %v181_v61  ;;  %1351 = vmatpush2.msra.mxu0 %v116_v63  ;;  %v280_v61 = vld [vmem:[#allocation4 + $0x640] sm:$0xff]  ;;  %v279_v63 = vld [vmem:[#allocation4 + $0x638] sm:$0xff] }
  0x70   :  { %1422 = vmatpush2.msra.mxu1 %v180_v0  ;;  %1352 = vmatprep.subr.mxu0 %v115_v1  ;;  %v214_v0 = vld [vmem:[#allocation4 + $0x430] sm:$0xff] }
  0x71   :  { %1423 = vmatprep.subr.mxu1 %v179_v2  ;;  %1353 = vmatpush2.msra.mxu0 %v114_v4  ;;  %v278_v1 = vld [vmem:[#allocation4 + $0x630] sm:$0xff]  ;;  %v213_v2 = vld [vmem:[#allocation4 + $0x428] sm:$0xff]  ;;  %v212_v4 = vld [vmem:[#allocation4 + $0x420] sm:$0xff] }
  0x72   :  { %1424 = vmatpush2.msra.mxu1 %v178_v5  ;;  %1354 = vmatprep.subr.mxu0 %v113_v6  ;;  %v276_v5 = vld [vmem:[#allocation4 + $0x620] sm:$0xff]  ;;  %v211_v6 = vld [vmem:[#allocation4 + $0x418] sm:$0xff] }
  0x73   :  { %1425 = vmatprep.subr.mxu1 %v177_v7  ;;  %1355 = vmatpush2.msra.mxu0 %v112_v9  ;;  %v275_v7 = vld [vmem:[#allocation4 + $0x618] sm:$0xff]  ;;  %v274_v9 = vld [vmem:[#allocation4 + $0x610] sm:$0xff] }
  0x74   :  { %1356 = vmatprep.mubr.f32.mxu0 %v1139_v8  ;;  %1426 = vmatpush2.msra.mxu1 %v176_v10  ;;  %v210_v8 = vld [vmem:[#allocation4 + $0x410] sm:$0xff]  ;;  %v209_v10 = vld [vmem:[#allocation4 + $0x408] sm:$0xff] }
  0x75   :  { %1357 = vmatmul.mubr.f32.vlgmr.msra.gmra.mxu0 %v1131_v62  ;;  %1427 = vmatprep.mubr.f32.mxu1 %v1140_v11  ;;  %v215_v62 = vld [vmem:[#allocation4 + $0x438] sm:$0xff]  ;;  %v273_v11 = vld [vmem:[#allocation4 + $0x608] sm:$0xff] }
  0x76   :  { %1434 = vmatprep.subr.mxu0 %v239_v12  ;;  %1505 = vmatprep.subr.mxu1 %v303_v13  ;;  %v208_v12 = vld [vmem:[#allocation4 + $0x400] sm:$0xff] }
  0x77   :  { %1428 = vmatmul.mubr.f32.vlgmr.msra.gmra.mxu1 %v1138_v3  ;;  %1435 = vmatpush1.msra.mxu0 %v238_v14  ;;  %v277_v3 = vld [vmem:[#allocation4 + $0x628] sm:$0xff]  ;;  %v272_v13 = vld [vmem:[#allocation4 + $0x600] sm:$0xff]  ;;  %v271_v14 = vld [vmem:[#allocation4 + $0x5f8] sm:$0xff] }
  0x78   :  { %1506 = vmatpush1.msra.mxu1 %v302_v15  ;;  %1436 = vmatprep.subr.mxu0 %v237_v16  ;;  %v335_v15 = vld [vmem:[#allocation4 + $0x7f8] sm:$0xff]  ;;  %v270_v16 = vld [vmem:[#allocation4 + $0x5f0] sm:$0xff] }
  0x79   :  { %1507 = vmatprep.subr.mxu1 %v301_v17  ;;  %1437 = vmatpush1.msra.mxu0 %v236_v18  ;;  %v334_v17 = vld [vmem:[#allocation4 + $0x7f0] sm:$0xff]  ;;  %v269_v18 = vld [vmem:[#allocation4 + $0x5e8] sm:$0xff] }
  0x7a   :  { %1508 = vmatpush1.msra.mxu1 %v300_v19  ;;  %1438 = vmatprep.subr.mxu0 %v235_v20  ;;  %v333_v19 = vld [vmem:[#allocation4 + $0x7e8] sm:$0xff]  ;;  %v268_v20 = vld [vmem:[#allocation4 + $0x5e0] sm:$0xff] }
  0x7b   :  { %1509 = vmatprep.subr.mxu1 %v299_v21  ;;  %1439 = vmatpush1.msra.mxu0 %v234_v22  ;;  %v332_v21 = vld [vmem:[#allocation4 + $0x7e0] sm:$0xff]  ;;  %v267_v22 = vld [vmem:[#allocation4 + $0x5d8] sm:$0xff] }
  0x7c   :  { %1510 = vmatpush1.msra.mxu1 %v298_v23  ;;  %1440 = vmatprep.subr.mxu0 %v233_v24  ;;  %v331_v23 = vld [vmem:[#allocation4 + $0x7d8] sm:$0xff]  ;;  %v266_v24 = vld [vmem:[#allocation4 + $0x5d0] sm:$0xff] }
  0x7d   :  { %1511 = vmatprep.subr.mxu1 %v297_v25  ;;  %1441 = vmatpush1.msra.mxu0 %v232_v26  ;;  %v330_v25 = vld [vmem:[#allocation4 + $0x7d0] sm:$0xff]  ;;  %v265_v26 = vld [vmem:[#allocation4 + $0x5c8] sm:$0xff] }
  0x7e   :  { %1512 = vmatpush1.msra.mxu1 %v296_v27  ;;  %1442 = vmatprep.subr.mxu0 %v231_v28  ;;  %v329_v27 = vld [vmem:[#allocation4 + $0x7c8] sm:$0xff]  ;;  %v264_v28 = vld [vmem:[#allocation4 + $0x5c0] sm:$0xff] }
  0x7f   :  { %1513 = vmatprep.subr.mxu1 %v295_v29  ;;  %1443 = vmatpush1.msra.mxu0 %v230_v30  ;;  %v328_v29 = vld [vmem:[#allocation4 + $0x7c0] sm:$0xff]  ;;  %v263_v30 = vld [vmem:[#allocation4 + $0x5b8] sm:$0xff] }
  0x80   :  { %1514 = vmatpush1.msra.mxu1 %v294_v31  ;;  %1444 = vmatprep.subr.mxu0 %v229_v32  ;;  %v327_v31 = vld [vmem:[#allocation4 + $0x7b8] sm:$0xff]  ;;  %v262_v32 = vld [vmem:[#allocation4 + $0x5b0] sm:$0xff] }
  0x81   :  { %1515 = vmatprep.subr.mxu1 %v293_v33  ;;  %1445 = vmatpush1.msra.mxu0 %v228_v34  ;;  %v326_v33 = vld [vmem:[#allocation4 + $0x7b0] sm:$0xff]  ;;  %v261_v34 = vld [vmem:[#allocation4 + $0x5a8] sm:$0xff] }
  0x82   :  { %1516 = vmatpush1.msra.mxu1 %v292_v35  ;;  %1446 = vmatprep.subr.mxu0 %v227_v36  ;;  %v325_v35 = vld [vmem:[#allocation4 + $0x7a8] sm:$0xff]  ;;  %v260_v36 = vld [vmem:[#allocation4 + $0x5a0] sm:$0xff] }
  0x83   :  { %1517 = vmatprep.subr.mxu1 %v291_v37  ;;  %1447 = vmatpush1.msra.mxu0 %v226_v38  ;;  %v324_v37 = vld [vmem:[#allocation4 + $0x7a0] sm:$0xff]  ;;  %v259_v38 = vld [vmem:[#allocation4 + $0x598] sm:$0xff] }
  0x84   :  { %1518 = vmatpush1.msra.mxu1 %v290_v39  ;;  %1448 = vmatprep.subr.mxu0 %v225_v40  ;;  %v323_v39 = vld [vmem:[#allocation4 + $0x798] sm:$0xff]  ;;  %v258_v40 = vld [vmem:[#allocation4 + $0x590] sm:$0xff] }
  0x85   :  { %1519 = vmatprep.subr.mxu1 %v289_v42  ;;  %1449 = vmatpush1.msra.mxu0 %v224_v43  ;;  %v322_v42 = vld [vmem:[#allocation4 + $0x790] sm:$0xff]  ;;  %v257_v43 = vld [vmem:[#allocation4 + $0x588] sm:$0xff] }
  0x86   :  { %1520 = vmatpush1.msra.mxu1 %v288_v44  ;;  %1450 = vmatprep.subr.mxu0 %v223_v45  ;;  %v321_v44 = vld [vmem:[#allocation4 + $0x788] sm:$0xff]  ;;  %v256_v45 = vld [vmem:[#allocation4 + $0x580] sm:$0xff] }
  0x87   :  { %1521 = vmatprep.subr.mxu1 %v287_v46  ;;  %1451 = vmatpush1.msra.mxu0 %v222_v47  ;;  %v320_v46 = vld [vmem:[#allocation4 + $0x780] sm:$0xff]  ;;  %v255_v47 = vld [vmem:[#allocation4 + $0x578] sm:$0xff] }
  0x88   :  { %1522 = vmatpush1.msra.mxu1 %v286_v48  ;;  %1452 = vmatprep.subr.mxu0 %v221_v49  ;;  %v319_v48 = vld [vmem:[#allocation4 + $0x778] sm:$0xff]  ;;  %v254_v49 = vld [vmem:[#allocation4 + $0x570] sm:$0xff] }
  0x89   :  { %1523 = vmatprep.subr.mxu1 %v285_v50  ;;  %1453 = vmatpush1.msra.mxu0 %v220_v51  ;;  %v318_v50 = vld [vmem:[#allocation4 + $0x770] sm:$0xff]  ;;  %v253_v51 = vld [vmem:[#allocation4 + $0x568] sm:$0xff] }
  0x8a   :  { %1524 = vmatpush1.msra.mxu1 %v284_v53  ;;  %1454 = vmatprep.subr.mxu0 %v219_v54  ;;  %v317_v53 = vld [vmem:[#allocation4 + $0x768] sm:$0xff]  ;;  %v252_v54 = vld [vmem:[#allocation4 + $0x560] sm:$0xff] }
  0x8b   :  { %1525 = vmatprep.subr.mxu1 %v283_v55  ;;  %1455 = vmatpush1.msra.mxu0 %v218_v56  ;;  %v316_v55 = vld [vmem:[#allocation4 + $0x760] sm:$0xff]  ;;  %v251_v56 = vld [vmem:[#allocation4 + $0x558] sm:$0xff] }
  0x8c   :  { %1526 = vmatpush1.msra.mxu1 %v282_v57  ;;  %1456 = vmatprep.subr.mxu0 %v217_v58  ;;  %v315_v57 = vld [vmem:[#allocation4 + $0x758] sm:$0xff]  ;;  %v250_v58 = vld [vmem:[#allocation4 + $0x550] sm:$0xff] }
  0x8d   :  { %1527 = vmatprep.subr.mxu1 %v281_v59  ;;  %1457 = vmatpush1.msra.mxu0 %v216_v60  ;;  %v314_v59 = vld [vmem:[#allocation4 + $0x750] sm:$0xff]  ;;  %v73_v60 = vld [vmem:[%s2997_s0 + $0x8] sm:$0xff] }
  0x8e   :  { %1528 = vmatpush1.msra.mxu1 %v280_v61  ;;  %1458 = vmatprep.subr.mxu0 %v215_v62  ;;  %v249_v61 = vld [vmem:[#allocation4 + $0x548] sm:$0xff] }
  0x8f   :  { %1529 = vmatprep.subr.mxu1 %v279_v63  ;;  %1459 = vmatpush1.msra.mxu0 %v214_v0  ;;  %v313_v62 = vld [vmem:[#allocation4 + $0x748] sm:$0xff]  ;;  %v248_v63 = vld [vmem:[#allocation4 + $0x540] sm:$0xff] }
  0x90   :  { %1530 = vmatpush1.msra.mxu1 %v278_v1  ;;  %1460 = vmatprep.subr.mxu0 %v213_v2  ;;  %v312_v0 = vld [vmem:[#allocation4 + $0x740] sm:$0xff]  ;;  %v247_v1 = vld [vmem:[#allocation4 + $0x538] sm:$0xff] }
  0x91   :  { %1531 = vmatprep.subr.mxu1 %v277_v3  ;;  %1461 = vmatpush1.msra.mxu0 %v212_v4  ;;  %v311_v2 = vld [vmem:[#allocation4 + $0x738] sm:$0xff]  ;;  %v1141_v3 = vcombine.high %v73_v60, %v73_v60  ;;  %v246_v4 = vld [vmem:[#allocation4 + $0x530] sm:$0xff] }
  0x92   :  { %1532 = vmatpush1.msra.mxu1 %v276_v5  ;;  %1462 = vmatprep.subr.mxu0 %v211_v6  ;;  %v310_v5 = vld [vmem:[#allocation4 + $0x730] sm:$0xff]  ;;  %v245_v6 = vld [vmem:[#allocation4 + $0x528] sm:$0xff] }
  0x93   :  { %1533 = vmatprep.subr.mxu1 %v275_v7  ;;  %1463 = vmatpush1.msra.mxu0 %v210_v8  ;;  %v309_v7 = vld [vmem:[#allocation4 + $0x728] sm:$0xff]  ;;  %v1148_v8 = vrot.slane %v73_v60, %v2856_v52 }
  0x94   :  { %1534 = vmatpush1.msra.mxu1 %v274_v9  ;;  %1464 = vmatprep.subr.mxu0 %v209_v10  ;;  %v244_v9 = vld [vmem:[#allocation4 + $0x520] sm:$0xff]  ;;  %v349_v60 = vld [vmem:[#allocation4 + $0x868] sm:$0xff] }
  0x95   :  { %1535 = vmatprep.subr.mxu1 %v273_v11  ;;  %1465 = vmatpush1.msra.mxu0 %v208_v12  ;;  %v308_v10 = vld [vmem:[#allocation4 + $0x720] sm:$0xff]  ;;  %v243_v11 = vld [vmem:[#allocation4 + $0x518] sm:$0xff] }
  0x96   :  { %1536 = vmatpush1.msra.mxu1 %v272_v13  ;;  %1466 = vmatprep.subr.mxu0 %v271_v14  ;;  %v307_v12 = vld [vmem:[#allocation4 + $0x718] sm:$0xff]  ;;  %v1155_v13 = vrot.slane %v1141_v3, %v2856_v52  ;;  %v242_v14 = vld [vmem:[#allocation4 + $0x510] sm:$0xff] }
  0x97   :  { %1537 = vmatprep.subr.mxu1 %v335_v15  ;;  %1467 = vmatpush2.msra.mxu0 %v270_v16  ;;  %v306_v15 = vld [vmem:[#allocation4 + $0x710] sm:$0xff]  ;;  %v241_v16 = vld [vmem:[#allocation4 + $0x508] sm:$0xff] }
  0x98   :  { %1538 = vmatpush2.msra.mxu1 %v334_v17  ;;  %1468 = vmatprep.subr.mxu0 %v269_v18  ;;  %v305_v17 = vld [vmem:[#allocation4 + $0x708] sm:$0xff]  ;;  %v1156_v18 = vcombine.high %v1148_v8, %v1148_v8  ;;  %v410_v3 = vld [vmem:[#allocation4 + $0xa50] sm:$0xff] }
  0x99   :  { %1539 = vmatprep.subr.mxu1 %v333_v19  ;;  %1469 = vmatpush2.msra.mxu0 %v268_v20  ;;  %v240_v19 = vld [vmem:[#allocation4 + $0x500] sm:$0xff] }
  0x9a   :  { %1540 = vmatpush2.msra.mxu1 %v332_v21  ;;  %1470 = vmatprep.subr.mxu0 %v267_v22  ;;  %v304_v20 = vld [vmem:[#allocation4 + $0x700] sm:$0xff]  ;;  %v1157_v21 = vcombine.high %v1155_v13, %v1155_v13  ;;  %v367_v22 = vld [vmem:[#allocation4 + $0x8f8] sm:$0xff] }
  0x9b   :  { %1541 = vmatprep.subr.mxu1 %v331_v23  ;;  %1471 = vmatpush2.msra.mxu0 %v266_v24  ;;  %v431_v23 = vld [vmem:[#allocation4 + $0xaf8] sm:$0xff]  ;;  %v366_v24 = vld [vmem:[#allocation4 + $0x8f0] sm:$0xff] }
  0x9c   :  { %1542 = vmatpush2.msra.mxu1 %v330_v25  ;;  %1472 = vmatprep.subr.mxu0 %v265_v26  ;;  %v430_v25 = vld [vmem:[#allocation4 + $0xaf0] sm:$0xff]  ;;  %v365_v26 = vld [vmem:[#allocation4 + $0x8e8] sm:$0xff] }
  0x9d   :  { %1543 = vmatprep.subr.mxu1 %v329_v27  ;;  %1473 = vmatpush2.msra.mxu0 %v264_v28  ;;  %v429_v27 = vld [vmem:[#allocation4 + $0xae8] sm:$0xff]  ;;  %v364_v28 = vld [vmem:[#allocation4 + $0x8e0] sm:$0xff] }
  0x9e   :  { %1544 = vmatpush2.msra.mxu1 %v328_v29  ;;  %1474 = vmatprep.subr.mxu0 %v263_v30  ;;  %v428_v29 = vld [vmem:[#allocation4 + $0xae0] sm:$0xff]  ;;  %v363_v30 = vld [vmem:[#allocation4 + $0x8d8] sm:$0xff] }
  0x9f   :  { %1545 = vmatprep.subr.mxu1 %v327_v31  ;;  %1475 = vmatpush2.msra.mxu0 %v262_v32  ;;  %v427_v31 = vld [vmem:[#allocation4 + $0xad8] sm:$0xff]  ;;  %v362_v32 = vld [vmem:[#allocation4 + $0x8d0] sm:$0xff] }
  0xa0   :  { %1546 = vmatpush2.msra.mxu1 %v326_v33  ;;  %1476 = vmatprep.subr.mxu0 %v261_v34  ;;  %v426_v33 = vld [vmem:[#allocation4 + $0xad0] sm:$0xff]  ;;  %v361_v34 = vld [vmem:[#allocation4 + $0x8c8] sm:$0xff] }
  0xa1   :  { %1547 = vmatprep.subr.mxu1 %v325_v35  ;;  %1477 = vmatpush2.msra.mxu0 %v260_v36  ;;  %v425_v35 = vld [vmem:[#allocation4 + $0xac8] sm:$0xff]  ;;  %v360_v36 = vld [vmem:[#allocation4 + $0x8c0] sm:$0xff] }
  0xa2   :  { %1548 = vmatpush2.msra.mxu1 %v324_v37  ;;  %1478 = vmatprep.subr.mxu0 %v259_v38  ;;  %v424_v37 = vld [vmem:[#allocation4 + $0xac0] sm:$0xff]  ;;  %v359_v38 = vld [vmem:[#allocation4 + $0x8b8] sm:$0xff] }
  0xa3   :  { %1549 = vmatprep.subr.mxu1 %v323_v39  ;;  %1479 = vmatpush2.msra.mxu0 %v258_v40  ;;  %v423_v39 = vld [vmem:[#allocation4 + $0xab8] sm:$0xff]  ;;  %v358_v40 = vld [vmem:[#allocation4 + $0x8b0] sm:$0xff] }
  0xa4   :  { %1550 = vmatpush2.msra.mxu1 %v322_v42  ;;  %1480 = vmatprep.subr.mxu0 %v257_v43  ;;  %v422_v42 = vld [vmem:[#allocation4 + $0xab0] sm:$0xff]  ;;  %v357_v43 = vld [vmem:[#allocation4 + $0x8a8] sm:$0xff] }
  0xa5   :  { %1551 = vmatprep.subr.mxu1 %v321_v44  ;;  %1481 = vmatpush2.msra.mxu0 %v256_v45  ;;  %v421_v44 = vld [vmem:[#allocation4 + $0xaa8] sm:$0xff]  ;;  %v356_v45 = vld [vmem:[#allocation4 + $0x8a0] sm:$0xff] }
  0xa6   :  { %1552 = vmatpush2.msra.mxu1 %v320_v46  ;;  %1482 = vmatprep.subr.mxu0 %v255_v47  ;;  %v420_v46 = vld [vmem:[#allocation4 + $0xaa0] sm:$0xff]  ;;  %v355_v47 = vld [vmem:[#allocation4 + $0x898] sm:$0xff] }
  0xa7   :  { %1553 = vmatprep.subr.mxu1 %v319_v48  ;;  %1483 = vmatpush2.msra.mxu0 %v254_v49  ;;  %v419_v48 = vld [vmem:[#allocation4 + $0xa98] sm:$0xff]  ;;  %v354_v49 = vld [vmem:[#allocation4 + $0x890] sm:$0xff] }
  0xa8   :  { %1554 = vmatpush2.msra.mxu1 %v318_v50  ;;  %1484 = vmatprep.subr.mxu0 %v253_v51  ;;  %v418_v50 = vld [vmem:[#allocation4 + $0xa90] sm:$0xff]  ;;  %v353_v51 = vld [vmem:[#allocation4 + $0x888] sm:$0xff] }
  0xa9   :  { %1555 = vmatprep.subr.mxu1 %v317_v53  ;;  %1485 = vmatpush2.msra.mxu0 %v252_v54  ;;  %v417_v53 = vld [vmem:[#allocation4 + $0xa88] sm:$0xff]  ;;  %v352_v54 = vld [vmem:[#allocation4 + $0x880] sm:$0xff] }
  0xaa   :  { %1556 = vmatpush2.msra.mxu1 %v316_v55  ;;  %1486 = vmatprep.subr.mxu0 %v251_v56  ;;  %v416_v55 = vld [vmem:[#allocation4 + $0xa80] sm:$0xff]  ;;  %v351_v56 = vld [vmem:[#allocation4 + $0x878] sm:$0xff] }
  0xab   :  { %1557 = vmatprep.subr.mxu1 %v315_v57  ;;  %1487 = vmatpush2.msra.mxu0 %v250_v58  ;;  %v415_v57 = vld [vmem:[#allocation4 + $0xa78] sm:$0xff]  ;;  %v350_v58 = vld [vmem:[#allocation4 + $0x870] sm:$0xff] }
  0xac   :  { %1558 = vmatpush2.msra.mxu1 %v314_v59  ;;  %1488 = vmatprep.subr.mxu0 %v249_v61  ;;  %v414_v59 = vld [vmem:[#allocation4 + $0xa70] sm:$0xff]  ;;  %v413_v61 = vld [vmem:[#allocation4 + $0xa68] sm:$0xff] }
  0xad   :  { %1559 = vmatprep.subr.mxu1 %v313_v62  ;;  %1489 = vmatpush2.msra.mxu0 %v248_v63  ;;  %v348_v62 = vld [vmem:[#allocation4 + $0x860] sm:$0xff] }
  0xae   :  { %1560 = vmatpush2.msra.mxu1 %v312_v0  ;;  %1490 = vmatprep.subr.mxu0 %v247_v1  ;;  %v412_v63 = vld [vmem:[#allocation4 + $0xa60] sm:$0xff]  ;;  %v347_v0 = vld [vmem:[#allocation4 + $0x858] sm:$0xff] }
  0xaf   :  { %1561 = vmatprep.subr.mxu1 %v311_v2  ;;  %1491 = vmatpush2.msra.mxu0 %v246_v4  ;;  %v411_v1 = vld [vmem:[#allocation4 + $0xa58] sm:$0xff]  ;;  %v346_v2 = vld [vmem:[#allocation4 + $0x850] sm:$0xff]  ;;  %v345_v4 = vld [vmem:[#allocation4 + $0x848] sm:$0xff] }
  0xb0   :  { %1562 = vmatpush2.msra.mxu1 %v310_v5  ;;  %1492 = vmatprep.subr.mxu0 %v245_v6  ;;  %v409_v5 = vld [vmem:[#allocation4 + $0xa48] sm:$0xff]  ;;  %v344_v6 = vld [vmem:[#allocation4 + $0x840] sm:$0xff] }
  0xb1   :  { %1563 = vmatprep.subr.mxu1 %v309_v7  ;;  %1493 = vmatpush2.msra.mxu0 %v244_v9  ;;  %v408_v7 = vld [vmem:[#allocation4 + $0xa40] sm:$0xff]  ;;  %v407_v9 = vld [vmem:[#allocation4 + $0xa38] sm:$0xff] }
  0xb2   :  { %1564 = vmatpush2.msra.mxu1 %v308_v10  ;;  %1494 = vmatprep.subr.mxu0 %v243_v11  ;;  %v342_v10 = vld [vmem:[#allocation4 + $0x830] sm:$0xff] }
  0xb3   :  { %1565 = vmatprep.subr.mxu1 %v307_v12  ;;  %1495 = vmatpush2.msra.mxu0 %v242_v14  ;;  %v406_v11 = vld [vmem:[#allocation4 + $0xa30] sm:$0xff]  ;;  %v341_v12 = vld [vmem:[#allocation4 + $0x828] sm:$0xff]  ;;  %v340_v14 = vld [vmem:[#allocation4 + $0x820] sm:$0xff] }
  0xb4   :  { %1566 = vmatpush2.msra.mxu1 %v306_v15  ;;  %1496 = vmatprep.subr.mxu0 %v241_v16  ;;  %v404_v15 = vld [vmem:[#allocation4 + $0xa20] sm:$0xff]  ;;  %v339_v16 = vld [vmem:[#allocation4 + $0x818] sm:$0xff] }
  0xb5   :  { %1567 = vmatprep.subr.mxu1 %v305_v17  ;;  %1497 = vmatpush2.msra.mxu0 %v240_v19  ;;  %v403_v17 = vld [vmem:[#allocation4 + $0xa18] sm:$0xff]  ;;  %v402_v19 = vld [vmem:[#allocation4 + $0xa10] sm:$0xff] }
  0xb6   :  { %1498 = vmatprep.mubr.f32.mxu0 %v1156_v18  ;;  %1568 = vmatpush2.msra.mxu1 %v304_v20  ;;  %v338_v18 = vld [vmem:[#allocation4 + $0x810] sm:$0xff]  ;;  %v337_v20 = vld [vmem:[#allocation4 + $0x808] sm:$0xff] }
  0xb7   :  { %1499 = vmatmul.mubr.f32.vlgmr.msra.gmra.mxu0 %v1148_v8  ;;  %1569 = vmatprep.mubr.f32.mxu1 %v1157_v21  ;;  %v343_v8 = vld [vmem:[#allocation4 + $0x838] sm:$0xff]  ;;  %v401_v21 = vld [vmem:[#allocation4 + $0xa08] sm:$0xff] }
  0xb8   :  { %1576 = vmatprep.subr.mxu0 %v367_v22  ;;  %1647 = vmatprep.subr.mxu1 %v431_v23  ;;  %v336_v22 = vld [vmem:[#allocation4 + $0x800] sm:$0xff] }
  0xb9   :  { %1570 = vmatmul.mubr.f32.vlgmr.msra.gmra.mxu1 %v1155_v13  ;;  %1577 = vmatpush1.msra.mxu0 %v366_v24  ;;  %v405_v13 = vld [vmem:[#allocation4 + $0xa28] sm:$0xff]  ;;  %v400_v23 = vld [vmem:[#allocation4 + $0xa00] sm:$0xff]  ;;  %v399_v24 = vld [vmem:[#allocation4 + $0x9f8] sm:$0xff] }
  0xba   :  { %1648 = vmatpush1.msra.mxu1 %v430_v25  ;;  %1578 = vmatprep.subr.mxu0 %v365_v26  ;;  %v463_v25 = vld [vmem:[#allocation4 + $0xbf8] sm:$0xff]  ;;  %v398_v26 = vld [vmem:[#allocation4 + $0x9f0] sm:$0xff] }
  0xbb   :  { %1649 = vmatprep.subr.mxu1 %v429_v27  ;;  %1579 = vmatpush1.msra.mxu0 %v364_v28  ;;  %v462_v27 = vld [vmem:[#allocation4 + $0xbf0] sm:$0xff]  ;;  %v397_v28 = vld [vmem:[#allocation4 + $0x9e8] sm:$0xff] }
  0xbc   :  { %1650 = vmatpush1.msra.mxu1 %v428_v29  ;;  %1580 = vmatprep.subr.mxu0 %v363_v30  ;;  %v461_v29 = vld [vmem:[#allocation4 + $0xbe8] sm:$0xff]  ;;  %v396_v30 = vld [vmem:[#allocation4 + $0x9e0] sm:$0xff] }
  0xbd   :  { %1651 = vmatprep.subr.mxu1 %v427_v31  ;;  %1581 = vmatpush1.msra.mxu0 %v362_v32  ;;  %v460_v31 = vld [vmem:[#allocation4 + $0xbe0] sm:$0xff]  ;;  %v395_v32 = vld [vmem:[#allocation4 + $0x9d8] sm:$0xff] }
  0xbe   :  { %1652 = vmatpush1.msra.mxu1 %v426_v33  ;;  %1582 = vmatprep.subr.mxu0 %v361_v34  ;;  %v459_v33 = vld [vmem:[#allocation4 + $0xbd8] sm:$0xff]  ;;  %v394_v34 = vld [vmem:[#allocation4 + $0x9d0] sm:$0xff] }
  0xbf   :  { %1653 = vmatprep.subr.mxu1 %v425_v35  ;;  %1583 = vmatpush1.msra.mxu0 %v360_v36  ;;  %v458_v35 = vld [vmem:[#allocation4 + $0xbd0] sm:$0xff]  ;;  %v393_v36 = vld [vmem:[#allocation4 + $0x9c8] sm:$0xff] }
  0xc0   :  { %1654 = vmatpush1.msra.mxu1 %v424_v37  ;;  %1584 = vmatprep.subr.mxu0 %v359_v38  ;;  %v457_v37 = vld [vmem:[#allocation4 + $0xbc8] sm:$0xff]  ;;  %v392_v38 = vld [vmem:[#allocation4 + $0x9c0] sm:$0xff] }
  0xc1   :  { %1655 = vmatprep.subr.mxu1 %v423_v39  ;;  %1585 = vmatpush1.msra.mxu0 %v358_v40  ;;  %v456_v39 = vld [vmem:[#allocation4 + $0xbc0] sm:$0xff]  ;;  %v391_v40 = vld [vmem:[#allocation4 + $0x9b8] sm:$0xff] }
  0xc2   :  { %1656 = vmatpush1.msra.mxu1 %v422_v42  ;;  %1586 = vmatprep.subr.mxu0 %v357_v43  ;;  %v455_v42 = vld [vmem:[#allocation4 + $0xbb8] sm:$0xff]  ;;  %v390_v43 = vld [vmem:[#allocation4 + $0x9b0] sm:$0xff] }
  0xc3   :  { %1657 = vmatprep.subr.mxu1 %v421_v44  ;;  %1587 = vmatpush1.msra.mxu0 %v356_v45  ;;  %v454_v44 = vld [vmem:[#allocation4 + $0xbb0] sm:$0xff]  ;;  %v389_v45 = vld [vmem:[#allocation4 + $0x9a8] sm:$0xff] }
  0xc4   :  { %1658 = vmatpush1.msra.mxu1 %v420_v46  ;;  %1588 = vmatprep.subr.mxu0 %v355_v47  ;;  %v453_v46 = vld [vmem:[#allocation4 + $0xba8] sm:$0xff]  ;;  %v388_v47 = vld [vmem:[#allocation4 + $0x9a0] sm:$0xff] }
  0xc5   :  { %1659 = vmatprep.subr.mxu1 %v419_v48  ;;  %1589 = vmatpush1.msra.mxu0 %v354_v49  ;;  %v452_v48 = vld [vmem:[#allocation4 + $0xba0] sm:$0xff]  ;;  %v387_v49 = vld [vmem:[#allocation4 + $0x998] sm:$0xff] }
  0xc6   :  { %1660 = vmatpush1.msra.mxu1 %v418_v50  ;;  %1590 = vmatprep.subr.mxu0 %v353_v51  ;;  %v451_v50 = vld [vmem:[#allocation4 + $0xb98] sm:$0xff]  ;;  %v386_v51 = vld [vmem:[#allocation4 + $0x990] sm:$0xff] }
  0xc7   :  { %1661 = vmatprep.subr.mxu1 %v417_v53  ;;  %1591 = vmatpush1.msra.mxu0 %v352_v54  ;;  %v450_v53 = vld [vmem:[#allocation4 + $0xb90] sm:$0xff]  ;;  %v385_v54 = vld [vmem:[#allocation4 + $0x988] sm:$0xff] }
  0xc8   :  { %1662 = vmatpush1.msra.mxu1 %v416_v55  ;;  %1592 = vmatprep.subr.mxu0 %v351_v56  ;;  %v449_v55 = vld [vmem:[#allocation4 + $0xb88] sm:$0xff]  ;;  %v384_v56 = vld [vmem:[#allocation4 + $0x980] sm:$0xff] }
  0xc9   :  { %1663 = vmatprep.subr.mxu1 %v415_v57  ;;  %1593 = vmatpush1.msra.mxu0 %v350_v58  ;;  %v448_v57 = vld [vmem:[#allocation4 + $0xb80] sm:$0xff]  ;;  %v383_v58 = vld [vmem:[#allocation4 + $0x978] sm:$0xff] }
  0xca   :  { %1664 = vmatpush1.msra.mxu1 %v414_v59  ;;  %1594 = vmatprep.subr.mxu0 %v349_v60  ;;  %v447_v59 = vld [vmem:[#allocation4 + $0xb78] sm:$0xff]  ;;  %v382_v60 = vld [vmem:[#allocation4 + $0x970] sm:$0xff] }
  0xcb   :  { %1665 = vmatprep.subr.mxu1 %v413_v61  ;;  %1595 = vmatpush1.msra.mxu0 %v348_v62  ;;  %v446_v61 = vld [vmem:[#allocation4 + $0xb70] sm:$0xff]  ;;  %v381_v62 = vld [vmem:[#allocation4 + $0x968] sm:$0xff] }
  0xcc   :  { %1666 = vmatpush1.msra.mxu1 %v412_v63  ;;  %1596 = vmatprep.subr.mxu0 %v347_v0  ;;  %v445_v63 = vld [vmem:[#allocation4 + $0xb68] sm:$0xff]  ;;  %v380_v0 = vld [vmem:[#allocation4 + $0x960] sm:$0xff] }
  0xcd   :  { %1667 = vmatprep.subr.mxu1 %v411_v1  ;;  %1597 = vmatpush1.msra.mxu0 %v346_v2  ;;  %v444_v1 = vld [vmem:[#allocation4 + $0xb60] sm:$0xff]  ;;  %v379_v2 = vld [vmem:[#allocation4 + $0x958] sm:$0xff] }
  0xce   :  { %1668 = vmatpush1.msra.mxu1 %v410_v3  ;;  %1598 = vmatprep.subr.mxu0 %v345_v4  ;;  %v443_v3 = vld [vmem:[#allocation4 + $0xb58] sm:$0xff]  ;;  %v378_v4 = vld [vmem:[#allocation4 + $0x950] sm:$0xff] }
  0xcf   :  { %1669 = vmatprep.subr.mxu1 %v409_v5  ;;  %1599 = vmatpush1.msra.mxu0 %v344_v6  ;;  %v442_v5 = vld [vmem:[#allocation4 + $0xb50] sm:$0xff] }
  0xd0   :  { %1670 = vmatpush1.msra.mxu1 %v408_v7  ;;  %1600 = vmatprep.subr.mxu0 %v343_v8  ;;  %v74_v6 = vld [vmem:[%s2997_s0 + $0x10] sm:$0xff] }
  0xd1   :  { %1671 = vmatprep.subr.mxu1 %v407_v9  ;;  %1601 = vmatpush1.msra.mxu0 %v342_v10  ;;  %v377_v7 = vld [vmem:[#allocation4 + $0x948] sm:$0xff]  ;;  %v376_v9 = vld [vmem:[#allocation4 + $0x940] sm:$0xff] }
  0xd2   :  { %1672 = vmatpush1.msra.mxu1 %v406_v11  ;;  %1602 = vmatprep.subr.mxu0 %v341_v12  ;;  %v441_v8 = vld [vmem:[#allocation4 + $0xb48] sm:$0xff]  ;;  %v440_v10 = vld [vmem:[#allocation4 + $0xb40] sm:$0xff]  ;;  %v375_v11 = vld [vmem:[#allocation4 + $0x938] sm:$0xff] }
  0xd3   :  { %1673 = vmatprep.subr.mxu1 %v405_v13  ;;  %1603 = vmatpush1.msra.mxu0 %v340_v14  ;;  %v439_v12 = vld [vmem:[#allocation4 + $0xb38] sm:$0xff]  ;;  %v1158_v13 = vcombine.high %v74_v6, %v74_v6  ;;  %v374_v14 = vld [vmem:[#allocation4 + $0x930] sm:$0xff] }
  0xd4   :  { %1674 = vmatpush1.msra.mxu1 %v404_v15  ;;  %1604 = vmatprep.subr.mxu0 %v339_v16  ;;  %v438_v15 = vld [vmem:[#allocation4 + $0xb30] sm:$0xff]  ;;  %v373_v16 = vld [vmem:[#allocation4 + $0x928] sm:$0xff] }
  0xd5   :  { %1675 = vmatprep.subr.mxu1 %v403_v17  ;;  %1605 = vmatpush1.msra.mxu0 %v338_v18  ;;  %v437_v17 = vld [vmem:[#allocation4 + $0xb28] sm:$0xff]  ;;  %v1165_v18 = vrot.slane %v74_v6, %v2856_v52 }
  0xd6   :  { %1676 = vmatpush1.msra.mxu1 %v402_v19  ;;  %1606 = vmatprep.subr.mxu0 %v337_v20  ;;  %v372_v19 = vld [vmem:[#allocation4 + $0x920] sm:$0xff]  ;;  %v477_v6 = vld [vmem:[#allocation4 + $0xc68] sm:$0xff] }
  0xd7   :  { %1677 = vmatprep.subr.mxu1 %v401_v21  ;;  %1607 = vmatpush1.msra.mxu0 %v336_v22  ;;  %v436_v20 = vld [vmem:[#allocation4 + $0xb20] sm:$0xff]  ;;  %v371_v21 = vld [vmem:[#allocation4 + $0x918] sm:$0xff] }
  0xd8   :  { %1678 = vmatpush1.msra.mxu1 %v400_v23  ;;  %1608 = vmatprep.subr.mxu0 %v399_v24  ;;  %v435_v22 = vld [vmem:[#allocation4 + $0xb18] sm:$0xff]  ;;  %v1172_v23 = vrot.slane %v1158_v13, %v2856_v52  ;;  %v370_v24 = vld [vmem:[#allocation4 + $0x910] sm:$0xff] }
  0xd9   :  { %1679 = vmatprep.subr.mxu1 %v463_v25  ;;  %1609 = vmatpush2.msra.mxu0 %v398_v26  ;;  %v434_v25 = vld [vmem:[#allocation4 + $0xb10] sm:$0xff]  ;;  %v369_v26 = vld [vmem:[#allocation4 + $0x908] sm:$0xff] }
  0xda   :  { %1680 = vmatpush2.msra.mxu1 %v462_v27  ;;  %1610 = vmatprep.subr.mxu0 %v397_v28  ;;  %v433_v27 = vld [vmem:[#allocation4 + $0xb08] sm:$0xff]  ;;  %v1173_v28 = vcombine.high %v1165_v18, %v1165_v18  ;;  %v538_v13 = vld [vmem:[#allocation4 + $0xe50] sm:$0xff] }
  0xdb   :  { %1681 = vmatprep.subr.mxu1 %v461_v29  ;;  %1611 = vmatpush2.msra.mxu0 %v396_v30  ;;  %v368_v29 = vld [vmem:[#allocation4 + $0x900] sm:$0xff] }
  0xdc   :  { %1682 = vmatpush2.msra.mxu1 %v460_v31  ;;  %1612 = vmatprep.subr.mxu0 %v395_v32  ;;  %v432_v30 = vld [vmem:[#allocation4 + $0xb00] sm:$0xff]  ;;  %v1174_v31 = vcombine.high %v1172_v23, %v1172_v23  ;;  %v495_v32 = vld [vmem:[#allocation4 + $0xcf8] sm:$0xff] }
  0xdd   :  { %1683 = vmatprep.subr.mxu1 %v459_v33  ;;  %1613 = vmatpush2.msra.mxu0 %v394_v34  ;;  %v559_v33 = vld [vmem:[#allocation4 + $0xef8] sm:$0xff]  ;;  %v494_v34 = vld [vmem:[#allocation4 + $0xcf0] sm:$0xff] }
  0xde   :  { %1684 = vmatpush2.msra.mxu1 %v458_v35  ;;  %1614 = vmatprep.subr.mxu0 %v393_v36  ;;  %v558_v35 = vld [vmem:[#allocation4 + $0xef0] sm:$0xff]  ;;  %v493_v36 = vld [vmem:[#allocation4 + $0xce8] sm:$0xff] }
  0xdf   :  { %1685 = vmatprep.subr.mxu1 %v457_v37  ;;  %1615 = vmatpush2.msra.mxu0 %v392_v38  ;;  %v557_v37 = vld [vmem:[#allocation4 + $0xee8] sm:$0xff]  ;;  %v492_v38 = vld [vmem:[#allocation4 + $0xce0] sm:$0xff] }
  0xe0   :  { %1686 = vmatpush2.msra.mxu1 %v456_v39  ;;  %1616 = vmatprep.subr.mxu0 %v391_v40  ;;  %v556_v39 = vld [vmem:[#allocation4 + $0xee0] sm:$0xff]  ;;  %v491_v40 = vld [vmem:[#allocation4 + $0xcd8] sm:$0xff] }
  0xe1   :  { %1687 = vmatprep.subr.mxu1 %v455_v42  ;;  %1617 = vmatpush2.msra.mxu0 %v390_v43  ;;  %v555_v42 = vld [vmem:[#allocation4 + $0xed8] sm:$0xff]  ;;  %v490_v43 = vld [vmem:[#allocation4 + $0xcd0] sm:$0xff] }
  0xe2   :  { %1688 = vmatpush2.msra.mxu1 %v454_v44  ;;  %1618 = vmatprep.subr.mxu0 %v389_v45  ;;  %v554_v44 = vld [vmem:[#allocation4 + $0xed0] sm:$0xff]  ;;  %v489_v45 = vld [vmem:[#allocation4 + $0xcc8] sm:$0xff] }
  0xe3   :  { %1689 = vmatprep.subr.mxu1 %v453_v46  ;;  %1619 = vmatpush2.msra.mxu0 %v388_v47  ;;  %v553_v46 = vld [vmem:[#allocation4 + $0xec8] sm:$0xff]  ;;  %v488_v47 = vld [vmem:[#allocation4 + $0xcc0] sm:$0xff] }
  0xe4   :  { %1690 = vmatpush2.msra.mxu1 %v452_v48  ;;  %1620 = vmatprep.subr.mxu0 %v387_v49  ;;  %v552_v48 = vld [vmem:[#allocation4 + $0xec0] sm:$0xff]  ;;  %v487_v49 = vld [vmem:[#allocation4 + $0xcb8] sm:$0xff] }
  0xe5   :  { %1691 = vmatprep.subr.mxu1 %v451_v50  ;;  %1621 = vmatpush2.msra.mxu0 %v386_v51  ;;  %v551_v50 = vld [vmem:[#allocation4 + $0xeb8] sm:$0xff]  ;;  %v486_v51 = vld [vmem:[#allocation4 + $0xcb0] sm:$0xff] }
  0xe6   :  { %1692 = vmatpush2.msra.mxu1 %v450_v53  ;;  %1622 = vmatprep.subr.mxu0 %v385_v54  ;;  %v550_v53 = vld [vmem:[#allocation4 + $0xeb0] sm:$0xff]  ;;  %v485_v54 = vld [vmem:[#allocation4 + $0xca8] sm:$0xff] }
  0xe7   :  { %1693 = vmatprep.subr.mxu1 %v449_v55  ;;  %1623 = vmatpush2.msra.mxu0 %v384_v56  ;;  %v549_v55 = vld [vmem:[#allocation4 + $0xea8] sm:$0xff]  ;;  %v484_v56 = vld [vmem:[#allocation4 + $0xca0] sm:$0xff] }
  0xe8   :  { %1694 = vmatpush2.msra.mxu1 %v448_v57  ;;  %1624 = vmatprep.subr.mxu0 %v383_v58  ;;  %v548_v57 = vld [vmem:[#allocation4 + $0xea0] sm:$0xff]  ;;  %v483_v58 = vld [vmem:[#allocation4 + $0xc98] sm:$0xff] }
  0xe9   :  { %1695 = vmatprep.subr.mxu1 %v447_v59  ;;  %1625 = vmatpush2.msra.mxu0 %v382_v60  ;;  %v547_v59 = vld [vmem:[#allocation4 + $0xe98] sm:$0xff]  ;;  %v482_v60 = vld [vmem:[#allocation4 + $0xc90] sm:$0xff] }
  0xea   :  { %1696 = vmatpush2.msra.mxu1 %v446_v61  ;;  %1626 = vmatprep.subr.mxu0 %v381_v62  ;;  %v546_v61 = vld [vmem:[#allocation4 + $0xe90] sm:$0xff]  ;;  %v481_v62 = vld [vmem:[#allocation4 + $0xc88] sm:$0xff] }
  0xeb   :  { %1697 = vmatprep.subr.mxu1 %v445_v63  ;;  %1627 = vmatpush2.msra.mxu0 %v380_v0  ;;  %v545_v63 = vld [vmem:[#allocation4 + $0xe88] sm:$0xff]  ;;  %v480_v0 = vld [vmem:[#allocation4 + $0xc80] sm:$0xff] }
  0xec   :  { %1698 = vmatpush2.msra.mxu1 %v444_v1  ;;  %1628 = vmatprep.subr.mxu0 %v379_v2  ;;  %v544_v1 = vld [vmem:[#allocation4 + $0xe80] sm:$0xff]  ;;  %v479_v2 = vld [vmem:[#allocation4 + $0xc78] sm:$0xff] }
  0xed   :  { %1699 = vmatprep.subr.mxu1 %v443_v3  ;;  %1629 = vmatpush2.msra.mxu0 %v378_v4  ;;  %v543_v3 = vld [vmem:[#allocation4 + $0xe78] sm:$0xff]  ;;  %v478_v4 = vld [vmem:[#allocation4 + $0xc70] sm:$0xff] }
  0xee   :  { %1700 = vmatpush2.msra.mxu1 %v442_v5  ;;  %1630 = vmatprep.subr.mxu0 %v377_v7  ;;  %v542_v5 = vld [vmem:[#allocation4 + $0xe70] sm:$0xff]  ;;  %v541_v7 = vld [vmem:[#allocation4 + $0xe68] sm:$0xff] }
  0xef   :  { %1701 = vmatprep.subr.mxu1 %v441_v8  ;;  %1631 = vmatpush2.msra.mxu0 %v376_v9  ;;  %v476_v8 = vld [vmem:[#allocation4 + $0xc60] sm:$0xff] }
  0xf0   :  { %1702 = vmatpush2.msra.mxu1 %v440_v10  ;;  %1632 = vmatprep.subr.mxu0 %v375_v11  ;;  %v540_v9 = vld [vmem:[#allocation4 + $0xe60] sm:$0xff]  ;;  %v475_v10 = vld [vmem:[#allocation4 + $0xc58] sm:$0xff] }
  0xf1   :  { %1703 = vmatprep.subr.mxu1 %v439_v12  ;;  %1633 = vmatpush2.msra.mxu0 %v374_v14  ;;  %v539_v11 = vld [vmem:[#allocation4 + $0xe58] sm:$0xff]  ;;  %v474_v12 = vld [vmem:[#allocation4 + $0xc50] sm:$0xff]  ;;  %v473_v14 = vld [vmem:[#allocation4 + $0xc48] sm:$0xff] }
  0xf2   :  { %1704 = vmatpush2.msra.mxu1 %v438_v15  ;;  %1634 = vmatprep.subr.mxu0 %v373_v16  ;;  %v537_v15 = vld [vmem:[#allocation4 + $0xe48] sm:$0xff]  ;;  %v472_v16 = vld [vmem:[#allocation4 + $0xc40] sm:$0xff] }
  0xf3   :  { %1705 = vmatprep.subr.mxu1 %v437_v17  ;;  %1635 = vmatpush2.msra.mxu0 %v372_v19  ;;  %v536_v17 = vld [vmem:[#allocation4 + $0xe40] sm:$0xff]  ;;  %v535_v19 = vld [vmem:[#allocation4 + $0xe38] sm:$0xff] }
  0xf4   :  { %1706 = vmatpush2.msra.mxu1 %v436_v20  ;;  %1636 = vmatprep.subr.mxu0 %v371_v21  ;;  %v470_v20 = vld [vmem:[#allocation4 + $0xc30] sm:$0xff] }
  0xf5   :  { %1707 = vmatprep.subr.mxu1 %v435_v22  ;;  %1637 = vmatpush2.msra.mxu0 %v370_v24  ;;  %v534_v21 = vld [vmem:[#allocation4 + $0xe30] sm:$0xff]  ;;  %v469_v22 = vld [vmem:[#allocation4 + $0xc28] sm:$0xff]  ;;  %v468_v24 = vld [vmem:[#allocation4 + $0xc20] sm:$0xff] }
  0xf6   :  { %1708 = vmatpush2.msra.mxu1 %v434_v25  ;;  %1638 = vmatprep.subr.mxu0 %v369_v26  ;;  %v532_v25 = vld [vmem:[#allocation4 + $0xe20] sm:$0xff]  ;;  %v467_v26 = vld [vmem:[#allocation4 + $0xc18] sm:$0xff] }
  0xf7   :  { %1709 = vmatprep.subr.mxu1 %v433_v27  ;;  %1639 = vmatpush2.msra.mxu0 %v368_v29  ;;  %v531_v27 = vld [vmem:[#allocation4 + $0xe18] sm:$0xff]  ;;  %v530_v29 = vld [vmem:[#allocation4 + $0xe10] sm:$0xff] }
  0xf8   :  { %1640 = vmatprep.mubr.f32.mxu0 %v1173_v28  ;;  %1710 = vmatpush2.msra.mxu1 %v432_v30  ;;  %v466_v28 = vld [vmem:[#allocation4 + $0xc10] sm:$0xff]  ;;  %v465_v30 = vld [vmem:[#allocation4 + $0xc08] sm:$0xff] }
  0xf9   :  { %1641 = vmatmul.mubr.f32.vlgmr.msra.gmra.mxu0 %v1165_v18  ;;  %1711 = vmatprep.mubr.f32.mxu1 %v1174_v31  ;;  %v471_v18 = vld [vmem:[#allocation4 + $0xc38] sm:$0xff]  ;;  %v529_v31 = vld [vmem:[#allocation4 + $0xe08] sm:$0xff] }
  0xfa   :  { %1718 = vmatprep.subr.mxu0 %v495_v32  ;;  %1789 = vmatprep.subr.mxu1 %v559_v33  ;;  %v464_v32 = vld [vmem:[#allocation4 + $0xc00] sm:$0xff] }
  0xfb   :  { %1712 = vmatmul.mubr.f32.vlgmr.msra.gmra.mxu1 %v1172_v23  ;;  %1719 = vmatpush1.msra.mxu0 %v494_v34  ;;  %v533_v23 = vld [vmem:[#allocation4 + $0xe28] sm:$0xff]  ;;  %v528_v33 = vld [vmem:[#allocation4 + $0xe00] sm:$0xff]  ;;  %v527_v34 = vld [vmem:[#allocation4 + $0xdf8] sm:$0xff] }
  0xfc   :  { %1790 = vmatpush1.msra.mxu1 %v558_v35  ;;  %1720 = vmatprep.subr.mxu0 %v493_v36  ;;  %v591_v35 = vld [vmem:[#allocation4 + $0xff8] sm:$0xff]  ;;  %v526_v36 = vld [vmem:[#allocation4 + $0xdf0] sm:$0xff] }
  0xfd   :  { %1791 = vmatprep.subr.mxu1 %v557_v37  ;;  %1721 = vmatpush1.msra.mxu0 %v492_v38  ;;  %v590_v37 = vld [vmem:[#allocation4 + $0xff0] sm:$0xff]  ;;  %v525_v38 = vld [vmem:[#allocation4 + $0xde8] sm:$0xff] }
  0xfe   :  { %1792 = vmatpush1.msra.mxu1 %v556_v39  ;;  %1722 = vmatprep.subr.mxu0 %v491_v40  ;;  %v589_v39 = vld [vmem:[#allocation4 + $0xfe8] sm:$0xff]  ;;  %v524_v40 = vld [vmem:[#allocation4 + $0xde0] sm:$0xff] }
  0xff   :  { %1793 = vmatprep.subr.mxu1 %v555_v42  ;;  %1723 = vmatpush1.msra.mxu0 %v490_v43  ;;  %v588_v42 = vld [vmem:[#allocation4 + $0xfe0] sm:$0xff]  ;;  %v523_v43 = vld [vmem:[#allocation4 + $0xdd8] sm:$0xff] }
 0x100   :  { %1794 = vmatpush1.msra.mxu1 %v554_v44  ;;  %1724 = vmatprep.subr.mxu0 %v489_v45  ;;  %v587_v44 = vld [vmem:[#allocation4 + $0xfd8] sm:$0xff]  ;;  %v522_v45 = vld [vmem:[#allocation4 + $0xdd0] sm:$0xff] }
 0x101   :  { %1795 = vmatprep.subr.mxu1 %v553_v46  ;;  %1725 = vmatpush1.msra.mxu0 %v488_v47  ;;  %v586_v46 = vld [vmem:[#allocation4 + $0xfd0] sm:$0xff]  ;;  %v521_v47 = vld [vmem:[#allocation4 + $0xdc8] sm:$0xff] }
 0x102   :  { %1796 = vmatpush1.msra.mxu1 %v552_v48  ;;  %1726 = vmatprep.subr.mxu0 %v487_v49  ;;  %v585_v48 = vld [vmem:[#allocation4 + $0xfc8] sm:$0xff]  ;;  %v520_v49 = vld [vmem:[#allocation4 + $0xdc0] sm:$0xff] }
 0x103   :  { %1797 = vmatprep.subr.mxu1 %v551_v50  ;;  %1727 = vmatpush1.msra.mxu0 %v486_v51  ;;  %v584_v50 = vld [vmem:[#allocation4 + $0xfc0] sm:$0xff]  ;;  %v519_v51 = vld [vmem:[#allocation4 + $0xdb8] sm:$0xff] }
 0x104   :  { %1798 = vmatpush1.msra.mxu1 %v550_v53  ;;  %1728 = vmatprep.subr.mxu0 %v485_v54  ;;  %v583_v53 = vld [vmem:[#allocation4 + $0xfb8] sm:$0xff]  ;;  %v518_v54 = vld [vmem:[#allocation4 + $0xdb0] sm:$0xff] }
 0x105   :  { %1799 = vmatprep.subr.mxu1 %v549_v55  ;;  %1729 = vmatpush1.msra.mxu0 %v484_v56  ;;  %v582_v55 = vld [vmem:[#allocation4 + $0xfb0] sm:$0xff]  ;;  %v517_v56 = vld [vmem:[#allocation4 + $0xda8] sm:$0xff] }
 0x106   :  { %1800 = vmatpush1.msra.mxu1 %v548_v57  ;;  %1730 = vmatprep.subr.mxu0 %v483_v58  ;;  %v581_v57 = vld [vmem:[#allocation4 + $0xfa8] sm:$0xff]  ;;  %v516_v58 = vld [vmem:[#allocation4 + $0xda0] sm:$0xff] }
 0x107   :  { %1801 = vmatprep.subr.mxu1 %v547_v59  ;;  %1731 = vmatpush1.msra.mxu0 %v482_v60  ;;  %v580_v59 = vld [vmem:[#allocation4 + $0xfa0] sm:$0xff]  ;;  %v515_v60 = vld [vmem:[#allocation4 + $0xd98] sm:$0xff] }
 0x108   :  { %1802 = vmatpush1.msra.mxu1 %v546_v61  ;;  %1732 = vmatprep.subr.mxu0 %v481_v62  ;;  %v579_v61 = vld [vmem:[#allocation4 + $0xf98] sm:$0xff]  ;;  %v514_v62 = vld [vmem:[#allocation4 + $0xd90] sm:$0xff] }
 0x109   :  { %1803 = vmatprep.subr.mxu1 %v545_v63  ;;  %1733 = vmatpush1.msra.mxu0 %v480_v0  ;;  %v578_v63 = vld [vmem:[#allocation4 + $0xf90] sm:$0xff]  ;;  %v513_v0 = vld [vmem:[#allocation4 + $0xd88] sm:$0xff] }
 0x10a   :  { %1804 = vmatpush1.msra.mxu1 %v544_v1  ;;  %1734 = vmatprep.subr.mxu0 %v479_v2  ;;  %v577_v1 = vld [vmem:[#allocation4 + $0xf88] sm:$0xff]  ;;  %v512_v2 = vld [vmem:[#allocation4 + $0xd80] sm:$0xff] }
 0x10b   :  { %1805 = vmatprep.subr.mxu1 %v543_v3  ;;  %1735 = vmatpush1.msra.mxu0 %v478_v4  ;;  %v576_v3 = vld [vmem:[#allocation4 + $0xf80] sm:$0xff]  ;;  %v511_v4 = vld [vmem:[#allocation4 + $0xd78] sm:$0xff] }
 0x10c   :  { %1806 = vmatpush1.msra.mxu1 %v542_v5  ;;  %1736 = vmatprep.subr.mxu0 %v477_v6  ;;  %v575_v5 = vld [vmem:[#allocation4 + $0xf78] sm:$0xff]  ;;  %v510_v6 = vld [vmem:[#allocation4 + $0xd70] sm:$0xff] }
 0x10d   :  { %1807 = vmatprep.subr.mxu1 %v541_v7  ;;  %1737 = vmatpush1.msra.mxu0 %v476_v8  ;;  %v574_v7 = vld [vmem:[#allocation4 + $0xf70] sm:$0xff]  ;;  %v509_v8 = vld [vmem:[#allocation4 + $0xd68] sm:$0xff] }
 0x10e   :  { %1808 = vmatpush1.msra.mxu1 %v540_v9  ;;  %1738 = vmatprep.subr.mxu0 %v475_v10  ;;  %v573_v9 = vld [vmem:[#allocation4 + $0xf68] sm:$0xff]  ;;  %v508_v10 = vld [vmem:[#allocation4 + $0xd60] sm:$0xff] }
 0x10f   :  { %1809 = vmatprep.subr.mxu1 %v539_v11  ;;  %1739 = vmatpush1.msra.mxu0 %v474_v12  ;;  %v572_v11 = vld [vmem:[#allocation4 + $0xf60] sm:$0xff]  ;;  %v507_v12 = vld [vmem:[#allocation4 + $0xd58] sm:$0xff] }
 0x110   :  { %1810 = vmatpush1.msra.mxu1 %v538_v13  ;;  %1740 = vmatprep.subr.mxu0 %v473_v14  ;;  %v571_v13 = vld [vmem:[#allocation4 + $0xf58] sm:$0xff]  ;;  %v506_v14 = vld [vmem:[#allocation4 + $0xd50] sm:$0xff] }
 0x111   :  { %1811 = vmatprep.subr.mxu1 %v537_v15  ;;  %1741 = vmatpush1.msra.mxu0 %v472_v16  ;;  %v570_v15 = vld [vmem:[#allocation4 + $0xf50] sm:$0xff] }
 0x112   :  { %1812 = vmatpush1.msra.mxu1 %v536_v17  ;;  %1742 = vmatprep.subr.mxu0 %v471_v18  ;;  %v75_v16 = vld [vmem:[%s2997_s0 + $0x18] sm:$0xff]  ;;  %v505_v17 = vld [vmem:[#allocation4 + $0xd48] sm:$0xff] }
 0x113   :  { %1813 = vmatprep.subr.mxu1 %v535_v19  ;;  %1743 = vmatpush1.msra.mxu0 %v470_v20  ;;  %v569_v18 = vld [vmem:[#allocation4 + $0xf48] sm:$0xff]  ;;  %v504_v19 = vld [vmem:[#allocation4 + $0xd40] sm:$0xff] }
 0x114   :  { %1814 = vmatpush1.msra.mxu1 %v534_v21  ;;  %1744 = vmatprep.subr.mxu0 %v469_v22  ;;  %v568_v20 = vld [vmem:[#allocation4 + $0xf40] sm:$0xff]  ;;  %v503_v21 = vld [vmem:[#allocation4 + $0xd38] sm:$0xff] }
 0x115   :  { %1815 = vmatprep.subr.mxu1 %v533_v23  ;;  %1745 = vmatpush1.msra.mxu0 %v468_v24  ;;  %v567_v22 = vld [vmem:[#allocation4 + $0xf38] sm:$0xff]  ;;  %v1175_v23 = vcombine.high %v75_v16, %v75_v16  ;;  %v502_v24 = vld [vmem:[#allocation4 + $0xd30] sm:$0xff] }
 0x116   :  { %1816 = vmatpush1.msra.mxu1 %v532_v25  ;;  %1746 = vmatprep.subr.mxu0 %v467_v26  ;;  %v566_v25 = vld [vmem:[#allocation4 + $0xf30] sm:$0xff]  ;;  %v501_v26 = vld [vmem:[#allocation4 + $0xd28] sm:$0xff] }
 0x117   :  { %1817 = vmatprep.subr.mxu1 %v531_v27  ;;  %1747 = vmatpush1.msra.mxu0 %v466_v28  ;;  %v565_v27 = vld [vmem:[#allocation4 + $0xf28] sm:$0xff]  ;;  %v1182_v28 = vrot.slane %v75_v16, %v2856_v52 }
 0x118   :  { %1818 = vmatpush1.msra.mxu1 %v530_v29  ;;  %1748 = vmatprep.subr.mxu0 %v465_v30  ;;  %v500_v29 = vld [vmem:[#allocation4 + $0xd20] sm:$0xff]  ;;  %v605_v16 = vld [vmem:[#allocation4 + $0x1068] sm:$0xff] }
 0x119   :  { %1819 = vmatprep.subr.mxu1 %v529_v31  ;;  %1749 = vmatpush1.msra.mxu0 %v464_v32  ;;  %v564_v30 = vld [vmem:[#allocation4 + $0xf20] sm:$0xff]  ;;  %v499_v31 = vld [vmem:[#allocation4 + $0xd18] sm:$0xff] }
 0x11a   :  { %1820 = vmatpush1.msra.mxu1 %v528_v33  ;;  %1750 = vmatprep.subr.mxu0 %v527_v34  ;;  %v563_v32 = vld [vmem:[#allocation4 + $0xf18] sm:$0xff]  ;;  %v1189_v33 = vrot.slane %v1175_v23, %v2856_v52  ;;  %v498_v34 = vld [vmem:[#allocation4 + $0xd10] sm:$0xff] }
 0x11b   :  { %1821 = vmatprep.subr.mxu1 %v591_v35  ;;  %1751 = vmatpush2.msra.mxu0 %v526_v36  ;;  %v562_v35 = vld [vmem:[#allocation4 + $0xf10] sm:$0xff]  ;;  %v497_v36 = vld [vmem:[#allocation4 + $0xd08] sm:$0xff] }
 0x11c   :  { %1822 = vmatpush2.msra.mxu1 %v590_v37  ;;  %1752 = vmatprep.subr.mxu0 %v525_v38  ;;  %v561_v37 = vld [vmem:[#allocation4 + $0xf08] sm:$0xff]  ;;  %v1190_v38 = vcombine.high %v1182_v28, %v1182_v28  ;;  %v666_v23 = vld [vmem:[#allocation4 + $0x1250] sm:$0xff] }
 0x11d   :  { %1823 = vmatprep.subr.mxu1 %v589_v39  ;;  %1753 = vmatpush2.msra.mxu0 %v524_v40  ;;  %v496_v39 = vld [vmem:[#allocation4 + $0xd00] sm:$0xff] }
 0x11e   :  { %1824 = vmatpush2.msra.mxu1 %v588_v42  ;;  %1754 = vmatprep.subr.mxu0 %v523_v43  ;;  %v560_v40 = vld [vmem:[#allocation4 + $0xf00] sm:$0xff]  ;;  %v1191_v42 = vcombine.high %v1189_v33, %v1189_v33  ;;  %v623_v43 = vld [vmem:[#allocation4 + $0x10f8] sm:$0xff] }
 0x11f   :  { %1825 = vmatprep.subr.mxu1 %v587_v44  ;;  %1755 = vmatpush2.msra.mxu0 %v522_v45  ;;  %v687_v44 = vld [vmem:[#allocation4 + $0x12f8] sm:$0xff]  ;;  %v622_v45 = vld [vmem:[#allocation4 + $0x10f0] sm:$0xff] }
 0x120   :  { %1826 = vmatpush2.msra.mxu1 %v586_v46  ;;  %1756 = vmatprep.subr.mxu0 %v521_v47  ;;  %v686_v46 = vld [vmem:[#allocation4 + $0x12f0] sm:$0xff]  ;;  %v621_v47 = vld [vmem:[#allocation4 + $0x10e8] sm:$0xff] }
 0x121   :  { %1827 = vmatprep.subr.mxu1 %v585_v48  ;;  %1757 = vmatpush2.msra.mxu0 %v520_v49  ;;  %v685_v48 = vld [vmem:[#allocation4 + $0x12e8] sm:$0xff]  ;;  %v620_v49 = vld [vmem:[#allocation4 + $0x10e0] sm:$0xff] }
 0x122   :  { %1828 = vmatpush2.msra.mxu1 %v584_v50  ;;  %1758 = vmatprep.subr.mxu0 %v519_v51  ;;  %v684_v50 = vld [vmem:[#allocation4 + $0x12e0] sm:$0xff]  ;;  %v619_v51 = vld [vmem:[#allocation4 + $0x10d8] sm:$0xff] }
 0x123   :  { %1829 = vmatprep.subr.mxu1 %v583_v53  ;;  %1759 = vmatpush2.msra.mxu0 %v518_v54  ;;  %v683_v53 = vld [vmem:[#allocation4 + $0x12d8] sm:$0xff]  ;;  %v618_v54 = vld [vmem:[#allocation4 + $0x10d0] sm:$0xff] }
 0x124   :  { %1830 = vmatpush2.msra.mxu1 %v582_v55  ;;  %1760 = vmatprep.subr.mxu0 %v517_v56  ;;  %v682_v55 = vld [vmem:[#allocation4 + $0x12d0] sm:$0xff]  ;;  %v617_v56 = vld [vmem:[#allocation4 + $0x10c8] sm:$0xff] }
 0x125   :  { %1831 = vmatprep.subr.mxu1 %v581_v57  ;;  %1761 = vmatpush2.msra.mxu0 %v516_v58  ;;  %v681_v57 = vld [vmem:[#allocation4 + $0x12c8] sm:$0xff]  ;;  %v616_v58 = vld [vmem:[#allocation4 + $0x10c0] sm:$0xff] }
 0x126   :  { %1832 = vmatpush2.msra.mxu1 %v580_v59  ;;  %1762 = vmatprep.subr.mxu0 %v515_v60  ;;  %v680_v59 = vld [vmem:[#allocation4 + $0x12c0] sm:$0xff]  ;;  %v615_v60 = vld [vmem:[#allocation4 + $0x10b8] sm:$0xff] }
 0x127   :  { %1833 = vmatprep.subr.mxu1 %v579_v61  ;;  %1763 = vmatpush2.msra.mxu0 %v514_v62  ;;  %v679_v61 = vld [vmem:[#allocation4 + $0x12b8] sm:$0xff]  ;;  %v614_v62 = vld [vmem:[#allocation4 + $0x10b0] sm:$0xff] }
 0x128   :  { %1834 = vmatpush2.msra.mxu1 %v578_v63  ;;  %1764 = vmatprep.subr.mxu0 %v513_v0  ;;  %v678_v63 = vld [vmem:[#allocation4 + $0x12b0] sm:$0xff]  ;;  %v613_v0 = vld [vmem:[#allocation4 + $0x10a8] sm:$0xff] }
 0x129   :  { %1835 = vmatprep.subr.mxu1 %v577_v1  ;;  %1765 = vmatpush2.msra.mxu0 %v512_v2  ;;  %v677_v1 = vld [vmem:[#allocation4 + $0x12a8] sm:$0xff]  ;;  %v612_v2 = vld [vmem:[#allocation4 + $0x10a0] sm:$0xff] }
 0x12a   :  { %1836 = vmatpush2.msra.mxu1 %v576_v3  ;;  %1766 = vmatprep.subr.mxu0 %v511_v4  ;;  %v676_v3 = vld [vmem:[#allocation4 + $0x12a0] sm:$0xff]  ;;  %v611_v4 = vld [vmem:[#allocation4 + $0x1098] sm:$0xff] }
 0x12b   :  { %1837 = vmatprep.subr.mxu1 %v575_v5  ;;  %1767 = vmatpush2.msra.mxu0 %v510_v6  ;;  %v675_v5 = vld [vmem:[#allocation4 + $0x1298] sm:$0xff]  ;;  %v610_v6 = vld [vmem:[#allocation4 + $0x1090] sm:$0xff] }
 0x12c   :  { %1838 = vmatpush2.msra.mxu1 %v574_v7  ;;  %1768 = vmatprep.subr.mxu0 %v509_v8  ;;  %v674_v7 = vld [vmem:[#allocation4 + $0x1290] sm:$0xff]  ;;  %v609_v8 = vld [vmem:[#allocation4 + $0x1088] sm:$0xff] }
 0x12d   :  { %1839 = vmatprep.subr.mxu1 %v573_v9  ;;  %1769 = vmatpush2.msra.mxu0 %v508_v10  ;;  %v673_v9 = vld [vmem:[#allocation4 + $0x1288] sm:$0xff]  ;;  %v608_v10 = vld [vmem:[#allocation4 + $0x1080] sm:$0xff] }
 0x12e   :  { %1840 = vmatpush2.msra.mxu1 %v572_v11  ;;  %1770 = vmatprep.subr.mxu0 %v507_v12  ;;  %v672_v11 = vld [vmem:[#allocation4 + $0x1280] sm:$0xff]  ;;  %v607_v12 = vld [vmem:[#allocation4 + $0x1078] sm:$0xff] }
 0x12f   :  { %1841 = vmatprep.subr.mxu1 %v571_v13  ;;  %1771 = vmatpush2.msra.mxu0 %v506_v14  ;;  %v671_v13 = vld [vmem:[#allocation4 + $0x1278] sm:$0xff]  ;;  %v606_v14 = vld [vmem:[#allocation4 + $0x1070] sm:$0xff] }
 0x130   :  { %1842 = vmatpush2.msra.mxu1 %v570_v15  ;;  %1772 = vmatprep.subr.mxu0 %v505_v17  ;;  %v670_v15 = vld [vmem:[#allocation4 + $0x1270] sm:$0xff]  ;;  %v669_v17 = vld [vmem:[#allocation4 + $0x1268] sm:$0xff] }
 0x131   :  { %1843 = vmatprep.subr.mxu1 %v569_v18  ;;  %1773 = vmatpush2.msra.mxu0 %v504_v19  ;;  %v604_v18 = vld [vmem:[#allocation4 + $0x1060] sm:$0xff] }
 0x132   :  { %1844 = vmatpush2.msra.mxu1 %v568_v20  ;;  %1774 = vmatprep.subr.mxu0 %v503_v21  ;;  %v668_v19 = vld [vmem:[#allocation4 + $0x1260] sm:$0xff]  ;;  %v603_v20 = vld [vmem:[#allocation4 + $0x1058] sm:$0xff] }
 0x133   :  { %1845 = vmatprep.subr.mxu1 %v567_v22  ;;  %1775 = vmatpush2.msra.mxu0 %v502_v24  ;;  %v667_v21 = vld [vmem:[#allocation4 + $0x1258] sm:$0xff]  ;;  %v602_v22 = vld [vmem:[#allocation4 + $0x1050] sm:$0xff]  ;;  %v601_v24 = vld [vmem:[#allocation4 + $0x1048] sm:$0xff] }
 0x134   :  { %1846 = vmatpush2.msra.mxu1 %v566_v25  ;;  %1776 = vmatprep.subr.mxu0 %v501_v26  ;;  %v665_v25 = vld [vmem:[#allocation4 + $0x1248] sm:$0xff]  ;;  %v600_v26 = vld [vmem:[#allocation4 + $0x1040] sm:$0xff] }
 0x135   :  { %1847 = vmatprep.subr.mxu1 %v565_v27  ;;  %1777 = vmatpush2.msra.mxu0 %v500_v29  ;;  %v664_v27 = vld [vmem:[#allocation4 + $0x1240] sm:$0xff]  ;;  %v663_v29 = vld [vmem:[#allocation4 + $0x1238] sm:$0xff] }
 0x136   :  { %1848 = vmatpush2.msra.mxu1 %v564_v30  ;;  %1778 = vmatprep.subr.mxu0 %v499_v31  ;;  %v598_v30 = vld [vmem:[#allocation4 + $0x1030] sm:$0xff] }
 0x137   :  { %1849 = vmatprep.subr.mxu1 %v563_v32  ;;  %1779 = vmatpush2.msra.mxu0 %v498_v34  ;;  %v662_v31 = vld [vmem:[#allocation4 + $0x1230] sm:$0xff]  ;;  %v597_v32 = vld [vmem:[#allocation4 + $0x1028] sm:$0xff]  ;;  %v596_v34 = vld [vmem:[#allocation4 + $0x1020] sm:$0xff] }
 0x138   :  { %1850 = vmatpush2.msra.mxu1 %v562_v35  ;;  %1780 = vmatprep.subr.mxu0 %v497_v36  ;;  %v660_v35 = vld [vmem:[#allocation4 + $0x1220] sm:$0xff]  ;;  %v595_v36 = vld [vmem:[#allocation4 + $0x1018] sm:$0xff] }
 0x139   :  { %1851 = vmatprep.subr.mxu1 %v561_v37  ;;  %1781 = vmatpush2.msra.mxu0 %v496_v39  ;;  %v659_v37 = vld [vmem:[#allocation4 + $0x1218] sm:$0xff]  ;;  %v658_v39 = vld [vmem:[#allocation4 + $0x1210] sm:$0xff] }
 0x13a   :  { %1782 = vmatprep.mubr.f32.mxu0 %v1190_v38  ;;  %1852 = vmatpush2.msra.mxu1 %v560_v40  ;;  %v594_v38 = vld [vmem:[#allocation4 + $0x1010] sm:$0xff]  ;;  %v593_v40 = vld [vmem:[#allocation4 + $0x1008] sm:$0xff] }
 0x13b   :  { %1783 = vmatmul.mubr.f32.vlgmr.msra.gmra.mxu0 %v1182_v28  ;;  %1853 = vmatprep.mubr.f32.mxu1 %v1191_v42  ;;  %v599_v28 = vld [vmem:[#allocation4 + $0x1038] sm:$0xff]  ;;  %v657_v42 = vld [vmem:[#allocation4 + $0x1208] sm:$0xff] }
 0x13c   :  { %1860 = vmatprep.subr.mxu0 %v623_v43  ;;  %1931 = vmatprep.subr.mxu1 %v687_v44  ;;  %v592_v43 = vld [vmem:[#allocation4 + $0x1000] sm:$0xff] }
 0x13d   :  { %1854 = vmatmul.mubr.f32.vlgmr.msra.gmra.mxu1 %v1189_v33  ;;  %1861 = vmatpush1.msra.mxu0 %v622_v45  ;;  %v661_v33 = vld [vmem:[#allocation4 + $0x1228] sm:$0xff]  ;;  %v656_v44 = vld [vmem:[#allocation4 + $0x1200] sm:$0xff]  ;;  %v655_v45 = vld [vmem:[#allocation4 + $0x11f8] sm:$0xff] }
 0x13e   :  { %1932 = vmatpush1.msra.mxu1 %v686_v46  ;;  %1862 = vmatprep.subr.mxu0 %v621_v47  ;;  %v719_v46 = vld [vmem:[#allocation4 + $0x13f8] sm:$0xff]  ;;  %v654_v47 = vld [vmem:[#allocation4 + $0x11f0] sm:$0xff] }
 0x13f   :  { %1933 = vmatprep.subr.mxu1 %v685_v48  ;;  %1863 = vmatpush1.msra.mxu0 %v620_v49  ;;  %v718_v48 = vld [vmem:[#allocation4 + $0x13f0] sm:$0xff]  ;;  %v653_v49 = vld [vmem:[#allocation4 + $0x11e8] sm:$0xff] }
 0x140   :  { %1934 = vmatpush1.msra.mxu1 %v684_v50  ;;  %1864 = vmatprep.subr.mxu0 %v619_v51  ;;  %v717_v50 = vld [vmem:[#allocation4 + $0x13e8] sm:$0xff]  ;;  %v652_v51 = vld [vmem:[#allocation4 + $0x11e0] sm:$0xff] }
 0x141   :  { %1935 = vmatprep.subr.mxu1 %v683_v53  ;;  %1865 = vmatpush1.msra.mxu0 %v618_v54  ;;  %v716_v53 = vld [vmem:[#allocation4 + $0x13e0] sm:$0xff]  ;;  %v651_v54 = vld [vmem:[#allocation4 + $0x11d8] sm:$0xff] }
 0x142   :  { %1936 = vmatpush1.msra.mxu1 %v682_v55  ;;  %1866 = vmatprep.subr.mxu0 %v617_v56  ;;  %v715_v55 = vld [vmem:[#allocation4 + $0x13d8] sm:$0xff]  ;;  %v650_v56 = vld [vmem:[#allocation4 + $0x11d0] sm:$0xff] }
 0x143   :  { %1937 = vmatprep.subr.mxu1 %v681_v57  ;;  %1867 = vmatpush1.msra.mxu0 %v616_v58  ;;  %v714_v57 = vld [vmem:[#allocation4 + $0x13d0] sm:$0xff]  ;;  %v649_v58 = vld [vmem:[#allocation4 + $0x11c8] sm:$0xff] }
 0x144   :  { %1938 = vmatpush1.msra.mxu1 %v680_v59  ;;  %1868 = vmatprep.subr.mxu0 %v615_v60  ;;  %v713_v59 = vld [vmem:[#allocation4 + $0x13c8] sm:$0xff]  ;;  %v648_v60 = vld [vmem:[#allocation4 + $0x11c0] sm:$0xff] }
 0x145   :  { %1939 = vmatprep.subr.mxu1 %v679_v61  ;;  %1869 = vmatpush1.msra.mxu0 %v614_v62  ;;  %v712_v61 = vld [vmem:[#allocation4 + $0x13c0] sm:$0xff]  ;;  %v647_v62 = vld [vmem:[#allocation4 + $0x11b8] sm:$0xff] }
 0x146   :  { %1940 = vmatpush1.msra.mxu1 %v678_v63  ;;  %1870 = vmatprep.subr.mxu0 %v613_v0  ;;  %v711_v63 = vld [vmem:[#allocation4 + $0x13b8] sm:$0xff]  ;;  %v646_v0 = vld [vmem:[#allocation4 + $0x11b0] sm:$0xff] }
 0x147   :  { %1941 = vmatprep.subr.mxu1 %v677_v1  ;;  %1871 = vmatpush1.msra.mxu0 %v612_v2  ;;  %v710_v1 = vld [vmem:[#allocation4 + $0x13b0] sm:$0xff]  ;;  %v645_v2 = vld [vmem:[#allocation4 + $0x11a8] sm:$0xff] }
 0x148   :  { %1942 = vmatpush1.msra.mxu1 %v676_v3  ;;  %1872 = vmatprep.subr.mxu0 %v611_v4  ;;  %v709_v3 = vld [vmem:[#allocation4 + $0x13a8] sm:$0xff]  ;;  %v644_v4 = vld [vmem:[#allocation4 + $0x11a0] sm:$0xff] }
 0x149   :  { %1943 = vmatprep.subr.mxu1 %v675_v5  ;;  %1873 = vmatpush1.msra.mxu0 %v610_v6  ;;  %v708_v5 = vld [vmem:[#allocation4 + $0x13a0] sm:$0xff]  ;;  %v643_v6 = vld [vmem:[#allocation4 + $0x1198] sm:$0xff] }
 0x14a   :  { %1944 = vmatpush1.msra.mxu1 %v674_v7  ;;  %1874 = vmatprep.subr.mxu0 %v609_v8  ;;  %v707_v7 = vld [vmem:[#allocation4 + $0x1398] sm:$0xff]  ;;  %v642_v8 = vld [vmem:[#allocation4 + $0x1190] sm:$0xff] }
 0x14b   :  { %1945 = vmatprep.subr.mxu1 %v673_v9  ;;  %1875 = vmatpush1.msra.mxu0 %v608_v10  ;;  %v706_v9 = vld [vmem:[#allocation4 + $0x1390] sm:$0xff]  ;;  %v641_v10 = vld [vmem:[#allocation4 + $0x1188] sm:$0xff] }
 0x14c   :  { %1946 = vmatpush1.msra.mxu1 %v672_v11  ;;  %1876 = vmatprep.subr.mxu0 %v607_v12  ;;  %v705_v11 = vld [vmem:[#allocation4 + $0x1388] sm:$0xff]  ;;  %v640_v12 = vld [vmem:[#allocation4 + $0x1180] sm:$0xff] }
 0x14d   :  { %1947 = vmatprep.subr.mxu1 %v671_v13  ;;  %1877 = vmatpush1.msra.mxu0 %v606_v14  ;;  %v704_v13 = vld [vmem:[#allocation4 + $0x1380] sm:$0xff]  ;;  %v639_v14 = vld [vmem:[#allocation4 + $0x1178] sm:$0xff] }
 0x14e   :  { %1948 = vmatpush1.msra.mxu1 %v670_v15  ;;  %1878 = vmatprep.subr.mxu0 %v605_v16  ;;  %v703_v15 = vld [vmem:[#allocation4 + $0x1378] sm:$0xff]  ;;  %v638_v16 = vld [vmem:[#allocation4 + $0x1170] sm:$0xff] }
 0x14f   :  { %1949 = vmatprep.subr.mxu1 %v669_v17  ;;  %1879 = vmatpush1.msra.mxu0 %v604_v18  ;;  %v702_v17 = vld [vmem:[#allocation4 + $0x1370] sm:$0xff]  ;;  %v637_v18 = vld [vmem:[#allocation4 + $0x1168] sm:$0xff] }
 0x150   :  { %1950 = vmatpush1.msra.mxu1 %v668_v19  ;;  %1880 = vmatprep.subr.mxu0 %v603_v20  ;;  %v701_v19 = vld [vmem:[#allocation4 + $0x1368] sm:$0xff]  ;;  %v636_v20 = vld [vmem:[#allocation4 + $0x1160] sm:$0xff] }
 0x151   :  { %1951 = vmatprep.subr.mxu1 %v667_v21  ;;  %1881 = vmatpush1.msra.mxu0 %v602_v22  ;;  %v700_v21 = vld [vmem:[#allocation4 + $0x1360] sm:$0xff]  ;;  %v635_v22 = vld [vmem:[#allocation4 + $0x1158] sm:$0xff] }
 0x152   :  { %1952 = vmatpush1.msra.mxu1 %v666_v23  ;;  %1882 = vmatprep.subr.mxu0 %v601_v24  ;;  %v699_v23 = vld [vmem:[#allocation4 + $0x1358] sm:$0xff]  ;;  %v634_v24 = vld [vmem:[#allocation4 + $0x1150] sm:$0xff] }
 0x153   :  { %1953 = vmatprep.subr.mxu1 %v665_v25  ;;  %1883 = vmatpush1.msra.mxu0 %v600_v26  ;;  %v698_v25 = vld [vmem:[#allocation4 + $0x1350] sm:$0xff]  ;;  %v76_v26 = vld [vmem:[%s2997_s0 + $0x20] sm:$0xff] }
 0x154   :  { %1954 = vmatpush1.msra.mxu1 %v664_v27  ;;  %1884 = vmatprep.subr.mxu0 %v599_v28  ;;  %v633_v27 = vld [vmem:[#allocation4 + $0x1148] sm:$0xff] }
 0x155   :  { %1955 = vmatprep.subr.mxu1 %v663_v29  ;;  %1885 = vmatpush1.msra.mxu0 %v598_v30  ;;  %v697_v28 = vld [vmem:[#allocation4 + $0x1348] sm:$0xff]  ;;  %v632_v29 = vld [vmem:[#allocation4 + $0x1140] sm:$0xff] }
 0x156   :  { %1956 = vmatpush1.msra.mxu1 %v662_v31  ;;  %1886 = vmatprep.subr.mxu0 %v597_v32  ;;  %v696_v30 = vld [vmem:[#allocation4 + $0x1340] sm:$0xff]  ;;  %v631_v31 = vld [vmem:[#allocation4 + $0x1138] sm:$0xff] }
 0x157   :  { %1957 = vmatprep.subr.mxu1 %v661_v33  ;;  %1887 = vmatpush1.msra.mxu0 %v596_v34  ;;  %v695_v32 = vld [vmem:[#allocation4 + $0x1338] sm:$0xff]  ;;  %v1192_v33 = vcombine.high %v76_v26, %v76_v26  ;;  %v630_v34 = vld [vmem:[#allocation4 + $0x1130] sm:$0xff] }
 0x158   :  { %1958 = vmatpush1.msra.mxu1 %v660_v35  ;;  %1888 = vmatprep.subr.mxu0 %v595_v36  ;;  %v694_v35 = vld [vmem:[#allocation4 + $0x1330] sm:$0xff]  ;;  %v629_v36 = vld [vmem:[#allocation4 + $0x1128] sm:$0xff] }
 0x159   :  { %1959 = vmatprep.subr.mxu1 %v659_v37  ;;  %1889 = vmatpush1.msra.mxu0 %v594_v38  ;;  %v693_v37 = vld [vmem:[#allocation4 + $0x1328] sm:$0xff]  ;;  %v1199_v38 = vrot.slane %v76_v26, %v2856_v52 }
 0x15a   :  { %1960 = vmatpush1.msra.mxu1 %v658_v39  ;;  %1890 = vmatprep.subr.mxu0 %v593_v40  ;;  %v628_v39 = vld [vmem:[#allocation4 + $0x1120] sm:$0xff]  ;;  %v733_v26 = vld [vmem:[#allocation4 + $0x1468] sm:$0xff] }
 0x15b   :  { %1961 = vmatprep.subr.mxu1 %v657_v42  ;;  %1891 = vmatpush1.msra.mxu0 %v592_v43  ;;  %v692_v40 = vld [vmem:[#allocation4 + $0x1320] sm:$0xff]  ;;  %v627_v42 = vld [vmem:[#allocation4 + $0x1118] sm:$0xff] }
 0x15c   :  { %1962 = vmatpush1.msra.mxu1 %v656_v44  ;;  %1892 = vmatprep.subr.mxu0 %v655_v45  ;;  %v691_v43 = vld [vmem:[#allocation4 + $0x1318] sm:$0xff]  ;;  %v1206_v44 = vrot.slane %v1192_v33, %v2856_v52  ;;  %v626_v45 = vld [vmem:[#allocation4 + $0x1110] sm:$0xff] }
 0x15d   :  { %1963 = vmatprep.subr.mxu1 %v719_v46  ;;  %1893 = vmatpush2.msra.mxu0 %v654_v47  ;;  %v690_v46 = vld [vmem:[#allocation4 + $0x1310] sm:$0xff]  ;;  %v625_v47 = vld [vmem:[#allocation4 + $0x1108] sm:$0xff] }
 0x15e   :  { %1964 = vmatpush2.msra.mxu1 %v718_v48  ;;  %1894 = vmatprep.subr.mxu0 %v653_v49  ;;  %v689_v48 = vld [vmem:[#allocation4 + $0x1308] sm:$0xff]  ;;  %v1207_v49 = vcombine.high %v1199_v38, %v1199_v38  ;;  %v794_v33 = vld [vmem:[#allocation4 + $0x1650] sm:$0xff] }
 0x15f   :  { %1965 = vmatprep.subr.mxu1 %v717_v50  ;;  %1895 = vmatpush2.msra.mxu0 %v652_v51  ;;  %v624_v50 = vld [vmem:[#allocation4 + $0x1100] sm:$0xff] }
 0x160   :  { %1966 = vmatpush2.msra.mxu1 %v716_v53  ;;  %1896 = vmatprep.subr.mxu0 %v651_v54  ;;  %v688_v51 = vld [vmem:[#allocation4 + $0x1300] sm:$0xff]  ;;  %v1208_v53 = vcombine.high %v1206_v44, %v1206_v44  ;;  %v751_v54 = vld [vmem:[#allocation4 + $0x14f8] sm:$0xff] }
 0x161   :  { %1967 = vmatprep.subr.mxu1 %v715_v55  ;;  %1897 = vmatpush2.msra.mxu0 %v650_v56  ;;  %v815_v55 = vld [vmem:[#allocation4 + $0x16f8] sm:$0xff]  ;;  %v750_v56 = vld [vmem:[#allocation4 + $0x14f0] sm:$0xff] }
 0x162   :  { %1968 = vmatpush2.msra.mxu1 %v714_v57  ;;  %1898 = vmatprep.subr.mxu0 %v649_v58  ;;  %v814_v57 = vld [vmem:[#allocation4 + $0x16f0] sm:$0xff]  ;;  %v749_v58 = vld [vmem:[#allocation4 + $0x14e8] sm:$0xff] }
 0x163   :  { %1969 = vmatprep.subr.mxu1 %v713_v59  ;;  %1899 = vmatpush2.msra.mxu0 %v648_v60  ;;  %v813_v59 = vld [vmem:[#allocation4 + $0x16e8] sm:$0xff]  ;;  %v748_v60 = vld [vmem:[#allocation4 + $0x14e0] sm:$0xff] }
 0x164   :  { %1970 = vmatpush2.msra.mxu1 %v712_v61  ;;  %1900 = vmatprep.subr.mxu0 %v647_v62  ;;  %v812_v61 = vld [vmem:[#allocation4 + $0x16e0] sm:$0xff]  ;;  %v747_v62 = vld [vmem:[#allocation4 + $0x14d8] sm:$0xff] }
 0x165   :  { %1971 = vmatprep.subr.mxu1 %v711_v63  ;;  %1901 = vmatpush2.msra.mxu0 %v646_v0  ;;  %v811_v63 = vld [vmem:[#allocation4 + $0x16d8] sm:$0xff]  ;;  %v746_v0 = vld [vmem:[#allocation4 + $0x14d0] sm:$0xff] }
 0x166   :  { %1972 = vmatpush2.msra.mxu1 %v710_v1  ;;  %1902 = vmatprep.subr.mxu0 %v645_v2  ;;  %v810_v1 = vld [vmem:[#allocation4 + $0x16d0] sm:$0xff]  ;;  %v745_v2 = vld [vmem:[#allocation4 + $0x14c8] sm:$0xff] }
 0x167   :  { %1973 = vmatprep.subr.mxu1 %v709_v3  ;;  %1903 = vmatpush2.msra.mxu0 %v644_v4  ;;  %v809_v3 = vld [vmem:[#allocation4 + $0x16c8] sm:$0xff]  ;;  %v744_v4 = vld [vmem:[#allocation4 + $0x14c0] sm:$0xff] }
 0x168   :  { %1974 = vmatpush2.msra.mxu1 %v708_v5  ;;  %1904 = vmatprep.subr.mxu0 %v643_v6  ;;  %v808_v5 = vld [vmem:[#allocation4 + $0x16c0] sm:$0xff]  ;;  %v743_v6 = vld [vmem:[#allocation4 + $0x14b8] sm:$0xff] }
 0x169   :  { %1975 = vmatprep.subr.mxu1 %v707_v7  ;;  %1905 = vmatpush2.msra.mxu0 %v642_v8  ;;  %v807_v7 = vld [vmem:[#allocation4 + $0x16b8] sm:$0xff]  ;;  %v742_v8 = vld [vmem:[#allocation4 + $0x14b0] sm:$0xff] }
 0x16a   :  { %1976 = vmatpush2.msra.mxu1 %v706_v9  ;;  %1906 = vmatprep.subr.mxu0 %v641_v10  ;;  %v806_v9 = vld [vmem:[#allocation4 + $0x16b0] sm:$0xff]  ;;  %v741_v10 = vld [vmem:[#allocation4 + $0x14a8] sm:$0xff] }
 0x16b   :  { %1977 = vmatprep.subr.mxu1 %v705_v11  ;;  %1907 = vmatpush2.msra.mxu0 %v640_v12  ;;  %v805_v11 = vld [vmem:[#allocation4 + $0x16a8] sm:$0xff]  ;;  %v740_v12 = vld [vmem:[#allocation4 + $0x14a0] sm:$0xff] }
 0x16c   :  { %1978 = vmatpush2.msra.mxu1 %v704_v13  ;;  %1908 = vmatprep.subr.mxu0 %v639_v14  ;;  %v804_v13 = vld [vmem:[#allocation4 + $0x16a0] sm:$0xff]  ;;  %v739_v14 = vld [vmem:[#allocation4 + $0x1498] sm:$0xff] }
 0x16d   :  { %1979 = vmatprep.subr.mxu1 %v703_v15  ;;  %1909 = vmatpush2.msra.mxu0 %v638_v16  ;;  %v803_v15 = vld [vmem:[#allocation4 + $0x1698] sm:$0xff]  ;;  %v738_v16 = vld [vmem:[#allocation4 + $0x1490] sm:$0xff] }
 0x16e   :  { %1980 = vmatpush2.msra.mxu1 %v702_v17  ;;  %1910 = vmatprep.subr.mxu0 %v637_v18  ;;  %v802_v17 = vld [vmem:[#allocation4 + $0x1690] sm:$0xff]  ;;  %v737_v18 = vld [vmem:[#allocation4 + $0x1488] sm:$0xff] }
 0x16f   :  { %1981 = vmatprep.subr.mxu1 %v701_v19  ;;  %1911 = vmatpush2.msra.mxu0 %v636_v20  ;;  %v801_v19 = vld [vmem:[#allocation4 + $0x1688] sm:$0xff]  ;;  %v736_v20 = vld [vmem:[#allocation4 + $0x1480] sm:$0xff] }
 0x170   :  { %1982 = vmatpush2.msra.mxu1 %v700_v21  ;;  %1912 = vmatprep.subr.mxu0 %v635_v22  ;;  %v800_v21 = vld [vmem:[#allocation4 + $0x1680] sm:$0xff]  ;;  %v735_v22 = vld [vmem:[#allocation4 + $0x1478] sm:$0xff] }
 0x171   :  { %1983 = vmatprep.subr.mxu1 %v699_v23  ;;  %1913 = vmatpush2.msra.mxu0 %v634_v24  ;;  %v799_v23 = vld [vmem:[#allocation4 + $0x1678] sm:$0xff]  ;;  %v734_v24 = vld [vmem:[#allocation4 + $0x1470] sm:$0xff] }
 0x172   :  { %1984 = vmatpush2.msra.mxu1 %v698_v25  ;;  %1914 = vmatprep.subr.mxu0 %v633_v27  ;;  %v798_v25 = vld [vmem:[#allocation4 + $0x1670] sm:$0xff]  ;;  %v797_v27 = vld [vmem:[#allocation4 + $0x1668] sm:$0xff] }
 0x173   :  { %1985 = vmatprep.subr.mxu1 %v697_v28  ;;  %1915 = vmatpush2.msra.mxu0 %v632_v29  ;;  %v732_v28 = vld [vmem:[#allocation4 + $0x1460] sm:$0xff] }
 0x174   :  { %1986 = vmatpush2.msra.mxu1 %v696_v30  ;;  %1916 = vmatprep.subr.mxu0 %v631_v31  ;;  %v796_v29 = vld [vmem:[#allocation4 + $0x1660] sm:$0xff]  ;;  %v731_v30 = vld [vmem:[#allocation4 + $0x1458] sm:$0xff] }
 0x175   :  { %1987 = vmatprep.subr.mxu1 %v695_v32  ;;  %1917 = vmatpush2.msra.mxu0 %v630_v34  ;;  %v795_v31 = vld [vmem:[#allocation4 + $0x1658] sm:$0xff]  ;;  %v730_v32 = vld [vmem:[#allocation4 + $0x1450] sm:$0xff]  ;;  %v729_v34 = vld [vmem:[#allocation4 + $0x1448] sm:$0xff] }
 0x176   :  { %1988 = vmatpush2.msra.mxu1 %v694_v35  ;;  %1918 = vmatprep.subr.mxu0 %v629_v36  ;;  %v793_v35 = vld [vmem:[#allocation4 + $0x1648] sm:$0xff]  ;;  %v728_v36 = vld [vmem:[#allocation4 + $0x1440] sm:$0xff] }
 0x177   :  { %1989 = vmatprep.subr.mxu1 %v693_v37  ;;  %1919 = vmatpush2.msra.mxu0 %v628_v39  ;;  %v792_v37 = vld [vmem:[#allocation4 + $0x1640] sm:$0xff]  ;;  %v791_v39 = vld [vmem:[#allocation4 + $0x1638] sm:$0xff] }
 0x178   :  { %1990 = vmatpush2.msra.mxu1 %v692_v40  ;;  %1920 = vmatprep.subr.mxu0 %v627_v42  ;;  %v726_v40 = vld [vmem:[#allocation4 + $0x1430] sm:$0xff] }
 0x179   :  { %1991 = vmatprep.subr.mxu1 %v691_v43  ;;  %1921 = vmatpush2.msra.mxu0 %v626_v45  ;;  %v790_v42 = vld [vmem:[#allocation4 + $0x1630] sm:$0xff]  ;;  %v725_v43 = vld [vmem:[#allocation4 + $0x1428] sm:$0xff]  ;;  %v724_v45 = vld [vmem:[#allocation4 + $0x1420] sm:$0xff] }
 0x17a   :  { %1992 = vmatpush2.msra.mxu1 %v690_v46  ;;  %1922 = vmatprep.subr.mxu0 %v625_v47  ;;  %v788_v46 = vld [vmem:[#allocation4 + $0x1620] sm:$0xff]  ;;  %v723_v47 = vld [vmem:[#allocation4 + $0x1418] sm:$0xff] }
 0x17b   :  { %1993 = vmatprep.subr.mxu1 %v689_v48  ;;  %1923 = vmatpush2.msra.mxu0 %v624_v50  ;;  %v787_v48 = vld [vmem:[#allocation4 + $0x1618] sm:$0xff]  ;;  %v786_v50 = vld [vmem:[#allocation4 + $0x1610] sm:$0xff] }
 0x17c   :  { %1924 = vmatprep.mubr.f32.mxu0 %v1207_v49  ;;  %1994 = vmatpush2.msra.mxu1 %v688_v51  ;;  %v722_v49 = vld [vmem:[#allocation4 + $0x1410] sm:$0xff]  ;;  %v721_v51 = vld [vmem:[#allocation4 + $0x1408] sm:$0xff] }
 0x17d   :  { %1925 = vmatmul.mubr.f32.vlgmr.msra.gmra.mxu0 %v1199_v38  ;;  %1995 = vmatprep.mubr.f32.mxu1 %v1208_v53  ;;  %v727_v38 = vld [vmem:[#allocation4 + $0x1438] sm:$0xff]  ;;  %v785_v53 = vld [vmem:[#allocation4 + $0x1608] sm:$0xff] }
 0x17e   :  { %2002 = vmatprep.subr.mxu0 %v751_v54  ;;  %2073 = vmatprep.subr.mxu1 %v815_v55  ;;  %v720_v54 = vld [vmem:[#allocation4 + $0x1400] sm:$0xff] }
 0x17f   :  { %1996 = vmatmul.mubr.f32.vlgmr.msra.gmra.mxu1 %v1206_v44  ;;  %2003 = vmatpush1.msra.mxu0 %v750_v56  ;;  %v789_v44 = vld [vmem:[#allocation4 + $0x1628] sm:$0xff]  ;;  %v784_v55 = vld [vmem:[#allocation4 + $0x1600] sm:$0xff]  ;;  %v783_v56 = vld [vmem:[#allocation4 + $0x15f8] sm:$0xff] }
 0x180   :  { %2074 = vmatpush1.msra.mxu1 %v814_v57  ;;  %2004 = vmatprep.subr.mxu0 %v749_v58  ;;  %v847_v57 = vld [vmem:[#allocation4 + $0x17f8] sm:$0xff]  ;;  %v782_v58 = vld [vmem:[#allocation4 + $0x15f0] sm:$0xff] }
 0x181   :  { %2075 = vmatprep.subr.mxu1 %v813_v59  ;;  %2005 = vmatpush1.msra.mxu0 %v748_v60  ;;  %v846_v59 = vld [vmem:[#allocation4 + $0x17f0] sm:$0xff]  ;;  %v781_v60 = vld [vmem:[#allocation4 + $0x15e8] sm:$0xff] }
 0x182   :  { %2076 = vmatpush1.msra.mxu1 %v812_v61  ;;  %2006 = vmatprep.subr.mxu0 %v747_v62  ;;  %v845_v61 = vld [vmem:[#allocation4 + $0x17e8] sm:$0xff]  ;;  %v780_v62 = vld [vmem:[#allocation4 + $0x15e0] sm:$0xff] }
 0x183   :  { %2077 = vmatprep.subr.mxu1 %v811_v63  ;;  %2007 = vmatpush1.msra.mxu0 %v746_v0  ;;  %v844_v63 = vld [vmem:[#allocation4 + $0x17e0] sm:$0xff]  ;;  %v779_v0 = vld [vmem:[#allocation4 + $0x15d8] sm:$0xff] }
 0x184   :  { %2078 = vmatpush1.msra.mxu1 %v810_v1  ;;  %2008 = vmatprep.subr.mxu0 %v745_v2  ;;  %v843_v1 = vld [vmem:[#allocation4 + $0x17d8] sm:$0xff]  ;;  %v778_v2 = vld [vmem:[#allocation4 + $0x15d0] sm:$0xff] }
 0x185   :  { %2079 = vmatprep.subr.mxu1 %v809_v3  ;;  %2009 = vmatpush1.msra.mxu0 %v744_v4  ;;  %v842_v3 = vld [vmem:[#allocation4 + $0x17d0] sm:$0xff]  ;;  %v777_v4 = vld [vmem:[#allocation4 + $0x15c8] sm:$0xff] }
 0x186   :  { %2080 = vmatpush1.msra.mxu1 %v808_v5  ;;  %2010 = vmatprep.subr.mxu0 %v743_v6  ;;  %v841_v5 = vld [vmem:[#allocation4 + $0x17c8] sm:$0xff]  ;;  %v776_v6 = vld [vmem:[#allocation4 + $0x15c0] sm:$0xff] }
 0x187   :  { %2081 = vmatprep.subr.mxu1 %v807_v7  ;;  %2011 = vmatpush1.msra.mxu0 %v742_v8  ;;  %v840_v7 = vld [vmem:[#allocation4 + $0x17c0] sm:$0xff]  ;;  %v775_v8 = vld [vmem:[#allocation4 + $0x15b8] sm:$0xff] }
 0x188   :  { %2082 = vmatpush1.msra.mxu1 %v806_v9  ;;  %2012 = vmatprep.subr.mxu0 %v741_v10  ;;  %v839_v9 = vld [vmem:[#allocation4 + $0x17b8] sm:$0xff]  ;;  %v774_v10 = vld [vmem:[#allocation4 + $0x15b0] sm:$0xff] }
 0x189   :  { %2083 = vmatprep.subr.mxu1 %v805_v11  ;;  %2013 = vmatpush1.msra.mxu0 %v740_v12  ;;  %v838_v11 = vld [vmem:[#allocation4 + $0x17b0] sm:$0xff]  ;;  %v773_v12 = vld [vmem:[#allocation4 + $0x15a8] sm:$0xff] }
 0x18a   :  { %2084 = vmatpush1.msra.mxu1 %v804_v13  ;;  %2014 = vmatprep.subr.mxu0 %v739_v14  ;;  %v837_v13 = vld [vmem:[#allocation4 + $0x17a8] sm:$0xff]  ;;  %v772_v14 = vld [vmem:[#allocation4 + $0x15a0] sm:$0xff] }
 0x18b   :  { %2085 = vmatprep.subr.mxu1 %v803_v15  ;;  %2015 = vmatpush1.msra.mxu0 %v738_v16  ;;  %v836_v15 = vld [vmem:[#allocation4 + $0x17a0] sm:$0xff]  ;;  %v771_v16 = vld [vmem:[#allocation4 + $0x1598] sm:$0xff] }
 0x18c   :  { %2086 = vmatpush1.msra.mxu1 %v802_v17  ;;  %2016 = vmatprep.subr.mxu0 %v737_v18  ;;  %v835_v17 = vld [vmem:[#allocation4 + $0x1798] sm:$0xff]  ;;  %v770_v18 = vld [vmem:[#allocation4 + $0x1590] sm:$0xff] }
 0x18d   :  { %2087 = vmatprep.subr.mxu1 %v801_v19  ;;  %2017 = vmatpush1.msra.mxu0 %v736_v20  ;;  %v834_v19 = vld [vmem:[#allocation4 + $0x1790] sm:$0xff]  ;;  %v769_v20 = vld [vmem:[#allocation4 + $0x1588] sm:$0xff] }
 0x18e   :  { %2088 = vmatpush1.msra.mxu1 %v800_v21  ;;  %2018 = vmatprep.subr.mxu0 %v735_v22  ;;  %v833_v21 = vld [vmem:[#allocation4 + $0x1788] sm:$0xff]  ;;  %v768_v22 = vld [vmem:[#allocation4 + $0x1580] sm:$0xff] }
 0x18f   :  { %2089 = vmatprep.subr.mxu1 %v799_v23  ;;  %2019 = vmatpush1.msra.mxu0 %v734_v24  ;;  %v832_v23 = vld [vmem:[#allocation4 + $0x1780] sm:$0xff]  ;;  %v767_v24 = vld [vmem:[#allocation4 + $0x1578] sm:$0xff] }
 0x190   :  { %2090 = vmatpush1.msra.mxu1 %v798_v25  ;;  %2020 = vmatprep.subr.mxu0 %v733_v26  ;;  %v831_v25 = vld [vmem:[#allocation4 + $0x1778] sm:$0xff]  ;;  %v766_v26 = vld [vmem:[#allocation4 + $0x1570] sm:$0xff] }
 0x191   :  { %2091 = vmatprep.subr.mxu1 %v797_v27  ;;  %2021 = vmatpush1.msra.mxu0 %v732_v28  ;;  %v830_v27 = vld [vmem:[#allocation4 + $0x1770] sm:$0xff]  ;;  %v765_v28 = vld [vmem:[#allocation4 + $0x1568] sm:$0xff] }
 0x192   :  { %2092 = vmatpush1.msra.mxu1 %v796_v29  ;;  %2022 = vmatprep.subr.mxu0 %v731_v30  ;;  %v829_v29 = vld [vmem:[#allocation4 + $0x1768] sm:$0xff]  ;;  %v764_v30 = vld [vmem:[#allocation4 + $0x1560] sm:$0xff] }
 0x193   :  { %2093 = vmatprep.subr.mxu1 %v795_v31  ;;  %2023 = vmatpush1.msra.mxu0 %v730_v32  ;;  %v828_v31 = vld [vmem:[#allocation4 + $0x1760] sm:$0xff]  ;;  %v763_v32 = vld [vmem:[#allocation4 + $0x1558] sm:$0xff] }
 0x194   :  { %2094 = vmatpush1.msra.mxu1 %v794_v33  ;;  %2024 = vmatprep.subr.mxu0 %v729_v34  ;;  %v827_v33 = vld [vmem:[#allocation4 + $0x1758] sm:$0xff]  ;;  %v762_v34 = vld [vmem:[#allocation4 + $0x1550] sm:$0xff] }
 0x195   :  { %2095 = vmatprep.subr.mxu1 %v793_v35  ;;  %2025 = vmatpush1.msra.mxu0 %v728_v36  ;;  %v826_v35 = vld [vmem:[#allocation4 + $0x1750] sm:$0xff]  ;;  %v77_v36 = vld [vmem:[%s2997_s0 + $0x28] sm:$0xff] }
 0x196   :  { %2096 = vmatpush1.msra.mxu1 %v792_v37  ;;  %2026 = vmatprep.subr.mxu0 %v727_v38  ;;  %v761_v37 = vld [vmem:[#allocation4 + $0x1548] sm:$0xff] }
 0x197   :  { %2097 = vmatprep.subr.mxu1 %v791_v39  ;;  %2027 = vmatpush1.msra.mxu0 %v726_v40  ;;  %v825_v38 = vld [vmem:[#allocation4 + $0x1748] sm:$0xff]  ;;  %v760_v39 = vld [vmem:[#allocation4 + $0x1540] sm:$0xff] }
 0x198   :  { %2098 = vmatpush1.msra.mxu1 %v790_v42  ;;  %2028 = vmatprep.subr.mxu0 %v725_v43  ;;  %v824_v40 = vld [vmem:[#allocation4 + $0x1740] sm:$0xff]  ;;  %v759_v42 = vld [vmem:[#allocation4 + $0x1538] sm:$0xff] }
 0x199   :  { %2099 = vmatprep.subr.mxu1 %v789_v44  ;;  %2029 = vmatpush1.msra.mxu0 %v724_v45  ;;  %v823_v43 = vld [vmem:[#allocation4 + $0x1738] sm:$0xff]  ;;  %v1209_v44 = vcombine.high %v77_v36, %v77_v36  ;;  %v758_v45 = vld [vmem:[#allocation4 + $0x1530] sm:$0xff] }
 0x19a   :  { %2100 = vmatpush1.msra.mxu1 %v788_v46  ;;  %2030 = vmatprep.subr.mxu0 %v723_v47  ;;  %v822_v46 = vld [vmem:[#allocation4 + $0x1730] sm:$0xff]  ;;  %v757_v47 = vld [vmem:[#allocation4 + $0x1528] sm:$0xff] }
 0x19b   :  { %2101 = vmatprep.subr.mxu1 %v787_v48  ;;  %2031 = vmatpush1.msra.mxu0 %v722_v49  ;;  %v821_v48 = vld [vmem:[#allocation4 + $0x1728] sm:$0xff]  ;;  %v1216_v49 = vrot.slane %v77_v36, %v2856_v52 }
 0x19c   :  { %2102 = vmatpush1.msra.mxu1 %v786_v50  ;;  %2032 = vmatprep.subr.mxu0 %v721_v51  ;;  %v756_v50 = vld [vmem:[#allocation4 + $0x1520] sm:$0xff]  ;;  %v861_v36 = vld [vmem:[#allocation4 + $0x1868] sm:$0xff] }
 0x19d   :  { %2103 = vmatprep.subr.mxu1 %v785_v53  ;;  %2033 = vmatpush1.msra.mxu0 %v720_v54  ;;  %v820_v51 = vld [vmem:[#allocation4 + $0x1720] sm:$0xff]  ;;  %v755_v53 = vld [vmem:[#allocation4 + $0x1518] sm:$0xff] }
 0x19e   :  { %2104 = vmatpush1.msra.mxu1 %v784_v55  ;;  %2034 = vmatprep.subr.mxu0 %v783_v56  ;;  %v819_v54 = vld [vmem:[#allocation4 + $0x1718] sm:$0xff]  ;;  %v1223_v55 = vrot.slane %v1209_v44, %v2856_v52  ;;  %v754_v56 = vld [vmem:[#allocation4 + $0x1510] sm:$0xff] }
 0x19f   :  { %2105 = vmatprep.subr.mxu1 %v847_v57  ;;  %2035 = vmatpush2.msra.mxu0 %v782_v58  ;;  %v818_v57 = vld [vmem:[#allocation4 + $0x1710] sm:$0xff]  ;;  %v753_v58 = vld [vmem:[#allocation4 + $0x1508] sm:$0xff] }
 0x1a0   :  { %2106 = vmatpush2.msra.mxu1 %v846_v59  ;;  %2036 = vmatprep.subr.mxu0 %v781_v60  ;;  %v817_v59 = vld [vmem:[#allocation4 + $0x1708] sm:$0xff]  ;;  %v1224_v60 = vcombine.high %v1216_v49, %v1216_v49  ;;  %v922_v44 = vld [vmem:[#allocation4 + $0x1a50] sm:$0xff] }
 0x1a1   :  { %2107 = vmatprep.subr.mxu1 %v845_v61  ;;  %2037 = vmatpush2.msra.mxu0 %v780_v62  ;;  %v752_v61 = vld [vmem:[#allocation4 + $0x1500] sm:$0xff] }
 0x1a2   :  { %2108 = vmatpush2.msra.mxu1 %v844_v63  ;;  %2038 = vmatprep.subr.mxu0 %v779_v0  ;;  %v816_v62 = vld [vmem:[#allocation4 + $0x1700] sm:$0xff]  ;;  %v1225_v63 = vcombine.high %v1223_v55, %v1223_v55  ;;  %v879_v0 = vld [vmem:[#allocation4 + $0x18f8] sm:$0xff] }
 0x1a3   :  { %2109 = vmatprep.subr.mxu1 %v843_v1  ;;  %2039 = vmatpush2.msra.mxu0 %v778_v2  ;;  %v943_v1 = vld [vmem:[#allocation4 + $0x1af8] sm:$0xff]  ;;  %v878_v2 = vld [vmem:[#allocation4 + $0x18f0] sm:$0xff] }
 0x1a4   :  { %2110 = vmatpush2.msra.mxu1 %v842_v3  ;;  %2040 = vmatprep.subr.mxu0 %v777_v4  ;;  %v942_v3 = vld [vmem:[#allocation4 + $0x1af0] sm:$0xff]  ;;  %v877_v4 = vld [vmem:[#allocation4 + $0x18e8] sm:$0xff] }
 0x1a5   :  { %2111 = vmatprep.subr.mxu1 %v841_v5  ;;  %2041 = vmatpush2.msra.mxu0 %v776_v6  ;;  %v941_v5 = vld [vmem:[#allocation4 + $0x1ae8] sm:$0xff]  ;;  %v876_v6 = vld [vmem:[#allocation4 + $0x18e0] sm:$0xff] }
 0x1a6   :  { %2112 = vmatpush2.msra.mxu1 %v840_v7  ;;  %2042 = vmatprep.subr.mxu0 %v775_v8  ;;  %v940_v7 = vld [vmem:[#allocation4 + $0x1ae0] sm:$0xff]  ;;  %v875_v8 = vld [vmem:[#allocation4 + $0x18d8] sm:$0xff] }
 0x1a7   :  { %2113 = vmatprep.subr.mxu1 %v839_v9  ;;  %2043 = vmatpush2.msra.mxu0 %v774_v10  ;;  %v939_v9 = vld [vmem:[#allocation4 + $0x1ad8] sm:$0xff]  ;;  %v874_v10 = vld [vmem:[#allocation4 + $0x18d0] sm:$0xff] }
 0x1a8   :  { %2114 = vmatpush2.msra.mxu1 %v838_v11  ;;  %2044 = vmatprep.subr.mxu0 %v773_v12  ;;  %v938_v11 = vld [vmem:[#allocation4 + $0x1ad0] sm:$0xff]  ;;  %v873_v12 = vld [vmem:[#allocation4 + $0x18c8] sm:$0xff] }
 0x1a9   :  { %2115 = vmatprep.subr.mxu1 %v837_v13  ;;  %2045 = vmatpush2.msra.mxu0 %v772_v14  ;;  %v937_v13 = vld [vmem:[#allocation4 + $0x1ac8] sm:$0xff]  ;;  %v872_v14 = vld [vmem:[#allocation4 + $0x18c0] sm:$0xff] }
 0x1aa   :  { %2116 = vmatpush2.msra.mxu1 %v836_v15  ;;  %2046 = vmatprep.subr.mxu0 %v771_v16  ;;  %v936_v15 = vld [vmem:[#allocation4 + $0x1ac0] sm:$0xff]  ;;  %v871_v16 = vld [vmem:[#allocation4 + $0x18b8] sm:$0xff] }
 0x1ab   :  { %2117 = vmatprep.subr.mxu1 %v835_v17  ;;  %2047 = vmatpush2.msra.mxu0 %v770_v18  ;;  %v935_v17 = vld [vmem:[#allocation4 + $0x1ab8] sm:$0xff]  ;;  %v870_v18 = vld [vmem:[#allocation4 + $0x18b0] sm:$0xff] }
 0x1ac   :  { %2118 = vmatpush2.msra.mxu1 %v834_v19  ;;  %2048 = vmatprep.subr.mxu0 %v769_v20  ;;  %v934_v19 = vld [vmem:[#allocation4 + $0x1ab0] sm:$0xff]  ;;  %v869_v20 = vld [vmem:[#allocation4 + $0x18a8] sm:$0xff] }
 0x1ad   :  { %2119 = vmatprep.subr.mxu1 %v833_v21  ;;  %2049 = vmatpush2.msra.mxu0 %v768_v22  ;;  %v933_v21 = vld [vmem:[#allocation4 + $0x1aa8] sm:$0xff]  ;;  %v868_v22 = vld [vmem:[#allocation4 + $0x18a0] sm:$0xff] }
 0x1ae   :  { %2120 = vmatpush2.msra.mxu1 %v832_v23  ;;  %2050 = vmatprep.subr.mxu0 %v767_v24  ;;  %v932_v23 = vld [vmem:[#allocation4 + $0x1aa0] sm:$0xff]  ;;  %v867_v24 = vld [vmem:[#allocation4 + $0x1898] sm:$0xff] }
 0x1af   :  { %2121 = vmatprep.subr.mxu1 %v831_v25  ;;  %2051 = vmatpush2.msra.mxu0 %v766_v26  ;;  %v931_v25 = vld [vmem:[#allocation4 + $0x1a98] sm:$0xff]  ;;  %v866_v26 = vld [vmem:[#allocation4 + $0x1890] sm:$0xff] }
 0x1b0   :  { %2122 = vmatpush2.msra.mxu1 %v830_v27  ;;  %2052 = vmatprep.subr.mxu0 %v765_v28  ;;  %v930_v27 = vld [vmem:[#allocation4 + $0x1a90] sm:$0xff]  ;;  %v865_v28 = vld [vmem:[#allocation4 + $0x1888] sm:$0xff] }
 0x1b1   :  { %2123 = vmatprep.subr.mxu1 %v829_v29  ;;  %2053 = vmatpush2.msra.mxu0 %v764_v30  ;;  %v929_v29 = vld [vmem:[#allocation4 + $0x1a88] sm:$0xff]  ;;  %v864_v30 = vld [vmem:[#allocation4 + $0x1880] sm:$0xff] }
 0x1b2   :  { %2124 = vmatpush2.msra.mxu1 %v828_v31  ;;  %2054 = vmatprep.subr.mxu0 %v763_v32  ;;  %v928_v31 = vld [vmem:[#allocation4 + $0x1a80] sm:$0xff]  ;;  %v863_v32 = vld [vmem:[#allocation4 + $0x1878] sm:$0xff] }
 0x1b3   :  { %2125 = vmatprep.subr.mxu1 %v827_v33  ;;  %2055 = vmatpush2.msra.mxu0 %v762_v34  ;;  %v927_v33 = vld [vmem:[#allocation4 + $0x1a78] sm:$0xff]  ;;  %v862_v34 = vld [vmem:[#allocation4 + $0x1870] sm:$0xff] }
 0x1b4   :  { %2126 = vmatpush2.msra.mxu1 %v826_v35  ;;  %2056 = vmatprep.subr.mxu0 %v761_v37  ;;  %v926_v35 = vld [vmem:[#allocation4 + $0x1a70] sm:$0xff]  ;;  %v925_v37 = vld [vmem:[#allocation4 + $0x1a68] sm:$0xff] }
 0x1b5   :  { %2127 = vmatprep.subr.mxu1 %v825_v38  ;;  %2057 = vmatpush2.msra.mxu0 %v760_v39  ;;  %v860_v38 = vld [vmem:[#allocation4 + $0x1860] sm:$0xff] }
 0x1b6   :  { %2128 = vmatpush2.msra.mxu1 %v824_v40  ;;  %2058 = vmatprep.subr.mxu0 %v759_v42  ;;  %v924_v39 = vld [vmem:[#allocation4 + $0x1a60] sm:$0xff]  ;;  %v859_v40 = vld [vmem:[#allocation4 + $0x1858] sm:$0xff] }
 0x1b7   :  { %2129 = vmatprep.subr.mxu1 %v823_v43  ;;  %2059 = vmatpush2.msra.mxu0 %v758_v45  ;;  %v923_v42 = vld [vmem:[#allocation4 + $0x1a58] sm:$0xff]  ;;  %v858_v43 = vld [vmem:[#allocation4 + $0x1850] sm:$0xff]  ;;  %v857_v45 = vld [vmem:[#allocation4 + $0x1848] sm:$0xff] }
 0x1b8   :  { %2130 = vmatpush2.msra.mxu1 %v822_v46  ;;  %2060 = vmatprep.subr.mxu0 %v757_v47  ;;  %v921_v46 = vld [vmem:[#allocation4 + $0x1a48] sm:$0xff]  ;;  %v856_v47 = vld [vmem:[#allocation4 + $0x1840] sm:$0xff] }
 0x1b9   :  { %2131 = vmatprep.subr.mxu1 %v821_v48  ;;  %2061 = vmatpush2.msra.mxu0 %v756_v50  ;;  %v920_v48 = vld [vmem:[#allocation4 + $0x1a40] sm:$0xff]  ;;  %v919_v50 = vld [vmem:[#allocation4 + $0x1a38] sm:$0xff] }
 0x1ba   :  { %2132 = vmatpush2.msra.mxu1 %v820_v51  ;;  %2062 = vmatprep.subr.mxu0 %v755_v53  ;;  %v854_v51 = vld [vmem:[#allocation4 + $0x1830] sm:$0xff] }
 0x1bb   :  { %2133 = vmatprep.subr.mxu1 %v819_v54  ;;  %2063 = vmatpush2.msra.mxu0 %v754_v56  ;;  %v918_v53 = vld [vmem:[#allocation4 + $0x1a30] sm:$0xff]  ;;  %v853_v54 = vld [vmem:[#allocation4 + $0x1828] sm:$0xff]  ;;  %v852_v56 = vld [vmem:[#allocation4 + $0x1820] sm:$0xff] }
 0x1bc   :  { %2134 = vmatpush2.msra.mxu1 %v818_v57  ;;  %2064 = vmatprep.subr.mxu0 %v753_v58  ;;  %v916_v57 = vld [vmem:[#allocation4 + $0x1a20] sm:$0xff]  ;;  %v851_v58 = vld [vmem:[#allocation4 + $0x1818] sm:$0xff] }
 0x1bd   :  { %2135 = vmatprep.subr.mxu1 %v817_v59  ;;  %2065 = vmatpush2.msra.mxu0 %v752_v61  ;;  %v915_v59 = vld [vmem:[#allocation4 + $0x1a18] sm:$0xff]  ;;  %v914_v61 = vld [vmem:[#allocation4 + $0x1a10] sm:$0xff] }
 0x1be   :  { %2066 = vmatprep.mubr.f32.mxu0 %v1224_v60  ;;  %2136 = vmatpush2.msra.mxu1 %v816_v62  ;;  %v850_v60 = vld [vmem:[#allocation4 + $0x1810] sm:$0xff]  ;;  %v849_v62 = vld [vmem:[#allocation4 + $0x1808] sm:$0xff] }
 0x1bf   :  { %2067 = vmatmul.mubr.f32.vlgmr.msra.gmra.mxu0 %v1216_v49  ;;  %2137 = vmatprep.mubr.f32.mxu1 %v1225_v63  ;;  %v855_v49 = vld [vmem:[#allocation4 + $0x1838] sm:$0xff]  ;;  %v913_v63 = vld [vmem:[#allocation4 + $0x1a08] sm:$0xff] }
 0x1c0   :  { %2144 = vmatprep.subr.mxu0 %v879_v0  ;;  %2215 = vmatprep.subr.mxu1 %v943_v1  ;;  %v848_v0 = vld [vmem:[#allocation4 + $0x1800] sm:$0xff] }
 0x1c1   :  { %2138 = vmatmul.mubr.f32.vlgmr.msra.gmra.mxu1 %v1223_v55  ;;  %2145 = vmatpush1.msra.mxu0 %v878_v2  ;;  %v917_v55 = vld [vmem:[#allocation4 + $0x1a28] sm:$0xff]  ;;  %v912_v1 = vld [vmem:[#allocation4 + $0x1a00] sm:$0xff]  ;;  %v911_v2 = vld [vmem:[#allocation4 + $0x19f8] sm:$0xff] }
 0x1c2   :  { %2216 = vmatpush1.msra.mxu1 %v942_v3  ;;  %2146 = vmatprep.subr.mxu0 %v877_v4  ;;  %v975_v3 = vld [vmem:[#allocation4 + $0x1bf8] sm:$0xff]  ;;  %v910_v4 = vld [vmem:[#allocation4 + $0x19f0] sm:$0xff] }
 0x1c3   :  { %2217 = vmatprep.subr.mxu1 %v941_v5  ;;  %2147 = vmatpush1.msra.mxu0 %v876_v6  ;;  %v974_v5 = vld [vmem:[#allocation4 + $0x1bf0] sm:$0xff]  ;;  %v909_v6 = vld [vmem:[#allocation4 + $0x19e8] sm:$0xff] }
 0x1c4   :  { %2218 = vmatpush1.msra.mxu1 %v940_v7  ;;  %2148 = vmatprep.subr.mxu0 %v875_v8  ;;  %v973_v7 = vld [vmem:[#allocation4 + $0x1be8] sm:$0xff]  ;;  %v908_v8 = vld [vmem:[#allocation4 + $0x19e0] sm:$0xff] }
 0x1c5   :  { %2219 = vmatprep.subr.mxu1 %v939_v9  ;;  %2149 = vmatpush1.msra.mxu0 %v874_v10  ;;  %v972_v9 = vld [vmem:[#allocation4 + $0x1be0] sm:$0xff]  ;;  %v907_v10 = vld [vmem:[#allocation4 + $0x19d8] sm:$0xff] }
 0x1c6   :  { %2220 = vmatpush1.msra.mxu1 %v938_v11  ;;  %2150 = vmatprep.subr.mxu0 %v873_v12  ;;  %v971_v11 = vld [vmem:[#allocation4 + $0x1bd8] sm:$0xff]  ;;  %v906_v12 = vld [vmem:[#allocation4 + $0x19d0] sm:$0xff] }
 0x1c7   :  { %2221 = vmatprep.subr.mxu1 %v937_v13  ;;  %2151 = vmatpush1.msra.mxu0 %v872_v14  ;;  %v970_v13 = vld [vmem:[#allocation4 + $0x1bd0] sm:$0xff]  ;;  %v905_v14 = vld [vmem:[#allocation4 + $0x19c8] sm:$0xff] }
 0x1c8   :  { %2222 = vmatpush1.msra.mxu1 %v936_v15  ;;  %2152 = vmatprep.subr.mxu0 %v871_v16  ;;  %v969_v15 = vld [vmem:[#allocation4 + $0x1bc8] sm:$0xff]  ;;  %v904_v16 = vld [vmem:[#allocation4 + $0x19c0] sm:$0xff] }
 0x1c9   :  { %2223 = vmatprep.subr.mxu1 %v935_v17  ;;  %2153 = vmatpush1.msra.mxu0 %v870_v18  ;;  %v968_v17 = vld [vmem:[#allocation4 + $0x1bc0] sm:$0xff]  ;;  %v903_v18 = vld [vmem:[#allocation4 + $0x19b8] sm:$0xff] }
 0x1ca   :  { %2224 = vmatpush1.msra.mxu1 %v934_v19  ;;  %2154 = vmatprep.subr.mxu0 %v869_v20  ;;  %v967_v19 = vld [vmem:[#allocation4 + $0x1bb8] sm:$0xff]  ;;  %v902_v20 = vld [vmem:[#allocation4 + $0x19b0] sm:$0xff] }
 0x1cb   :  { %2225 = vmatprep.subr.mxu1 %v933_v21  ;;  %2155 = vmatpush1.msra.mxu0 %v868_v22  ;;  %v966_v21 = vld [vmem:[#allocation4 + $0x1bb0] sm:$0xff]  ;;  %v901_v22 = vld [vmem:[#allocation4 + $0x19a8] sm:$0xff] }
 0x1cc   :  { %2226 = vmatpush1.msra.mxu1 %v932_v23  ;;  %2156 = vmatprep.subr.mxu0 %v867_v24  ;;  %v965_v23 = vld [vmem:[#allocation4 + $0x1ba8] sm:$0xff]  ;;  %v900_v24 = vld [vmem:[#allocation4 + $0x19a0] sm:$0xff] }
 0x1cd   :  { %2227 = vmatprep.subr.mxu1 %v931_v25  ;;  %2157 = vmatpush1.msra.mxu0 %v866_v26  ;;  %v964_v25 = vld [vmem:[#allocation4 + $0x1ba0] sm:$0xff]  ;;  %v899_v26 = vld [vmem:[#allocation4 + $0x1998] sm:$0xff] }
 0x1ce   :  { %2228 = vmatpush1.msra.mxu1 %v930_v27  ;;  %2158 = vmatprep.subr.mxu0 %v865_v28  ;;  %v963_v27 = vld [vmem:[#allocation4 + $0x1b98] sm:$0xff]  ;;  %v898_v28 = vld [vmem:[#allocation4 + $0x1990] sm:$0xff] }
 0x1cf   :  { %2229 = vmatprep.subr.mxu1 %v929_v29  ;;  %2159 = vmatpush1.msra.mxu0 %v864_v30  ;;  %v962_v29 = vld [vmem:[#allocation4 + $0x1b90] sm:$0xff]  ;;  %v897_v30 = vld [vmem:[#allocation4 + $0x1988] sm:$0xff] }
 0x1d0   :  { %2230 = vmatpush1.msra.mxu1 %v928_v31  ;;  %2160 = vmatprep.subr.mxu0 %v863_v32  ;;  %v961_v31 = vld [vmem:[#allocation4 + $0x1b88] sm:$0xff]  ;;  %v896_v32 = vld [vmem:[#allocation4 + $0x1980] sm:$0xff] }
 0x1d1   :  { %2231 = vmatprep.subr.mxu1 %v927_v33  ;;  %2161 = vmatpush1.msra.mxu0 %v862_v34  ;;  %v960_v33 = vld [vmem:[#allocation4 + $0x1b80] sm:$0xff]  ;;  %v895_v34 = vld [vmem:[#allocation4 + $0x1978] sm:$0xff] }
 0x1d2   :  { %2232 = vmatpush1.msra.mxu1 %v926_v35  ;;  %2162 = vmatprep.subr.mxu0 %v861_v36  ;;  %v959_v35 = vld [vmem:[#allocation4 + $0x1b78] sm:$0xff]  ;;  %v894_v36 = vld [vmem:[#allocation4 + $0x1970] sm:$0xff] }
 0x1d3   :  { %2233 = vmatprep.subr.mxu1 %v925_v37  ;;  %2163 = vmatpush1.msra.mxu0 %v860_v38  ;;  %v958_v37 = vld [vmem:[#allocation4 + $0x1b70] sm:$0xff]  ;;  %v893_v38 = vld [vmem:[#allocation4 + $0x1968] sm:$0xff] }
 0x1d4   :  { %2234 = vmatpush1.msra.mxu1 %v924_v39  ;;  %2164 = vmatprep.subr.mxu0 %v859_v40  ;;  %v957_v39 = vld [vmem:[#allocation4 + $0x1b68] sm:$0xff]  ;;  %v892_v40 = vld [vmem:[#allocation4 + $0x1960] sm:$0xff] }
 0x1d5   :  { %2235 = vmatprep.subr.mxu1 %v923_v42  ;;  %2165 = vmatpush1.msra.mxu0 %v858_v43  ;;  %v956_v42 = vld [vmem:[#allocation4 + $0x1b60] sm:$0xff]  ;;  %v891_v43 = vld [vmem:[#allocation4 + $0x1958] sm:$0xff] }
 0x1d6   :  { %2236 = vmatpush1.msra.mxu1 %v922_v44  ;;  %2166 = vmatprep.subr.mxu0 %v857_v45  ;;  %v955_v44 = vld [vmem:[#allocation4 + $0x1b58] sm:$0xff]  ;;  %v890_v45 = vld [vmem:[#allocation4 + $0x1950] sm:$0xff] }
 0x1d7   :  { %2237 = vmatprep.subr.mxu1 %v921_v46  ;;  %2167 = vmatpush1.msra.mxu0 %v856_v47  ;;  %v954_v46 = vld [vmem:[#allocation4 + $0x1b50] sm:$0xff] }
 0x1d8   :  { %2238 = vmatpush1.msra.mxu1 %v920_v48  ;;  %2168 = vmatprep.subr.mxu0 %v855_v49  ;;  %v78_v47 = vld [vmem:[%s2997_s0 + $0x30] sm:$0xff] }
 0x1d9   :  { %2239 = vmatprep.subr.mxu1 %v919_v50  ;;  %2169 = vmatpush1.msra.mxu0 %v854_v51  ;;  %v889_v48 = vld [vmem:[#allocation4 + $0x1948] sm:$0xff]  ;;  %v888_v50 = vld [vmem:[#allocation4 + $0x1940] sm:$0xff] }
 0x1da   :  { %2240 = vmatpush1.msra.mxu1 %v918_v53  ;;  %2170 = vmatprep.subr.mxu0 %v853_v54  ;;  %v953_v49 = vld [vmem:[#allocation4 + $0x1b48] sm:$0xff]  ;;  %v952_v51 = vld [vmem:[#allocation4 + $0x1b40] sm:$0xff]  ;;  %v887_v53 = vld [vmem:[#allocation4 + $0x1938] sm:$0xff] }
 0x1db   :  { %2241 = vmatprep.subr.mxu1 %v917_v55  ;;  %2171 = vmatpush1.msra.mxu0 %v852_v56  ;;  %v951_v54 = vld [vmem:[#allocation4 + $0x1b38] sm:$0xff]  ;;  %v1226_v55 = vcombine.high %v78_v47, %v78_v47  ;;  %v886_v56 = vld [vmem:[#allocation4 + $0x1930] sm:$0xff] }
 0x1dc   :  { %2242 = vmatpush1.msra.mxu1 %v916_v57  ;;  %2172 = vmatprep.subr.mxu0 %v851_v58  ;;  %v950_v57 = vld [vmem:[#allocation4 + $0x1b30] sm:$0xff]  ;;  %v885_v58 = vld [vmem:[#allocation4 + $0x1928] sm:$0xff] }
 0x1dd   :  { %2243 = vmatprep.subr.mxu1 %v915_v59  ;;  %2173 = vmatpush1.msra.mxu0 %v850_v60  ;;  %v949_v59 = vld [vmem:[#allocation4 + $0x1b28] sm:$0xff]  ;;  %v1233_v60 = vrot.slane %v78_v47, %v2856_v52 }
 0x1de   :  { %2244 = vmatpush1.msra.mxu1 %v914_v61  ;;  %2174 = vmatprep.subr.mxu0 %v849_v62  ;;  %v884_v61 = vld [vmem:[#allocation4 + $0x1920] sm:$0xff]  ;;  %v989_v47 = vld [vmem:[#allocation4 + $0x1c68] sm:$0xff] }
 0x1df   :  { %2245 = vmatprep.subr.mxu1 %v913_v63  ;;  %2175 = vmatpush1.msra.mxu0 %v848_v0  ;;  %v948_v62 = vld [vmem:[#allocation4 + $0x1b20] sm:$0xff]  ;;  %v883_v63 = vld [vmem:[#allocation4 + $0x1918] sm:$0xff] }
 0x1e0   :  { %2246 = vmatpush1.msra.mxu1 %v912_v1  ;;  %2176 = vmatprep.subr.mxu0 %v911_v2  ;;  %v947_v0 = vld [vmem:[#allocation4 + $0x1b18] sm:$0xff]  ;;  %v1240_v1 = vrot.slane %v1226_v55, %v2856_v52  ;;  %v882_v2 = vld [vmem:[#allocation4 + $0x1910] sm:$0xff] }
 0x1e1   :  { %2247 = vmatprep.subr.mxu1 %v975_v3  ;;  %2177 = vmatpush2.msra.mxu0 %v910_v4  ;;  %v946_v3 = vld [vmem:[#allocation4 + $0x1b10] sm:$0xff]  ;;  %v881_v4 = vld [vmem:[#allocation4 + $0x1908] sm:$0xff] }
 0x1e2   :  { %2248 = vmatpush2.msra.mxu1 %v974_v5  ;;  %2178 = vmatprep.subr.mxu0 %v909_v6  ;;  %v945_v5 = vld [vmem:[#allocation4 + $0x1b08] sm:$0xff]  ;;  %v1241_v6 = vcombine.high %v1233_v60, %v1233_v60  ;;  %v1050_v55 = vld [vmem:[#allocation4 + $0x1e50] sm:$0xff] }
 0x1e3   :  { %2249 = vmatprep.subr.mxu1 %v973_v7  ;;  %2179 = vmatpush2.msra.mxu0 %v908_v8  ;;  %v880_v7 = vld [vmem:[#allocation4 + $0x1900] sm:$0xff] }
 0x1e4   :  { %2250 = vmatpush2.msra.mxu1 %v972_v9  ;;  %2180 = vmatprep.subr.mxu0 %v907_v10  ;;  %v944_v8 = vld [vmem:[#allocation4 + $0x1b00] sm:$0xff]  ;;  %v1242_v9 = vcombine.high %v1240_v1, %v1240_v1  ;;  %v1007_v10 = vld [vmem:[#allocation4 + $0x1cf8] sm:$0xff] }
 0x1e5   :  { %2251 = vmatprep.subr.mxu1 %v971_v11  ;;  %2181 = vmatpush2.msra.mxu0 %v906_v12  ;;  %v1071_v11 = vld [vmem:[#allocation4 + $0x1ef8] sm:$0xff]  ;;  %v1006_v12 = vld [vmem:[#allocation4 + $0x1cf0] sm:$0xff] }
 0x1e6   :  { %2252 = vmatpush2.msra.mxu1 %v970_v13  ;;  %2182 = vmatprep.subr.mxu0 %v905_v14  ;;  %v1070_v13 = vld [vmem:[#allocation4 + $0x1ef0] sm:$0xff]  ;;  %v1005_v14 = vld [vmem:[#allocation4 + $0x1ce8] sm:$0xff] }
 0x1e7   :  { %2253 = vmatprep.subr.mxu1 %v969_v15  ;;  %2183 = vmatpush2.msra.mxu0 %v904_v16  ;;  %v1069_v15 = vld [vmem:[#allocation4 + $0x1ee8] sm:$0xff]  ;;  %v1004_v16 = vld [vmem:[#allocation4 + $0x1ce0] sm:$0xff] }
 0x1e8   :  { %2254 = vmatpush2.msra.mxu1 %v968_v17  ;;  %2184 = vmatprep.subr.mxu0 %v903_v18  ;;  %v1068_v17 = vld [vmem:[#allocation4 + $0x1ee0] sm:$0xff]  ;;  %v1003_v18 = vld [vmem:[#allocation4 + $0x1cd8] sm:$0xff] }
 0x1e9   :  { %2255 = vmatprep.subr.mxu1 %v967_v19  ;;  %2185 = vmatpush2.msra.mxu0 %v902_v20  ;;  %v1067_v19 = vld [vmem:[#allocation4 + $0x1ed8] sm:$0xff]  ;;  %v1002_v20 = vld [vmem:[#allocation4 + $0x1cd0] sm:$0xff] }
 0x1ea   :  { %2256 = vmatpush2.msra.mxu1 %v966_v21  ;;  %2186 = vmatprep.subr.mxu0 %v901_v22  ;;  %v1066_v21 = vld [vmem:[#allocation4 + $0x1ed0] sm:$0xff]  ;;  %v1001_v22 = vld [vmem:[#allocation4 + $0x1cc8] sm:$0xff] }
 0x1eb   :  { %2257 = vmatprep.subr.mxu1 %v965_v23  ;;  %2187 = vmatpush2.msra.mxu0 %v900_v24  ;;  %v1065_v23 = vld [vmem:[#allocation4 + $0x1ec8] sm:$0xff]  ;;  %v1000_v24 = vld [vmem:[#allocation4 + $0x1cc0] sm:$0xff] }
 0x1ec   :  { %2258 = vmatpush2.msra.mxu1 %v964_v25  ;;  %2188 = vmatprep.subr.mxu0 %v899_v26  ;;  %v1064_v25 = vld [vmem:[#allocation4 + $0x1ec0] sm:$0xff]  ;;  %v999_v26 = vld [vmem:[#allocation4 + $0x1cb8] sm:$0xff] }
 0x1ed   :  { %2259 = vmatprep.subr.mxu1 %v963_v27  ;;  %2189 = vmatpush2.msra.mxu0 %v898_v28  ;;  %v1063_v27 = vld [vmem:[#allocation4 + $0x1eb8] sm:$0xff]  ;;  %v998_v28 = vld [vmem:[#allocation4 + $0x1cb0] sm:$0xff] }
 0x1ee   :  { %2260 = vmatpush2.msra.mxu1 %v962_v29  ;;  %2190 = vmatprep.subr.mxu0 %v897_v30  ;;  %v1062_v29 = vld [vmem:[#allocation4 + $0x1eb0] sm:$0xff]  ;;  %v997_v30 = vld [vmem:[#allocation4 + $0x1ca8] sm:$0xff] }
 0x1ef   :  { %2261 = vmatprep.subr.mxu1 %v961_v31  ;;  %2191 = vmatpush2.msra.mxu0 %v896_v32  ;;  %v1061_v31 = vld [vmem:[#allocation4 + $0x1ea8] sm:$0xff]  ;;  %v996_v32 = vld [vmem:[#allocation4 + $0x1ca0] sm:$0xff] }
 0x1f0   :  { %2262 = vmatpush2.msra.mxu1 %v960_v33  ;;  %2192 = vmatprep.subr.mxu0 %v895_v34  ;;  %v1060_v33 = vld [vmem:[#allocation4 + $0x1ea0] sm:$0xff]  ;;  %v995_v34 = vld [vmem:[#allocation4 + $0x1c98] sm:$0xff] }
 0x1f1   :  { %2263 = vmatprep.subr.mxu1 %v959_v35  ;;  %2193 = vmatpush2.msra.mxu0 %v894_v36  ;;  %v1059_v35 = vld [vmem:[#allocation4 + $0x1e98] sm:$0xff]  ;;  %v994_v36 = vld [vmem:[#allocation4 + $0x1c90] sm:$0xff] }
 0x1f2   :  { %2264 = vmatpush2.msra.mxu1 %v958_v37  ;;  %2194 = vmatprep.subr.mxu0 %v893_v38  ;;  %v1058_v37 = vld [vmem:[#allocation4 + $0x1e90] sm:$0xff]  ;;  %v993_v38 = vld [vmem:[#allocation4 + $0x1c88] sm:$0xff] }
 0x1f3   :  { %2265 = vmatprep.subr.mxu1 %v957_v39  ;;  %2195 = vmatpush2.msra.mxu0 %v892_v40  ;;  %v1057_v39 = vld [vmem:[#allocation4 + $0x1e88] sm:$0xff]  ;;  %v992_v40 = vld [vmem:[#allocation4 + $0x1c80] sm:$0xff] }
 0x1f4   :  { %2266 = vmatpush2.msra.mxu1 %v956_v42  ;;  %2196 = vmatprep.subr.mxu0 %v891_v43  ;;  %v1056_v42 = vld [vmem:[#allocation4 + $0x1e80] sm:$0xff]  ;;  %v991_v43 = vld [vmem:[#allocation4 + $0x1c78] sm:$0xff] }
 0x1f5   :  { %2267 = vmatprep.subr.mxu1 %v955_v44  ;;  %2197 = vmatpush2.msra.mxu0 %v890_v45  ;;  %v1055_v44 = vld [vmem:[#allocation4 + $0x1e78] sm:$0xff]  ;;  %v990_v45 = vld [vmem:[#allocation4 + $0x1c70] sm:$0xff] }
 0x1f6   :  { %2268 = vmatpush2.msra.mxu1 %v954_v46  ;;  %2198 = vmatprep.subr.mxu0 %v889_v48  ;;  %v1054_v46 = vld [vmem:[#allocation4 + $0x1e70] sm:$0xff]  ;;  %v1053_v48 = vld [vmem:[#allocation4 + $0x1e68] sm:$0xff] }
 0x1f7   :  { %2269 = vmatprep.subr.mxu1 %v953_v49  ;;  %2199 = vmatpush2.msra.mxu0 %v888_v50  ;;  %v988_v49 = vld [vmem:[#allocation4 + $0x1c60] sm:$0xff] }
 0x1f8   :  { %2270 = vmatpush2.msra.mxu1 %v952_v51  ;;  %2200 = vmatprep.subr.mxu0 %v887_v53  ;;  %v1052_v50 = vld [vmem:[#allocation4 + $0x1e60] sm:$0xff]  ;;  %v987_v51 = vld [vmem:[#allocation4 + $0x1c58] sm:$0xff] }
 0x1f9   :  { %2271 = vmatprep.subr.mxu1 %v951_v54  ;;  %2201 = vmatpush2.msra.mxu0 %v886_v56  ;;  %v1051_v53 = vld [vmem:[#allocation4 + $0x1e58] sm:$0xff]  ;;  %v986_v54 = vld [vmem:[#allocation4 + $0x1c50] sm:$0xff]  ;;  %v985_v56 = vld [vmem:[#allocation4 + $0x1c48] sm:$0xff] }
 0x1fa   :  { %2272 = vmatpush2.msra.mxu1 %v950_v57  ;;  %2202 = vmatprep.subr.mxu0 %v885_v58  ;;  %v1049_v57 = vld [vmem:[#allocation4 + $0x1e48] sm:$0xff]  ;;  %v984_v58 = vld [vmem:[#allocation4 + $0x1c40] sm:$0xff] }
 0x1fb   :  { %2273 = vmatprep.subr.mxu1 %v949_v59  ;;  %2203 = vmatpush2.msra.mxu0 %v884_v61  ;;  %v1048_v59 = vld [vmem:[#allocation4 + $0x1e40] sm:$0xff]  ;;  %v1047_v61 = vld [vmem:[#allocation4 + $0x1e38] sm:$0xff] }
 0x1fc   :  { %2274 = vmatpush2.msra.mxu1 %v948_v62  ;;  %2204 = vmatprep.subr.mxu0 %v883_v63  ;;  %v982_v62 = vld [vmem:[#allocation4 + $0x1c30] sm:$0xff] }
 0x1fd   :  { %2275 = vmatprep.subr.mxu1 %v947_v0  ;;  %2205 = vmatpush2.msra.mxu0 %v882_v2  ;;  %v1046_v63 = vld [vmem:[#allocation4 + $0x1e30] sm:$0xff]  ;;  %v981_v0 = vld [vmem:[#allocation4 + $0x1c28] sm:$0xff]  ;;  %v980_v2 = vld [vmem:[#allocation4 + $0x1c20] sm:$0xff] }
 0x1fe   :  { %2276 = vmatpush2.msra.mxu1 %v946_v3  ;;  %2206 = vmatprep.subr.mxu0 %v881_v4  ;;  %v1044_v3 = vld [vmem:[#allocation4 + $0x1e20] sm:$0xff]  ;;  %v979_v4 = vld [vmem:[#allocation4 + $0x1c18] sm:$0xff] }
 0x1ff   :  { %2277 = vmatprep.subr.mxu1 %v945_v5  ;;  %2207 = vmatpush2.msra.mxu0 %v880_v7  ;;  %v1043_v5 = vld [vmem:[#allocation4 + $0x1e18] sm:$0xff]  ;;  %v1042_v7 = vld [vmem:[#allocation4 + $0x1e10] sm:$0xff] }
 0x200   :  { %2208 = vmatprep.mubr.f32.mxu0 %v1241_v6  ;;  %2278 = vmatpush2.msra.mxu1 %v944_v8  ;;  %v978_v6 = vld [vmem:[#allocation4 + $0x1c10] sm:$0xff]  ;;  %v977_v8 = vld [vmem:[#allocation4 + $0x1c08] sm:$0xff] }
 0x201   :  { %2209 = vmatmul.mubr.f32.vlgmr.msra.gmra.mxu0 %v1233_v60  ;;  %2279 = vmatprep.mubr.f32.mxu1 %v1242_v9  ;;  %v983_v60 = vld [vmem:[#allocation4 + $0x1c38] sm:$0xff]  ;;  %v1041_v9 = vld [vmem:[#allocation4 + $0x1e08] sm:$0xff] }
 0x202   :  { %2286 = vmatprep.subr.mxu0 %v1007_v10  ;;  %2357 = vmatprep.subr.mxu1 %v1071_v11  ;;  %v976_v10 = vld [vmem:[#allocation4 + $0x1c00] sm:$0xff] }
 0x203   :  { %2280 = vmatmul.mubr.f32.vlgmr.msra.gmra.mxu1 %v1240_v1  ;;  %2287 = vmatpush1.msra.mxu0 %v1006_v12  ;;  %v1045_v1 = vld [vmem:[#allocation4 + $0x1e28] sm:$0xff]  ;;  %v1040_v11 = vld [vmem:[#allocation4 + $0x1e00] sm:$0xff]  ;;  %v1039_v12 = vld [vmem:[#allocation4 + $0x1df8] sm:$0xff] }
 0x204   :  { %2358 = vmatpush1.msra.mxu1 %v1070_v13  ;;  %2288 = vmatprep.subr.mxu0 %v1005_v14  ;;  %v1103_v13 = vld [vmem:[#allocation4 + $0x1ff8] sm:$0xff]  ;;  %v1038_v14 = vld [vmem:[#allocation4 + $0x1df0] sm:$0xff] }
 0x205   :  { %2359 = vmatprep.subr.mxu1 %v1069_v15  ;;  %2289 = vmatpush1.msra.mxu0 %v1004_v16  ;;  %v1102_v15 = vld [vmem:[#allocation4 + $0x1ff0] sm:$0xff]  ;;  %v1037_v16 = vld [vmem:[#allocation4 + $0x1de8] sm:$0xff] }
 0x206   :  { %2360 = vmatpush1.msra.mxu1 %v1068_v17  ;;  %2290 = vmatprep.subr.mxu0 %v1003_v18  ;;  %v1101_v17 = vld [vmem:[#allocation4 + $0x1fe8] sm:$0xff]  ;;  %v1036_v18 = vld [vmem:[#allocation4 + $0x1de0] sm:$0xff] }
 0x207   :  { %2361 = vmatprep.subr.mxu1 %v1067_v19  ;;  %2291 = vmatpush1.msra.mxu0 %v1002_v20  ;;  %v1100_v19 = vld [vmem:[#allocation4 + $0x1fe0] sm:$0xff]  ;;  %v1035_v20 = vld [vmem:[#allocation4 + $0x1dd8] sm:$0xff] }
 0x208   :  { %2362 = vmatpush1.msra.mxu1 %v1066_v21  ;;  %2292 = vmatprep.subr.mxu0 %v1001_v22  ;;  %v1099_v21 = vld [vmem:[#allocation4 + $0x1fd8] sm:$0xff]  ;;  %v1034_v22 = vld [vmem:[#allocation4 + $0x1dd0] sm:$0xff] }
 0x209   :  { %2363 = vmatprep.subr.mxu1 %v1065_v23  ;;  %2293 = vmatpush1.msra.mxu0 %v1000_v24  ;;  %v1098_v23 = vld [vmem:[#allocation4 + $0x1fd0] sm:$0xff]  ;;  %v1033_v24 = vld [vmem:[#allocation4 + $0x1dc8] sm:$0xff] }
 0x20a   :  { %2364 = vmatpush1.msra.mxu1 %v1064_v25  ;;  %2294 = vmatprep.subr.mxu0 %v999_v26  ;;  %v1097_v25 = vld [vmem:[#allocation4 + $0x1fc8] sm:$0xff]  ;;  %v1032_v26 = vld [vmem:[#allocation4 + $0x1dc0] sm:$0xff] }
 0x20b   :  { %2365 = vmatprep.subr.mxu1 %v1063_v27  ;;  %2295 = vmatpush1.msra.mxu0 %v998_v28  ;;  %v1096_v27 = vld [vmem:[#allocation4 + $0x1fc0] sm:$0xff]  ;;  %v1031_v28 = vld [vmem:[#allocation4 + $0x1db8] sm:$0xff] }
 0x20c   :  { %2366 = vmatpush1.msra.mxu1 %v1062_v29  ;;  %2296 = vmatprep.subr.mxu0 %v997_v30  ;;  %v1095_v29 = vld [vmem:[#allocation4 + $0x1fb8] sm:$0xff]  ;;  %v1030_v30 = vld [vmem:[#allocation4 + $0x1db0] sm:$0xff] }
 0x20d   :  { %2367 = vmatprep.subr.mxu1 %v1061_v31  ;;  %2297 = vmatpush1.msra.mxu0 %v996_v32  ;;  %v1094_v31 = vld [vmem:[#allocation4 + $0x1fb0] sm:$0xff]  ;;  %v1029_v32 = vld [vmem:[#allocation4 + $0x1da8] sm:$0xff] }
 0x20e   :  { %2368 = vmatpush1.msra.mxu1 %v1060_v33  ;;  %2298 = vmatprep.subr.mxu0 %v995_v34  ;;  %v1093_v33 = vld [vmem:[#allocation4 + $0x1fa8] sm:$0xff]  ;;  %v1028_v34 = vld [vmem:[#allocation4 + $0x1da0] sm:$0xff] }
 0x20f   :  { %2369 = vmatprep.subr.mxu1 %v1059_v35  ;;  %2299 = vmatpush1.msra.mxu0 %v994_v36  ;;  %v1092_v35 = vld [vmem:[#allocation4 + $0x1fa0] sm:$0xff]  ;;  %v1027_v36 = vld [vmem:[#allocation4 + $0x1d98] sm:$0xff] }
 0x210   :  { %2370 = vmatpush1.msra.mxu1 %v1058_v37  ;;  %2300 = vmatprep.subr.mxu0 %v993_v38  ;;  %v1091_v37 = vld [vmem:[#allocation4 + $0x1f98] sm:$0xff]  ;;  %v1026_v38 = vld [vmem:[#allocation4 + $0x1d90] sm:$0xff] }
 0x211   :  { %2371 = vmatprep.subr.mxu1 %v1057_v39  ;;  %2301 = vmatpush1.msra.mxu0 %v992_v40  ;;  %v1090_v39 = vld [vmem:[#allocation4 + $0x1f90] sm:$0xff]  ;;  %v1025_v40 = vld [vmem:[#allocation4 + $0x1d88] sm:$0xff] }
 0x212   :  { %2372 = vmatpush1.msra.mxu1 %v1056_v42  ;;  %2302 = vmatprep.subr.mxu0 %v991_v43  ;;  %v1089_v42 = vld [vmem:[#allocation4 + $0x1f88] sm:$0xff]  ;;  %v1024_v43 = vld [vmem:[#allocation4 + $0x1d80] sm:$0xff] }
 0x213   :  { %2373 = vmatprep.subr.mxu1 %v1055_v44  ;;  %2303 = vmatpush1.msra.mxu0 %v990_v45  ;;  %v1088_v44 = vld [vmem:[#allocation4 + $0x1f80] sm:$0xff]  ;;  %v1023_v45 = vld [vmem:[#allocation4 + $0x1d78] sm:$0xff] }
 0x214   :  { %2374 = vmatpush1.msra.mxu1 %v1054_v46  ;;  %2304 = vmatprep.subr.mxu0 %v989_v47  ;;  %v1087_v46 = vld [vmem:[#allocation4 + $0x1f78] sm:$0xff]  ;;  %v1022_v47 = vld [vmem:[#allocation4 + $0x1d70] sm:$0xff] }
 0x215   :  { %2375 = vmatprep.subr.mxu1 %v1053_v48  ;;  %2305 = vmatpush1.msra.mxu0 %v988_v49  ;;  %v1086_v48 = vld [vmem:[#allocation4 + $0x1f70] sm:$0xff]  ;;  %v1021_v49 = vld [vmem:[#allocation4 + $0x1d68] sm:$0xff] }
 0x216   :  { %2376 = vmatpush1.msra.mxu1 %v1052_v50  ;;  %2306 = vmatprep.subr.mxu0 %v987_v51  ;;  %v1085_v50 = vld [vmem:[#allocation4 + $0x1f68] sm:$0xff]  ;;  %v1020_v51 = vld [vmem:[#allocation4 + $0x1d60] sm:$0xff] }
 0x217   :  { %2377 = vmatprep.subr.mxu1 %v1051_v53  ;;  %2307 = vmatpush1.msra.mxu0 %v986_v54  ;;  %v1084_v53 = vld [vmem:[#allocation4 + $0x1f60] sm:$0xff]  ;;  %v1019_v54 = vld [vmem:[#allocation4 + $0x1d58] sm:$0xff] }
 0x218   :  { %2378 = vmatpush1.msra.mxu1 %v1050_v55  ;;  %2308 = vmatprep.subr.mxu0 %v985_v56  ;;  %v1083_v55 = vld [vmem:[#allocation4 + $0x1f58] sm:$0xff] }
 0x219   :  { %2379 = vmatprep.subr.mxu1 %v1049_v57  ;;  %2309 = vmatpush1.msra.mxu0 %v984_v58  ;;  %v79_v56 = vld [vmem:[%s2997_s0 + $0x38] sm:$0xff] }
 0x21a   :  { %2380 = vmatpush1.msra.mxu1 %v1048_v59  ;;  %2310 = vmatprep.subr.mxu0 %v983_v60  ;;  %v1018_v57 = vld [vmem:[#allocation4 + $0x1d50] sm:$0xff]  ;;  %v1017_v59 = vld [vmem:[#allocation4 + $0x1d48] sm:$0xff] }
 0x21b   :  { %2381 = vmatprep.subr.mxu1 %v1047_v61  ;;  %2311 = vmatpush1.msra.mxu0 %v982_v62  ;;  %v1082_v58 = vld [vmem:[#allocation4 + $0x1f50] sm:$0xff]  ;;  %v1081_v60 = vld [vmem:[#allocation4 + $0x1f48] sm:$0xff]  ;;  %v1016_v61 = vld [vmem:[#allocation4 + $0x1d40] sm:$0xff] }
 0x21c   :  { %2382 = vmatpush1.msra.mxu1 %v1046_v63  ;;  %2312 = vmatprep.subr.mxu0 %v981_v0  ;;  %v1080_v62 = vld [vmem:[#allocation4 + $0x1f40] sm:$0xff]  ;;  %v1243_v63 = vcombine.high %v79_v56, %v79_v56  ;;  %v1015_v0 = vld [vmem:[#allocation4 + $0x1d38] sm:$0xff] }
 0x21d   :  { %2383 = vmatprep.subr.mxu1 %v1045_v1  ;;  %2313 = vmatpush1.msra.mxu0 %v980_v2  ;;  %v1079_v1 = vld [vmem:[#allocation4 + $0x1f38] sm:$0xff]  ;;  %v1014_v2 = vld [vmem:[#allocation4 + $0x1d30] sm:$0xff] }
 0x21e   :  { %2384 = vmatpush1.msra.mxu1 %v1044_v3  ;;  %2314 = vmatprep.subr.mxu0 %v979_v4  ;;  %v1078_v3 = vld [vmem:[#allocation4 + $0x1f30] sm:$0xff]  ;;  %v1013_v4 = vld [vmem:[#allocation4 + $0x1d28] sm:$0xff] }
 0x21f   :  { %2385 = vmatprep.subr.mxu1 %v1043_v5  ;;  %2315 = vmatpush1.msra.mxu0 %v978_v6  ;;  %v1077_v5 = vld [vmem:[#allocation4 + $0x1f28] sm:$0xff]  ;;  %v1250_v6 = vrot.slane %v79_v56, %v2856_v52  ;;  %v2792_v56 = vmov 3  }
 0x220   :  { %2386 = vmatpush1.msra.mxu1 %v1042_v7  ;;  %2316 = vmatprep.subr.mxu0 %v977_v8  ;;  %v1012_v7 = vld [vmem:[#allocation4 + $0x1d20] sm:$0xff] }
 0x221   :  { %2387 = vmatprep.subr.mxu1 %v1041_v9  ;;  %2317 = vmatpush1.msra.mxu0 %v976_v10  ;;  %v1076_v8 = vld [vmem:[#allocation4 + $0x1f20] sm:$0xff]  ;;  %v1257_v9 = vrot.slane %v1243_v63, %v2856_v52  ;;  %v1011_v10 = vld [vmem:[#allocation4 + $0x1d18] sm:$0xff] }
 0x222   :  { %2388 = vmatpush1.msra.mxu1 %v1040_v11  ;;  %2318 = vmatprep.subr.mxu0 %v1039_v12  ;;  %v1075_v11 = vld [vmem:[#allocation4 + $0x1f18] sm:$0xff]  ;;  %v1010_v12 = vld [vmem:[#allocation4 + $0x1d10] sm:$0xff]  ;;  %v1072_v52 = vld [vmem:[#allocation4 + $0x1f00] sm:$0xff] }
 0x223   :  { %2389 = vmatprep.subr.mxu1 %v1103_v13  ;;  %2319 = vmatpush2.msra.mxu0 %v1038_v14  ;;  %v1074_v13 = vld [vmem:[#allocation4 + $0x1f10] sm:$0xff]  ;;  %v1009_v14 = vld [vmem:[#allocation4 + $0x1d08] sm:$0xff] }
 0x224   :  { %2390 = vmatpush2.msra.mxu1 %v1102_v15  ;;  %2320 = vmatprep.subr.mxu0 %v1037_v16  ;;  %v1073_v15 = vld [vmem:[#allocation4 + $0x1f08] sm:$0xff]  ;;  %v1258_v16 = vcombine.high %v1250_v6, %v1250_v6 }
 0x225   :  { %2391 = vmatprep.subr.mxu1 %v1101_v17  ;;  %2321 = vmatpush2.msra.mxu0 %v1036_v18  ;;  %v1008_v17 = vld [vmem:[#allocation4 + $0x1d00] sm:$0xff]  ;;  %v1259_v18 = vcombine.high %v1257_v9, %v1257_v9 }
 0x226   :  { %2392 = vmatpush2.msra.mxu1 %v1100_v19  ;;  %2322 = vmatprep.subr.mxu0 %v1035_v20  ;;  %v2461_v19 = vld [vmem:[%s3001_s4 + $0xf8] sm:$0xff] }
 0x227   :  { %2393 = vmatprep.subr.mxu1 %v1099_v21  ;;  %2323 = vmatpush2.msra.mxu0 %v1034_v22  ;;  %v2445_v20 = vld [vmem:[%s3001_s4 + $0x78] sm:$0xff]  ;;  %v2460_v21 = vld [vmem:[%s3001_s4 + $0xf0] sm:$0xff] }
 0x228   :  { %2394 = vmatpush2.msra.mxu1 %v1098_v23  ;;  %2324 = vmatprep.subr.mxu0 %v1033_v24  ;;  %v2444_v22 = vld [vmem:[%s3001_s4 + $0x70] sm:$0xff]  ;;  %v2459_v23 = vld [vmem:[%s3001_s4 + $0xe8] sm:$0xff] }
 0x229   :  { %2395 = vmatprep.subr.mxu1 %v1097_v25  ;;  %2325 = vmatpush2.msra.mxu0 %v1032_v26  ;;  %v2443_v24 = vld [vmem:[%s3001_s4 + $0x68] sm:$0xff]  ;;  %v2458_v25 = vld [vmem:[%s3001_s4 + $0xe0] sm:$0xff] }
 0x22a   :  { %2396 = vmatpush2.msra.mxu1 %v1096_v27  ;;  %2326 = vmatprep.subr.mxu0 %v1031_v28  ;;  %v2442_v26 = vld [vmem:[%s3001_s4 + $0x60] sm:$0xff]  ;;  %v2457_v27 = vld [vmem:[%s3001_s4 + $0xd8] sm:$0xff] }
 0x22b   :  { %2397 = vmatprep.subr.mxu1 %v1095_v29  ;;  %2327 = vmatpush2.msra.mxu0 %v1030_v30  ;;  %v2441_v28 = vld [vmem:[%s3001_s4 + $0x58] sm:$0xff]  ;;  %v2456_v29 = vld [vmem:[%s3001_s4 + $0xd0] sm:$0xff] }
 0x22c   :  { %2398 = vmatpush2.msra.mxu1 %v1094_v31  ;;  %2328 = vmatprep.subr.mxu0 %v1029_v32  ;;  %v2440_v30 = vld [vmem:[%s3001_s4 + $0x50] sm:$0xff]  ;;  %v2455_v31 = vld [vmem:[%s3001_s4 + $0xc8] sm:$0xff] }
 0x22d   :  { %2399 = vmatprep.subr.mxu1 %v1093_v33  ;;  %2329 = vmatpush2.msra.mxu0 %v1028_v34  ;;  %v2439_v32 = vld [vmem:[%s3001_s4 + $0x48] sm:$0xff]  ;;  %v2454_v33 = vld [vmem:[%s3001_s4 + $0xc0] sm:$0xff] }
 0x22e   :  { %2400 = vmatpush2.msra.mxu1 %v1092_v35  ;;  %2330 = vmatprep.subr.mxu0 %v1027_v36  ;;  %v2438_v34 = vld [vmem:[%s3001_s4 + $0x40] sm:$0xff]  ;;  %v2453_v35 = vld [vmem:[%s3001_s4 + $0xb8] sm:$0xff] }
 0x22f   :  { %2401 = vmatprep.subr.mxu1 %v1091_v37  ;;  %2331 = vmatpush2.msra.mxu0 %v1026_v38  ;;  %v2437_v36 = vld [vmem:[%s3001_s4 + $0x38] sm:$0xff]  ;;  %v2452_v37 = vld [vmem:[%s3001_s4 + $0xb0] sm:$0xff] }
 0x230   :  { %2402 = vmatpush2.msra.mxu1 %v1090_v39  ;;  %2332 = vmatprep.subr.mxu0 %v1025_v40  ;;  %v2436_v38 = vld [vmem:[%s3001_s4 + $0x30] sm:$0xff]  ;;  %v2451_v39 = vld [vmem:[%s3001_s4 + $0xa8] sm:$0xff] }
 0x231   :  { %2403 = vmatprep.subr.mxu1 %v1089_v42  ;;  %2333 = vmatpush2.msra.mxu0 %v1024_v43  ;;  %v2435_v40 = vld [vmem:[%s3001_s4 + $0x28] sm:$0xff]  ;;  %v2450_v42 = vld [vmem:[%s3001_s4 + $0xa0] sm:$0xff] }
 0x232   :  { %2404 = vmatpush2.msra.mxu1 %v1088_v44  ;;  %2334 = vmatprep.subr.mxu0 %v1023_v45  ;;  %v2434_v43 = vld [vmem:[%s3001_s4 + $0x20] sm:$0xff]  ;;  %v2449_v44 = vld [vmem:[%s3001_s4 + $0x98] sm:$0xff] }
 0x233   :  { %2405 = vmatprep.subr.mxu1 %v1087_v46  ;;  %2335 = vmatpush2.msra.mxu0 %v1022_v47  ;;  %v2433_v45 = vld [vmem:[%s3001_s4 + $0x18] sm:$0xff]  ;;  %v2448_v46 = vld [vmem:[%s3001_s4 + $0x90] sm:$0xff] }
 0x234   :  { %2406 = vmatpush2.msra.mxu1 %v1086_v48  ;;  %2336 = vmatprep.subr.mxu0 %v1021_v49  ;;  %v2432_v47 = vld [vmem:[%s3001_s4 + $0x10] sm:$0xff]  ;;  %v2447_v48 = vld [vmem:[%s3001_s4 + $0x88] sm:$0xff] }
 0x235   :  { %2407 = vmatprep.subr.mxu1 %v1085_v50  ;;  %2337 = vmatpush2.msra.mxu0 %v1020_v51  ;;  %v2431_v49 = vld [vmem:[%s3001_s4 + $0x8] sm:$0xff]  ;;  %v2446_v50 = vld [vmem:[%s3001_s4 + $0x80] sm:$0xff] }
 0x236   :  { %2408 = vmatpush2.msra.mxu1 %v1084_v53  ;;  %2338 = vmatprep.subr.mxu0 %v1019_v54  ;;  %v2430_v51 = vld [vmem:[%s3001_s4] sm:$0xff]  ;;  %v2790_v54 = vmov 2   ;;  %s2795_s4 = smov 32  }
 0x237   :  { %2409 = vmatprep.subr.mxu1 %v1083_v55  ;;  %2339 = vmatpush2.msra.mxu0 %v1018_v57  ;;  %v2540_v53 = vld [vmem:[#allocation2] sm:$0x3]  ;;  %v2791_v55 = vmov 0   ;;  %v2793_v57 = vmov 1  }
 0x238   :  { %2410 = vmatpush2.msra.mxu1 %v1082_v58  ;;  %2340 = vmatprep.subr.mxu0 %v1017_v59  ;;  %v2794_v58 = vmov 4   ;;  %v1108_v59 = vsub.s32 0, %v2850_v41 }
 0x239   :  { %2411 = vmatprep.subr.mxu1 %v1081_v60  ;;  %2341 = vmatpush2.msra.mxu0 %v1016_v61  ;;  %v1104_v60 = vld [vmem:[#allocation6] sm:$0x3]  ;;  %v1112_v61 = vsub.s32 1, %v2850_v41 }
 0x23a   :  { %2412 = vmatpush2.msra.mxu1 %v1080_v62  ;;  %2342 = vmatprep.subr.mxu0 %v1015_v0  ;;  %v1358_v62 = vpop.f32.mrf.mxu0  ;;  %v1109_v63 = vrot.slane %v1104_v60, %v1108_v59 }
 0x23b   :  { %2413 = vmatprep.subr.mxu1 %v1079_v1  ;;  %2343 = vmatpush2.msra.mxu0 %v1014_v2  ;;  %v1113_v0 = vrot.slane %v1104_v60, %v1112_v61  ;;  %v1429_v1 = vpop.f32.mrf.mxu1 }
 0x23c   :  { %2414 = vmatpush2.msra.mxu1 %v1078_v3  ;;  %2344 = vmatprep.subr.mxu0 %v1013_v4  ;;  %v1360_v2 = vpop.f32.mrf.mxu0  ;;  %v1359_v3 = vadd.f32 %v1358_v62, %v1109_v63 }
 0x23d   :  { %2415 = vmatprep.subr.mxu1 %v1077_v5  ;;  %2345 = vmatpush2.msra.mxu0 %v1012_v7  ;;  %v1361_v5 = vadd.f32 %v1360_v2, %v1113_v0 }
 0x23e   :  { %2416 = vmatpush2.msra.mxu1 %v1076_v8  ;;  %2346 = vmatprep.subr.mxu0 %v1011_v10  ;;  %v1500_v4 = vpop.f32.mrf.mxu0  ;;  %v1430_v7 = vadd.f32 %v1429_v1, %v1359_v3 }
 0x23f   :  { %2417 = vmatprep.subr.mxu1 %v1075_v11  ;;  %2347 = vmatpush2.msra.mxu0 %v1010_v12 }
 0x240   :  { %2418 = vmatpush2.msra.mxu1 %v1074_v13  ;;  %2348 = vmatprep.subr.mxu0 %v1009_v14  ;;  %v1501_v11 = vadd.f32 %v1500_v4, %v1430_v7 }
 0x241   :  { %2419 = vmatprep.subr.mxu1 %v1073_v15  ;;  %2349 = vmatpush2.msra.mxu0 %v1008_v17 }
 0x242   :  { %2350 = vmatprep.mubr.f32.mxu0 %v1258_v16  ;;  %2420 = vmatpush2.msra.mxu1 %v1072_v52 }
 0x243   :  { %2421 = vmatprep.mubr.f32.mxu1 %v1259_v18  ;;  %2351 = vmatmul.mubr.f32.vlgmr.msra.gmra.mxu0 %v1250_v6  ;;  %v1431_v6 = vpop.f32.mrf.mxu1 }
 0x244   :  { %2422 = vmatmul.mubr.f32.vlgmr.msra.gmra.mxu1 %v1257_v9  ;;  %2627 = vmatprep.subr.mxu0 %v2461_v19  ;;  %v1502_v9 = vpop.f32.mrf.mxu0  ;;  %v1432_v10 = vadd.f32 %v1431_v6, %v1361_v5  ;;  %v2625_v5 = vld [vmem:[#allocation7] ss:$0 sm:$0xff] }
 0x245   :  { %2628 = vmatpush3.msra.mxu0 %v2445_v20  ;;  %2683 = vset.pattern.permute.xlu1 %v2790_v54  ;;  %v1571_v8 = vpop.f32.mrf.mxu1 }
 0x246   :  { %2629 = vmatprep.subr.mxu0 %v2460_v21  ;;  %2681 = vset.pattern.permute.xlu0 %v2791_v55  ;;  %v1642_v12 = vpop.f32.mrf.mxu0  ;;  %v1503_v13 = vadd.f32 %v1502_v9, %v1432_v10  ;;  %v1572_v15 = vadd.f32 %v1571_v8, %v1501_v11 }
 0x247   :  { %2630 = vmatpush3.msra.mxu0 %v2444_v22  ;;  %2563 = vperm.xlu1 %2683, %v2540_v53   ;;  %v1573_v14 = vpop.f32.mrf.mxu1 }
 0x248   :  { %2631 = vmatprep.subr.mxu0 %v2459_v23  ;;  %2543 = vperm.xlu0 %2681, %v2540_v53   ;;  %v1644_v41 = vpop.f32.mrf.mxu0  ;;  %v1574_v17 = vadd.f32 %v1573_v14, %v1503_v13  ;;  %v1643_v18 = vadd.f32 %v1642_v12, %v1572_v15 }
 0x249   :  { %2632 = vmatpush3.msra.mxu0 %v2443_v24  ;;  %v1713_v16 = vpop.f32.mrf.mxu1 }
 0x24a   :  { %2633 = vmatprep.subr.mxu0 %v2458_v25  ;;  %v1784_v52 = vpop.f32.mrf.mxu0  ;;  %v1645_v19 = vadd.f32 %v1644_v41, %v1574_v17  ;;  %v1714_v21 = vadd.f32 %v1713_v16, %v1643_v18 }
 0x24b   :  { %2634 = vmatpush3.msra.mxu0 %v2442_v26  ;;  %2684 = vset.pattern.permute.xlu1 %v2792_v56  ;;  %v1715_v20 = vpop.f32.mrf.mxu1 }
 0x24c   :  { %2635 = vmatprep.subr.mxu0 %v2457_v27  ;;  %2682 = vset.pattern.permute.xlu0 %v2793_v57  ;;  %v1786_v23 = vpop.f32.mrf.mxu0  ;;  %v1716_v24 = vadd.f32 %v1715_v20, %v1645_v19  ;;  %v1785_v25 = vadd.f32 %v1784_v52, %v1714_v21 }
 0x24d   :  { %2636 = vmatpush3.msra.mxu0 %v2441_v28  ;;  %2573 = vperm.xlu1 %2684, %v2540_v53   ;;  %v1855_v22 = vpop.f32.mrf.mxu1 }
 0x24e   :  { %2637 = vmatprep.subr.mxu0 %v2456_v29  ;;  %2553 = vperm.xlu0 %2682, %v2540_v53   ;;  %v1926_v26 = vpop.f32.mrf.mxu0  ;;  %v1787_v27 = vadd.f32 %v1786_v23, %v1716_v24  ;;  %v1856_v29 = vadd.f32 %v1855_v22, %v1785_v25 }
 0x24f   :  { %2638 = vmatpush3.msra.mxu0 %v2440_v30  ;;  %v1857_v28 = vpop.f32.mrf.mxu1 }
 0x250   :  { %2639 = vmatprep.subr.mxu0 %v2455_v31  ;;  %v1928_v31 = vpop.f32.mrf.mxu0 }
 0x251   :  { %2640 = vmatpush3.msra.mxu0 %v2439_v32  ;;  %2685 = vset.pattern.permute.xlu1 %v2794_v58  ;;  %v1997_v30 = vpop.f32.mrf.mxu1  ;;  %v1858_v32 = vadd.f32 %v1857_v28, %v1787_v27 }
 0x252   :  { %2641 = vmatprep.subr.mxu0 %v2454_v33  ;;  %2686 = vset.pattern.permute.xlu0 %v2794_v58  ;;  %v1927_v33 = vadd.f32 %v1926_v26, %v1856_v29 }
 0x253   :  { %2642 = vmatpush3.msra.mxu0 %v2438_v34  ;;  %2583 = vperm.xlu1 %2685, %v2540_v53  }
 0x254   :  { %2643 = vmatprep.subr.mxu0 %v2453_v35  ;;  %v1929_v35 = vadd.f32 %v1928_v31, %v1858_v32 }
 0x255   :  { %2644 = vmatpush3.msra.mxu0 %v2437_v36  ;;  %v1999_v36 = vpop.f32.mrf.mxu1 }
 0x256   :  { %2645 = vmatprep.subr.mxu0 %v2452_v37  ;;  %v1998_v37 = vadd.f32 %v1997_v30, %v1927_v33 }
 0x257   :  { %2646 = vmatpush3.msra.mxu0 %v2436_v38 }
 0x258   :  { %2647 = vmatprep.subr.mxu0 %v2451_v39 }
 0x259   :  { %2648 = vmatpush3.msra.mxu0 %v2435_v40  ;;  %v2000_v40 = vadd.f32 %v1999_v36, %v1929_v35 }
 0x25a   :  { %2649 = vmatprep.subr.mxu0 %v2450_v42 }
 0x25b   :  { %2650 = vmatpush3.msra.mxu0 %v2434_v43 }
 0x25c   :  { %2651 = vmatprep.subr.mxu0 %v2449_v44 }
 0x25d   :  { %2652 = vmatpush3.msra.mxu0 %v2433_v45 }
 0x25e   :  { %2653 = vmatprep.subr.mxu0 %v2448_v46 }
 0x25f   :  { %2654 = vmatpush3.msra.mxu0 %v2432_v47 }
 0x260   :  { %2655 = vmatprep.subr.mxu0 %v2447_v48 }
 0x261   :  { %2656 = vmatpush3.msra.mxu0 %v2431_v49 }
 0x262   :  { %2657 = vmatprep.subr.mxu0 %v2446_v50 }
 0x263   :  { %2658 = vmatpush3.msra.mxu0 %v2430_v51 }
 0x27f   :  { %v2068_v34 = vpop.f32.mrf.mxu0 }
 0x280   :  { %v2069_v42 = vadd.f32 %v2068_v34, %v1998_v37 }
 0x281   :  { %v2139_v38 = vpop.f32.mrf.mxu1  ;;  %v2070_v39 = vpop.f32.mrf.mxu0 }
 0x282   :  { %v2071_v44 = vadd.f32 %v2070_v39, %v2000_v40  ;;  %v2140_v46 = vadd.f32 %v2139_v38, %v2069_v42 }
 0x283   :  { %v2141_v45 = vpop.f32.mrf.mxu1 }
 0x284   :  { %v2142_v49 = vadd.f32 %v2141_v45, %v2071_v44 }
 0x2c1   :  { %v2210_v43 = vpop.f32.mrf.mxu0 }
 0x2c2   :  { %v2211_v50 = vadd.f32 %v2210_v43, %v2140_v46  ;;  %v2564_v4 = vpop.permute.xlu1 %2563 }
 0x2c3   :  { %v2281_v47 = vpop.f32.mrf.mxu1  ;;  %v2212_v48 = vpop.f32.mrf.mxu0 }
 0x2c4   :  { %v2213_v51 = vadd.f32 %v2212_v48, %v2142_v49  ;;  %v2282_v54 = vadd.f32 %v2281_v47, %v2211_v50  ;;  %v2544_v3 = vpop.permute.xlu0 %2543 }
 0x2c5   :  { %v2283_v53 = vpop.f32.mrf.mxu1 }
 0x2c6   :  { %v2284_v57 = vadd.f32 %v2283_v53, %v2213_v51 }
 0x2c8   :  { %v2574_v11 = vpop.permute.xlu1 %2573 }
 0x2c9   :  { %v2554_v9 = vpop.permute.xlu0 %2553 }
 0x2ce   :  { %v2584_v16 = vpop.permute.xlu1 %2583 }
 0x303   :  { %v2352_v55 = vpop.f32.mrf.mxu0 }
 0x304   :  { %v2423_v56 = vpop.f32.mrf.mxu1  ;;  %v2353_v58 = vadd.f32 %v2352_v55, %v2282_v54 }
 0x305   :  { %v2354_v59 = vpop.f32.mrf.mxu0 }
 0x306   :  { %v2355_v60 = vadd.f32 %v2354_v59, %v2284_v57  ;;  %v2424_v61 = vadd.f32 %v2423_v56, %v2353_v58  ;;  %v2425_v62 = vpop.f32.mrf.mxu1 }
 0x308   :  { %v2426_v63 = vadd.f32 %v2425_v62, %v2355_v60  ;;  %v2428_v1 = vmax.f32 %v2424_v61, 0.0 }
 0x30a   :  { %v2429_v0 = vmax.f32 %v2426_v63, 0.0 }
 0x30c   :  { %2533 = vmatprep.mubr.f32.mxu0 %v2429_v0 }
 0x30d   :  { %2534 = vmatmul.mubr.f32.vlgmr.msra.gmra.mxu0 %v2428_v1 }
 0x3cd   :  { %v2659_v2 = vpop.f32.mrf.mxu0 }
 0x3cf   :  { %v2660_v6 = vpop.f32.mrf.mxu0 }
 0x3d0   :  { %v2661_v7 = vadd.f32 %v2660_v6, %v2659_v2 }
 0x3d2   :  { %v2536_v8 = vadd.f32 %v2661_v7, %v2625_v5 }
 0x3d4   :  { %v2539_v10 = vand.u32 2147483647, %v2536_v8 }
 0x3d6   :  { %v2546_v12 = vmul.f32 %v2544_v3, %v2539_v10  ;;  %v2556_v13 = vmul.f32 %v2554_v9, %v2539_v10  ;;  %v2576_v14 = vmul.f32 %v2574_v11, %v2539_v10  ;;  %v2566_v15 = vmul.f32 %v2564_v4, %v2539_v10 }
 0x3d7   :  { %v2586_v41 = vmul.f32 %v2584_v16, %v2539_v10 }
 0x3d8   :  { %2558 = vrot.lane.b32.xlu1 %v2556_v13, %s2795_s4  ;;  %2548 = vrot.lane.b32.xlu0 %v2546_v12, %s2796_s15 }
 0x3dc   :  { %2578 = vrot.lane.b32.xlu1 %v2576_v14, %s2785_s25  ;;  %2568 = vrot.lane.b32.xlu0 %v2566_v15, %s2797_s16  ;;  %s2800_s25 = smov 88  }
 0x3e0   :  { %2599 = vrot.lane.b32.xlu1 %v2539_v10, %s2798_s1  ;;  %2588 = vrot.lane.b32.xlu0 %v2586_v41, %s2799_s17 }
 0x44a   :  { %v2559_v17 = vpop.permute.xlu1 %2558  ;;  %v2549_v18 = vpop.permute.xlu0 %2548 }
 0x44b   :  { %v2551_v52 = vadd.f32 %v2549_v18, %v2536_v8 }
 0x44d   :  { %v2561_v19 = vadd.f32 %v2559_v17, %v2551_v52 }
 0x44e   :  { %v2569_v20 = vpop.permute.xlu0 %2568  ;;  %v2579_v22 = vpop.permute.xlu1 %2578 }
 0x44f   :  { %v2571_v21 = vadd.f32 %v2569_v20, %v2561_v19 }
 0x451   :  { %v2581_v23 = vadd.f32 %v2579_v22, %v2571_v21 }
 0x452   :  { %v2589_v24 = vpop.permute.xlu0 %2588  ;;  %v2600_v30 = vpop.permute.xlu1 %2599 }
 0x453   :  { %v2591_v25 = vadd.f32 %v2589_v24, %v2581_v23 }
 0x455   :  { %v2593_v26 = vmin.f32 %v2591_v25, 0.0  ;;  %vm2592_vm0 = vcmp.gt.f32.partialorder %v2591_v25, 0.0 }
 0x457   :  { %v2594_v27 = vmul.f32 1.442695, %v2593_v26 }
 0x459   :  { %2695 = vpow2.f32 %v2594_v27 }
 0x466   :  { %v2696_v28 = vpop.eup %2695 }
 0x467   :  { %v2626_v29 = vadd.f32 -1.0, %v2696_v28 }
 0x469   :  { %v2597_v31 = vsel %vm2592_vm0, %v2591_v25, %v2626_v29 }
 0x46a   :  { %v2602_v32 = vmul.f32 %v2600_v30, %v2597_v31 }
 0x46c   :  { %2604 = vrot.lane.b32.xlu0 %v2602_v32, %s2800_s25 }
 0x4de   :  { %v2605_v33 = vpop.permute.xlu0 %2604 }
 0x4df   :  { %v2608_v34 = vsel %vm2607_vm1, %v2605_v33, 0.0 }
 0x4e0   :  { %2609 = vadd.xlane.f32.xlu1 %v2608_v34 }
 0x569   :  { %v2610_v35 = vpop.xlane.xlu1 %2609 }
 0x56a   :  { %v2611_v36 = vadd.f32 %v2610_v35, %v2536_v8 }
 0x56c   :  { %2613 = vrot.lane.b32.xlu0 %v2611_v36, %s2801_s3 }
 0x5de   :  { %v2614_v37 = vpop.permute.xlu0 %2613 }
 0x5df   :  { %2617 = vst.msk [vmem:[%s3003_s6] sm:$0x3] %vm2616_vm2, %v2614_v37 }
 0x5e0   :  { %2622 = vsyncpa [#allocation3], 1 }
 0x5e1   :  { %2623 = vsyncpa [#allocation5], 1 }
 0x5e2   :  { %2624 = vsyncpa [#allocation8], 1 }

</bundles_post_ra>
